<compile_context>
chip_gen: v5e
topology: v5e:2x2
jax: 0.10.0
libtpu: 0.0.40
codegen_flags: <defaults>
</compile_context>

<pallas_src>
import math
import functools

import numpy as np
import jax
import jax.numpy as jnp
from jax.experimental import pallas as pl
from jax.experimental.pallas import tpu as pltpu

# ---------------- problem sizes (consistent with the module) ----------------
D = 4                    # input_dim
NUM_FREQ = 5             # fourier_num_frequencies
K = D * 2 * NUM_FREQ     # fourier basis output dim = 40
R = 32                   # reduced_dim
H = 32                   # hidden width of interpretable layers
O = 3                    # output_dim
O_PAD = 128              # lane-dense padded output width
TB_MAX = 256             # max batch tile


def _round_up(n, m):
    return ((n + m - 1) // m) * m


def _pick_tile(batch):
    """Largest tile <= TB_MAX (multiple of 8), preferring >= 2 grid steps."""
    if batch <= 16:
        return _round_up(max(batch, 8), 8)
    return min(TB_MAX, _round_up(pl.cdiv(batch, 2), 8))


# ---------------- Pallas kernel ---------------------------------------------
def oikan_kernel(x_ref, a_ref, phase_ref, wsvd_t_ref, wsvd_beff_ref,
                 w1_ref, b1_ref, w2_ref, b2_ref, o_ref):
    x = x_ref[...]                                              # [TB, D]

    # Fourier basis: arg[b, j] = x[b, i_of_j] * freq_of_j via a constant
    # selection matrix; one cosine with a per-lane phase replaces the
    # sin/cos blend (cos(t - pi/2) == sin(t)).
    arg = jnp.dot(x, a_ref[...], preferred_element_type=jnp.float32)   # [TB, K]
    basis = jnp.cos(arg - phase_ref[...])                              # [TB, K]

    # SVD projection with the feature concat folded into two matmuls; the
    # interaction path uses the pre-folded sigmoid(W_int) @ W_svd_bot.
    red = (jnp.dot(basis, wsvd_t_ref[...], preferred_element_type=jnp.float32)
           + jnp.dot(x * x, wsvd_beff_ref[...],
                     preferred_element_type=jnp.float32))              # [TB, R]

    # Interpretable layers: Linear -> ReLU -> Linear (lane-dense output).
    h = jnp.maximum(
        jnp.dot(red, w1_ref[...], preferred_element_type=jnp.float32)
        + b1_ref[...], 0.0)                                            # [TB, H]
    o_ref[...] = (jnp.dot(h, w2_ref[...], preferred_element_type=jnp.float32)
                  + b2_ref[...])                                       # [TB, O_PAD]


# ---------------- wrapper ----------------------------------------------------
@jax.jit
def oikan_forward(x, a_mat, phase, w_int, w_svd, w1, b1, w2, b2):
    batch = x.shape[0]

    # ---- weight-only algebraic folds (exact) --------------------------------
    w_svd_top = w_svd[:K, :]                                   # [K, R]
    wsvd_b_eff = jax.nn.sigmoid(w_int) @ w_svd[K:, :]          # [D, R]
    w2p = jnp.zeros((H, O_PAD), jnp.float32).at[:, :O].set(w2)
    b2p = jnp.zeros((1, O_PAD), jnp.float32).at[:, :O].set(b2)

    # ---- batch tiling / padding ---------------------------------------------
    tb = _pick_tile(batch)
    batch_p = _round_up(batch, tb)
    if batch_p != batch:
        x = jnp.pad(x, ((0, batch_p - batch), (0, 0)))
    grid_steps = batch_p // tb
    grid = (grid_steps,)

    rep = lambda i: (0, 0)   # replicated (whole-array) blocks for params
    in_specs = [
        pl.BlockSpec((tb, D), lambda i: (i, 0)),   # x, tiled over batch
        pl.BlockSpec((D, K), rep),                 # A (frequency selection)
        pl.BlockSpec((1, K), rep),                 # phase (pi/2 = sin, 0 = cos)
        pl.BlockSpec((K, R), rep),                 # W_svd (basis rows)
        pl.BlockSpec((D, R), rep),                 # sigmoid(W_int) @ W_svd_bot
        pl.BlockSpec((R, H), rep),                 # W1
        pl.BlockSpec((1, H), rep),                 # b1
        pl.BlockSpec((H, O_PAD), rep),             # W2 (lane-padded)
        pl.BlockSpec((1, O_PAD), rep),             # b2 (lane-padded)
    ]
    out_specs = pl.BlockSpec((tb, O_PAD), lambda i: (i, 0))

    # Advisory cost estimate for XLA scheduling.
    flops = 2 * batch_p * (D * K + K * R + D * R + R * H + H * O_PAD)
    transcendentals = batch_p * K
    bytes_accessed = 4 * (batch_p * (D + O_PAD)
                          + grid_steps * (D * K + K + K * R + D * R
                                          + R * H + H + H * O_PAD + O_PAD))
    cost = pl.CostEstimate(flops=flops, transcendentals=transcendentals,
                           bytes_accessed=bytes_accessed)

    out = pl.pallas_call(
        oikan_kernel,
        out_shape=jax.ShapeDtypeStruct((batch_p, O_PAD), jnp.float32),
        grid=grid,
        in_specs=in_specs,
        out_specs=out_specs,
        cost_estimate=cost,
        compiler_params=pltpu.CompilerParams(
            dimension_semantics=("parallel",)),
    )(x, a_mat, phase, w_svd_top, wsvd_b_eff, w1, b1, w2p, b2p)

    return out[:batch, :O]


# ---------------- plain-JAX reference (mirrors the PyTorch code) ------------
def oikan_reference(x, w_int, w_svd, w1, b1, w2, b2):
    freqs = jnp.arange(1, NUM_FREQ + 1, dtype=jnp.float32)
    pieces = []
    for i in range(D):
        xi = x[:, i:i + 1]                       # [B, 1]
        arg = xi * freqs[None, :]                # [B, F]
        pieces.append(jnp.concatenate([jnp.sin(arg), jnp.cos(arg)], axis=1))
    basis = jnp.concatenate(pieces, axis=1)      # [B, D*2F]
    im = jax.nn.sigmoid(w_int)                   # [D, D]
    inter = (x * x) @ im                         # [B, D]
    feats = jnp.concatenate([basis, inter], axis=1)
    red = feats @ w_svd                          # [B, R]
    h = jnp.maximum(red @ w1 + b1, 0.0)
    return h @ w2 + b2


# ---------------- constant construction --------------------------------------
def make_basis_constants():
    """Frequency-selection matrix A and per-lane phase (pi/2 = sin, 0 = cos)."""
    a = np.zeros((D, K), np.float32)
    phase = np.zeros((1, K), np.float32)
    for i in range(D):
        for k in range(2 * NUM_FREQ):
            f = (k + 1) if k < NUM_FREQ else (k - NUM_FREQ + 1)
            a[i, i * 2 * NUM_FREQ + k] = float(f)
            if k < NUM_FREQ:
                phase[0, i * 2 * NUM_FREQ + k] = math.pi / 2.0
    return jnp.asarray(a), jnp.asarray(phase)


# ---------------- main -------------------------------------------------------
if __name__ == "__main__":
    key = jax.random.PRNGKey(0)
    kx, kint, ksvd, kw1, kw2 = jax.random.split(key, 5)

    batch = 512   # => tile 256, grid=(2,): both v7x TensorCores get work
    x = jax.random.normal(kx, (batch, D), jnp.float32)

    w_int = jax.random.normal(kint, (D, D), jnp.float32)
    w_svd = jax.random.normal(ksvd, (K + D, R), jnp.float32) * 0.1
    w1 = jax.random.normal(kw1, (R, H), jnp.float32) * 0.1
    b1 = jnp.zeros((1, H), jnp.float32)
    w2 = jax.random.normal(kw2, (H, O), jnp.float32) * 0.1
    b2 = jnp.zeros((1, O), jnp.float32)

    a_mat, phase = make_basis_constants()

    out = oikan_forward(x, a_mat, phase, w_int, w_svd, w1, b1, w2, b2)
    out = jax.block_until_ready(out)

    ref = oikan_reference(x, w_int, w_svd, w1, b1, w2, b2)
    ref = jax.block_until_ready(ref)

    assert out.shape == (batch, O), out.shape
    max_err = float(jnp.max(jnp.abs(out - ref)))
    assert jnp.allclose(out, ref, rtol=1e-3, atol=1e-3), (
        f"max abs err = {max_err}")

    print("KERNEL_OK")
</pallas_src>

<mosaic_0001>
module attributes {stable_mosaic.version = 11 : i64} {
  func.func @oikan_kernel(%arg0: i32, %arg1: memref<256x4xf32, #tpu.memory_space<vmem>>, %arg2: memref<4x40xf32, #tpu.memory_space<vmem>>, %arg3: memref<1x40xf32, #tpu.memory_space<vmem>>, %arg4: memref<40x32xf32, #tpu.memory_space<vmem>>, %arg5: memref<4x32xf32, #tpu.memory_space<vmem>>, %arg6: memref<32x32xf32, #tpu.memory_space<vmem>>, %arg7: memref<1x32xf32, #tpu.memory_space<vmem>>, %arg8: memref<32x128xf32, #tpu.memory_space<vmem>>, %arg9: memref<1x128xf32, #tpu.memory_space<vmem>>, %arg10: memref<256x128xf32, #tpu.memory_space<vmem>>) attributes {dimension_semantics = [#tpu.dimension_semantics<parallel>], iteration_bounds = array<i64: 2>, scalar_prefetch = 0 : i64, scratch_operands = 0 : i64, tpu.core_type = #tpu.core_type<tc>, window_params = [{transform_indices = @transform_0, window_bounds = array<i64: 256, 4>}, {pipeline_mode = #tpu.pipeline_mode<synchronous>, transform_indices = @transform_1, window_bounds = array<i64: 4, 40>}, {pipeline_mode = #tpu.pipeline_mode<synchronous>, transform_indices = @transform_2, window_bounds = array<i64: 1, 40>}, {pipeline_mode = #tpu.pipeline_mode<synchronous>, transform_indices = @transform_3, window_bounds = array<i64: 40, 32>}, {pipeline_mode = #tpu.pipeline_mode<synchronous>, transform_indices = @transform_4, window_bounds = array<i64: 4, 32>}, {pipeline_mode = #tpu.pipeline_mode<synchronous>, transform_indices = @transform_5, window_bounds = array<i64: 32, 32>}, {pipeline_mode = #tpu.pipeline_mode<synchronous>, transform_indices = @transform_6, window_bounds = array<i64: 1, 32>}, {pipeline_mode = #tpu.pipeline_mode<synchronous>, transform_indices = @transform_7, window_bounds = array<i64: 32, 128>}, {pipeline_mode = #tpu.pipeline_mode<synchronous>, transform_indices = @transform_8, window_bounds = array<i64: 1, 128>}, {transform_indices = @transform_9, window_bounds = array<i64: 256, 128>}]} {
    %c0 = arith.constant 0 : index
    %c0_0 = arith.constant 0 : index
    %0 = vector.load %arg1[%c0, %c0_0] : memref<256x4xf32, #tpu.memory_space<vmem>>, vector<256x4xf32>
    %c0_1 = arith.constant 0 : index
    %c0_2 = arith.constant 0 : index
    %1 = vector.load %arg2[%c0_1, %c0_2] : memref<4x40xf32, #tpu.memory_space<vmem>>, vector<4x40xf32>
    %cst = arith.constant dense<0.000000e+00> : vector<256x40xf32>
    %2 = tpu.matmul %0, %1, %cst {dimension_numbers = #tpu.dot_dimension_numbers<[1], [0], [0], [1], [0, 0, 1, 1], [], []>} : vector<256x4xf32>, vector<4x40xf32>, vector<256x40xf32> -> vector<256x40xf32>
    %c0_3 = arith.constant 0 : index
    %c0_4 = arith.constant 0 : index
    %3 = vector.load %arg3[%c0_3, %c0_4] : memref<1x40xf32, #tpu.memory_space<vmem>>, vector<1x40xf32>
    %4 = vector.broadcast %3 : vector<1x40xf32> to vector<256x40xf32>
    %5 = arith.subf %2, %4 : vector<256x40xf32>
    %6 = math.cos %5 : vector<256x40xf32>
    %c0_5 = arith.constant 0 : index
    %c0_6 = arith.constant 0 : index
    %7 = vector.load %arg4[%c0_5, %c0_6] : memref<40x32xf32, #tpu.memory_space<vmem>>, vector<40x32xf32>
    %cst_7 = arith.constant dense<0.000000e+00> : vector<256x32xf32>
    %8 = tpu.matmul %6, %7, %cst_7 {dimension_numbers = #tpu.dot_dimension_numbers<[1], [0], [0], [1], [0, 0, 1, 1], [], []>} : vector<256x40xf32>, vector<40x32xf32>, vector<256x32xf32> -> vector<256x32xf32>
    %9 = arith.mulf %0, %0 : vector<256x4xf32>
    %c0_8 = arith.constant 0 : index
    %c0_9 = arith.constant 0 : index
    %10 = vector.load %arg5[%c0_8, %c0_9] : memref<4x32xf32, #tpu.memory_space<vmem>>, vector<4x32xf32>
    %cst_10 = arith.constant dense<0.000000e+00> : vector<256x32xf32>
    %11 = tpu.matmul %9, %10, %cst_10 {dimension_numbers = #tpu.dot_dimension_numbers<[1], [0], [0], [1], [0, 0, 1, 1], [], []>} : vector<256x4xf32>, vector<4x32xf32>, vector<256x32xf32> -> vector<256x32xf32>
    %12 = arith.addf %8, %11 : vector<256x32xf32>
    %c0_11 = arith.constant 0 : index
    %c0_12 = arith.constant 0 : index
    %13 = vector.load %arg6[%c0_11, %c0_12] : memref<32x32xf32, #tpu.memory_space<vmem>>, vector<32x32xf32>
    %cst_13 = arith.constant dense<0.000000e+00> : vector<256x32xf32>
    %14 = tpu.matmul %12, %13, %cst_13 {dimension_numbers = #tpu.dot_dimension_numbers<[1], [0], [0], [1], [0, 0, 1, 1], [], []>} : vector<256x32xf32>, vector<32x32xf32>, vector<256x32xf32> -> vector<256x32xf32>
    %c0_14 = arith.constant 0 : index
    %c0_15 = arith.constant 0 : index
    %15 = vector.load %arg7[%c0_14, %c0_15] : memref<1x32xf32, #tpu.memory_space<vmem>>, vector<1x32xf32>
    %16 = vector.broadcast %15 : vector<1x32xf32> to vector<256x32xf32>
    %17 = arith.addf %14, %16 : vector<256x32xf32>
    %cst_16 = arith.constant 0.000000e+00 : f32
    %18 = vector.broadcast %cst_16 : f32 to vector<256x32xf32>
    %19 = arith.maximumf %17, %18 : vector<256x32xf32>
    %c0_17 = arith.constant 0 : index
    %c0_18 = arith.constant 0 : index
    %20 = vector.load %arg8[%c0_17, %c0_18] : memref<32x128xf32, #tpu.memory_space<vmem>>, vector<32x128xf32>
    %cst_19 = arith.constant dense<0.000000e+00> : vector<256x128xf32>
    %21 = tpu.matmul %19, %20, %cst_19 {dimension_numbers = #tpu.dot_dimension_numbers<[1], [0], [0], [1], [0, 0, 1, 1], [], []>} : vector<256x32xf32>, vector<32x128xf32>, vector<256x128xf32> -> vector<256x128xf32>
    %c0_20 = arith.constant 0 : index
    %c0_21 = arith.constant 0 : index
    %22 = vector.load %arg9[%c0_20, %c0_21] : memref<1x128xf32, #tpu.memory_space<vmem>>, vector<1x128xf32>
    %23 = vector.broadcast %22 : vector<1x128xf32> to vector<256x128xf32>
    %24 = arith.addf %21, %23 : vector<256x128xf32>
    %c0_22 = arith.constant 0 : index
    %c0_23 = arith.constant 0 : index
    %25 = vector.load %arg10[%c0_22, %c0_23] : memref<256x128xf32, #tpu.memory_space<vmem>>, vector<256x128xf32>
    tpu.vector_store %arg10[%c0_22, %c0_23], %24 {strides = array<i32>} : memref<256x128xf32, #tpu.memory_space<vmem>>, vector<256x128xf32>,
    return
  }
  func.func @transform_0(%arg0: i32) -> (i32, i32) {
    %c0_i32 = arith.constant 0 : i32
    %c0_i32_0 = arith.constant 0 : i32
    return %arg0, %c0_i32 : i32, i32
  }
  func.func @transform_1(%arg0: i32) -> (i32, i32) {
    %c0_i32 = arith.constant 0 : i32
    %c0_i32_0 = arith.constant 0 : i32
    %c0_i32_1 = arith.constant 0 : i32
    return %c0_i32, %c0_i32_0 : i32, i32
  }
  func.func @transform_2(%arg0: i32) -> (i32, i32) {
    %c0_i32 = arith.constant 0 : i32
    %c0_i32_0 = arith.constant 0 : i32
    %c0_i32_1 = arith.constant 0 : i32
    return %c0_i32, %c0_i32_0 : i32, i32
  }
  func.func @transform_3(%arg0: i32) -> (i32, i32) {
    %c0_i32 = arith.constant 0 : i32
    %c0_i32_0 = arith.constant 0 : i32
    %c0_i32_1 = arith.constant 0 : i32
    return %c0_i32, %c0_i32_0 : i32, i32
  }
  func.func @transform_4(%arg0: i32) -> (i32, i32) {
    %c0_i32 = arith.constant 0 : i32
    %c0_i32_0 = arith.constant 0 : i32
    %c0_i32_1 = arith.constant 0 : i32
    return %c0_i32, %c0_i32_0 : i32, i32
  }
  func.func @transform_5(%arg0: i32) -> (i32, i32) {
    %c0_i32 = arith.constant 0 : i32
    %c0_i32_0 = arith.constant 0 : i32
    %c0_i32_1 = arith.constant 0 : i32
    return %c0_i32, %c0_i32_0 : i32, i32
  }
  func.func @transform_6(%arg0: i32) -> (i32, i32) {
    %c0_i32 = arith.constant 0 : i32
    %c0_i32_0 = arith.constant 0 : i32
    %c0_i32_1 = arith.constant 0 : i32
    return %c0_i32, %c0_i32_0 : i32, i32
  }
  func.func @transform_7(%arg0: i32) -> (i32, i32) {
    %c0_i32 = arith.constant 0 : i32
    %c0_i32_0 = arith.constant 0 : i32
    %c0_i32_1 = arith.constant 0 : i32
    return %c0_i32, %c0_i32_0 : i32, i32
  }
  func.func @transform_8(%arg0: i32) -> (i32, i32) {
    %c0_i32 = arith.constant 0 : i32
    %c0_i32_0 = arith.constant 0 : i32
    %c0_i32_1 = arith.constant 0 : i32
    return %c0_i32, %c0_i32_0 : i32, i32
  }
  func.func @transform_9(%arg0: i32) -> (i32, i32) {
    %c0_i32 = arith.constant 0 : i32
    %c0_i32_0 = arith.constant 0 : i32
    return %arg0, %c0_i32 : i32, i32
  }
}

</mosaic_0001>

<bundles_post_ra>
// kernel: oikan_forward.1
= control target key start
LH: loop header
LB: loop body
LE: loop exit
PB: predicated region body
PF: predicated region fallthrough
CT: control target
= control target key end

     0   :  { %s6925_s30 = smov 0   ;;  %s12693_s0 = inlined_call_operand.vmem [shape: f32[512,4], index: 0, kind: input, shape index: {}]   ;;  %s12694_s1 = inlined_call_operand.vmem [shape: f32[4,40], index: 1, kind: input, shape index: {}]   ;;  %s12695_s2 = inlined_call_operand.vmem [shape: f32[1,40], index: 2, kind: input, shape index: {}]   ;;  %s12696_s3 = inlined_call_operand.vmem [shape: f32[40,32], index: 3, kind: input, shape index: {}]   ;;  %s12697_s4 = inlined_call_operand.vmem [shape: f32[4,32], index: 4, kind: input, shape index: {}]   ;;  %s12698_s5 = inlined_call_operand.vmem [shape: f32[32,32], index: 5, kind: input, shape index: {}]   ;;  %s12699_s6 = inlined_call_operand.vmem [shape: f32[1,32], index: 6, kind: input, shape index: {}]   ;;  %s12700_s7 = inlined_call_operand.vmem [shape: f32[32,128], index: 7, kind: input, shape index: {}]   ;;  %s12701_s8 = inlined_call_operand.vmem [shape: f32[1,128], index: 8, kind: input, shape index: {}]   ;;  %s12702_s9 = inlined_call_operand.vmem [shape: f32[512,128], index: 9, kind: output, shape index: {}]  }
   0x1 LB: > { %s6562_s10 = sadd.s32 4294967295, %s6866_s30   ;;  %p6566_p0 = scmp.ge.s32.totalorder %s6866_s30, 1  ;;  %s6866_s30 = sphi %s6925_s30, %s19_s30  }
   0x2   : > { %p288_p1 = scmp.lt.s32.totalorder %s6866_s30, 3 }
   0x4   : > { %p289_p2 = pnand %p6566_p0, %p288_p1 }
   0x6   : > { %292 = sbr.rel (%p289_p2) target bundleno = 1827 (0x723), region = 56 }
   0xb   : > { %v368_v0 = vld [vmem:[%s12694_s1] sm:$0xf]  ;;  %vm466_vm0 = vcmask 1043456   ;;  %s6567_s13 = sshll.u32 %s6562_s10, 5  ;;  %vm12948_vm1 = vcmask 31744  }
   0xc   : > { %6571 = vmatpush.msk.msra.mxu0 %vm466_vm0, %v368_v0  ;;  %6831 = vmatpush.msk.msra.mxu1 %vm466_vm0, %v368_v0  ;;  %p325_p3 = scmp.lt.s32.totalorder %s6567_s13, 63  ;;  %v7101_v34 = vld [vmem:[%s12695_s2] ss:$0 sm:$0xff] }
   0xd   : > { %6832 = vmatpush.msk.msra.mxu2 %vm466_vm0, %v368_v0  ;;  %6833 = vmatpush.msk.msra.mxu3 %vm466_vm0, %v368_v0 }
   0xe   : > { %s13811_s13 = smov (!%p325_p3, %s6567_s13), 63 }
   0xf   : > { %s6568_s14 = sshll.u32 %s13811_s13, 3 }
  0x10   : > { %s6948_s17 = scalar_lea.vmem %s12693_s0, %s6568_s14  ;;  %s12589_s26 = scalar_lea.vmem %s12702_s9, %s6568_s14 }
  0x11   : > { %v6951_v1 = vld [vmem:[%s6948_s17] sm:$0xff]  ;;  %v6954_v2 = vld [vmem:[%s6948_s17 + $0x48] sm:$0xff]  ;;  %v6964_v4 = vld [vmem:[%s6948_s17 + $0x50] sm:$0xff] }
  0x12   : > { %6572 = vmatmul.msk.f32.vlgmr.msra.gmra.mxu0 %vm12948_vm1, %v6951_v1  ;;  %6581 = vmatmul.msk.f32.vlgmr.msra.gmra.mxu1 %vm12948_vm1, %v6954_v2  ;;  %v6961_v3 = vld [vmem:[%s6948_s17 + $0x8] sm:$0xff]  ;;  %v6971_v5 = vld [vmem:[%s6948_s17 + $0x90] sm:$0xff]  ;;  %v6979_v7 = vld [vmem:[%s6948_s17 + $0x58] sm:$0xff]  ;;  %v5552_v48 = vmul.f32 %v6951_v1, %v6951_v1  ;;  %v7122_v49 = vmul.f32 %v6954_v2, %v6954_v2  ;;  %v7128_v53 = vmul.f32 %v6964_v4, %v6964_v4 }
  0x13   : > { %6590 = vmatmul.msk.f32.vlgmr.msra.gmra.mxu2 %vm12948_vm1, %v6971_v5  ;;  %v6976_v6 = vld [vmem:[%s6948_s17 + $0x10] sm:$0xff]  ;;  %v6986_v8 = vld [vmem:[%s6948_s17 + $0x98] sm:$0xff]  ;;  %v6994_v10 = vld [vmem:[%s6948_s17 + $0x60] sm:$0xff]  ;;  %v5553_v50 = vmul.f32 %v6961_v3, %v6961_v3  ;;  %v7136_v55 = vmul.f32 %v6979_v7, %v6979_v7 }
  0x14   : > { %v6991_v9 = vld [vmem:[%s6948_s17 + $0x18] sm:$0xff]  ;;  %v7001_v11 = vld [vmem:[%s6948_s17 + $0xa0] sm:$0xff]  ;;  %v7009_v13 = vld [vmem:[%s6948_s17 + $0x68] sm:$0xff]  ;;  %v7132_v54 = vmul.f32 %v6976_v6, %v6976_v6  ;;  %v7145_v58 = vmul.f32 %v6994_v10, %v6994_v10 }
  0x15   : > { %v7006_v12 = vld [vmem:[%s6948_s17 + $0x20] sm:$0xff]  ;;  %v7016_v14 = vld [vmem:[%s6948_s17 + $0xa8] sm:$0xff]  ;;  %v7029_v17 = vld [vmem:[%s6948_s17 + $0x70] sm:$0xff]  ;;  %v7141_v57 = vmul.f32 %v6991_v9, %v6991_v9  ;;  %v7154_v63 = vmul.f32 %v7009_v13, %v7009_v13 }
  0x16   : > { %v7021_v15 = vld [vmem:[%s6948_s17 + $0xc0] sm:$0xff]  ;;  %v7026_v16 = vld [vmem:[%s6948_s17 + $0x28] sm:$0xff]  ;;  %v7032_v18 = vld [vmem:[%s6948_s17 + $0xb0] sm:$0xff]  ;;  %v7150_v62 = vmul.f32 %v7006_v12, %v7006_v12 }
  0x17   : > { %6596 = vmatmul.msk.f32.vlgmr.msra.gmra.mxu3 %vm12948_vm1, %v7021_v15  ;;  %v7035_v19 = vld [vmem:[%s6948_s17 + $0xc8] sm:$0xff]  ;;  %v342_v20 = vld [vmem:[%s6948_s17 + $0x30] sm:$0xff]  ;;  %v7047_v21 = vld [vmem:[%s6948_s17 + $0x78] sm:$0xff]  ;;  %v7158_v0 = vmul.f32 %v7026_v16, %v7026_v16 }
  0x18   : > { %v7050_v22 = vld [vmem:[%s6948_s17 + $0xb8] sm:$0xff]  ;;  %v7053_v23 = vld [vmem:[%s6948_s17 + $0xd0] sm:$0xff]  ;;  %v352_v25 = vld [vmem:[%s6948_s17 + $0x80] sm:$0xff] }
  0x19   : > { %v343_v24 = vld [vmem:[%s6948_s17 + $0x38] sm:$0xff]  ;;  %v344_v27 = vld [vmem:[%s6948_s17 + $0x40] sm:$0xff]  ;;  %v7073_v28 = vld [vmem:[%s6948_s17 + $0x88] sm:$0xff] }
  0x1a   : > { %6573 = vmatmul.msk.f32.gmra.mxu0 %vm12948_vm1, %v6961_v3  ;;  %6582 = vmatmul.msk.f32.gmra.mxu1 %vm12948_vm1, %v6964_v4  ;;  %v7065_v26 = vld [vmem:[%s6948_s17 + $0xd8] sm:$0xff]  ;;  %v7076_v29 = vld [vmem:[%s6948_s17 + $0xe0] sm:$0xff]  ;;  %v7084_v30 = vld [vmem:[%s6948_s17 + $0xe8] sm:$0xff]  ;;  %v7167_v3 = vmul.f32 %v7029_v17, %v7029_v17  ;;  %v7171_v4 = vmul.f32 %v6971_v5, %v6971_v5  ;;  %v7187_v5 = vmul.f32 %v352_v25, %v352_v25 }
  0x1b   : > { %6591 = vmatmul.msk.f32.gmra.mxu2 %vm12948_vm1, %v6986_v8  ;;  %v7089_v31 = vld [vmem:[%s6948_s17 + $0xf0] sm:$0xff]  ;;  %v7094_v32 = vld [vmem:[%s6948_s17 + $0xf8] sm:$0xff]  ;;  %v5584_v2 = vld [vmem:[%s12697_s4] sm:$0xf] }
  0x1c   : > { %6700 = vmatpush.msk.msrb.mxu1 %vm466_vm0, %v5584_v2  ;;  %v12704_v2 = vmov 683565275  }
  0x1f   : > { %6597 = vmatmul.msk.f32.gmra.mxu3 %vm12948_vm1, %v7035_v19 }
  0x22   : > { %6574 = vmatmul.msk.f32.gmra.mxu0 %vm12948_vm1, %v6976_v6  ;;  %6583 = vmatmul.msk.f32.gmra.mxu1 %vm12948_vm1, %v6979_v7  ;;  %v7173_v6 = vmul.f32 %v342_v20, %v342_v20  ;;  %v7178_v7 = vmul.f32 %v7047_v21, %v7047_v21 }
  0x23   : > { %6592 = vmatmul.msk.f32.gmra.mxu2 %vm12948_vm1, %v7001_v11 }
  0x27   : > { %6598 = vmatmul.msk.f32.gmra.mxu3 %vm12948_vm1, %v7053_v23 }
  0x2a   : > { %6575 = vmatmul.msk.f32.gmra.mxu0 %vm12948_vm1, %v6991_v9  ;;  %6584 = vmatmul.msk.f32.gmra.mxu1 %vm12948_vm1, %v6994_v10  ;;  %v7182_v9 = vmul.f32 %v6986_v8, %v6986_v8  ;;  %v7184_v10 = vmul.f32 %v343_v24, %v343_v24 }
  0x2b   : > { %6593 = vmatmul.msk.f32.gmra.mxu2 %vm12948_vm1, %v7016_v14 }
  0x2c   : > { %13069 = vst [vmem:[#allocation5_spill] sm:$0xff] %v7182_v9 }
  0x2f   : > { %6599 = vmatmul.msk.f32.gmra.mxu3 %vm12948_vm1, %v7065_v26 }
  0x32   : > { %6576 = vmatmul.msk.f32.gmra.mxu0 %vm12948_vm1, %v7006_v12  ;;  %6585 = vmatmul.msk.f32.gmra.mxu1 %vm12948_vm1, %v7009_v13  ;;  %v7191_v13 = vmul.f32 %v7001_v11, %v7001_v11  ;;  %v7208_v11 = vmul.f32 %v7032_v18, %v7032_v18 }
  0x33   : > { %6594 = vmatmul.msk.f32.gmra.mxu2 %vm12948_vm1, %v7032_v18 }
  0x34   : > { %13070 = vst [vmem:[#allocation6_spill] sm:$0xff] %v7191_v13 }
  0x35   : > { %13073 = vst [vmem:[#allocation9_spill] sm:$0xff] %v7208_v11 }
  0x37   : > { %6600 = vmatmul.msk.f32.gmra.mxu3 %vm12948_vm1, %v7076_v29 }
  0x3a   : > { %6577 = vmatmul.msk.f32.gmra.mxu0 %vm12948_vm1, %v7026_v16  ;;  %6586 = vmatmul.msk.f32.gmra.mxu1 %vm12948_vm1, %v7029_v17 }
  0x3b   : > { %6595 = vmatmul.msk.f32.gmra.mxu2 %vm12948_vm1, %v7050_v22 }
  0x3f   : > { %6601 = vmatmul.msk.f32.gmra.mxu3 %vm12948_vm1, %v7084_v30 }
  0x42   : > { %6578 = vmatmul.msk.f32.gmra.mxu0 %vm12948_vm1, %v342_v20  ;;  %6587 = vmatmul.msk.f32.gmra.mxu1 %vm12948_vm1, %v7047_v21  ;;  %v7193_v20 = vmul.f32 %v344_v27, %v344_v27 }
  0x47   : > { %6602 = vmatmul.msk.f32.gmra.mxu3 %vm12948_vm1, %v7089_v31 }
  0x4a   : > { %6579 = vmatmul.msk.f32.gmra.mxu0 %vm12948_vm1, %v343_v24  ;;  %6588 = vmatmul.msk.f32.gmra.mxu1 %vm12948_vm1, %v352_v25  ;;  %v7200_v24 = vmul.f32 %v7073_v28, %v7073_v28  ;;  %v7204_v25 = vmul.f32 %v7016_v14, %v7016_v14  ;;  %v7224_v14 = vmul.f32 %v7053_v23, %v7053_v23 }
  0x4b   : > { %v7238_v23 = vmul.f32 %v7076_v29, %v7076_v29 }
  0x4c   : > { %13072 = vst [vmem:[#allocation8_spill] sm:$0xff] %v7204_v25 }
  0x4d   : > { %13077 = vst [vmem:[#allocation13_spill] sm:$0xff] %v7224_v14 }
  0x4e   : > { %13081 = vst [vmem:[#allocation17_spill] sm:$0xff] %v7238_v23 }
  0x4f   : > { %6603 = vmatmul.msk.f32.gmra.mxu3 %vm12948_vm1, %v7094_v32 }
  0x52   : > { %6580 = vmatmul.msk.f32.gmra.mxu0 %vm12948_vm1, %v344_v27  ;;  %6589 = vmatmul.msk.f32.gmra.mxu1 %vm12948_vm1, %v7073_v28  ;;  %v7212_v27 = vmul.f32 %v7050_v22, %v7050_v22  ;;  %v7220_v28 = vmul.f32 %v7035_v19, %v7035_v19 }
  0x54   : > { %13074 = vst [vmem:[#allocation10_spill] sm:$0xff] %v7212_v27 }
  0x55   : > { %13076 = vst [vmem:[#allocation12_spill] sm:$0xff] %v7220_v28 }
  0x5a   : > { %6701 = vmatmul.msk.f32.vlgmr.msrb.gmra.mxu1 %vm12948_vm1, %v5552_v48 }
  0x62   : > { %6702 = vmatmul.msk.f32.gmra.mxu1 %vm12948_vm1, %v5553_v50 }
  0x6a   : > { %6703 = vmatmul.msk.f32.gmra.mxu1 %vm12948_vm1, %v7132_v54 }
  0x72   : > { %6704 = vmatmul.msk.f32.gmra.mxu1 %vm12948_vm1, %v7141_v57  ;;  %v5551_v57 = vld [vmem:[%s12696_s3 + $0x20] sm:$0xff] }
  0x73   : > { %5905 = vmatpush.msrb.mxu2 %v5551_v57 }
  0x7a   : > { %6705 = vmatmul.msk.f32.gmra.mxu1 %vm12948_vm1, %v7150_v62 }
  0x82   : > { %6706 = vmatmul.msk.f32.gmra.mxu1 %vm12948_vm1, %v7158_v0 }
  0x8a   : > { %6707 = vmatmul.msk.f32.gmra.mxu1 %vm12948_vm1, %v7173_v6 }
  0x8f   : > { %v487_v33 = vpop.f32.mrf.mxu0  ;;  %v514_v35 = vpop.f32.mrf.mxu1 }
  0x90   : > { %v7104_v36 = vsub.f32 %v487_v33, %v7101_v34  ;;  %v7108_v38 = vsub.f32 %v514_v35, %v7101_v34  ;;  %v7216_v35 = vmul.f32 %v7021_v15, %v7021_v15  ;;  %v7231_v15 = vmul.f32 %v7065_v26, %v7065_v26 }
  0x92   : > { %13066 = vst [vmem:[#allocation2_spill] sm:$0xff] %v7104_v36  ;;  %v622_v37 = vand.u32 2139095040, %v7104_v36  ;;  %v2008_v42 = vand.u32 2139095040, %v7108_v38  ;;  %v12703_v47 = vand.u32 2147483647, %v7104_v36  ;;  %6708 = vmatmul.msk.f32.gmra.mxu1 %vm12948_vm1, %v7184_v10 }
  0x93   : > { %13067 = vst [vmem:[#allocation3_spill] sm:$0xff] %v7108_v38 }
  0x94   : > { %v623_v40 = vshrl.u32 %v622_v37, 23  ;;  %v2009_v45 = vshrl.u32 %v2008_v42, 23  ;;  %v626_v1 = vand.u32 8388607, %v12703_v47  ;;  %13075 = vst [vmem:[#allocation11_spill] sm:$0xff] %v7216_v35 }
  0x95   : > { %13079 = vst [vmem:[#allocation15_spill] sm:$0xff] %v7231_v15  ;;  %v12712_v47 = vmov 2102212464  }
  0x96   : > { %v6604_v43 = vadd.s32 4294967169, %v623_v40  ;;  %v6631_v59 = vadd.s32 4294967169, %v2009_v45  ;;  %v627_v21 = vor.u32 8388608, %v626_v1 }
  0x97   : > { %v490_v39 = vpop.f32.mrf.mxu0  ;;  %v517_v41 = vpop.f32.mrf.mxu1 }
  0x98   : > { %v7112_v44 = vsub.f32 %v490_v39, %v7101_v34  ;;  %v7115_v46 = vsub.f32 %v517_v41, %v7101_v34  ;;  %v629_v51 = vadd.s32 1, %v6604_v43  ;;  %v2015_v16 = vadd.s32 1, %v6631_v59 }
  0x99   : > { %v7233_v41 = vshll.u32 %v627_v21, 8  ;;  %v7256_v59 = vmul.f32 %v7089_v31, %v7089_v31 }
  0x9a   : > { %13068 = vst [vmem:[#allocation4_spill] sm:$0xff] %v7115_v46  ;;  %v776_v56 = vand.u32 2139095040, %v7112_v44  ;;  %v2162_v60 = vand.u32 2139095040, %v7115_v46  ;;  %vm630_vm2 = vcmp.gt.s32.totalorder %v629_v51, 0  ;;  %vm2016_vm3 = vcmp.gt.s32.totalorder %v2015_v16, 0  ;;  %6709 = vmatmul.msk.f32.gmra.mxu1 %vm12948_vm1, %v7193_v20 }
  0x9b   : > { %v631_v33 = vsel %vm630_vm2, %v629_v51, 0  ;;  %13080 = vst [vmem:[#allocation16_spill] sm:$0xff] %v7233_v41  ;;  %v2017_v43 = vsel %vm2016_vm3, %v2015_v16, 0  ;;  %v7245_v51 = vmul.f32 %v7084_v30, %v7084_v30  ;;  %v7252_v29 = vshrl.u32 %v7233_v41, 16 }
  0x9c   : > { %v777_v12 = vshrl.u32 %v776_v56, 23  ;;  %v2163_v17 = vshrl.u32 %v2162_v60, 23  ;;  %v633_v39 = vand.u32 31, %v631_v33  ;;  %v7249_v56 = vand.u32 65535, %v7233_v41  ;;  %13083 = vst [vmem:[#allocation19_spill] sm:$0xff] %v7256_v59 }
  0x9d   : > { %13082 = vst [vmem:[#allocation18_spill] sm:$0xff] %v7245_v51  ;;  %v7258_v60 = vshrl.u32 %v631_v33, 5  ;;  %v7262_v30 = vand.u32 31, %v2017_v43  ;;  %v7270_v16 = vmul.f32 %v7094_v32, %v7094_v32  ;;  %v12706_v33 = vmov 920167782  }
  0x9e   : > { %v6607_v37 = vadd.s32 4294967169, %v777_v12  ;;  %v6634_v18 = vadd.s32 4294967169, %v2163_v17  ;;  %v7241_v48 = vsub.s32 32, %v633_v39  ;;  %v636_v12 = vshll.u32 %v12704_v2, %v633_v39 }
  0x9f   : > { %v493_v52 = vpop.f32.mrf.mxu0  ;;  %v520_v61 = vpop.f32.mrf.mxu1  ;;  %13085 = vst [vmem:[#allocation21_spill] sm:$0xff] %v7262_v30  ;;  %v12708_v17 = vmov 2475754826   ;;  %v13089_v51 = vmov 920167782   ;;  %v7292_v23 = vsub.s32 32, %v7262_v30 }
  0xa0   : > { %v7196_v8 = vsub.f32 %v493_v52, %v7101_v34  ;;  %v7227_v40 = vsub.f32 %v520_v61, %v7101_v34  ;;  %v783_v45 = vadd.s32 1, %v6607_v37  ;;  %v2169_v26 = vadd.s32 1, %v6634_v18  ;;  %13087 = vst [vmem:[#allocation23_spill] sm:$0xff] %v7270_v16 }
  0xa1   : > { %v7260_v61 = vshrl.u32 %v2017_v43, 5  ;;  %v639_v21 = vshll.u32 %v12708_v17, %v633_v39  ;;  %v646_v37 = vshrl.u32 %v12706_v33, %v7241_v48  ;;  %v643_v2 = vshrl.u32 %v12712_v47, %v7241_v48  ;;  %13090 = vst [vmem:[#allocation25_spill] sm:$0xff] %v7292_v23 }
  0xa2   : > { %13071 = vst [vmem:[#allocation7_spill] sm:$0xff] %v7196_v8  ;;  %v930_v19 = vand.u32 2139095040, %v7196_v8  ;;  %v2316_v52 = vand.u32 2139095040, %v7227_v40  ;;  %vm784_vm4 = vcmp.gt.s32.totalorder %v783_v45, 0  ;;  %vm2170_vm5 = vcmp.gt.s32.totalorder %v2169_v26, 0  ;;  %6710 = vmatmul.msk.f32.gmra.mxu1 %vm12948_vm1, %v7122_v49 }
  0xa3   : > { %13078 = vst [vmem:[#allocation14_spill] sm:$0xff] %v7227_v40  ;;  %v645_v16 = vshll.u32 %v12712_v47, %v633_v39  ;;  %v785_v33 = vsel %vm784_vm4, %v783_v45, 0  ;;  %v2171_v15 = vsel %vm2170_vm5, %v2169_v26, 0  ;;  %v12720_v47 = vmov 1326507024  }
  0xa4   : > { %v931_v50 = vshrl.u32 %v930_v19, 23  ;;  %13084 = vst [vmem:[#allocation20_spill] sm:$0xff] %v7260_v61  ;;  %v2317_v18 = vshrl.u32 %v2316_v52, 23  ;;  %v12710_v19 = vmov 2131351028   ;;  %v649_v45 = vshrl.u32 %v12720_v47, %v7241_v48 }
  0xa5   : > { %v640_v32 = vshrl.u32 %v12710_v19, %v7241_v48  ;;  %v642_v43 = vshll.u32 %v12710_v19, %v633_v39  ;;  %v7297_v19 = vor.u32 %v646_v37, %v645_v16  ;;  %vm651_vm6 = vcmp.lt.s32.totalorder %v7258_v60, 1 }
  0xa6   : > { %v6637_v14 = vadd.s32 4294967169, %v2317_v18  ;;  %v7306_v26 = vand.u32 31, %v785_v33  ;;  %vm653_vm7 = vcmp.lt.s32.totalorder %v7258_v60, 3  ;;  %v7311_v54 = vand.u32 31, %v2171_v15 }
  0xa7   : > { %v496_v22 = vpop.f32.mrf.mxu0  ;;  %v523_v42 = vpop.f32.mrf.mxu1  ;;  %v7304_v35 = vor.u32 %v640_v32, %v639_v21  ;;  %v7308_v40 = vor.u32 %v643_v2, %v642_v43  ;;  %vm654_vm8 = vcmp.lt.s32.totalorder %v7258_v60, 4  ;;  %v13092_v37 = vmov 2102212464  }
  0xa8   : > { %v7265_v1 = vsub.f32 %v496_v22, %v7101_v34  ;;  %v7273_v31 = vsub.f32 %v523_v42, %v7101_v34  ;;  %v637_v22 = vshrl.u32 %v12708_v17, %v7241_v48  ;;  %v6610_v42 = vadd.s32 4294967169, %v931_v50  ;;  %13091 = vst [vmem:[#allocation26_spill] sm:$0xff] %v7311_v54 }
  0xa9   : > { %v7289_v17 = vshll.u32 %v13089_v51, %v633_v39  ;;  %v2031_v18 = vshll.u32 %v13092_v37, %v7262_v30  ;;  %v2034_v2 = vshll.u32 %v13089_v51, %v7262_v30  ;;  %v2035_v32 = vshrl.u32 %v12720_v47, %v7292_v23 }
  0xaa   : > { %13086 = vst [vmem:[#allocation22_spill] sm:$0xff] %v7265_v1  ;;  %v1084_v52 = vand.u32 2139095040, %v7265_v1  ;;  %v2470_v50 = vand.u32 2139095040, %v7273_v31  ;;  %v7302_v28 = vor.u32 %v637_v22, %v636_v12  ;;  %v2032_v12 = vshrl.u32 %v13089_v51, %v7292_v23  ;;  %6711 = vmatmul.msk.f32.gmra.mxu1 %vm12948_vm1, %v7128_v53 }
  0xab   : > { %13088 = vst [vmem:[#allocation24_spill] sm:$0xff] %v7273_v31  ;;  %v937_v31 = vadd.s32 1, %v6610_v42  ;;  %v660_v22 = vsel %vm654_vm8, %v7297_v19, 920167782  ;;  %v2323_v43 = vadd.s32 1, %v6637_v14  ;;  %v650_v42 = vor.u32 %v649_v45, %v7289_v17 }
  0xac   : > { %v1085_v16 = vshrl.u32 %v1084_v52, 23  ;;  %v2471_v21 = vshrl.u32 %v2470_v50, 23  ;;  %v7330_v52 = vsel %vm651_vm6, %v7302_v28, %v7304_v35  ;;  %v7333_v50 = vsub.s32 32, %v7306_v26 }
  0xad   : > { %vm938_vm9 = vcmp.gt.s32.totalorder %v937_v31, 0  ;;  %v7339_v46 = vsel %vm651_vm6, %v7304_v35, %v7308_v40  ;;  %v7342_v14 = vsub.s32 32, %v7311_v54  ;;  %v7350_v47 = vsel %vm653_vm7, %v7308_v40, %v660_v22 }
  0xae   : > { %13093 = vst [vmem:[#allocation27_spill] sm:$0xff] %v7333_v50  ;;  %v6613_v17 = vadd.s32 4294967169, %v1085_v16  ;;  %v7352_v23 = vor.u32 %v2032_v12, %v2031_v18  ;;  %vm12893_vm10 = vcmp.lt.s32.totalorder %v7260_v61, 4  ;;  %v6640_v30 = vadd.s32 4294967169, %v2471_v21 }
  0xaf   : > { %v499_v59 = vpop.f32.mrf.mxu0  ;;  %v526_v39 = vpop.f32.mrf.mxu1  ;;  %13094 = vst [vmem:[#allocation28_spill] sm:$0xff] %v7342_v14  ;;  %v2036_v38 = vor.u32 %v2035_v32, %v2034_v2  ;;  %v7357_v1 = vshrl.u32 %v785_v33, 5  ;;  %v939_v16 = vsel %vm938_vm9, %v937_v31, 0  ;;  %vm2324_vm11 = vcmp.gt.s32.totalorder %v2323_v43, 0 }
  0xb0   : > { %v7345_v45 = vsub.f32 %v499_v59, %v7101_v34  ;;  %13096 = vst [vmem:[#allocation30_spill] sm:$0xff] %v7352_v23  ;;  %v799_v27 = vshll.u32 %v13092_v37, %v7306_v26  ;;  %v800_v22 = vshrl.u32 %v13089_v51, %v7333_v50  ;;  %v2185_v18 = vshll.u32 %v13092_v37, %v7311_v54 }
  0xb1   : > { %v7366_v12 = vsub.f32 %v526_v39, %v7101_v34  ;;  %v13098_v31 = vmov 1326507024   ;;  %v2186_v21 = vshrl.u32 %v13089_v51, %v7342_v14  ;;  %v1091_v2 = vadd.s32 1, %v6613_v17 }
  0xb2   : > { %13095 = vst [vmem:[#allocation29_spill] sm:$0xff] %v7345_v45  ;;  %v803_v33 = vshrl.u32 %v13098_v31, %v7333_v50  ;;  %v1238_v32 = vand.u32 2139095040, %v7345_v45  ;;  %v7376_v8 = vand.u32 31, %v939_v16  ;;  %v2325_v11 = vsel %vm2324_vm11, %v2323_v43, 0  ;;  %6712 = vmatmul.msk.f32.gmra.mxu1 %vm12948_vm1, %v7136_v55 }
  0xb3   : > { %13097 = vst [vmem:[#allocation31_spill] sm:$0xff] %v7366_v12  ;;  %v2477_v39 = vadd.s32 1, %v6640_v30  ;;  %v802_v13 = vshll.u32 %v13089_v51, %v7306_v26  ;;  %v7383_v41 = vshrl.u32 %v2171_v15, 5  ;;  %v2188_v9 = vshll.u32 %v13089_v51, %v7311_v54 }
  0xb4   : > { %13099 = vst [vmem:[#allocation32_spill] sm:$0xff] %v7376_v8  ;;  %v2189_v17 = vshrl.u32 %v13098_v31, %v7342_v14  ;;  %v7391_v57 = vsel %vm654_vm8, %v650_v42, 1326507024  ;;  %v7396_v30 = vsel %vm12893_vm10, %v7352_v23, 920167782  ;;  %v7398_v43 = vor.u32 %v800_v22, %v799_v27 }
  0xb5   : > { %13101 = vst [vmem:[#allocation34_spill] sm:$0xff] %v7383_v41  ;;  %v2624_v15 = vand.u32 2139095040, %v7366_v12  ;;  %v7401_v45 = vand.u32 31, %v2325_v11  ;;  %vm1092_vm12 = vcmp.gt.s32.totalorder %v1091_v2, 0  ;;  %v1239_v54 = vshrl.u32 %v1238_v32, 23 }
  0xb6   : > { %13102 = vst [vmem:[#allocation35_spill] sm:$0xff] %v7396_v30  ;;  %v7403_v50 = vor.u32 %v2186_v21, %v2185_v18  ;;  %v7406_v14 = vsub.s32 32, %v7376_v8  ;;  %vm2478_vm13 = vcmp.gt.s32.totalorder %v2477_v39, 0  ;;  %v7413_v27 = vsel %vm12893_vm10, %v2036_v38, 1326507024 }
  0xb7   : > { %v502_v59 = vpop.f32.mrf.mxu0  ;;  %v529_v36 = vpop.f32.mrf.mxu1  ;;  %13103 = vst [vmem:[#allocation36_spill] sm:$0xff] %v7398_v43  ;;  %vm808_vm14 = vcmp.lt.s32.totalorder %v7357_v1, 4  ;;  %vm12852_vm15 = vcmp.lt.s32.totalorder %v7383_v41, 4  ;;  %v1093_v18 = vsel %vm1092_vm12, %v1091_v2, 0  ;;  %v7430_v38 = vsub.s32 32, %v7401_v45 }
  0xb8   : > { %v7379_v25 = vsub.f32 %v502_v59, %v7101_v34  ;;  %v804_v59 = vor.u32 %v803_v33, %v802_v13  ;;  %13104 = vst [vmem:[#allocation37_spill] sm:$0xff] %v7401_v45  ;;  %v2190_v13 = vor.u32 %v2189_v17, %v2188_v9  ;;  %v7420_v22 = vsel %vm808_vm14, %v7398_v43, 920167782 }
  0xb9   : > { %13105 = vst [vmem:[#allocation38_spill] sm:$0xff] %v7403_v50  ;;  %v2625_v33 = vshrl.u32 %v2624_v15, 23  ;;  %v7423_v21 = vsub.f32 %v529_v36, %v7101_v34  ;;  %v2479_v9 = vsel %vm2478_vm13, %v2477_v39, 0  ;;  %v6616_v32 = vadd.s32 4294967169, %v1239_v54 }
  0xba   : > { %13100 = vst [vmem:[#allocation33_spill] sm:$0xff] %v7379_v25  ;;  %v1392_v42 = vand.u32 2139095040, %v7379_v25  ;;  %v7427_v62 = vsel %vm808_vm14, %v804_v59, 1326507024  ;;  %v7435_v17 = vsel %vm12852_vm15, %v7403_v50, 920167782  ;;  %v954_v36 = vshrl.u32 %v13089_v51, %v7406_v14  ;;  %6713 = vmatmul.msk.f32.gmra.mxu1 %vm12948_vm1, %v7145_v58 }
  0xbb   : > { %13106 = vst [vmem:[#allocation39_spill] sm:$0xff] %v7406_v14  ;;  %v7437_v12 = vshrl.u32 %v939_v16, 5  ;;  %v953_v59 = vshll.u32 %v13092_v37, %v7376_v8  ;;  %v7443_v23 = vshrl.u32 %v2325_v11, 5  ;;  %v2339_v54 = vshll.u32 %v13092_v37, %v7401_v45 }
  0xbc   : > { %13107 = vst [vmem:[#allocation40_spill] sm:$0xff] %v7413_v27  ;;  %v1393_v2 = vshrl.u32 %v1392_v42, 23  ;;  %v7447_v39 = vand.u32 31, %v1093_v18  ;;  %v7451_v16 = vshll.u32 %v13089_v51, %v7401_v45  ;;  %v6643_v50 = vadd.s32 4294967169, %v2625_v33 }
  0xbd   : > { %13108 = vst [vmem:[#allocation41_spill] sm:$0xff] %v7420_v22  ;;  %v2778_v42 = vand.u32 2139095040, %v7423_v21  ;;  %v957_v30 = vshrl.u32 %v13098_v31, %v7406_v14  ;;  %v2340_v11 = vshrl.u32 %v13089_v51, %v7430_v38  ;;  %v1245_v61 = vadd.s32 1, %v6616_v32 }
  0xbe   : > { %13109 = vst [vmem:[#allocation42_spill] sm:$0xff] %v7423_v21  ;;  %v7463_v22 = vor.u32 %v954_v36, %v953_v59  ;;  %v2343_v45 = vshrl.u32 %v13098_v31, %v7430_v38  ;;  %v6619_v43 = vadd.s32 4294967169, %v1393_v2  ;;  %v7474_v21 = vsel %vm12852_vm15, %v2190_v13, 1326507024 }
  0xbf   : > { %13110 = vst [vmem:[#allocation43_spill] sm:$0xff] %v7427_v62  ;;  %v505_v15 = vpop.f32.mrf.mxu0  ;;  %v532_v27 = vpop.f32.mrf.mxu1  ;;  %v956_v32 = vshll.u32 %v13089_v51, %v7376_v8  ;;  %vm962_vm0 = vcmp.lt.s32.totalorder %v7437_v12, 4  ;;  %v7480_v36 = vsub.s32 32, %v7447_v39  ;;  %vm12821_vm2 = vcmp.lt.s32.totalorder %v7443_v23, 4 }
  0xc0   : > { %13111 = vst [vmem:[#allocation44_spill] sm:$0xff] %v7430_v38  ;;  %v7461_v25 = vsub.f32 %v505_v15, %v7101_v34  ;;  %v7468_v33 = vsub.f32 %v532_v27, %v7101_v34  ;;  %v2631_v2 = vadd.s32 1, %v6643_v50  ;;  %v2779_v15 = vshrl.u32 %v2778_v42, 23  ;;  %v541_v38 = vpop.f32.mrf.mxu2  ;;  %v5550_v42 = vld [vmem:[%s12696_s3 + $0x18] sm:$0xff] }
  0xc1   : > { %13112 = vst [vmem:[#allocation45_spill] sm:$0xff] %v7435_v17  ;;  %v7453_v17 = vand.u32 31, %v2479_v9  ;;  %v958_v0 = vor.u32 %v957_v30, %v956_v32  ;;  %v7486_v59 = vor.u32 %v2340_v11, %v2339_v54  ;;  %vm1246_vm3 = vcmp.gt.s32.totalorder %v1245_v61, 0  ;;  %5906 = vmatpush.msrb.mxu2 %v5550_v42 }
  0xc2   : > { %13113 = vst [vmem:[#allocation46_spill] sm:$0xff] %v7443_v23  ;;  %v1546_v13 = vand.u32 2139095040, %v7461_v25  ;;  %v2344_v41 = vor.u32 %v2343_v45, %v7451_v16  ;;  %v1399_v8 = vadd.s32 1, %v6619_v43  ;;  %v2932_v14 = vand.u32 2139095040, %v7468_v33  ;;  %6714 = vmatmul.msk.f32.gmra.mxu1 %vm12948_vm1, %v7154_v63 }
  0xc3   : > { %13114 = vst [vmem:[#allocation47_spill] sm:$0xff] %v7447_v39  ;;  %v7484_v27 = vsub.s32 32, %v7453_v17  ;;  %v7496_v62 = vshrl.u32 %v1093_v18, 5  ;;  %v1108_v50 = vshrl.u32 %v13089_v51, %v7480_v36  ;;  %v1111_v30 = vshrl.u32 %v13098_v31, %v7480_v36 }
  0xc4   : > { %13115 = vst [vmem:[#allocation48_spill] sm:$0xff] %v7453_v17  ;;  %v2493_v54 = vshll.u32 %v13092_v37, %v7453_v17  ;;  %v1247_v43 = vsel %vm1246_vm3, %v1245_v61, 0  ;;  %vm2632_vm4 = vcmp.gt.s32.totalorder %v2631_v2, 0  ;;  %v6646_v18 = vadd.s32 4294967169, %v2779_v15 }
  0xc5   : > { %13116 = vst [vmem:[#allocation49_spill] sm:$0xff] %v7461_v25  ;;  %v2494_v45 = vshrl.u32 %v13089_v51, %v7484_v27  ;;  %v1107_v16 = vshll.u32 %v13092_v37, %v7447_v39  ;;  %v2496_v11 = vshll.u32 %v13089_v51, %v7453_v17  ;;  %v2497_v32 = vshrl.u32 %v13098_v31, %v7484_v27 }
  0xc6   : > { %13117 = vst [vmem:[#allocation50_spill] sm:$0xff] %v7463_v22  ;;  %v1110_v25 = vshll.u32 %v13089_v51, %v7447_v39  ;;  %vm1400_vm5 = vcmp.gt.s32.totalorder %v1399_v8, 0  ;;  %v2933_v61 = vshrl.u32 %v2932_v14, 23  ;;  %v7523_v15 = vsel %vm962_vm0, %v958_v0, 1326507024 }
  0xc7   : > { %13118 = vst [vmem:[#allocation51_spill] sm:$0xff] %v7468_v33  ;;  %v1547_v33 = vshrl.u32 %v1546_v13, 23  ;;  %v7525_v42 = vor.u32 %v1108_v50, %v1107_v16  ;;  %v7527_v17 = vand.u32 31, %v1247_v43  ;;  %v7532_v13 = vsel %vm12821_vm2, %v7486_v59, 920167782 }
  0xc8   : > { %13119 = vst [vmem:[#allocation52_spill] sm:$0xff] %v7474_v21  ;;  %v7492_v21 = vsel %vm962_vm0, %v7463_v22, 920167782  ;;  %v7534_v39 = vor.u32 %v2494_v45, %v2493_v54  ;;  %v2785_v14 = vadd.s32 1, %v6646_v18  ;;  %v1401_v6 = vsel %vm1400_vm5, %v1399_v8, 0 }
  0xc9   : > { %13120 = vst [vmem:[#allocation53_spill] sm:$0xff] %v7480_v36  ;;  %v7517_v36 = vshrl.u32 %v2479_v9, 5  ;;  %v1112_v9 = vor.u32 %v1111_v30, %v1110_v25  ;;  %v6622_v22 = vadd.s32 4294967169, %v1547_v33  ;;  %v7537_v0 = vsub.f32 %v541_v38, %v7101_v34  ;;  %v544_v30 = vpop.f32.mrf.mxu2 }
  0xca   : > { %13121 = vst [vmem:[#allocation54_spill] sm:$0xff] %v7484_v27  ;;  %v2633_v27 = vsel %vm2632_vm4, %v2631_v2, 0  ;;  %vm1116_vm9 = vcmp.lt.s32.totalorder %v7496_v62, 4  ;;  %v6649_v50 = vadd.s32 4294967169, %v2933_v61  ;;  %v7547_v25 = vsel %vm653_vm7, %v7297_v19, %v7391_v57  ;;  %6715 = vmatmul.msk.f32.gmra.mxu1 %vm12948_vm1, %v7167_v3 }
  0xcb   : > { %13122 = vst [vmem:[#allocation55_spill] sm:$0xff] %v7486_v59  ;;  %vm12820_vm11 = vcmp.lt.s32.totalorder %v7517_v36, 4  ;;  %v7541_v2 = vand.u32 31, %v2633_v27  ;;  %v7551_v8 = vsel %vm12821_vm2, %v2344_v41, 1326507024  ;;  %v7559_v33 = vsub.s32 32, %v7527_v17 }
  0xcc   : > { %13123 = vst [vmem:[#allocation56_spill] sm:$0xff] %v7492_v21  ;;  %v2498_v21 = vor.u32 %v2497_v32, %v2496_v11  ;;  %v7556_v38 = vsel %vm1116_vm9, %v7525_v42, 920167782  ;;  %v7563_v54 = vsel %vm1116_vm9, %v1112_v9, 1326507024  ;;  %v7565_v45 = vshrl.u32 %v1247_v43, 5  ;;  %v508_v11 = vpop.f32.mrf.mxu0  ;;  %v535_v9 = vpop.f32.mrf.mxu1 }
  0xcd   : > { %13124 = vst [vmem:[#allocation57_spill] sm:$0xff] %v7496_v62  ;;  %v7567_v19 = vand.u32 31, %v1401_v6  ;;  %vm2786_vm12 = vcmp.gt.s32.totalorder %v2785_v14, 0  ;;  %v7572_v41 = vsel %vm12820_vm11, %v7534_v39, 920167782  ;;  %v1553_v18 = vadd.s32 1, %v6622_v22 }
  0xce   : > { %13125 = vst [vmem:[#allocation58_spill] sm:$0xff] %v7517_v36  ;;  %v7576_v57 = vsel %vm12820_vm11, %v2498_v21, 1326507024  ;;  %v3394_v16 = vand.u32 2139095040, %v7537_v0  ;;  %v7579_v32 = vshrl.u32 %v2633_v27, 5  ;;  %v7582_v43 = vsub.s32 32, %v7541_v2 }
  0xcf   : > { %13126 = vst [vmem:[#allocation59_spill] sm:$0xff] %v7523_v15  ;;  %v2939_v61 = vadd.s32 1, %v6649_v50  ;;  %v1261_v21 = vshll.u32 %v13092_v37, %v7527_v17  ;;  %v1262_v22 = vshrl.u32 %v13089_v51, %v7559_v33  ;;  %v1264_v27 = vshll.u32 %v13089_v51, %v7527_v17 }
  0xd0   : > { %13127 = vst [vmem:[#allocation60_spill] sm:$0xff] %v7525_v42  ;;  %v1265_v50 = vshrl.u32 %v13098_v31, %v7559_v33  ;;  %vm1270_vm13 = vcmp.lt.s32.totalorder %v7565_v45, 4  ;;  %v7602_v10 = vsub.f32 %v508_v11, %v7101_v34  ;;  %vm1554_vm3 = vcmp.gt.s32.totalorder %v1553_v18, 0 }
  0xd1   : > { %13128 = vst [vmem:[#allocation61_spill] sm:$0xff] %v7527_v17  ;;  %v7607_v36 = vsub.f32 %v535_v9, %v7101_v34  ;;  %v2650_v59 = vshll.u32 %v13089_v51, %v7541_v2  ;;  %vm2940_vm4 = vcmp.gt.s32.totalorder %v2939_v61, 0  ;;  %v7615_v23 = vor.u32 %v1262_v22, %v1261_v21 }
  0xd2   : > { %13129 = vst [vmem:[#allocation62_spill] sm:$0xff] %v7532_v13  ;;  %v7585_v13 = vsub.f32 %v544_v30, %v7101_v34  ;;  %v7599_v30 = vsub.s32 32, %v7567_v19  ;;  %v2651_v11 = vshrl.u32 %v13098_v31, %v7582_v43  ;;  %vm12819_vm5 = vcmp.lt.s32.totalorder %v7579_v32, 4  ;;  %6716 = vmatmul.msk.f32.gmra.mxu1 %vm12948_vm1, %v7178_v7 }
  0xd3   : > { %13130 = vst [vmem:[#allocation63_spill] sm:$0xff] %v7534_v39  ;;  %v2647_v39 = vshll.u32 %v13092_v37, %v7541_v2  ;;  %v1266_v9 = vor.u32 %v1265_v50, %v1264_v27  ;;  %v1700_v42 = vand.u32 2139095040, %v7602_v10  ;;  %v2941_v22 = vsel %vm2940_vm4, %v2939_v61, 0 }
  0xd4   : > { %13131 = vst [vmem:[#allocation64_spill] sm:$0xff] %v7537_v0  ;;  %v1416_v17 = vshrl.u32 %v13089_v51, %v7599_v30  ;;  %v1419_v21 = vshrl.u32 %v13098_v31, %v7599_v30  ;;  %v1415_v61 = vshll.u32 %v13092_v37, %v7567_v19 }
  0xd5   : > { %13132 = vst [vmem:[#allocation65_spill] sm:$0xff] %v7541_v2  ;;  %v5549_v2 = vld [vmem:[%s12696_s3 + $0x10] sm:$0xff]  ;;  %v1701_v20 = vshrl.u32 %v1700_v42, 23  ;;  %v7668_v42 = vsel %vm1270_vm13, %v1266_v9, 1326507024 }
  0xd6   : > { %13133 = vst [vmem:[#allocation66_spill] sm:$0xff] %v7551_v8  ;;  %5907 = vmatpush.msrb.mxu2 %v5549_v2 }
  0xd7   : > { %13134 = vst [vmem:[#allocation67_spill] sm:$0xff] %v7556_v38  ;;  %v6625_v9 = vadd.s32 4294967169, %v1701_v20 }
  0xd8   : > { %13135 = vst [vmem:[#allocation68_spill] sm:$0xff] %v7559_v33  ;;  %v1555_v33 = vsel %vm1554_vm3, %v1553_v18, 0 }
  0xd9   : > { %13136 = vst [vmem:[#allocation69_spill] sm:$0xff] %v7563_v54  ;;  %v3086_v54 = vand.u32 2139095040, %v7607_v36  ;;  %v7645_v2 = vand.u32 31, %v1555_v33  ;;  %v7701_v20 = vshrl.u32 %v1555_v33, 5 }
  0xda   : > { %13137 = vst [vmem:[#allocation70_spill] sm:$0xff] %v7565_v45  ;;  %6717 = vmatmul.msk.f32.gmra.mxu1 %vm12948_vm1, %v7187_v5 }
  0xdb   : > { %13138 = vst [vmem:[#allocation71_spill] sm:$0xff] %v7567_v19  ;;  %v1569_v49 = vshll.u32 %v13092_v37, %v7645_v2  ;;  %v1572_v33 = vshll.u32 %v13089_v51, %v7645_v2 }
  0xdc   : > { %13139 = vst [vmem:[#allocation72_spill] sm:$0xff] %v7572_v41  ;;  %v2787_v41 = vsel %vm2786_vm12, %v2785_v14, 0  ;;  %v2648_v14 = vshrl.u32 %v13089_v51, %v7582_v43 }
  0xdd   : > { %13140 = vst [vmem:[#allocation73_spill] sm:$0xff] %v7576_v57  ;;  %v3395_v57 = vshrl.u32 %v3394_v16, 23  ;;  %v7613_v8 = vand.u32 31, %v2787_v41  ;;  %v7620_v16 = vshrl.u32 %v1401_v6, 5  ;;  %v7633_v27 = vshrl.u32 %v2787_v41, 5 }
  0xde   : > { %13141 = vst [vmem:[#allocation74_spill] sm:$0xff] %v7579_v32  ;;  %v7631_v6 = vor.u32 %v2648_v14, %v2647_v39  ;;  %v7650_v39 = vsel %vm1270_vm13, %v7615_v23, 920167782  ;;  %v7654_v14 = vand.u32 31, %v2941_v22  ;;  %v538_v32 = vpop.f32.mrf.mxu1 }
  0xdf   : > { %13142 = vst [vmem:[#allocation75_spill] sm:$0xff] %v7582_v43  ;;  %v6658_v43 = vadd.s32 4294967169, %v3395_v57  ;;  %v7636_v18 = vsub.s32 32, %v7613_v8  ;;  %v1418_v57 = vshll.u32 %v13089_v51, %v7567_v19  ;;  %v2801_v41 = vshll.u32 %v13092_v37, %v7613_v8 }
  0xe0   : > { %13143 = vst [vmem:[#allocation76_spill] sm:$0xff] %v7585_v13  ;;  %vm1424_vm12 = vcmp.lt.s32.totalorder %v7620_v16, 4  ;;  %vm12836_vm3 = vcmp.lt.s32.totalorder %v7633_v27, 4 }
  0xe1   : > { %13144 = vst [vmem:[#allocation77_spill] sm:$0xff] %v7599_v30  ;;  %v3401_v50 = vadd.s32 1, %v6658_v43  ;;  %v2802_v19 = vshrl.u32 %v13089_v51, %v7636_v18  ;;  %v2804_v30 = vshll.u32 %v13089_v51, %v7613_v8 }
  0xe2   : > { %13145 = vst [vmem:[#allocation78_spill] sm:$0xff] %v7602_v10  ;;  %v2652_v10 = vor.u32 %v2651_v11, %v2650_v59  ;;  %v7656_v59 = vor.u32 %v1416_v17, %v1415_v61  ;;  %v1420_v11 = vor.u32 %v1419_v21, %v1418_v57  ;;  %v7673_v17 = vsel %vm12819_vm5, %v7631_v6, 920167782  ;;  %v511_v61 = vpop.f32.mrf.mxu0  ;;  %6718 = vmatmul.msk.f32.gmra.mxu1 %vm12948_vm1, %v7200_v24 }
  0xe3   : > { %13146 = vst [vmem:[#allocation79_spill] sm:$0xff] %v7607_v36  ;;  %v3087_v36 = vshrl.u32 %v3086_v54, 23  ;;  %v7677_v54 = vsub.s32 32, %v7645_v2  ;;  %v7685_v21 = vsub.s32 32, %v7654_v14  ;;  %vm3402_vm4 = vcmp.gt.s32.totalorder %v3401_v50, 0 }
  0xe4   : > { %13147 = vst [vmem:[#allocation80_spill] sm:$0xff] %v7613_v8  ;;  %v7681_v43 = vsel %vm12819_vm5, %v2652_v10, 1326507024  ;;  %v7690_v57 = vsel %vm1424_vm12, %v7656_v59, 920167782  ;;  %v7696_v10 = vor.u32 %v2802_v19, %v2801_v41  ;;  %v1707_v19 = vadd.s32 1, %v6625_v9 }
  0xe5   : > { %13148 = vst [vmem:[#allocation81_spill] sm:$0xff] %v7615_v23  ;;  %v2805_v23 = vshrl.u32 %v13098_v31, %v7636_v18  ;;  %vm1578_vm5 = vcmp.lt.s32.totalorder %v7701_v20, 4 }
  0xe6   : > { %13149 = vst [vmem:[#allocation82_spill] sm:$0xff] %v7620_v16 }
  0xe7   : > { %13150 = vst [vmem:[#allocation83_spill] sm:$0xff] %v7631_v6  ;;  %v1570_v6 = vshrl.u32 %v13089_v51, %v7677_v54 }
  0xe8   : > { %13151 = vst [vmem:[#allocation84_spill] sm:$0xff] %v7633_v27 }
  0xe9   : > { %13152 = vst [vmem:[#allocation85_spill] sm:$0xff] %v7636_v18  ;;  %v2806_v18 = vor.u32 %v2805_v23, %v2804_v30  ;;  %v1573_v23 = vshrl.u32 %v13098_v31, %v7677_v54  ;;  %v7718_v30 = vshrl.u32 %v2941_v22, 5  ;;  %v7732_v22 = vsel %vm12836_vm3, %v7696_v10, 920167782 }
  0xea   : > { %13153 = vst [vmem:[#allocation86_spill] sm:$0xff] %v7645_v2  ;;  %6719 = vmatmul.msk.f32.gmra.mxu1 %vm12948_vm1, %v7171_v4 }
  0xeb   : > { %13154 = vst [vmem:[#allocation87_spill] sm:$0xff] %v7650_v39  ;;  %v13157_v39 = vand.u32 2147483647, %v7537_v0  ;;  %v6652_v0 = vadd.s32 4294967169, %v3087_v36  ;;  %v2956_v36 = vshrl.u32 %v13089_v51, %v7685_v21  ;;  %vm12846_vm11 = vcmp.lt.s32.totalorder %v7718_v30, 4 }
  0xec   : > { %13155 = vst [vmem:[#allocation88_spill] sm:$0xff] %v7654_v14 }
  0xed   : > { %13156 = vst [vmem:[#allocation89_spill] sm:$0xff] %v7656_v59  ;;  %v3398_v38 = vand.u32 8388607, %v13157_v39  ;;  %v7694_v39 = vsel %vm1424_vm12, %v1420_v11, 1326507024  ;;  %v2955_v11 = vshll.u32 %v13092_v37, %v7654_v14  ;;  %v3093_v41 = vadd.s32 1, %v6652_v0 }
  0xee   : > { %13158 = vst [vmem:[#allocation90_spill] sm:$0xff] %v7668_v42  ;;  %v7734_v0 = vor.u32 %v1570_v6, %v1569_v49 }
  0xef   : > { %13159 = vst [vmem:[#allocation91_spill] sm:$0xff] %v7673_v17  ;;  %v3399_v8 = vor.u32 8388608, %v3398_v38  ;;  %v3548_v17 = vand.u32 2139095040, %v7585_v13  ;;  %v3403_v38 = vsel %vm3402_vm4, %v3401_v50, 0  ;;  %v2959_v50 = vshrl.u32 %v13098_v31, %v7685_v21 }
  0xf0   : > { %13160 = vst [vmem:[#allocation92_spill] sm:$0xff] %v7677_v54  ;;  %v2958_v54 = vshll.u32 %v13089_v51, %v7654_v14  ;;  %v3405_v2 = vand.u32 31, %v3403_v38  ;;  %v7737_v16 = vor.u32 %v2956_v36, %v2955_v11  ;;  %vm1708_vm4 = vcmp.gt.s32.totalorder %v1707_v19, 0  ;;  %v547_v36 = vpop.f32.mrf.mxu2 }
  0xf1   : > { %13161 = vst [vmem:[#allocation93_spill] sm:$0xff] %v7681_v43  ;;  %v7708_v43 = vsub.f32 %v511_v61, %v7101_v34  ;;  %v5548_v61 = vld [vmem:[%s12696_s3 + $0x8] sm:$0xff]  ;;  %v7727_v9 = vshll.u32 %v3399_v8, 8  ;;  %v3549_v59 = vshrl.u32 %v3548_v17, 23  ;;  %v5547_v8 = vld [vmem:[%s12696_s3] sm:$0xff]  ;;  %vm3094_vm2 = vcmp.gt.s32.totalorder %v3093_v41, 0 }
  0xf2   : > { %13162 = vst [vmem:[#allocation94_spill] sm:$0xff] %v7685_v21  ;;  %5908 = vmatpush.msrb.mxu2 %v5548_v61  ;;  %v7740_v21 = vsub.f32 %v538_v32, %v7101_v34  ;;  %v7747_v17 = vsel %vm12836_vm3, %v2806_v18, 1326507024  ;;  %v2960_v6 = vor.u32 %v2959_v50, %v2958_v54  ;;  %v7762_v18 = vsel %vm1578_vm5, %v7734_v0, 920167782 }
  0xf3   : > { %13163 = vst [vmem:[#allocation95_spill] sm:$0xff] %v7690_v57  ;;  %v1574_v57 = vor.u32 %v1573_v23, %v1572_v33  ;;  %v7752_v11 = vand.u32 65535, %v7727_v9  ;;  %v7755_v32 = vshrl.u32 %v7727_v9, 16  ;;  %v6661_v23 = vadd.s32 4294967169, %v3549_v59 }
  0xf4   : > { %13164 = vst [vmem:[#allocation96_spill] sm:$0xff] %v7694_v39  ;;  %v1854_v39 = vand.u32 2139095040, %v7708_v43  ;;  %5909 = vmatpush.msrb.mxu2 %v5547_v8  ;;  %v7764_v49 = vsub.s32 32, %v3405_v2  ;;  %v1709_v54 = vsel %vm1708_vm4, %v1707_v19, 0  ;;  %v7774_v59 = vsel %vm12846_vm11, %v7737_v16, 920167782 }
  0xf5   : > { %13165 = vst [vmem:[#allocation97_spill] sm:$0xff] %v7696_v10  ;;  %v7769_v61 = vsel %vm1578_vm5, %v1574_v57, 1326507024  ;;  %v3095_v53 = vsel %vm3094_vm2, %v3093_v41, 0  ;;  %v3240_v50 = vand.u32 2139095040, %v7740_v21  ;;  %v7777_v8 = vshrl.u32 %v3403_v38, 5 }
  0xf6   : > { %13166 = vst [vmem:[#allocation98_spill] sm:$0xff] %v7701_v20  ;;  %v1855_v33 = vshrl.u32 %v1854_v39, 23  ;;  %v7782_v39 = vsub.f32 %v547_v36, %v7101_v34  ;;  %v13184_v19 = vmov 2475754826   ;;  %v13185_v14 = vmov 2131351028  }
  0xf7   : > { %13167 = vst [vmem:[#allocation99_spill] sm:$0xff] %v7708_v43  ;;  %v3411_v57 = vshll.u32 %v13184_v19, %v3405_v2  ;;  %v7786_v10 = vand.u32 31, %v1709_v54  ;;  %v3409_v41 = vshrl.u32 %v13184_v19, %v7764_v49  ;;  %v3417_v38 = vshll.u32 %v13092_v37, %v3405_v2 }
  0xf8   : > { %13168 = vst [vmem:[#allocation100_spill] sm:$0xff] %v7718_v30  ;;  %v3415_v36 = vshrl.u32 %v13092_v37, %v7764_v49  ;;  %v3241_v27 = vshrl.u32 %v3240_v50, 23  ;;  %v3420_v43 = vshll.u32 %v13089_v51, %v3405_v2  ;;  %vm12858_vm2 = vcmp.lt.s32.totalorder %v7777_v8, 1 }
  0xf9   : > { %13169 = vst [vmem:[#allocation101_spill] sm:$0xff] %v7727_v9  ;;  %v13182_v9 = vmov 683565275   ;;  %vm12853_vm4 = vcmp.lt.s32.totalorder %v7777_v8, 4  ;;  %v13190_v50 = vand.u32 2147483647, %v7585_v13 }
  0xfa   : > { %13170 = vst [vmem:[#allocation102_spill] sm:$0xff] %v7732_v22  ;;  %v3414_v22 = vshll.u32 %v13185_v14, %v3405_v2  ;;  %v6655_v42 = vadd.s32 4294967169, %v3241_v27  ;;  %v7825_v62 = vshrl.u32 %v3095_v53, 5 }
  0xfb   : > { %13171 = vst [vmem:[#allocation103_spill] sm:$0xff] %v7734_v0  ;;  %v3421_v0 = vshrl.u32 %v13098_v31, %v7764_v49 }
  0xfc   : > { %13172 = vst [vmem:[#allocation104_spill] sm:$0xff] %v7737_v16  ;;  %v3555_v16 = vadd.s32 1, %v6661_v23  ;;  %v7801_v23 = vsel %vm12846_vm11, %v2960_v6, 1326507024  ;;  %vm12854_vm11 = vcmp.lt.s32.totalorder %v7777_v8, 3 }
  0xfd   : > { %13173 = vst [vmem:[#allocation105_spill] sm:$0xff] %v7740_v21  ;;  %v7791_v21 = vand.u32 31, %v3095_v53  ;;  %v3422_v45 = vor.u32 %v3421_v0, %v3420_v43  ;;  %v1723_v0 = vshll.u32 %v13092_v37, %v7786_v10  ;;  %v3247_v53 = vadd.s32 1, %v6655_v42 }
  0xfe   : > { %13174 = vst [vmem:[#allocation106_spill] sm:$0xff] %v7747_v17  ;;  %v3418_v17 = vshrl.u32 %v13089_v51, %v7764_v49  ;;  %vm3556_vm3 = vcmp.gt.s32.totalorder %v3555_v16, 0 }
  0xff   : > { %13175 = vst [vmem:[#allocation107_spill] sm:$0xff] %v7752_v11  ;;  %v3412_v11 = vshrl.u32 %v13185_v14, %v7764_v49  ;;  %v3557_v15 = vsel %vm3556_vm3, %v3555_v16, 0  ;;  %v3436_v42 = vsel %vm12853_vm4, %v3422_v45, 1326507024  ;;  %vm3248_vm15 = vcmp.gt.s32.totalorder %v3247_v53, 0 }
 0x100   : > { %13176 = vst [vmem:[#allocation108_spill] sm:$0xff] %v7755_v32  ;;  %v3408_v32 = vshll.u32 %v13182_v9, %v3405_v2  ;;  %v7817_v2 = vsub.s32 32, %v7791_v21  ;;  %v3419_v20 = vor.u32 %v3418_v17, %v3417_v38  ;;  %v1726_v17 = vshll.u32 %v13089_v51, %v7786_v10 }
 0x101   : > { %13177 = vst [vmem:[#allocation109_spill] sm:$0xff] %v7762_v18  ;;  %v7821_v30 = vor.u32 %v3412_v11, %v3411_v57  ;;  %v7823_v18 = vor.u32 %v3415_v36, %v3414_v22  ;;  %v3112_v22 = vshll.u32 %v13089_v51, %v7791_v21  ;;  %v3559_v11 = vand.u32 31, %v3557_v15 }
 0x102   : > { %13178 = vst [vmem:[#allocation110_spill] sm:$0xff] %v7764_v49  ;;  %v7814_v6 = vor.u32 %v3409_v41, %v3408_v32  ;;  %v3552_v49 = vand.u32 8388607, %v13190_v50  ;;  %v3110_v27 = vshrl.u32 %v13089_v51, %v7817_v2  ;;  %v3113_v43 = vshrl.u32 %v13098_v31, %v7817_v2 }
 0x103   : > { %13179 = vst [vmem:[#allocation111_spill] sm:$0xff] %v7769_v61  ;;  %v7810_v61 = vsub.s32 32, %v7786_v10  ;;  %v7850_v38 = vshrl.u32 %v1709_v54, 5  ;;  %v3432_v36 = vsel %vm12853_vm4, %v3419_v20, 920167782  ;;  %v550_v54 = vpop.f32.mrf.mxu2 }
 0x104   : > { %13180 = vst [vmem:[#allocation112_spill] sm:$0xff] %v7774_v59  ;;  %v6628_v59 = vadd.s32 4294967169, %v1855_v33  ;;  %v3702_v33 = vand.u32 2139095040, %v7782_v39  ;;  %v3553_v16 = vor.u32 8388608, %v3552_v49  ;;  %v7848_v57 = vsel %vm12858_vm2, %v7814_v6, %v7821_v30 }
 0x105   : > { %13181 = vst [vmem:[#allocation113_spill] sm:$0xff] %v7777_v8  ;;  %v1724_v32 = vshrl.u32 %v13089_v51, %v7810_v61  ;;  %v1727_v41 = vshrl.u32 %v13098_v31, %v7810_v61  ;;  %v7876_v58 = vsel %vm12854_vm11, %v7823_v18, %v3432_v36  ;;  %vm12895_vm4 = vcmp.lt.s32.totalorder %v7850_v38, 4 }
 0x106   : > { %13183 = vst [vmem:[#allocation114_spill] sm:$0xff] %v7782_v39  ;;  %v3703_v55 = vshrl.u32 %v3702_v33, 23  ;;  %v3565_v36 = vshll.u32 %v13184_v19, %v3559_v11 }
 0x107   : > { %13186 = vst [vmem:[#allocation115_spill] sm:$0xff] %v7791_v21  ;;  %v7854_v33 = vor.u32 %v1724_v32, %v1723_v0  ;;  %v1728_v50 = vor.u32 %v1727_v41, %v1726_v17  ;;  %v7883_v41 = vsel %vm12854_vm11, %v3419_v20, %v3436_v42  ;;  %v3249_v0 = vsel %vm3248_vm15, %v3247_v53, 0 }
 0x108   : > { %13187 = vst [vmem:[#allocation116_spill] sm:$0xff] %v7801_v23  ;;  %v1861_v23 = vadd.s32 1, %v6628_v59  ;;  %v3109_v59 = vshll.u32 %v13092_v37, %v7791_v21  ;;  %v6664_v49 = vadd.s32 4294967169, %v3703_v55  ;;  %v7868_v55 = vsel %vm12858_vm2, %v7821_v30, %v7823_v18 }
 0x109   : > { %13188 = vst [vmem:[#allocation117_spill] sm:$0xff] %v7814_v6  ;;  %v3114_v6 = vor.u32 %v3113_v43, %v3112_v22  ;;  %v7892_v22 = vsel %vm12895_vm4, %v1728_v50, 1326507024  ;;  %v7909_v17 = vshrl.u32 %v3557_v15, 5  ;;  %v3574_v50 = vshll.u32 %v13089_v51, %v3559_v11 }
 0x10a   : > { %13189 = vst [vmem:[#allocation118_spill] sm:$0xff] %v7817_v2  ;;  %vm1862_vm3 = vcmp.gt.s32.totalorder %v1861_v23, 0  ;;  %v7860_v2 = vor.u32 %v3110_v27, %v3109_v59  ;;  %v3709_v32 = vadd.s32 1, %v6664_v49  ;;  %v7888_v59 = vsel %vm12895_vm4, %v7854_v33, 920167782 }
 0x10b   : > { %13191 = vst [vmem:[#allocation119_spill] sm:$0xff] %v7821_v30  ;;  %v1863_v13 = vsel %vm1862_vm3, %v1861_v23, 0  ;;  %vm12861_vm3 = vcmp.lt.s32.totalorder %v7825_v62, 4  ;;  %v7871_v23 = vsub.s32 32, %v3559_v11  ;;  %v7895_v27 = vsub.f32 %v550_v54, %v7101_v34 }
 0x10c   : > { %13192 = vst [vmem:[#allocation120_spill] sm:$0xff] %v7823_v18  ;;  %v7879_v45 = vand.u32 31, %v1863_v13  ;;  %v7900_v43 = vsel %vm12861_vm3, %v7860_v2, 920167782  ;;  %v7904_v20 = vsel %vm12861_vm3, %v3114_v6, 1326507024  ;;  %v3571_v49 = vshll.u32 %v13092_v37, %v3559_v11 }
 0x10d   : > { %13193 = vst [vmem:[#allocation121_spill] sm:$0xff] %v7825_v62  ;;  %v3572_v34 = vshrl.u32 %v13089_v51, %v7871_v23  ;;  %v3575_v42 = vshrl.u32 %v13098_v31, %v7871_v23  ;;  %vm3710_vm11 = vcmp.gt.s32.totalorder %v3709_v32, 0  ;;  %v3562_v53 = vshll.u32 %v13182_v9, %v3559_v11  ;;  %v553_v62 = vpop.f32.mrf.mxu2 }
 0x10e   : > { %13194 = vst [vmem:[#allocation122_spill] sm:$0xff] %v7848_v57  ;;  %v7862_v57 = vshll.u32 %v3553_v16, 8  ;;  %v7919_v6 = vsub.s32 32, %v7879_v45  ;;  %v3563_v15 = vshrl.u32 %v13184_v19, %v7871_v23  ;;  %v7924_v54 = vand.u32 31, %v3249_v0 }
 0x10f   : > { %13195 = vst [vmem:[#allocation123_spill] sm:$0xff] %v7860_v2  ;;  %v3566_v30 = vshrl.u32 %v13185_v14, %v7871_v23  ;;  %v3568_v18 = vshll.u32 %v13185_v14, %v3559_v11  ;;  %vm12887_vm15 = vcmp.lt.s32.totalorder %v7909_v17, 1  ;;  %vm12884_vm2 = vcmp.lt.s32.totalorder %v7909_v17, 3 }
 0x110   : > { %13196 = vst [vmem:[#allocation124_spill] sm:$0xff] %v7862_v57  ;;  %v7907_v16 = vand.u32 65535, %v7862_v57  ;;  %v3576_v8 = vor.u32 %v3575_v42, %v3574_v50  ;;  %vm12872_vm3 = vcmp.lt.s32.totalorder %v7909_v17, 4  ;;  %v1878_v63 = vshrl.u32 %v13089_v51, %v7919_v6 }
 0x111   : > { %13197 = vst [vmem:[#allocation125_spill] sm:$0xff] %v7868_v55  ;;  %v3569_v55 = vshrl.u32 %v13092_v37, %v7871_v23  ;;  %v1881_v11 = vshrl.u32 %v13098_v31, %v7919_v6  ;;  %v1877_v50 = vshll.u32 %v13092_v37, %v7879_v45  ;;  %v3263_v21 = vshll.u32 %v13092_v37, %v7924_v54 }
 0x112   : > { %13198 = vst [vmem:[#allocation126_spill] sm:$0xff] %v7871_v23  ;;  %v7949_v23 = vor.u32 %v3566_v30, %v3565_v36  ;;  %v3590_v30 = vsel %vm12872_vm3, %v3576_v8, 1326507024  ;;  %vm652_vm4 = vcmp.lt.s32.totalorder %v7258_v60, 2 }
 0x113   : > { %13199 = vst [vmem:[#allocation127_spill] sm:$0xff] %v7876_v58  ;;  %v3711_v58 = vsel %vm3710_vm11, %v3709_v32, 0  ;;  %v7951_v32 = vor.u32 %v3569_v55, %v3568_v18  ;;  %v7966_v18 = vshrl.u32 %v7862_v57, 16  ;;  %v7968_v55 = vor.u32 %v1878_v63, %v1877_v50 }
 0x114   : > { %13200 = vst [vmem:[#allocation128_spill] sm:$0xff] %v7879_v45  ;;  %v3713_v42 = vand.u32 31, %v3711_v58  ;;  %v3266_v50 = vshll.u32 %v13089_v51, %v7924_v54 }
 0x115   : > { %13201 = vst [vmem:[#allocation129_spill] sm:$0xff] %v7883_v41  ;;  %v3573_v41 = vor.u32 %v3572_v34, %v3571_v49  ;;  %v7947_v49 = vsub.s32 32, %v7924_v54 }
 0x116   : > { %13202 = vst [vmem:[#allocation130_spill] sm:$0xff] %v7888_v59  ;;  %v7993_v63 = vsub.s32 32, %v3713_v42 }
 0x117   : > { %13203 = vst [vmem:[#allocation131_spill] sm:$0xff] %v7895_v27  ;;  %v7997_v3 = vsel %vm12884_vm2, %v3573_v41, %v3590_v30 }
 0x118   : > { %13204 = vst [vmem:[#allocation132_spill] sm:$0xff] %v7900_v43  ;;  %v13210_v43 = vand.u32 2147483647, %v7782_v39  ;;  %v7961_v39 = vshrl.u32 %v3249_v0, 5  ;;  %v7991_v0 = vsel %vm12887_vm15, %v7949_v23, %v7951_v32 }
 0x119   : > { %13205 = vst [vmem:[#allocation133_spill] sm:$0xff] %v7904_v20  ;;  %v7942_v20 = vor.u32 %v3563_v15, %v3562_v53  ;;  %v7957_v53 = vshrl.u32 %v1863_v13, 5  ;;  %v1880_v15 = vshll.u32 %v13089_v51, %v7879_v45  ;;  %v3264_v13 = vshrl.u32 %v13089_v51, %v7947_v49 }
 0x11a   : > { %13206 = vst [vmem:[#allocation134_spill] sm:$0xff] %v7907_v16  ;;  %v3856_v16 = vand.u32 2139095040, %v7895_v27  ;;  %v3706_v2 = vand.u32 8388607, %v13210_v43  ;;  %v3586_v43 = vsel %vm12872_vm3, %v3573_v41, 920167782 }
 0x11b   : > { %13207 = vst [vmem:[#allocation135_spill] sm:$0xff] %v7909_v17  ;;  %v1882_v36 = vor.u32 %v1881_v11, %v1880_v15  ;;  %v7980_v8 = vsel %vm12887_vm15, %v7942_v20, %v7949_v23  ;;  %vm12894_vm11 = vcmp.lt.s32.totalorder %v7957_v53, 4  ;;  %vm12929_vm3 = vcmp.lt.s32.totalorder %v7961_v39, 4 }
 0x11c   : > { %13208 = vst [vmem:[#allocation136_spill] sm:$0xff] %v7919_v6  ;;  %v3857_v34 = vshrl.u32 %v3856_v16, 23  ;;  %v3707_v16 = vor.u32 8388608, %v3706_v2  ;;  %v7985_v2 = vsel %vm12884_vm2, %v7951_v32, %v3586_v43  ;;  %v3267_v43 = vshrl.u32 %v13098_v31, %v7947_v49 }
 0x11d   : > { %13209 = vst [vmem:[#allocation137_spill] sm:$0xff] %v7924_v54  ;;  %v8015_v41 = vsel %vm12894_vm11, %v1882_v36, 1326507024  ;;  %v8017_v30 = vor.u32 %v3264_v13, %v3263_v21  ;;  %v8019_v11 = vshrl.u32 %v3711_v58, 5  ;;  %v3719_v21 = vshll.u32 %v13184_v19, %v3713_v42 }
 0x11e   : > { %13211 = vst [vmem:[#allocation138_spill] sm:$0xff] %v7942_v20  ;;  %v6667_v6 = vadd.s32 4294967169, %v3857_v34  ;;  %v8005_v34 = vsel %vm12894_vm11, %v7968_v55, 920167782  ;;  %v8011_v15 = vshll.u32 %v3707_v16, 8  ;;  %v3726_v20 = vshrl.u32 %v13089_v51, %v7993_v63 }
 0x11f   : > { %13212 = vst [vmem:[#allocation139_spill] sm:$0xff] %v7947_v49  ;;  %v8028_v16 = vld [vmem:[%s12695_s2] ss:$0 sm:$0xff]  ;;  %v3728_v58 = vshll.u32 %v13089_v51, %v3713_v42  ;;  %v13230_v13 = vand.u32 2147483647, %v7895_v27  ;;  %v3268_v17 = vor.u32 %v3267_v43, %v3266_v50  ;;  %vm12916_vm15 = vcmp.lt.s32.totalorder %v8019_v11, 4 }
 0x120   : > { %13213 = vst [vmem:[#allocation140_spill] sm:$0xff] %v7949_v23  ;;  %v3863_v57 = vadd.s32 1, %v6667_v6  ;;  %v3716_v23 = vshll.u32 %v13182_v9, %v3713_v42  ;;  %v8031_v36 = vsub.f32 %v553_v62, %v8028_v16  ;;  %v3729_v6 = vshrl.u32 %v13098_v31, %v7993_v63 }
 0x121   : > { %13214 = vst [vmem:[#allocation141_spill] sm:$0xff] %v7951_v32  ;;  %v3725_v32 = vshll.u32 %v13092_v37, %v3713_v42  ;;  %v3723_v62 = vshrl.u32 %v13092_v37, %v7993_v63  ;;  %v8047_v49 = vand.u32 65535, %v8011_v15  ;;  %v8050_v54 = vshrl.u32 %v8011_v15, 16 }
 0x122   : > { %13215 = vst [vmem:[#allocation142_spill] sm:$0xff] %v7957_v53  ;;  %vm3864_vm2 = vcmp.gt.s32.totalorder %v3863_v57, 0  ;;  %v12896_v27 = vand.u32 2147483647, %v8031_v36  ;;  %v4010_v50 = vand.u32 2139095040, %v8031_v36  ;;  %v3730_v43 = vor.u32 %v3729_v6, %v3728_v58 }
 0x123   : > { %13216 = vst [vmem:[#allocation143_spill] sm:$0xff] %v7961_v39  ;;  %vm12915_vm10 = vcmp.lt.s32.totalorder %v8019_v11, 1  ;;  %vm12908_vm11 = vcmp.lt.s32.totalorder %v8019_v11, 3 }
 0x124   : > { %13217 = vst [vmem:[#allocation144_spill] sm:$0xff] %v7966_v18  ;;  %v3860_v18 = vand.u32 8388607, %v13230_v13  ;;  %v8057_v13 = vsel %vm12929_vm3, %v8017_v30, 920167782 }
 0x125   : > { %13218 = vst [vmem:[#allocation145_spill] sm:$0xff] %v7968_v55 }
 0x126   : > { %13219 = vst [vmem:[#allocation146_spill] sm:$0xff] %v7980_v8  ;;  %v3722_v8 = vshll.u32 %v13185_v14, %v3713_v42  ;;  %v3727_v42 = vor.u32 %v3726_v20, %v3725_v32 }
 0x127   : > { %13220 = vst [vmem:[#allocation147_spill] sm:$0xff] %v7985_v2  ;;  %v556_v2 = vpop.f32.mrf.mxu2 }
 0x128   : > { %13221 = vst [vmem:[#allocation148_spill] sm:$0xff] %v7991_v0  ;;  %v3717_v0 = vshrl.u32 %v13184_v19, %v7993_v63  ;;  %v3740_v32 = vsel %vm12916_vm15, %v3727_v42, 920167782 }
 0x129   : > { %13222 = vst [vmem:[#allocation149_spill] sm:$0xff] %v7993_v63 }
 0x12a   : > { %13223 = vst [vmem:[#allocation150_spill] sm:$0xff] %v7997_v3  ;;  %v3720_v3 = vshrl.u32 %v13185_v14, %v7993_v63  ;;  %v3861_v63 = vor.u32 8388608, %v3860_v18  ;;  %v4011_v18 = vshrl.u32 %v4010_v50, 23  ;;  %v662_v50 = vsel %vm652_vm4, %v7330_v52, %v7350_v47 }
 0x12b   : > { %13224 = vst [vmem:[#allocation151_spill] sm:$0xff] %v8005_v34 }
 0x12c   : > { %13225 = vst [vmem:[#allocation152_spill] sm:$0xff] %v8011_v15  ;;  %v8063_v15 = vsub.f32 %v556_v2, %v8028_v16  ;;  %v8067_v7 = vor.u32 %v3720_v3, %v3719_v21  ;;  %v3744_v2 = vsel %vm12916_vm15, %v3730_v43, 1326507024  ;;  %v8089_v3 = vshll.u32 %v3861_v63, 8 }
 0x12d   : > { %13226 = vst [vmem:[#allocation153_spill] sm:$0xff] %v8015_v41  ;;  %v8121_v43 = vsel %vm12908_vm11, %v3727_v42, %v3744_v2 }
 0x12e   : > { %13227 = vst [vmem:[#allocation154_spill] sm:$0xff] %v8017_v30  ;;  %v3865_v30 = vsel %vm3864_vm2, %v3863_v57, 0  ;;  %v12899_v20 = vand.u32 2147483647, %v8063_v15  ;;  %v666_v57 = vsel %vm652_vm4, %v7339_v46, %v7547_v25  ;;  %v559_v25 = vpop.f32.mrf.mxu3  ;;  %v4164_v6 = vand.u32 2139095040, %v8063_v15 }
 0x12f   : > { %13228 = vst [vmem:[#allocation155_spill] sm:$0xff] %v8019_v11  ;;  %v671_v58 = vshrl.u32 %v666_v57, 16  ;;  %v8133_v47 = vsub.f32 %v559_v25, %v8028_v16 }
 0x130   : > { %13229 = vst [vmem:[#allocation156_spill] sm:$0xff] %v8031_v36  ;;  %v4165_v2 = vshrl.u32 %v4164_v6, 23 }
 0x131   : > { %13231 = vst [vmem:[#allocation157_spill] sm:$0xff] %v8047_v49  ;;  %v8069_v49 = vor.u32 %v3723_v62, %v3722_v8  ;;  %v8085_v8 = vsel %vm12929_vm3, %v3268_v17, 1326507024  ;;  %v670_v17 = vand.u32 65535, %v666_v57  ;;  %v8111_v62 = vand.u32 8388607, %v12899_v20 }
 0x132   : > { %13232 = vst [vmem:[#allocation158_spill] sm:$0xff] %v8050_v54  ;;  %v8065_v54 = vor.u32 %v3717_v0, %v3716_v23  ;;  %v4014_v23 = vand.u32 8388607, %v12896_v27  ;;  %v3867_v0 = vand.u32 31, %v3865_v30  ;;  %v673_v27 = vmul.u32 %v671_v58, %v7249_v56 }
 0x133   : > { %13233 = vst [vmem:[#allocation159_spill] sm:$0xff] %v8057_v13  ;;  %v8101_v46 = vsel %vm12915_vm10, %v8067_v7, %v8069_v49  ;;  %v8106_v63 = vsel %vm12908_vm11, %v8069_v49, %v3740_v32  ;;  %v6670_v32 = vadd.s32 4294967169, %v4011_v18  ;;  %v8127_v20 = vand.u32 65535, %v8089_v3 }
 0x134   : > { %13234 = vst [vmem:[#allocation160_spill] sm:$0xff] %v8063_v15  ;;  %v8095_v21 = vsel %vm12915_vm10, %v8065_v54, %v8067_v7  ;;  %v4015_v57 = vor.u32 8388608, %v4014_v23  ;;  %v8124_v36 = vsub.s32 32, %v3867_v0  ;;  %v8130_v15 = vshrl.u32 %v8089_v3, 16 }
 0x135   : > { %13235 = vst [vmem:[#allocation161_spill] sm:$0xff] %v8065_v54  ;;  %v672_v5 = vmul.u32 %v670_v17, %v7249_v56  ;;  %v8137_v52 = vmul.u32 %v670_v17, %v7252_v29  ;;  %v676_v42 = vshll.u32 %v673_v27, 16  ;;  %v693_v18 = vshrl.u32 %v662_v50, 16 }
 0x136   : > { %13236 = vst [vmem:[#allocation162_spill] sm:$0xff] %v8067_v7  ;;  %v8139_v23 = vshrl.u32 %v3865_v30, 5  ;;  %v8146_v25 = vshll.u32 %v4015_v57, 8  ;;  %v692_v17 = vand.u32 65535, %v662_v50  ;;  %v3871_v30 = vshrl.u32 %v13184_v19, %v8124_v36 }
 0x137   : > { %13237 = vst [vmem:[#allocation163_spill] sm:$0xff] %v8069_v49  ;;  %v682_v54 = vadd.s32 %v676_v42, %v672_v5  ;;  %v3873_v49 = vshll.u32 %v13184_v19, %v3867_v0  ;;  %vm680_vm2 = vc.u32 %v672_v5, %v676_v42  ;;  %v3876_v6 = vshll.u32 %v13185_v14, %v3867_v0 }
 0x138   : > { %13238 = vst [vmem:[#allocation164_spill] sm:$0xff] %v8085_v8  ;;  %v678_v7 = vshll.u32 %v8137_v52, 16  ;;  %v3877_v57 = vshrl.u32 %v13092_v37, %v8124_v36  ;;  %v3880_v50 = vshrl.u32 %v13089_v51, %v8124_v36  ;;  %v8163_v5 = vadd.s32 4294967169, %v4165_v2 }
 0x139   : > { %13239 = vst [vmem:[#allocation165_spill] sm:$0xff] %v8089_v3  ;;  %v3870_v3 = vshll.u32 %v13182_v9, %v3867_v0  ;;  %v675_v42 = vmul.u32 %v671_v58, %v7252_v29  ;;  %v8172_v11 = vshrl.u32 %v13098_v31, %v8124_v36  ;;  %v8175_v13 = vand.u32 65535, %v8146_v25 }
 0x13a   : > { %13240 = vst [vmem:[#allocation166_spill] sm:$0xff] %v8095_v21  ;;  %v3879_v21 = vshll.u32 %v13092_v37, %v3867_v0  ;;  %vm684_vm11 = vc.u32 %v682_v54, %v678_v7  ;;  %v696_v24 = vmul.u32 %v692_v17, %v7252_v29  ;;  %v8183_v54 = vor.u32 %v3877_v57, %v3876_v6 }
 0x13b   : > { %13241 = vst [vmem:[#allocation167_spill] sm:$0xff] %v8101_v46  ;;  %v8178_v2 = vor.u32 %v3871_v30, %v3870_v3  ;;  %v656_v3 = vsel %vm654_vm8, %v7308_v40, 2102212464  ;;  %vm12924_vm15 = vcmp.lt.s32.totalorder %v8139_v23, 1 }
 0x13c   : > { %13242 = vst [vmem:[#allocation168_spill] sm:$0xff] %v8106_v63  ;;  %v12918_v63 = vmov 0   ;;  %v8185_v7 = vor.u32 %v3880_v50, %v3879_v21  ;;  %v700_v6 = vshll.u32 %v696_v24, 16 }
 0x13d   : > { %13243 = vst [vmem:[#allocation169_spill] sm:$0xff] %v8121_v43  ;;  %v681_v46 = vsel %vm680_vm2, 1, %v12918_v63  ;;  %v8168_v43 = vshll.u32 %v13089_v51, %v3867_v0  ;;  %v685_v58 = vsel %vm684_vm11, 1, %v12918_v63  ;;  %v694_v0 = vmul.u32 %v692_v17, %v7249_v56 }
 0x13e   : > { %13244 = vst [vmem:[#allocation170_spill] sm:$0xff] %v8124_v36  ;;  %v683_v8 = vadd.s32 %v681_v46, %v675_v42  ;;  %v677_v46 = vshrl.u32 %v673_v27, 16  ;;  %vm12928_vm11 = vcmp.lt.s32.totalorder %v8139_v23, 4  ;;  %v657_v27 = vsel %vm653_vm7, %v7304_v35, %v656_v3 }
 0x13f   : > { %13245 = vst [vmem:[#allocation171_spill] sm:$0xff] %v8127_v20  ;;  %v695_v20 = vmul.u32 %v693_v18, %v7249_v56  ;;  %v790_v35 = vshll.u32 %v13182_v9, %v7306_v26  ;;  %vm807_vm7 = vcmp.lt.s32.totalorder %v7357_v1, 3 }
 0x140   : > { %13246 = vst [vmem:[#allocation172_spill] sm:$0xff] %v8130_v15  ;;  %v8144_v15 = vadd.s32 1, %v6670_v32  ;;  %v3874_v32 = vshrl.u32 %v13185_v14, %v8124_v36  ;;  %v687_v30 = vadd.s32 %v685_v58, %v683_v8  ;;  %v796_v58 = vshll.u32 %v13185_v14, %v7306_v26 }
 0x141   : > { %13247 = vst [vmem:[#allocation173_spill] sm:$0xff] %v8133_v47  ;;  %v698_v39 = vshll.u32 %v695_v20, 16 }
 0x142   : > { %13248 = vst [vmem:[#allocation174_spill] sm:$0xff] %v8139_v23  ;;  %v8181_v55 = vor.u32 %v3874_v32, %v3873_v49  ;;  %vm4018_vm2 = vcmp.gt.s32.totalorder %v8144_v15, 0  ;;  %v697_v49 = vmul.u32 %v693_v18, %v7252_v29  ;;  %v3884_v32 = vor.u32 %v8172_v11, %v8168_v43  ;;  %v13254_v18 = vld [vmem:[#allocation27_spill] sm:$0xff] }
 0x143   : > { %13249 = vst [vmem:[#allocation175_spill] sm:$0xff] %v8146_v25  ;;  %vm702_vm10 = vc.u32 %v694_v0, %v698_v39  ;;  %v704_v21 = vadd.s32 %v698_v39, %v694_v0  ;;  %v688_v56 = vadd.s32 %v687_v30, %v677_v46  ;;  %v679_v39 = vshrl.u32 %v8137_v52, 16 }
 0x144   : > { %13250 = vst [vmem:[#allocation176_spill] sm:$0xff] %v8175_v13  ;;  %v635_v13 = vshrl.u32 %v13182_v9, %v7241_v48  ;;  %v703_v17 = vsel %vm702_vm10, 1, %v12918_v63  ;;  %v12917_v48 = vand.u32 2147483647, %v7112_v44  ;;  %v699_v11 = vshrl.u32 %v695_v20, 16 }
 0x145   : > { %13251 = vst [vmem:[#allocation177_spill] sm:$0xff] %v8178_v2  ;;  %v705_v29 = vadd.s32 %v703_v17, %v697_v49  ;;  %vm706_vm8 = vc.u32 %v704_v21, %v700_v6  ;;  %v791_v57 = vshrl.u32 %v13184_v19, %v13254_v18  ;;  %v8218_v4 = vadd.s32 %v688_v56, %v679_v39  ;;  %v13255_v17 = vld [vmem:[#allocation43_spill] sm:$0xff] }
 0x146   : > { %13252 = vst [vmem:[#allocation178_spill] sm:$0xff] %v8181_v55  ;;  %v655_v40 = vsel %vm651_vm6, %v635_v13, %v7302_v28  ;;  %v707_v8 = vsel %vm706_vm8, 1, %v12918_v63  ;;  %v780_v43 = vand.u32 8388607, %v12917_v48  ;;  %v701_v28 = vshrl.u32 %v696_v24, 16 }
 0x147   : > { %13253 = vst [vmem:[#allocation179_spill] sm:$0xff] %v8183_v54  ;;  %v709_v13 = vadd.s32 %v707_v8, %v705_v29  ;;  %vm12927_vm6 = vcmp.lt.s32.totalorder %v8139_v23, 3  ;;  %v793_v20 = vshll.u32 %v13184_v19, %v7306_v26  ;;  %v794_v52 = vshrl.u32 %v13185_v14, %v13254_v18  ;;  %v13256_v29 = vld [vmem:[#allocation36_spill] sm:$0xff] }
 0x148   : > { %v781_v50 = vor.u32 8388608, %v780_v43  ;;  %v8224_v24 = vor.u32 %v791_v57, %v790_v35  ;;  %v797_v0 = vshrl.u32 %v13092_v37, %v13254_v18  ;;  %v658_v3 = vsel %vm652_vm4, %v655_v40, %v657_v27  ;;  %v13257_v27 = vld [vmem:[#allocation41_spill] sm:$0xff]  ;;  %v13259_v43 = vld [vmem:[#allocation16_spill] sm:$0xff] }
 0x149   : > { %v710_v42 = vadd.s32 %v709_v13, %v699_v11  ;;  %v8232_v46 = vadd.s32 %v704_v21, %v700_v6  ;;  %v8234_v30 = vor.u32 %v794_v52, %v793_v20  ;;  %vm805_vm10 = vcmp.lt.s32.totalorder %v7357_v1, 1  ;;  %v13258_v11 = vld [vmem:[#allocation5_spill] sm:$0xff]  ;;  %v13294_v23 = vld [vmem:[#allocation56_spill] sm:$0xff] }
 0x14a   : > { %v8237_v56 = vor.u32 %v797_v0, %v796_v58  ;;  %v819_v26 = vsel %vm807_vm7, %v13256_v29, %v13255_v17  ;;  %v4019_v60 = vsel %vm4018_vm2, %v8144_v15, 0  ;;  %v8253_v21 = vshll.u32 %v781_v50, 8  ;;  %6720 = vmatmul.msk.f32.gmra.mxu1 %vm12948_vm1, %v13258_v11 }
 0x14b   : > { %v711_v49 = vadd.s32 %v710_v42, %v701_v28  ;;  %vm714_vm4 = vc.u32 %v8218_v4, %v8232_v46  ;;  %v813_v6 = vsel %vm805_vm10, %v8224_v24, %v8234_v30  ;;  %vm806_vm8 = vcmp.lt.s32.totalorder %v7357_v1, 2 }
 0x14c   : > { %v815_v39 = vsel %vm807_vm7, %v8237_v56, %v13257_v27  ;;  %v817_v15 = vsel %vm805_vm10, %v8234_v30, %v8237_v56  ;;  %v3894_v8 = vsel %vm12928_vm11, %v8185_v7, 920167782  ;;  %v712_v28 = vmul.u32 %v13259_v43, %v658_v3 }
 0x14d   : > { %v715_v40 = vadd.s32 1, %v711_v49  ;;  %v816_v13 = vsel %vm806_vm8, %v813_v6, %v815_v39  ;;  %v820_v35 = vsel %vm806_vm8, %v817_v15, %v819_v26  ;;  %v822_v50 = vand.u32 65535, %v8253_v21 }
 0x14e   : > { %v823_v20 = vshrl.u32 %v8253_v21, 16  ;;  %v824_v52 = vand.u32 65535, %v820_v35  ;;  %v825_v58 = vshrl.u32 %v820_v35, 16  ;;  %v846_v0 = vand.u32 65535, %v816_v13 }
 0x14f   : > { %v716_v57 = vsel %vm714_vm4, %v715_v40, %v711_v49  ;;  %v847_v17 = vshrl.u32 %v816_v13, 16  ;;  %v8280_v3 = vsel %vm12924_vm15, %v8178_v2, %v8181_v55  ;;  %v8286_v49 = vsel %vm12924_vm15, %v8181_v55, %v8183_v54 }
 0x150   : > { %v717_v42 = vadd.s32 %v716_v57, %v712_v28  ;;  %13260 = vst [vmem:[#allocation27_spill] sm:$0xff] %v8280_v3  ;;  %v8289_v29 = vshrl.u32 %v8146_v25, 16  ;;  %v4171_v26 = vadd.s32 1, %v8163_v5  ;;  %v3898_v6 = vsel %vm12928_vm11, %v3884_v32, 1326507024 }
 0x151   : > { %13261 = vst [vmem:[#allocation43_spill] sm:$0xff] %v8286_v49  ;;  %v827_v27 = vmul.u32 %v825_v58, %v822_v50  ;;  %v828_v39 = vmul.u32 %v824_v52, %v823_v20  ;;  %v8297_v15 = vsel %vm12927_vm6, %v8183_v54, %v3894_v8  ;;  %v8299_v11 = vshrl.u32 %v4019_v60, 5  ;;  %v13266_v8 = vld [vmem:[#allocation6_spill] sm:$0xff] }
 0x152   : > { %13262 = vst [vmem:[#allocation36_spill] sm:$0xff] %v8289_v29  ;;  %v718_v40 = vadd.s32 536870912, %v717_v42  ;;  %v849_v43 = vmul.u32 %v847_v17, %v822_v50  ;;  %v850_v28 = vmul.u32 %v846_v0, %v823_v20  ;;  %v4021_v13 = vand.u32 31, %v4019_v60  ;;  %6721 = vmatmul.msk.f32.gmra.mxu1 %vm12948_vm1, %v13266_v8 }
 0x153   : > { %13263 = vst [vmem:[#allocation41_spill] sm:$0xff] %v8297_v15  ;;  %v826_v57 = vmul.u32 %v824_v52, %v822_v50  ;;  %v830_v5 = vshll.u32 %v827_v27, 16  ;;  %v8306_v32 = vsel %vm12927_vm6, %v8185_v7, %v3898_v6  ;;  %vm4172_vm2 = vcmp.gt.s32.totalorder %v4171_v26, 0 }
 0x154   : > { %13264 = vst [vmem:[#allocation5_spill] sm:$0xff] %v8299_v11  ;;  %v8301_v35 = vshrl.u32 %v718_v40, 30  ;;  %v829_v48 = vmul.u32 %v825_v58, %v823_v20  ;;  %v848_v63 = vmul.u32 %v846_v0, %v822_v50  ;;  %v852_v25 = vshll.u32 %v849_v43, 16 }
 0x155   : > { %13265 = vst [vmem:[#allocation16_spill] sm:$0xff] %v8306_v32  ;;  %v832_v55 = vshll.u32 %v828_v39, 16  ;;  %vm834_vm4 = vc.u32 %v826_v57, %v830_v5  ;;  %v836_v60 = vadd.s32 %v830_v5, %v826_v57  ;;  %v13267_v40 = vmov 0  }
 0x156   : > { %v720_v29 = vshll.u32 %v8301_v35, 30  ;;  %v835_v52 = vsel %vm834_vm4, 1, %v13267_v40  ;;  %v854_v2 = vshll.u32 %v850_v28, 16  ;;  %vm856_vm15 = vc.u32 %v848_v63, %v852_v25 }
 0x157   : > { %v858_v54 = vadd.s32 %v852_v25, %v848_v63  ;;  %v8312_v36 = vsub.s32 32, %v4021_v13  ;;  %v837_v58 = vadd.s32 %v835_v52, %v829_v48  ;;  %vm838_vm6 = vc.u32 %v836_v60, %v832_v55 }
 0x158   : > { %v8314_v7 = vsub.s32 %v717_v42, %v720_v29  ;;  %v839_v50 = vsel %vm838_vm6, 1, %v13267_v40  ;;  %v851_v0 = vmul.u32 %v847_v17, %v823_v20  ;;  %v857_v6 = vsel %vm856_vm15, 1, %v13267_v40 }
 0x159   : > { %13268 = vst [vmem:[#allocation6_spill] sm:$0xff] %v8312_v36  ;;  %vm860_vm11 = vc.u32 %v858_v54, %v854_v2  ;;  %v4024_v8 = vshll.u32 %v13182_v9, %v4021_v13  ;;  %v841_v5 = vadd.s32 %v839_v50, %v837_v58  ;;  %v810_v63 = vsel %vm808_vm14, %v8237_v56, 2102212464  ;;  %v13269_v50 = vld [vmem:[#allocation8_spill] sm:$0xff] }
 0x15a   : > { %vm722_vm3 = vcmp.lt.s32.totalorder %v8314_v7, 0  ;;  %v723_v57 = vsub.s32 0, %v8314_v7  ;;  %v831_v25 = vshrl.u32 %v827_v27, 16  ;;  %v859_v48 = vadd.s32 %v857_v6, %v851_v0  ;;  %6722 = vmatmul.msk.f32.gmra.mxu1 %vm12948_vm1, %v13269_v50  ;;  %v13273_v50 = vld [vmem:[#allocation9_spill] sm:$0xff] }
 0x15b   : > { %v861_v55 = vsel %vm860_vm11, 1, %v13267_v40  ;;  %v4027_v20 = vshll.u32 %v13184_v19, %v4021_v13  ;;  %v789_v17 = vshrl.u32 %v13182_v9, %v13254_v18  ;;  %v833_v29 = vshrl.u32 %v828_v39, 16 }
 0x15c   : > { %v724_v42 = vsel %vm722_vm3, %v723_v57, %v8314_v7  ;;  %v842_v52 = vadd.s32 %v841_v5, %v831_v25  ;;  %v853_v49 = vshrl.u32 %v849_v43, 16  ;;  %v863_v58 = vadd.s32 %v861_v55, %v859_v48 }
 0x15d   : > { %v725_v60 = vclz %v724_v42  ;;  %v4030_v56 = vshll.u32 %v13185_v14, %v4021_v13  ;;  %v4033_v27 = vshll.u32 %v13092_v37, %v4021_v13  ;;  %v809_v0 = vsel %vm805_vm10, %v789_v17, %v8224_v24 }
 0x15e   : > { %v811_v18 = vsel %vm807_vm7, %v8234_v30, %v810_v63  ;;  %v8339_v6 = vadd.s32 %v842_v52, %v833_v29  ;;  %v855_v43 = vshrl.u32 %v850_v28, 16  ;;  %v864_v57 = vadd.s32 %v863_v58, %v853_v49 }
 0x15f   : > { %v6605_v39 = vadd.s32 4294967294, %v725_v60  ;;  %v8342_v5 = vshll.u32 %v13089_v51, %v4021_v13  ;;  %v4173_v25 = vsel %vm4172_vm2, %v4171_v26, 0  ;;  %v13270_v48 = vor.u32 8388608, %v8111_v62 }
 0x160   : > { %v8349_v42 = vadd.s32 %v858_v54, %v854_v2  ;;  %v4025_v24 = vshrl.u32 %v13184_v19, %v8312_v36  ;;  %vm12941_vm14 = vcmp.lt.s32.totalorder %v8299_v11, 1  ;;  %v812_v30 = vsel %vm806_vm8, %v809_v0, %v811_v18  ;;  %v13274_v18 = vld [vmem:[#allocation7_spill] sm:$0xff] }
 0x161   : > { %v8347_v55 = vshll.u32 %v13270_v48, 8  ;;  %vm6606_vm3 = vcmp.lt.s32.totalorder %v6605_v39, 0  ;;  %v865_v49 = vadd.s32 %v864_v57, %v855_v43  ;;  %v4028_v28 = vshrl.u32 %v13185_v14, %v8312_v36  ;;  %v13275_v43 = vld [vmem:[#allocation39_spill] sm:$0xff] }
 0x162   : > { %v4031_v62 = vshrl.u32 %v13092_v37, %v8312_v36  ;;  %v728_v26 = vsel %vm6606_vm3, 0, %v6605_v39  ;;  %vm868_vm15 = vc.u32 %v8339_v6, %v8349_v42  ;;  %v713_v2 = vadd.s32 %v8232_v46, %v8218_v4  ;;  %6723 = vmatmul.msk.f32.gmra.mxu1 %vm12948_vm1, %v13273_v50 }
 0x163   : > { %13271 = vst [vmem:[#allocation8_spill] sm:$0xff] %v8347_v55  ;;  %v729_v54 = vsub.s32 32, %v728_v26  ;;  %v733_v13 = vsub.s32 4294967266, %v728_v26  ;;  %v869_v63 = vadd.s32 1, %v865_v49  ;;  %v4034_v1 = vshrl.u32 %v13089_v51, %v8312_v36 }
 0x164   : > { %v8368_v17 = vshrl.u32 %v13098_v31, %v8312_v36  ;;  %vm12943_vm11 = vcmp.lt.s32.totalorder %v8299_v11, 4  ;;  %v8371_v29 = vshrl.u32 %v4173_v25, 5  ;;  %v866_v60 = vmul.u32 %v8253_v21, %v812_v30 }
 0x165   : > { %v730_v52 = vshll.u32 %v8314_v7, %v728_v26  ;;  %v731_v58 = vshrl.u32 %v713_v2, %v729_v54  ;;  %v734_v4 = vadd.s32 127, %v733_v13  ;;  %v870_v46 = vsel %vm868_vm15, %v869_v63, %v865_v49  ;;  %v13277_v49 = vld [vmem:[#allocation2_spill] sm:$0xff]  ;;  %v13279_v54 = vld [vmem:[#allocation32_spill] sm:$0xff] }
 0x166   : > { %13272 = vst [vmem:[#allocation180_spill] sm:$0xff] %v8371_v29  ;;  %v871_v0 = vadd.s32 %v870_v46, %v866_v60  ;;  %v12931_v39 = vand.u32 2147483647, %v13274_v18  ;;  %v948_v57 = vshrl.u32 %v13185_v14, %v13275_v43  ;;  %v951_v48 = vshrl.u32 %v13092_v37, %v13275_v43 }
 0x167   : > { %v8382_v36 = vor.u32 %v4025_v24, %v4024_v8  ;;  %vm12940_vm6 = vcmp.lt.s32.totalorder %v8299_v11, 3  ;;  %v8385_v21 = vand.u32 31, %v4173_v25  ;;  %v732_v7 = vor.u32 %v731_v58, %v730_v52 }
 0x168   : > { %v735_v30 = vshll.u32 %v734_v4, 23  ;;  %vm621_vm7 = vcmp.lt.s32.totalorder %v13277_v49, 0  ;;  %v8388_v26 = vor.u32 %v4028_v28, %v4027_v20  ;;  %v872_v2 = vadd.s32 536870912, %v871_v0 }
 0x169   : > { %13276 = vst [vmem:[#allocation9_spill] sm:$0xff] %v8382_v36  ;;  %v947_v13 = vshll.u32 %v13184_v19, %v13279_v54  ;;  %v950_v63 = vshll.u32 %v13185_v14, %v13279_v54  ;;  %v8394_v60 = vor.u32 %v4031_v62, %v4030_v56  ;;  %v4035_v8 = vor.u32 %v4034_v1, %v4033_v27 }
 0x16a   : > { %13278 = vst [vmem:[#allocation7_spill] sm:$0xff] %v8388_v26  ;;  %v8397_v24 = vand.u32 65535, %v8347_v55  ;;  %v736_v25 = vor.u32 4788187, %v735_v30  ;;  %v8399_v52 = vshrl.u32 %v872_v2, 30  ;;  %v4038_v4 = vor.u32 %v8368_v17, %v8342_v5 }
 0x16b   : > { %13280 = vst [vmem:[#allocation39_spill] sm:$0xff] %v8394_v60  ;;  %v934_v20 = vand.u32 8388607, %v12931_v39  ;;  %v8403_v28 = vor.u32 %v948_v57, %v947_v13  ;;  %v8405_v58 = vor.u32 %v951_v48, %v950_v63  ;;  %v8410_v56 = vsub.s32 32, %v8385_v21  ;;  %v13284_v48 = vld [vmem:[#allocation10_spill] sm:$0xff]  ;;  %v13285_v13 = vld [vmem:[#allocation59_spill] sm:$0xff] }
 0x16c   : > { %13281 = vst [vmem:[#allocation2_spill] sm:$0xff] %v8397_v24  ;;  %v737_v27 = vand.u32 2147483647, %v736_v25  ;;  %v739_v62 = vcvt.s32.f32 %v732_v7  ;;  %v8416_v1 = vsel %vm12941_vm14, %v8382_v36, %v8388_v26  ;;  %v4178_v46 = vshll.u32 %v13182_v9, %v8385_v21  ;;  %6724 = vmatmul.msk.f32.gmra.mxu1 %vm12948_vm1, %v13284_v48  ;;  %v13286_v63 = vld [vmem:[#allocation50_spill] sm:$0xff] }
 0x16d   : > { %13282 = vst [vmem:[#allocation32_spill] sm:$0xff] %v8410_v56  ;;  %v4181_v50 = vshll.u32 %v13184_v19, %v8385_v21  ;;  %v874_v57 = vshll.u32 %v8399_v52, 30  ;;  %v743_v17 = vsub.s32 4, %v8301_v35  ;;  %vm959_vm10 = vcmp.lt.s32.totalorder %v7437_v12, 1 }
 0x16e   : > { %13283 = vst [vmem:[#allocation181_spill] sm:$0xff] %v8416_v1  ;;  %v740_v5 = vmul.f32 %v739_v62, %v737_v27  ;;  %vm961_vm8 = vcmp.lt.s32.totalorder %v7437_v12, 3  ;;  %v935_v30 = vor.u32 8388608, %v934_v20  ;;  %v971_v2 = vsel %vm959_vm10, %v8403_v28, %v8405_v58 }
 0x16f   : > { %v8428_v7 = vsub.s32 %v871_v0, %v874_v57  ;;  %v973_v25 = vsel %vm961_vm8, %v13286_v63, %v13285_v13  ;;  %v4048_v27 = vsel %vm12943_vm11, %v4035_v8, 920167782  ;;  %v8444_v0 = vsel %vm12941_vm14, %v8388_v26, %v8394_v60 }
 0x170   : > { %13287 = vst [vmem:[#allocation10_spill] sm:$0xff] %v8444_v0  ;;  %v4184_v20 = vshll.u32 %v13185_v14, %v8385_v21  ;;  %v741_v62 = vxor.u32 2147483648, %v740_v5  ;;  %v4318_v57 = vand.u32 2139095040, %v8133_v47  ;;  %vm960_vm4 = vcmp.lt.s32.totalorder %v7437_v12, 2 }
 0x171   : > { %vm876_vm2 = vcmp.lt.s32.totalorder %v8428_v7, 0  ;;  %v877_v48 = vsub.s32 0, %v8428_v7  ;;  %v13288_v13 = vand.u32 2147483647, %v13277_v49  ;;  %v945_v24 = vshrl.u32 %v13184_v19, %v13275_v43 }
 0x172   : > { %v742_v39 = vsel %vm621_vm7, %v741_v62, %v740_v5  ;;  %v8464_v26 = vsel %vm960_vm4, %v971_v2, %v973_v25  ;;  %v8469_v36 = vsel %vm12940_vm6, %v8394_v60, %v4048_v27  ;;  %v8477_v62 = vshll.u32 %v935_v30, 8 }
 0x173   : > { %vm8454_vm3 = vcmp.le.f32.partialorder %v13288_v13, 0.7853982  ;;  %13291 = vst [vmem:[#allocation59_spill] sm:$0xff] %v8469_v36  ;;  %v744_v13 = vsel %vm621_vm7, %v743_v17, %v8301_v35  ;;  %v4052_v1 = vsel %vm12943_vm11, %v4038_v4, 1326507024  ;;  %v878_v25 = vsel %vm876_vm2, %v877_v48, %v8428_v7 }
 0x174   : > { %v745_v5 = vsel %vm8454_vm3, %v13277_v49, %v742_v39  ;;  %v944_v27 = vshll.u32 %v13182_v9, %v13279_v54  ;;  %v4179_v60 = vshrl.u32 %v13184_v19, %v8410_v56  ;;  %v4182_v35 = vshrl.u32 %v13185_v14, %v8410_v56 }
 0x175   : > { %v747_v2 = vmul.f32 %v745_v5, %v745_v5  ;;  %v4319_v17 = vshrl.u32 %v4318_v57, 23  ;;  %v979_v39 = vshrl.u32 %v8464_v26, 16  ;;  %v746_v30 = vsel %vm8454_vm3, 0, %v744_v13 }
 0x176   : > { %v8491_v0 = vor.u32 %v945_v24, %v944_v27  ;;  %v8495_v48 = vsel %vm12940_vm6, %v4035_v8, %v4052_v1  ;;  %v4185_v54 = vshrl.u32 %v13092_v37, %v8410_v56  ;;  %v879_v32 = vclz %v878_v25 }
 0x177   : > { %v748_v36 = vmul.f32 -0.001358992, %v747_v2  ;;  %v755_v4 = vmul.f32 -0.00019511016, %v747_v2  ;;  %13292 = vst [vmem:[#allocation50_spill] sm:$0xff] %v8495_v48  ;;  %v976_v3 = vand.u32 65535, %v8477_v62  ;;  %v4187_v57 = vshll.u32 %v13092_v37, %v8385_v21 }
 0x178   : > { %v4188_v63 = vshrl.u32 %v13089_v51, %v8410_v56  ;;  %v8504_v24 = vor.u32 %v4179_v60, %v4178_v46  ;;  %v6676_v27 = vadd.s32 4294967169, %v4319_v17  ;;  %v763_v11 = vand.u32 3, %v746_v30 }
 0x179   : > { %v749_v13 = vadd.f32 0.041655596, %v748_v36  ;;  %v756_v15 = vadd.f32 0.008332121, %v755_v4  ;;  %v8506_v8 = vmul.u32 %v979_v39, %v976_v3  ;;  %v967_v25 = vsel %vm959_vm10, %v8491_v0, %v8403_v28 }
 0x17a   : > { %13293 = vst [vmem:[#allocation182_spill] sm:$0xff] %v8504_v24  ;;  %v969_v41 = vsel %vm961_vm8, %v8405_v58, %v13294_v23  ;;  %v8516_v36 = vor.u32 %v4182_v35, %v4181_v50  ;;  %v8520_v60 = vshll.u32 %v13089_v51, %v8385_v21  ;;  %v6608_v46 = vadd.s32 4294967294, %v879_v32 }
 0x17b   : > { %v750_v1 = vmul.f32 %v749_v13, %v747_v2  ;;  %v757_v48 = vmul.f32 %v756_v15, %v747_v2  ;;  %v978_v17 = vand.u32 65535, %v8464_v26  ;;  %v8523_v15 = vor.u32 %v4185_v54, %v4184_v20 }
 0x17c   : > { %13295 = vst [vmem:[#allocation56_spill] sm:$0xff] %v8516_v36  ;;  %v8527_v30 = vshrl.u32 %v13098_v31, %v8410_v56  ;;  %v8529_v34 = vor.u32 %v4188_v63, %v4187_v57  ;;  %v970_v23 = vsel %vm960_vm4, %v967_v25, %v969_v41  ;;  %v977_v50 = vshrl.u32 %v8477_v62, 16 }
 0x17d   : > { %13296 = vst [vmem:[#allocation183_spill] sm:$0xff] %v8523_v15  ;;  %v751_v4 = vadd.f32 -0.4999988, %v750_v1  ;;  %v758_v13 = vadd.f32 -0.16666654, %v757_v48  ;;  %v984_v21 = vshll.u32 %v8506_v8, 16  ;;  %v980_v35 = vmul.u32 %v978_v17, %v976_v3 }
 0x17e   : > { %v8535_v32 = vadd.s32 1, %v6676_v27  ;;  %vm764_vm15 = vcmp.lt.s32.totalorder %v763_v11, 2  ;;  %vm765_vm7 = vcmp.eq.s32.totalorder %v763_v11, 0  ;;  %vm6609_vm2 = vcmp.lt.s32.totalorder %v6608_v46, 0 }
 0x17f   : > { %v752_v26 = vmul.f32 %v751_v4, %v747_v2  ;;  %v759_v20 = vmul.f32 %v758_v13, %v747_v2  ;;  %v8537_v54 = vmul.u32 %v978_v17, %v977_v50  ;;  %vm768_vm3 = vcmp.eq.s32.totalorder %v763_v11, 2 }
 0x180   : > { %v1000_v63 = vand.u32 65535, %v970_v23  ;;  %vm12962_vm6 = vcmp.lt.s32.totalorder %v8371_v29, 1  ;;  %v882_v41 = vsel %vm6609_vm2, 0, %v6608_v46  ;;  %vm988_vm14 = vc.u32 %v980_v35, %v984_v21 }
 0x181   : > { %v753_v48 = vadd.f32 1.0, %v752_v26  ;;  %v760_v57 = vadd.f32 1.0, %v759_v20  ;;  %v990_v1 = vadd.s32 %v984_v21, %v980_v35  ;;  %v1001_v25 = vshrl.u32 %v970_v23, 16 }
 0x182   : > { %v867_v2 = vadd.s32 %v8349_v42, %v8339_v6  ;;  %v883_v4 = vsub.s32 32, %v882_v41  ;;  %vm5797_vm11 = vcmask 326656   ;;  %v887_v13 = vsub.s32 4294967266, %v882_v41 }
 0x183   : > { %v761_v27 = vmul.f32 %v760_v57, %v745_v5  ;;  %v769_v56 = vxor.u32 2147483648, %v753_v48  ;;  %v983_v17 = vmul.u32 %v979_v39, %v977_v50  ;;  %v986_v26 = vshll.u32 %v8537_v54, 16 }
 0x184   : > { %v885_v53 = vshrl.u32 %v867_v2, %v883_v4  ;;  %v989_v45 = vsel %vm988_vm14, 1, %v13267_v40  ;;  %v1003_v59 = vmul.u32 %v1001_v25, %v976_v3  ;;  %v884_v46 = vshll.u32 %v8428_v7, %v882_v41 }
 0x185   : > { %v766_v20 = vxor.u32 2147483648, %v761_v27  ;;  %v888_v21 = vadd.s32 127, %v887_v13  ;;  %vm8545_vm2 = vc.u32 %v990_v1, %v986_v26  ;;  %v1002_v23 = vmul.u32 %v1000_v63, %v976_v3 }
 0x186   : > { %v770_v42 = vsel %vm768_vm3, %v769_v56, %v761_v27  ;;  %v8551_v39 = vmul.u32 %v1000_v63, %v977_v50  ;;  %v1006_v35 = vshll.u32 %v1003_v59, 16  ;;  %vm762_vm1 = vweird.f32 %v13277_v49 }
 0x187   : > { %v767_v6 = vsel %vm765_vm7, %v753_v48, %v766_v20  ;;  %v886_v2 = vor.u32 %v885_v53, %v884_v46  ;;  %v889_v4 = vshll.u32 %v888_v21, 23  ;;  %v991_v41 = vadd.s32 %v989_v45, %v983_v17 }
 0x188   : > { %v771_v57 = vsel %vm764_vm15, %v767_v6, %v770_v42  ;;  %v1005_v1 = vmul.u32 %v1001_v25, %v977_v50  ;;  %vm1010_vm14 = vc.u32 %v1002_v23, %v1006_v35  ;;  %v4192_v3 = vor.u32 %v8527_v30, %v8520_v60 }
 0x189   : > { %v772_v7 = vsel %vm762_vm1, nan, %v771_v57  ;;  %v890_v48 = vor.u32 4788187, %v889_v4  ;;  %v993_v56 = vsel %vm8545_vm2, 1, %v13267_v40  ;;  %v1011_v49 = vsel %vm1010_vm14, 1, %v13267_v40 }
 0x18a   : > { %6733 = vmatmul.msk.f32.vlgmr.msrb.gmra.mxu2 %vm5797_vm11, %v772_v7  ;;  %vm4326_vm15 = vcmp.gt.s32.totalorder %v8535_v32, 0  ;;  %v1008_v53 = vshll.u32 %v8551_v39, 16  ;;  %v1012_v11 = vadd.s32 %v1006_v35, %v1002_v23  ;;  %v1013_v45 = vadd.s32 %v1011_v49, %v1005_v1 }
 0x18b   : > { %vm4196_vm1 = vcmp.lt.s32.totalorder %v8371_v29, 4  ;;  %v13299_v50 = vand.u32 2147483647, %v8133_v47  ;;  %v891_v30 = vand.u32 2147483647, %v890_v48  ;;  %v893_v63 = vcvt.s32.f32 %v886_v2 }
 0x18c   : > { %vm12961_vm7 = vcmp.lt.s32.totalorder %v8371_v29, 3  ;;  %v8572_v25 = vsel %vm12962_vm6, %v8504_v24, %v8516_v36  ;;  %v995_v27 = vadd.s32 %v993_v56, %v991_v41  ;;  %vm1014_vm3 = vc.u32 %v1012_v11, %v1008_v53 }
 0x18d   : > { %v4322_v60 = vand.u32 8388607, %v13299_v50  ;;  %13300 = vst [vmem:[#allocation184_spill] sm:$0xff] %v8572_v25  ;;  %v8575_v13 = vshrl.u32 %v8347_v55, 16  ;;  %v4327_v17 = vsel %vm4326_vm15, %v8535_v32, 0  ;;  %v894_v26 = vmul.f32 %v893_v63, %v891_v30  ;;  %v562_v50 = vpop.f32.mrf.mxu3 }
 0x18e   : > { %v1015_v20 = vsel %vm1014_vm3, 1, %v13267_v40  ;;  %v4202_v46 = vsel %vm4196_vm1, %v8529_v34, 920167782  ;;  %v985_v21 = vshrl.u32 %v8506_v8, 16  ;;  %v1007_v5 = vshrl.u32 %v1003_v59, 16 }
 0x18f   : > { %13301 = vst [vmem:[#allocation185_spill] sm:$0xff] %v8575_v13  ;;  %v1017_v23 = vadd.s32 %v1015_v20, %v1013_v45  ;;  %v8587_v6 = vsel %vm12962_vm6, %v8516_v36, %v8523_v15  ;;  %v4206_v32 = vsel %vm4196_vm1, %v4192_v3, 1326507024  ;;  %v4323_v42 = vor.u32 8388608, %v4322_v60 }
 0x190   : > { %13302 = vst [vmem:[#allocation186_spill] sm:$0xff] %v8587_v6  ;;  %v895_v35 = vxor.u32 2147483648, %v894_v26  ;;  %v8591_v57 = vand.u32 31, %v4327_v17  ;;  %vm775_vm2 = vcmp.lt.s32.totalorder %v7112_v44, 0  ;;  %v996_v2 = vadd.s32 %v995_v27, %v985_v21 }
 0x191   : > { %v1018_v4 = vadd.s32 %v1017_v23, %v1007_v5  ;;  %v8597_v59 = vsel %vm12961_vm7, %v8523_v15, %v4202_v46  ;;  %v13304_v8 = vand.u32 2147483647, %v7112_v44  ;;  %v1009_v1 = vshrl.u32 %v8551_v39, 16 }
 0x192   : > { %13303 = vst [vmem:[#allocation187_spill] sm:$0xff] %v8597_v59  ;;  %v896_v41 = vsel %vm775_vm2, %v895_v35, %v894_v26  ;;  %v8611_v3 = vsel %vm12961_vm7, %v8529_v34, %v4206_v32  ;;  %v964_v56 = vsel %vm962_vm0, %v8405_v58, 2102212464  ;;  %v987_v49 = vshrl.u32 %v8537_v54, 16 }
 0x193   : > { %vm8601_vm14 = vcmp.le.f32.partialorder %v13304_v8, 0.7853982  ;;  %13307 = vst [vmem:[#allocation188_spill] sm:$0xff] %v8611_v3  ;;  %v8620_v45 = vshll.u32 %v4323_v42, 8  ;;  %v943_v39 = vshrl.u32 %v13182_v9, %v13275_v43  ;;  %v1019_v30 = vadd.s32 %v1018_v4, %v1009_v1  ;;  %v13313_v4 = vld [vmem:[#allocation53_spill] sm:$0xff] }
 0x194   : > { %v899_v48 = vsel %vm8601_vm14, %v7112_v44, %v896_v41  ;;  %v8624_v34 = vshrl.u32 %v4327_v17, 5  ;;  %v8627_v63 = vsub.s32 32, %v8591_v57  ;;  %v897_v27 = vsub.s32 4, %v8399_v52 }
 0x195   : > { %13308 = vst [vmem:[#allocation189_spill] sm:$0xff] %v8620_v45  ;;  %v901_v60 = vmul.f32 %v899_v48, %v899_v48  ;;  %v8630_v26 = vadd.s32 %v996_v2, %v987_v49  ;;  %v963_v54 = vsel %vm959_vm10, %v943_v39, %v8491_v0  ;;  %v965_v43 = vsel %vm961_vm8, %v8403_v28, %v964_v56  ;;  %v13314_v56 = vld [vmem:[#allocation47_spill] sm:$0xff] }
 0x196   : > { %13309 = vst [vmem:[#allocation190_spill] sm:$0xff] %v8624_v34  ;;  %v8640_v17 = vshll.u32 %v13182_v9, %v8591_v57  ;;  %v8644_v46 = vshll.u32 %v13184_v19, %v8591_v57  ;;  %v8647_v21 = vsub.f32 %v562_v50, %v8028_v16  ;;  %v8649_v5 = vadd.s32 %v1012_v11, %v1008_v53  ;;  %v13312_v16 = vld [vmem:[#allocation22_spill] sm:$0xff] }
 0x197   : > { %13310 = vst [vmem:[#allocation191_spill] sm:$0xff] %v8627_v63  ;;  %v902_v58 = vmul.f32 -0.001358992, %v901_v60  ;;  %v909_v20 = vmul.f32 -0.00019511016, %v901_v60  ;;  %v8653_v0 = vshll.u32 %v13185_v14, %v8591_v57  ;;  %v1023_v28 = vadd.s32 1, %v1019_v30 }
 0x198   : > { %13311 = vst [vmem:[#allocation192_spill] sm:$0xff] %v8647_v21  ;;  %v898_v42 = vsel %vm775_vm2, %v897_v27, %v8399_v52  ;;  %v966_v35 = vsel %vm960_vm4, %v963_v54, %v965_v43  ;;  %vm1022_vm0 = vc.u32 %v8630_v26, %v8649_v5  ;;  %v12952_v53 = vand.u32 2147483647, %v13312_v16 }
 0x199   : > { %v903_v23 = vadd.f32 0.041655596, %v902_v58  ;;  %v910_v32 = vadd.f32 0.008332121, %v909_v20  ;;  %v1099_v8 = vshrl.u32 %v13184_v19, %v13313_v4  ;;  %v1102_v41 = vshrl.u32 %v13185_v14, %v13313_v4 }
 0x19a   : > { %v8669_v1 = vshrl.u32 %v13184_v19, %v8627_v63  ;;  %v8673_v12 = vshll.u32 %v13092_v37, %v8591_v57  ;;  %v4472_v52 = vand.u32 2139095040, %v8647_v21  ;;  %v1098_v49 = vshll.u32 %v13182_v9, %v13314_v56 }
 0x19b   : > { %v904_v11 = vmul.f32 %v903_v23, %v901_v60  ;;  %v911_v2 = vmul.f32 %v910_v32, %v901_v60  ;;  %v1024_v27 = vsel %vm1022_vm0, %v1023_v28, %v1019_v30  ;;  %v1101_v58 = vshll.u32 %v13184_v19, %v13314_v56 }
 0x19c   : > { %v900_v20 = vsel %vm8601_vm14, 0, %v898_v42  ;;  %v1020_v54 = vmul.u32 %v8477_v62, %v966_v35  ;;  %v1088_v43 = vand.u32 8388607, %v12952_v53  ;;  %v1105_v23 = vshrl.u32 %v13092_v37, %v13313_v4 }
 0x19d   : > { %v905_v50 = vadd.f32 -0.4999988, %v904_v11  ;;  %v912_v39 = vadd.f32 -0.16666654, %v911_v2  ;;  %v8687_v55 = vor.u32 %v1099_v8, %v1098_v49  ;;  %v8689_v11 = vor.u32 %v1102_v41, %v1101_v58  ;;  %v13315_v41 = vld [vmem:[#allocation57_spill] sm:$0xff] }
 0x19e   : > { %v4336_v30 = vshrl.u32 %v13185_v14, %v8627_v63  ;;  %v4473_v28 = vshrl.u32 %v4472_v52, 23  ;;  %v1025_v7 = vadd.s32 %v1024_v27, %v1020_v54  ;;  %v1104_v62 = vshll.u32 %v13185_v14, %v13314_v56 }
 0x19f   : > { %v906_v32 = vmul.f32 %v905_v50, %v901_v60  ;;  %v913_v47 = vmul.f32 %v912_v39, %v901_v60  ;;  %v4342_v42 = vshrl.u32 %v13089_v51, %v8627_v63  ;;  %v917_v53 = vand.u32 3, %v900_v20 }
 0x1a0   : > { %v1026_v50 = vadd.s32 536870912, %v1025_v7  ;;  %v1089_v60 = vor.u32 8388608, %v1088_v43  ;;  %v8697_v8 = vor.u32 %v1105_v23, %v1104_v62  ;;  %vm1113_vm10 = vcmp.lt.s32.totalorder %v13315_v41, 1  ;;  %v13317_v23 = vld [vmem:[#allocation69_spill] sm:$0xff] }
 0x1a1   : > { %v907_v35 = vadd.f32 1.0, %v906_v32  ;;  %v914_v2 = vadd.f32 1.0, %v913_v47  ;;  %vm1115_vm8 = vcmp.lt.s32.totalorder %v13315_v41, 3  ;;  %v1121_v52 = vsel %vm1113_vm10, %v8687_v55, %v8689_v11  ;;  %v13316_v47 = vld [vmem:[#allocation67_spill] sm:$0xff]  ;;  %v13318_v32 = vld [vmem:[#allocation60_spill] sm:$0xff] }
 0x1a2   : > { %v6679_v56 = vadd.s32 4294967169, %v4473_v28  ;;  %v8705_v27 = vshrl.u32 %v1026_v50, 30  ;;  %v1123_v58 = vsel %vm1115_vm8, %v8697_v8, %v13316_v47  ;;  %vm918_vm4 = vcmp.lt.s32.totalorder %v917_v53, 2 }
 0x1a3   : > { %v915_v49 = vmul.f32 %v914_v2, %v899_v48  ;;  %v923_v39 = vxor.u32 2147483648, %v907_v35  ;;  %v1125_v48 = vsel %vm1113_vm10, %v8689_v11, %v8697_v8  ;;  %vm919_vm15 = vcmp.eq.s32.totalorder %v917_v53, 0 }
 0x1a4   : > { %vm1114_vm3 = vcmp.lt.s32.totalorder %v13315_v41, 2  ;;  %vm922_vm2 = vcmp.eq.s32.totalorder %v917_v53, 2  ;;  %v1028_v54 = vshll.u32 %v8705_v27, 30  ;;  %v1127_v28 = vsel %vm1115_vm8, %v13318_v32, %v13317_v23 }
 0x1a5   : > { %v920_v20 = vxor.u32 2147483648, %v915_v49  ;;  %v1124_v43 = vsel %vm1114_vm3, %v1121_v52, %v1123_v58  ;;  %v924_v2 = vsel %vm922_vm2, %v923_v39, %v915_v49  ;;  %v1128_v50 = vsel %vm1114_vm3, %v1125_v48, %v1127_v28 }
 0x1a6   : > { %v8725_v47 = vshll.u32 %v1089_v60, 8  ;;  %vm916_vm14 = vweird.f32 %v7112_v44  ;;  %v1029_v36 = vsub.s32 %v1025_v7, %v1028_v54  ;;  %v1132_v24 = vand.u32 65535, %v1128_v50 }
 0x1a7   : > { %v921_v62 = vsel %vm919_vm15, %v907_v35, %v920_v20  ;;  %v12957_v15 = vand.u32 2147483647, %v8647_v21  ;;  %v8729_v52 = vadd.s32 1, %v6679_v56  ;;  %v1154_v13 = vand.u32 65535, %v1124_v43 }
 0x1a8   : > { %v925_v53 = vsel %vm918_vm4, %v921_v62, %v924_v2  ;;  %vm1030_vm0 = vcmp.lt.s32.totalorder %v1029_v36, 0  ;;  %v1031_v35 = vsub.s32 0, %v1029_v36  ;;  %v1131_v49 = vshrl.u32 %v8725_v47, 16 }
 0x1a9   : > { %v926_v58 = vsel %vm916_vm14, nan, %v925_v53  ;;  %v1133_v39 = vshrl.u32 %v1128_v50, 16  ;;  %v8735_v60 = vshrl.u32 %v13092_v37, %v8627_v63  ;;  %v8739_v44 = vshll.u32 %v13089_v51, %v8591_v57 }
 0x1aa   : > { %6734 = vmatmul.msk.f32.gmra.mxu2 %vm5797_vm11, %v926_v58  ;;  %v1130_v7 = vand.u32 65535, %v8725_v47  ;;  %v1155_v56 = vshrl.u32 %v1124_v43, 16  ;;  %v8744_v48 = vor.u32 %v8669_v1, %v8640_v17  ;;  %v8748_v20 = vshrl.u32 %v13098_v31, %v8627_v63 }
 0x1ab   : > { %v1032_v54 = vsel %vm1030_vm0, %v1031_v35, %v1029_v36  ;;  %v1136_v23 = vmul.u32 %v1132_v24, %v1131_v49  ;;  %v8751_v32 = vor.u32 %v4336_v30, %v8644_v46  ;;  %v8754_v28 = vor.u32 %v4342_v42, %v8673_v12 }
 0x1ac   : > { %13319 = vst [vmem:[#allocation22_spill] sm:$0xff] %v8744_v48  ;;  %v1033_v57 = vclz %v1032_v54  ;;  %v1135_v62 = vmul.u32 %v1133_v39, %v1130_v7  ;;  %v8758_v43 = vand.u32 8388607, %v12957_v15  ;;  %vm4480_vm4 = vcmp.gt.s32.totalorder %v8729_v52, 0 }
 0x1ad   : > { %13320 = vst [vmem:[#allocation53_spill] sm:$0xff] %v8751_v32  ;;  %v1157_v17 = vmul.u32 %v1155_v56, %v1130_v7  ;;  %v1158_v1 = vmul.u32 %v1154_v13, %v1131_v49  ;;  %v1021_v2 = vadd.s32 %v8649_v5, %v8630_v26  ;;  %v1134_v53 = vmul.u32 %v1132_v24, %v1130_v7 }
 0x1ae   : > { %v6611_v50 = vadd.s32 4294967294, %v1033_v57  ;;  %v1138_v46 = vshll.u32 %v1135_v62, 16  ;;  %v1137_v30 = vmul.u32 %v1133_v39, %v1131_v49  ;;  %v1140_v58 = vshll.u32 %v1136_v23, 16 }
 0x1af   : > { %v1156_v12 = vmul.u32 %v1154_v13, %v1130_v7  ;;  %v1160_v42 = vshll.u32 %v1157_v17, 16  ;;  %vm4350_vm15 = vcmp.lt.s32.totalorder %v8624_v34, 4  ;;  %v1162_v54 = vshll.u32 %v1158_v1, 16 }
 0x1b0   : > { %vm6612_vm2 = vcmp.lt.s32.totalorder %v6611_v50, 0  ;;  %vm1142_vm14 = vc.u32 %v1134_v53, %v1138_v46  ;;  %v1144_v35 = vadd.s32 %v1138_v46, %v1134_v53  ;;  %v1159_v24 = vmul.u32 %v1155_v56, %v1131_v49 }
 0x1b1   : > { %v1036_v15 = vsel %vm6612_vm2, 0, %v6611_v50  ;;  %v1143_v21 = vsel %vm1142_vm14, 1, %v13267_v40  ;;  %vm1164_vm0 = vc.u32 %v1156_v12, %v1160_v42  ;;  %v1166_v63 = vadd.s32 %v1160_v42, %v1156_v12 }
 0x1b2   : > { %v1037_v25 = vsub.s32 32, %v1036_v15  ;;  %v1041_v26 = vsub.s32 4294967266, %v1036_v15  ;;  %v1145_v5 = vadd.s32 %v1143_v21, %v1137_v30  ;;  %v1038_v57 = vshll.u32 %v1029_v36, %v1036_v15 }
 0x1b3   : > { %vm1146_vm7 = vc.u32 %v1144_v35, %v1140_v58  ;;  %v1165_v13 = vsel %vm1164_vm0, 1, %v13267_v40  ;;  %vm1168_vm6 = vc.u32 %v1166_v63, %v1162_v54  ;;  %v1118_v50 = vsel %vm1116_vm9, %v8697_v8, 2102212464 }
 0x1b4   : > { %v1039_v39 = vshrl.u32 %v1021_v2, %v1037_v25  ;;  %v1042_v7 = vadd.s32 127, %v1041_v26  ;;  %v1147_v59 = vsel %vm1146_vm7, 1, %v13267_v40  ;;  %v1167_v53 = vadd.s32 %v1165_v13, %v1159_v24 }
 0x1b5   : > { %v1139_v46 = vshrl.u32 %v1135_v62, 16  ;;  %v1149_v12 = vadd.s32 %v1147_v59, %v1145_v5  ;;  %v1169_v42 = vsel %vm1168_vm6, 1, %v13267_v40  ;;  %v1161_v36 = vshrl.u32 %v1157_v17, 16 }
 0x1b6   : > { %v1040_v21 = vor.u32 %v1039_v39, %v1038_v57  ;;  %v1043_v49 = vshll.u32 %v1042_v7, 23  ;;  %v1171_v15 = vadd.s32 %v1169_v42, %v1167_v53  ;;  %v4346_v56 = vor.u32 %v8748_v20, %v8739_v44 }
 0x1b7   : > { %v1097_v25 = vshrl.u32 %v13182_v9, %v13313_v4  ;;  %v1141_v2 = vshrl.u32 %v1136_v23, 16  ;;  %v1150_v30 = vadd.s32 %v1149_v12, %v1139_v46  ;;  %v4477_v58 = vor.u32 8388608, %v8758_v43 }
 0x1b8   : > { %v4481_v59 = vsel %vm4480_vm4, %v8729_v52, 0  ;;  %v1044_v8 = vor.u32 4788187, %v1043_v49  ;;  %v1172_v62 = vadd.s32 %v1171_v15, %v1161_v36  ;;  %v1119_v44 = vsel %vm1115_vm8, %v8689_v11, %v1118_v50  ;;  %v565_v36 = vpop.f32.mrf.mxu3 }
 0x1b9   : > { %v1117_v17 = vsel %vm1113_vm10, %v1097_v25, %v8687_v55  ;;  %v8785_v20 = vadd.s32 %v1150_v30, %v1141_v2  ;;  %v1163_v4 = vshrl.u32 %v1158_v1, 16  ;;  %v8789_v23 = vor.u32 %v8735_v60, %v8653_v0 }
 0x1ba   : > { %v1045_v43 = vand.u32 2147483647, %v1044_v8  ;;  %v1047_v35 = vcvt.s32.f32 %v1040_v21  ;;  %v8791_v52 = vadd.s32 %v1166_v63, %v1162_v54  ;;  %vm4347_vm9 = vcmp.lt.s32.totalorder %v8624_v34, 1 }
 0x1bb   : > { %13321 = vst [vmem:[#allocation47_spill] sm:$0xff] %v8789_v23  ;;  %vm12978_vm6 = vcmp.lt.s32.totalorder %v8624_v34, 3  ;;  %v4356_v55 = vsel %vm4350_vm15, %v8754_v28, 920167782  ;;  %v1173_v11 = vadd.s32 %v1172_v62, %v1163_v4  ;;  %v4483_v26 = vand.u32 31, %v4481_v59  ;;  %v13334_v62 = vld [vmem:[#allocation29_spill] sm:$0xff] }
 0x1bc   : > { %v1048_v5 = vmul.f32 %v1047_v35, %v1045_v43  ;;  %v1120_v1 = vsel %vm1114_vm3, %v1117_v17, %v1119_v44  ;;  %vm1176_vm7 = vc.u32 %v8785_v20, %v8791_v52  ;;  %v4360_v63 = vsel %vm4350_vm15, %v4346_v56, 1326507024  ;;  %v8872_v4 = vld [vmem:[%s12695_s2] ss:$0 sm:$0xff] }
 0x1bd   : > { %v8805_v0 = vand.u32 65535, %v8620_v45  ;;  %v8807_v60 = vshll.u32 %v4477_v58, 8  ;;  %v1177_v54 = vadd.s32 1, %v1173_v11  ;;  %v8813_v24 = vsel %vm4347_vm9, %v8744_v48, %v8751_v32 }
 0x1be   : > { %13324 = vst [vmem:[#allocation69_spill] sm:$0xff] %v8813_v24  ;;  %v8819_v41 = vsel %vm4347_vm9, %v8751_v32, %v8789_v23  ;;  %v8822_v57 = vshrl.u32 %v8620_v45, 16  ;;  %v1049_v13 = vxor.u32 2147483648, %v1048_v5  ;;  %v8827_v39 = vsel %vm12978_vm6, %v8789_v23, %v4356_v55 }
 0x1bf   : > { %13322 = vst [vmem:[#allocation57_spill] sm:$0xff] %v8805_v0  ;;  %vm929_vm10 = vcmp.lt.s32.totalorder %v13274_v18, 0  ;;  %v1174_v7 = vmul.u32 %v8725_v47, %v1120_v1  ;;  %v1178_v53 = vsel %vm1176_vm7, %v1177_v54, %v1173_v11  ;;  %v8834_v50 = vsel %vm12978_vm6, %v8754_v28, %v4360_v63 }
 0x1c0   : > { %13323 = vst [vmem:[#allocation67_spill] sm:$0xff] %v8807_v60  ;;  %v8836_v46 = vsub.s32 32, %v4483_v26  ;;  %v13330_v12 = vand.u32 2147483647, %v13274_v18  ;;  %v1050_v21 = vsel %vm929_vm10, %v1049_v13, %v1048_v5  ;;  %v8846_v49 = vshrl.u32 %v4481_v59, 5  ;;  %v13336_v5 = vld [vmem:[#allocation68_spill] sm:$0xff] }
 0x1c1   : > { %13325 = vst [vmem:[#allocation60_spill] sm:$0xff] %v8819_v41  ;;  %v8849_v47 = vand.u32 65535, %v8807_v60  ;;  %v1179_v15 = vadd.s32 %v1178_v53, %v1174_v7  ;;  %v4486_v56 = vshll.u32 %v13182_v9, %v4483_v26  ;;  %v4489_v25 = vshll.u32 %v13184_v19, %v4483_v26 }
 0x1c2   : > { %13326 = vst [vmem:[#allocation193_spill] sm:$0xff] %v8822_v57  ;;  %vm8840_vm8 = vcmp.le.f32.partialorder %v13330_v12, 0.7853982  ;;  %v8857_v2 = vshll.u32 %v13185_v14, %v4483_v26  ;;  %v8860_v58 = vshll.u32 %v13092_v37, %v4483_v26  ;;  %v8863_v59 = vshll.u32 %v13089_v51, %v4483_v26 }
 0x1c3   : > { %13327 = vst [vmem:[#allocation194_spill] sm:$0xff] %v8827_v39  ;;  %v1053_v28 = vsel %vm8840_vm8, %v13274_v18, %v1050_v21  ;;  %v1051_v8 = vsub.s32 4, %v8705_v27  ;;  %v12968_v17 = vand.u32 2147483647, %v13334_v62  ;;  %v4487_v44 = vshrl.u32 %v13184_v19, %v8836_v46 }
 0x1c4   : > { %13328 = vst [vmem:[#allocation195_spill] sm:$0xff] %v8834_v50  ;;  %v1055_v30 = vmul.f32 %v1053_v28, %v1053_v28  ;;  %v8875_v43 = vsub.f32 %v565_v36, %v8872_v4  ;;  %v4490_v11 = vshrl.u32 %v13185_v14, %v8836_v46  ;;  %v1180_v26 = vadd.s32 536870912, %v1179_v15  ;;  %v13337_v36 = vld [vmem:[#allocation61_spill] sm:$0xff] }
 0x1c5   : > { %13329 = vst [vmem:[#allocation196_spill] sm:$0xff] %v8836_v46  ;;  %v1256_v1 = vshrl.u32 %v13185_v14, %v13336_v5  ;;  %v1259_v63 = vshrl.u32 %v13092_v37, %v13336_v5  ;;  %v8885_v54 = vshrl.u32 %v13092_v37, %v8836_v46  ;;  %v1253_v53 = vshrl.u32 %v13184_v19, %v13336_v5 }
 0x1c6   : > { %13333 = vst [vmem:[#allocation197_spill] sm:$0xff] %v8849_v47  ;;  %v1056_v35 = vmul.f32 -0.001358992, %v1055_v30  ;;  %v1063_v55 = vmul.f32 -0.00019511016, %v1055_v30  ;;  %v1052_v12 = vsel %vm929_vm10, %v1051_v8, %v8705_v27  ;;  %v1255_v47 = vshll.u32 %v13184_v19, %v13337_v36 }
 0x1c7   : > { %13335 = vst [vmem:[#allocation29_spill] sm:$0xff] %v8875_v43  ;;  %v1242_v21 = vand.u32 8388607, %v12968_v17  ;;  %v1258_v45 = vshll.u32 %v13185_v14, %v13337_v36  ;;  %v4626_v32 = vand.u32 2139095040, %v8875_v43  ;;  %v1252_v48 = vshll.u32 %v13182_v9, %v13337_v36 }
 0x1c8   : > { %v1057_v13 = vadd.f32 0.041655596, %v1056_v35  ;;  %v1064_v7 = vadd.f32 0.008332121, %v1063_v55  ;;  %v4496_v23 = vshrl.u32 %v13089_v51, %v8836_v46  ;;  %v8903_v27 = vshrl.u32 %v1180_v26, 30 }
 0x1c9   : > { %v8905_v8 = vor.u32 %v1256_v1, %v1255_v47  ;;  %v8907_v17 = vor.u32 %v1259_v63, %v1258_v45  ;;  %v1054_v57 = vsel %vm8840_vm8, 0, %v1052_v12  ;;  %v8911_v50 = vor.u32 %v1253_v53, %v1252_v48  ;;  %v13340_v63 = vld [vmem:[#allocation70_spill] sm:$0xff] }
 0x1ca   : > { %v1058_v35 = vmul.f32 %v1057_v13, %v1055_v30  ;;  %v1065_v55 = vmul.f32 %v1064_v7, %v1055_v30  ;;  %v8913_v13 = vor.u32 %v4487_v44, %v4486_v56  ;;  %v8915_v7 = vor.u32 %v4490_v11, %v4489_v25  ;;  %v13343_v44 = vld [vmem:[#allocation81_spill] sm:$0xff] }
 0x1cb   : > { %v8919_v36 = vshrl.u32 %v13098_v31, %v8836_v46  ;;  %v1243_v26 = vor.u32 8388608, %v1242_v21  ;;  %v4627_v47 = vshrl.u32 %v4626_v32, 23  ;;  %vm1267_vm3 = vcmp.lt.s32.totalorder %v13340_v63, 1 }
 0x1cc   : > { %v1059_v0 = vadd.f32 -0.4999988, %v1058_v35  ;;  %v1066_v41 = vadd.f32 -0.16666654, %v1065_v55  ;;  %13338 = vst [vmem:[#allocation68_spill] sm:$0xff] %v8913_v13  ;;  %v1071_v42 = vand.u32 3, %v1054_v57  ;;  %v1279_v48 = vsel %vm1267_vm3, %v8905_v8, %v8907_v17 }
 0x1cd   : > { %13339 = vst [vmem:[#allocation61_spill] sm:$0xff] %v8915_v7  ;;  %v1182_v12 = vshll.u32 %v8903_v27, 30  ;;  %vm1269_vm4 = vcmp.lt.s32.totalorder %v13340_v63, 3  ;;  %v1275_v32 = vsel %vm1267_vm3, %v8911_v50, %v8905_v8  ;;  %vm1268_vm2 = vcmp.lt.s32.totalorder %v13340_v63, 2 }
 0x1ce   : > { %v1060_v1 = vmul.f32 %v1059_v0, %v1055_v30  ;;  %v1067_v45 = vmul.f32 %v1066_v41, %v1055_v30  ;;  %v13341_v0 = vld [vmem:[#allocation87_spill] sm:$0xff]  ;;  %v13342_v30 = vld [vmem:[#allocation90_spill] sm:$0xff]  ;;  %v8943_v53 = vshll.u32 %v1243_v26, 8  ;;  %vm1072_vm0 = vcmp.lt.s32.totalorder %v1071_v42, 2 }
 0x1cf   : > { %v1277_v41 = vsel %vm1269_vm4, %v8907_v17, %v13341_v0  ;;  %v8936_v57 = vsub.s32 %v1179_v15, %v1182_v12  ;;  %v1281_v11 = vsel %vm1269_vm4, %v13343_v44, %v13342_v30  ;;  %vm1073_vm7 = vcmp.eq.s32.totalorder %v1071_v42, 0 }
 0x1d0   : > { %v1061_v56 = vadd.f32 1.0, %v1060_v1  ;;  %v1068_v25 = vadd.f32 1.0, %v1067_v45  ;;  %v1282_v1 = vsel %vm1268_vm2, %v1279_v48, %v1281_v11  ;;  %v6682_v45 = vadd.s32 4294967169, %v4627_v47 }
 0x1d1   : > { %vm1184_vm14 = vcmp.lt.s32.totalorder %v8936_v57, 0  ;;  %v1185_v15 = vsub.s32 0, %v8936_v57  ;;  %v1278_v12 = vsel %vm1268_vm2, %v1275_v32, %v1277_v41  ;;  %vm1076_vm10 = vcmp.eq.s32.totalorder %v1071_v42, 2 }
 0x1d2   : > { %v1069_v35 = vmul.f32 %v1068_v25, %v1053_v28  ;;  %v1077_v55 = vxor.u32 2147483648, %v1061_v56  ;;  %v1284_v28 = vand.u32 65535, %v8943_v53  ;;  %v1286_v25 = vand.u32 65535, %v1282_v1 }
 0x1d3   : > { %v1186_v26 = vsel %vm1184_vm14, %v1185_v15, %v8936_v57  ;;  %v1287_v30 = vshrl.u32 %v1282_v1, 16  ;;  %v1309_v11 = vshrl.u32 %v1278_v12, 16  ;;  %vm1070_vm8 = vweird.f32 %v13274_v18 }
 0x1d4   : > { %v1074_v0 = vxor.u32 2147483648, %v1069_v35  ;;  %v1078_v48 = vsel %vm1076_vm10, %v1077_v55, %v1069_v35  ;;  %v1187_v47 = vclz %v1186_v26  ;;  %v1285_v46 = vshrl.u32 %v8943_v53, 16 }
 0x1d5   : > { %v1308_v32 = vand.u32 65535, %v1278_v12  ;;  %v8957_v41 = vor.u32 %v4496_v23, %v8860_v58  ;;  %v1289_v15 = vmul.u32 %v1287_v30, %v1284_v28  ;;  %v13344_v39 = vand.u32 2147483647, %v8875_v43 }
 0x1d6   : > { %v1075_v44 = vsel %vm1073_vm7, %v1061_v56, %v1074_v0  ;;  %v6614_v24 = vadd.s32 4294967294, %v1187_v47  ;;  %v4633_v56 = vadd.s32 1, %v6682_v45  ;;  %v1290_v35 = vmul.u32 %v1286_v25, %v1285_v46 }
 0x1d7   : > { %v1079_v21 = vsel %vm1072_vm0, %v1075_v44, %v1078_v48  ;;  %v8961_v34 = vand.u32 8388607, %v13344_v39  ;;  %v1311_v55 = vmul.u32 %v1309_v11, %v1284_v28  ;;  %v1175_v18 = vadd.s32 %v8791_v52, %v8785_v20 }
 0x1d8   : > { %v1080_v42 = vsel %vm1070_vm8, nan, %v1079_v21  ;;  %vm6615_vm14 = vcmp.lt.s32.totalorder %v6614_v24, 0  ;;  %v1288_v1 = vmul.u32 %v1286_v25, %v1284_v28  ;;  %v1292_v12 = vshll.u32 %v1289_v15, 16 }
 0x1d9   : > { %6735 = vmatmul.msk.f32.gmra.mxu2 %vm5797_vm11, %v1080_v42  ;;  %v1190_v23 = vsel %vm6615_vm14, 0, %v6614_v24  ;;  %v1310_v58 = vmul.u32 %v1308_v32, %v1284_v28  ;;  %v1312_v21 = vmul.u32 %v1308_v32, %v1285_v46  ;;  %v1314_v0 = vshll.u32 %v1311_v55, 16 }
 0x1da   : > { %v1191_v26 = vsub.s32 32, %v1190_v23  ;;  %v1195_v44 = vsub.s32 4294967266, %v1190_v23  ;;  %v1291_v48 = vmul.u32 %v1287_v30, %v1285_v46  ;;  %vm1296_vm0 = vc.u32 %v1288_v1, %v1292_v12 }
 0x1db   : > { %v1294_v39 = vshll.u32 %v1290_v35, 16  ;;  %v1297_v45 = vsel %vm1296_vm0, 1, %v13267_v40  ;;  %v1298_v47 = vadd.s32 %v1292_v12, %v1288_v1  ;;  %v1313_v42 = vmul.u32 %v1309_v11, %v1285_v46 }
 0x1dc   : > { %v1192_v43 = vshll.u32 %v8936_v57, %v1190_v23  ;;  %v1193_v6 = vshrl.u32 %v1175_v18, %v1191_v26  ;;  %v1196_v20 = vadd.s32 127, %v1195_v44  ;;  %v1299_v52 = vadd.s32 %v1297_v45, %v1291_v48 }
 0x1dd   : > { %vm1300_vm7 = vc.u32 %v1298_v47, %v1294_v39  ;;  %v1316_v25 = vshll.u32 %v1312_v21, 16  ;;  %vm1318_vm10 = vc.u32 %v1310_v58, %v1314_v0  ;;  %v1320_v24 = vadd.s32 %v1314_v0, %v1310_v58 }
 0x1de   : > { %vm12990_vm8 = vcmp.lt.s32.totalorder %v8846_v49, 1  ;;  %v1194_v28 = vor.u32 %v1193_v6, %v1192_v43  ;;  %v1197_v32 = vshll.u32 %v1196_v20, 23  ;;  %v1301_v30 = vsel %vm1300_vm7, 1, %v13267_v40 }
 0x1df   : > { %v1319_v3 = vsel %vm1318_vm10, 1, %v13267_v40  ;;  %v1293_v29 = vshrl.u32 %v1289_v15, 16  ;;  %v1303_v1 = vadd.s32 %v1301_v30, %v1299_v52  ;;  %vm1322_vm14 = vc.u32 %v1320_v24, %v1316_v25 }
 0x1e0   : > { %v1321_v46 = vadd.s32 %v1319_v3, %v1313_v42  ;;  %vm12992_vm0 = vcmp.lt.s32.totalorder %v8846_v49, 4  ;;  %vm4634_vm6 = vcmp.gt.s32.totalorder %v4633_v56, 0  ;;  %v1198_v57 = vor.u32 4788187, %v1197_v32 }
 0x1e1   : > { %v1323_v11 = vsel %vm1322_vm14, 1, %v13267_v40  ;;  %v1295_v18 = vshrl.u32 %v1290_v35, 16  ;;  %v1304_v12 = vadd.s32 %v1303_v1, %v1293_v29  ;;  %v1315_v23 = vshrl.u32 %v1311_v55, 16 }
 0x1e2   : > { %v1325_v58 = vadd.s32 %v1323_v11, %v1321_v46  ;;  %v4631_v6 = vor.u32 8388608, %v8961_v34  ;;  %v1199_v43 = vand.u32 2147483647, %v1198_v57  ;;  %v1201_v0 = vcvt.s32.f32 %v1194_v28 }
 0x1e3   : > { %v1272_v15 = vsel %vm1270_vm13, %v8907_v17, 2102212464  ;;  %v1251_v3 = vshrl.u32 %v13182_v9, %v13336_v5  ;;  %v8979_v26 = vadd.s32 %v1304_v12, %v1295_v18  ;;  %v1317_v44 = vshrl.u32 %v1312_v21, 16 }
 0x1e4   : > { %v1326_v48 = vadd.s32 %v1325_v58, %v1315_v23  ;;  %v8983_v29 = vor.u32 %v8885_v54, %v8857_v2  ;;  %v4500_v34 = vor.u32 %v8919_v36, %v8863_v59  ;;  %v4635_v35 = vsel %vm4634_vm6, %v4633_v56, 0  ;;  %v568_v23 = vpop.f32.mrf.mxu3 }
 0x1e5   : > { %v1202_v55 = vmul.f32 %v1201_v0, %v1199_v43  ;;  %v1271_v17 = vsel %vm1267_vm3, %v1251_v3, %v8911_v50  ;;  %v1273_v5 = vsel %vm1269_vm4, %v8905_v8, %v1272_v15  ;;  %v8994_v21 = vadd.s32 %v1320_v24, %v1316_v25 }
 0x1e6   : > { %13345 = vst [vmem:[#allocation70_spill] sm:$0xff] %v8983_v29  ;;  %v1327_v39 = vadd.s32 %v1326_v48, %v1317_v44  ;;  %vm12985_vm13 = vcmp.lt.s32.totalorder %v8846_v49, 3  ;;  %v4510_v2 = vsel %vm12992_vm0, %v8957_v41, 920167782  ;;  %vm1083_vm6 = vcmp.lt.s32.totalorder %v13312_v16, 0 }
 0x1e7   : > { %v1203_v59 = vxor.u32 2147483648, %v1202_v55  ;;  %v4637_v54 = vand.u32 31, %v4635_v35  ;;  %v9001_v36 = vshll.u32 %v4631_v6, 8  ;;  %vm1330_vm3 = vc.u32 %v8979_v26, %v8994_v21 }
 0x1e8   : > { %v1331_v50 = vadd.s32 1, %v1327_v39  ;;  %v4514_v8 = vsel %vm12992_vm0, %v4500_v34, 1326507024  ;;  %v13347_v56 = vand.u32 2147483647, %v13312_v16  ;;  %v1274_v42 = vsel %vm1268_vm2, %v1271_v17, %v1273_v5  ;;  %v13355_v17 = vld [vmem:[#allocation33_spill] sm:$0xff] }
 0x1e9   : > { %13346 = vst [vmem:[#allocation87_spill] sm:$0xff] %v9001_v36  ;;  %v1204_v47 = vsel %vm1083_vm6, %v1203_v59, %v1202_v55  ;;  %v9021_v20 = vsel %vm12990_vm8, %v8913_v13, %v8915_v7  ;;  %v9024_v52 = vshrl.u32 %v8807_v60, 16  ;;  %v1205_v25 = vsub.s32 4, %v8903_v27 }
 0x1ea   : > { %vm9009_vm4 = vcmp.le.f32.partialorder %v13347_v56, 0.7853982  ;;  %v9033_v63 = vsel %vm12985_vm13, %v8983_v29, %v4510_v2  ;;  %v9039_v28 = vsel %vm12990_vm8, %v8915_v7, %v8983_v29  ;;  %v1332_v30 = vsel %vm1330_vm3, %v1331_v50, %v1327_v39  ;;  %v13356_v56 = vld [vmem:[#allocation77_spill] sm:$0xff] }
 0x1eb   : > { %13350 = vst [vmem:[#allocation90_spill] sm:$0xff] %v9024_v52  ;;  %v1207_v24 = vsel %vm9009_vm4, %v13312_v16, %v1204_v47  ;;  %v9044_v1 = vsel %vm12985_vm13, %v8957_v41, %v4514_v8  ;;  %v9046_v46 = vsub.s32 32, %v4637_v54  ;;  %v9049_v57 = vand.u32 65535, %v9001_v36 }
 0x1ec   : > { %13351 = vst [vmem:[#allocation81_spill] sm:$0xff] %v9039_v28  ;;  %v1209_v32 = vmul.f32 %v1207_v24, %v1207_v24  ;;  %v1328_v11 = vmul.u32 %v8943_v53, %v1274_v42  ;;  %v9052_v18 = vshrl.u32 %v4635_v35, 5  ;;  %v4640_v12 = vshll.u32 %v13182_v9, %v4637_v54 }
 0x1ed   : > { %13352 = vst [vmem:[#allocation198_spill] sm:$0xff] %v9046_v46  ;;  %v4643_v43 = vshll.u32 %v13184_v19, %v4637_v54  ;;  %v4646_v0 = vshll.u32 %v13185_v14, %v4637_v54  ;;  %v1206_v41 = vsel %vm1083_vm6, %v1205_v25, %v8903_v27  ;;  %v9061_v3 = vshll.u32 %v13092_v37, %v4637_v54 }
 0x1ee   : > { %13353 = vst [vmem:[#allocation199_spill] sm:$0xff] %v9049_v57  ;;  %v1210_v58 = vmul.f32 -0.001358992, %v1209_v32  ;;  %v1217_v6 = vmul.f32 -0.00019511016, %v1209_v32  ;;  %v1333_v15 = vadd.s32 %v1332_v30, %v1328_v11  ;;  %v9064_v53 = vshll.u32 %v13089_v51, %v4637_v54 }
 0x1ef   : > { %v4641_v34 = vshrl.u32 %v13184_v19, %v9046_v46  ;;  %v4644_v35 = vshrl.u32 %v13185_v14, %v9046_v46  ;;  %v9071_v55 = vsub.f32 %v568_v23, %v8872_v4  ;;  %v12982_v27 = vand.u32 2147483647, %v13355_v17 }
 0x1f0   : > { %v1211_v44 = vadd.f32 0.041655596, %v1210_v58  ;;  %v1218_v48 = vadd.f32 0.008332121, %v1217_v6  ;;  %v4647_v5 = vshrl.u32 %v13092_v37, %v9046_v46  ;;  %v1208_v39 = vsel %vm9009_vm4, 0, %v1206_v41  ;;  %v13357_v6 = vld [vmem:[#allocation71_spill] sm:$0xff] }
 0x1f1   : > { %13354 = vst [vmem:[#allocation200_spill] sm:$0xff] %v9071_v55  ;;  %v4650_v54 = vshrl.u32 %v13089_v51, %v9046_v46  ;;  %v9082_v50 = vshrl.u32 %v13098_v31, %v9046_v46  ;;  %v1334_v8 = vadd.s32 536870912, %v1333_v15  ;;  %v1407_v47 = vshrl.u32 %v13184_v19, %v13356_v56 }
 0x1f2   : > { %v1212_v2 = vmul.f32 %v1211_v44, %v1209_v32  ;;  %v1219_v59 = vmul.f32 %v1218_v48, %v1209_v32  ;;  %v1410_v30 = vshrl.u32 %v13185_v14, %v13356_v56  ;;  %v1413_v45 = vshrl.u32 %v13092_v37, %v13356_v56 }
 0x1f3   : > { %v4780_v11 = vand.u32 2139095040, %v9071_v55  ;;  %v1225_v23 = vand.u32 3, %v1208_v39  ;;  %v1396_v58 = vand.u32 8388607, %v12982_v27  ;;  %v1406_v41 = vshll.u32 %v13182_v9, %v13357_v6 }
 0x1f4   : > { %v1213_v42 = vadd.f32 -0.4999988, %v1212_v2  ;;  %v1220_v25 = vadd.f32 -0.16666654, %v1219_v59  ;;  %v1409_v2 = vshll.u32 %v13184_v19, %v13357_v6  ;;  %v1412_v59 = vshll.u32 %v13185_v14, %v13357_v6  ;;  %v13364_v6 = vld [vmem:[#allocation89_spill] sm:$0xff] }
 0x1f5   : > { %v9099_v46 = vor.u32 %v4641_v34, %v4640_v12  ;;  %v9101_v57 = vor.u32 %v4644_v35, %v4643_v43  ;;  %v9103_v60 = vshrl.u32 %v1334_v8, 30  ;;  %v9105_v39 = vor.u32 %v1407_v47, %v1406_v41  ;;  %v13361_v47 = vld [vmem:[#allocation82_spill] sm:$0xff] }
 0x1f6   : > { %v1214_v44 = vmul.f32 %v1213_v42, %v1209_v32  ;;  %v1221_v48 = vmul.f32 %v1220_v25, %v1209_v32  ;;  %v9107_v13 = vor.u32 %v1410_v30, %v1409_v2  ;;  %v9109_v42 = vor.u32 %v1413_v45, %v1412_v59 }
 0x1f7   : > { %13358 = vst [vmem:[#allocation33_spill] sm:$0xff] %v9099_v46  ;;  %v9111_v32 = vor.u32 %v4647_v5, %v4646_v0  ;;  %v4781_v25 = vshrl.u32 %v4780_v11, 23  ;;  %vm1224_vm2 = vweird.f32 %v13312_v16  ;;  %v1336_v12 = vshll.u32 %v9103_v60, 30  ;;  %v13362_v5 = vld [vmem:[#allocation95_spill] sm:$0xff] }
 0x1f8   : > { %13359 = vst [vmem:[#allocation77_spill] sm:$0xff] %v9101_v57  ;;  %v1215_v27 = vadd.f32 1.0, %v1214_v44  ;;  %v1222_v7 = vadd.f32 1.0, %v1221_v48  ;;  %vm1226_vm7 = vcmp.lt.s32.totalorder %v1225_v23, 2  ;;  %v1397_v35 = vor.u32 8388608, %v1396_v58  ;;  %v13363_v58 = vld [vmem:[#allocation96_spill] sm:$0xff] }
 0x1f9   : > { %13360 = vst [vmem:[#allocation71_spill] sm:$0xff] %v9111_v32  ;;  %vm1227_vm10 = vcmp.eq.s32.totalorder %v1225_v23, 0  ;;  %v9115_v8 = vsub.s32 %v1333_v15, %v1336_v12  ;;  %vm1421_vm14 = vcmp.lt.s32.totalorder %v13361_v47, 1  ;;  %vm1423_vm6 = vcmp.lt.s32.totalorder %v13361_v47, 3 }
 0x1fa   : > { %v1223_v34 = vmul.f32 %v1222_v7, %v1207_v24  ;;  %v1231_v43 = vxor.u32 2147483648, %v1215_v27  ;;  %vm1230_vm3 = vcmp.eq.s32.totalorder %v1225_v23, 2  ;;  %v1429_v0 = vsel %vm1421_vm14, %v9105_v39, %v9107_v13 }
 0x1fb   : > { %v1431_v7 = vsel %vm1423_vm6, %v9109_v42, %v13362_v5  ;;  %vm1338_vm4 = vcmp.lt.s32.totalorder %v9115_v8, 0  ;;  %v1339_v15 = vsub.s32 0, %v9115_v8  ;;  %vm1422_vm13 = vcmp.lt.s32.totalorder %v13361_v47, 2 }
 0x1fc   : > { %v1228_v30 = vxor.u32 2147483648, %v1223_v34  ;;  %v1232_v24 = vsel %vm1230_vm3, %v1231_v43, %v1223_v34  ;;  %v1433_v11 = vsel %vm1421_vm14, %v9107_v13, %v9109_v42  ;;  %v1435_v41 = vsel %vm1423_vm6, %v13364_v6, %v13363_v58 }
 0x1fd   : > { %v9138_v44 = vshll.u32 %v1397_v35, 8  ;;  %v12986_v48 = vand.u32 2147483647, %v9071_v55  ;;  %v1340_v59 = vsel %vm1338_vm4, %v1339_v15, %v9115_v8  ;;  %v6685_v12 = vadd.s32 4294967169, %v4781_v25 }
 0x1fe   : > { %v1229_v45 = vsel %vm1227_vm10, %v1215_v27, %v1228_v30  ;;  %v1432_v27 = vsel %vm1422_vm13, %v1429_v0, %v1431_v7  ;;  %v1341_v43 = vclz %v1340_v59  ;;  %v1436_v30 = vsel %vm1422_vm13, %v1433_v11, %v1435_v41 }
 0x1ff   : > { %v1233_v2 = vsel %vm1226_vm7, %v1229_v45, %v1232_v24  ;;  %v1438_v35 = vand.u32 65535, %v9138_v44  ;;  %v1439_v23 = vshrl.u32 %v9138_v44, 16  ;;  %v1440_v5 = vand.u32 65535, %v1436_v30 }
 0x200   : > { %v1234_v34 = vsel %vm1224_vm2, nan, %v1233_v2  ;;  %v1441_v24 = vshrl.u32 %v1436_v30, 16  ;;  %v9153_v15 = vor.u32 %v4650_v54, %v9061_v3  ;;  %vm13003_vm7 = vcmp.lt.s32.totalorder %v9052_v18, 1 }
 0x201   : > { %6736 = vmatmul.msk.f32.gmra.mxu2 %vm5797_vm11, %v1234_v34  ;;  %v6617_v25 = vadd.s32 4294967294, %v1341_v43  ;;  %v1462_v16 = vand.u32 65535, %v1432_v27  ;;  %v1463_v0 = vshrl.u32 %v1432_v27, 16  ;;  %v4654_v7 = vor.u32 %v9082_v50, %v9064_v53 }
 0x202   : > { %vm13004_vm2 = vcmp.lt.s32.totalorder %v9052_v18, 4  ;;  %v9159_v45 = vmul.u32 %v1441_v24, %v1438_v35  ;;  %v9161_v11 = vmul.u32 %v1440_v5, %v1439_v23  ;;  %vm13002_vm10 = vcmp.lt.s32.totalorder %v9052_v18, 3 }
 0x203   : > { %v4784_v3 = vand.u32 8388607, %v12986_v48  ;;  %v4787_v54 = vadd.s32 1, %v6685_v12  ;;  %vm6618_vm3 = vcmp.lt.s32.totalorder %v6617_v25, 0  ;;  %v1465_v58 = vmul.u32 %v1463_v0, %v1438_v35 }
 0x204   : > { %v1329_v6 = vadd.s32 %v8994_v21, %v8979_v26  ;;  %v1344_v41 = vsel %vm6618_vm3, 0, %v6617_v25  ;;  %v1442_v2 = vmul.u32 %v1440_v5, %v1438_v35  ;;  %v1446_v53 = vshll.u32 %v9159_v45, 16 }
 0x205   : > { %v1345_v50 = vsub.s32 32, %v1344_v41  ;;  %v1349_v59 = vsub.s32 4294967266, %v1344_v41  ;;  %v1464_v27 = vmul.u32 %v1462_v16, %v1438_v35  ;;  %v9169_v34 = vmul.u32 %v1462_v16, %v1439_v23 }
 0x206   : > { %v1448_v43 = vshll.u32 %v9161_v11, 16  ;;  %vm1450_vm4 = vc.u32 %v1442_v2, %v1446_v53  ;;  %v1452_v30 = vadd.s32 %v1446_v53, %v1442_v2  ;;  %v1468_v48 = vshll.u32 %v1465_v58, 16 }
 0x207   : > { %v1346_v12 = vshll.u32 %v9115_v8, %v1344_v41  ;;  %v1347_v55 = vshrl.u32 %v1329_v6, %v1345_v50  ;;  %v1350_v29 = vadd.s32 127, %v1349_v59  ;;  %v1451_v26 = vsel %vm1450_vm4, 1, %v13267_v40 }
 0x208   : > { %v4785_v21 = vor.u32 8388608, %v4784_v3  ;;  %vm4788_vm3 = vcmp.gt.s32.totalorder %v4787_v54, 0  ;;  %v1445_v5 = vmul.u32 %v1441_v24, %v1439_v23  ;;  %vm1454_vm8 = vc.u32 %v1452_v30, %v1448_v43 }
 0x209   : > { %v1348_v25 = vor.u32 %v1347_v55, %v1346_v12  ;;  %v1351_v52 = vshll.u32 %v1350_v29, 23  ;;  %v1467_v35 = vmul.u32 %v1463_v0, %v1439_v23  ;;  %vm1472_vm0 = vc.u32 %v1464_v27, %v1468_v48 }
 0x20a   : > { %v1453_v16 = vadd.s32 %v1451_v26, %v1445_v5  ;;  %v1470_v28 = vshll.u32 %v9169_v34, 16  ;;  %v1473_v2 = vsel %vm1472_vm0, 1, %v13267_v40  ;;  %v1474_v53 = vadd.s32 %v1468_v48, %v1464_v27 }
 0x20b   : > { %v4664_v8 = vsel %vm13004_vm2, %v9153_v15, 920167782  ;;  %v1352_v6 = vor.u32 4788187, %v1351_v52  ;;  %v1455_v3 = vsel %vm1454_vm8, 1, %v13267_v40  ;;  %v1475_v41 = vadd.s32 %v1473_v2, %v1467_v35 }
 0x20c   : > { %v9184_v29 = vsel %vm13003_vm7, %v9099_v46, %v9101_v57  ;;  %v9187_v55 = vshrl.u32 %v9001_v36, 16  ;;  %v4789_v23 = vsel %vm4788_vm3, %v4787_v54, 0  ;;  %vm1476_vm0 = vc.u32 %v1474_v53, %v1470_v28 }
 0x20d   : > { %13365 = vst [vmem:[#allocation82_spill] sm:$0xff] %v9184_v29  ;;  %v4668_v48 = vsel %vm13004_vm2, %v4654_v7, 1326507024  ;;  %v9192_v24 = vshll.u32 %v4785_v21, 8  ;;  %v1353_v52 = vand.u32 2147483647, %v1352_v6  ;;  %v1355_v0 = vcvt.s32.f32 %v1348_v25  ;;  %v571_v7 = vpop.f32.mrf.mxu3 }
 0x20e   : > { %13366 = vst [vmem:[#allocation95_spill] sm:$0xff] %v9187_v55  ;;  %v9197_v50 = vsel %vm13002_vm10, %v9111_v32, %v4664_v8  ;;  %v9203_v59 = vsel %vm13003_vm7, %v9101_v57, %v9111_v32  ;;  %v1457_v54 = vadd.s32 %v1455_v3, %v1453_v16  ;;  %v1477_v27 = vsel %vm1476_vm0, 1, %v13267_v40 }
 0x20f   : > { %13367 = vst [vmem:[#allocation96_spill] sm:$0xff] %v9192_v24  ;;  %v4791_v43 = vand.u32 31, %v4789_v23  ;;  %v1356_v30 = vmul.f32 %v1355_v0, %v1353_v52  ;;  %v1469_v12 = vshrl.u32 %v1465_v58, 16  ;;  %v1479_v26 = vadd.s32 %v1477_v27, %v1475_v41 }
 0x210   : > { %13368 = vst [vmem:[#allocation89_spill] sm:$0xff] %v9197_v50  ;;  %v9209_v21 = vsel %vm13002_vm10, %v9153_v15, %v4668_v48  ;;  %v13371_v5 = vand.u32 2147483647, %v13334_v62  ;;  %vm1237_vm4 = vcmp.lt.s32.totalorder %v13334_v62, 0  ;;  %v1447_v35 = vshrl.u32 %v9159_v45, 16 }
 0x211   : > { %13369 = vst [vmem:[#allocation201_spill] sm:$0xff] %v9203_v59  ;;  %v9220_v16 = vand.u32 65535, %v9192_v24  ;;  %v9223_v58 = vshrl.u32 %v9192_v24, 16  ;;  %v1357_v2 = vxor.u32 2147483648, %v1356_v30  ;;  %v1480_v8 = vadd.s32 %v1479_v26, %v1469_v12 }
 0x212   : > { %13370 = vst [vmem:[#allocation202_spill] sm:$0xff] %v9209_v21  ;;  %vm9213_vm8 = vcmp.le.f32.partialorder %v13371_v5, 0.7853982  ;;  %v9225_v15 = vshrl.u32 %v4789_v23, 5  ;;  %v9228_v6 = vsub.f32 %v571_v7, %v8872_v4  ;;  %v1359_v3 = vsub.s32 4, %v9103_v60 }
 0x213   : > { %13374 = vst [vmem:[#allocation203_spill] sm:$0xff] %v9220_v16  ;;  %v1458_v41 = vadd.s32 %v1457_v54, %v1447_v35  ;;  %v9231_v48 = vsub.s32 32, %v4791_v43  ;;  %v4794_v45 = vshll.u32 %v13182_v9, %v4791_v43  ;;  %v1358_v52 = vsel %vm1237_vm4, %v1357_v2, %v1356_v30 }
 0x214   : > { %13375 = vst [vmem:[#allocation204_spill] sm:$0xff] %v9223_v58  ;;  %v1471_v0 = vshrl.u32 %v9169_v34, 16  ;;  %v9238_v27 = vshll.u32 %v13184_v19, %v4791_v43  ;;  %v1361_v23 = vsel %vm9213_vm8, %v13334_v62, %v1358_v52  ;;  %v1426_v54 = vsel %vm1424_vm12, %v9109_v42, 2102212464 }
 0x215   : > { %13376 = vst [vmem:[#allocation205_spill] sm:$0xff] %v9228_v6  ;;  %v1449_v7 = vshrl.u32 %v9161_v11, 16  ;;  %v9248_v12 = vshll.u32 %v13185_v14, %v4791_v43  ;;  %v1363_v26 = vmul.f32 %v1361_v23, %v1361_v23  ;;  %v1405_v34 = vshrl.u32 %v13182_v9, %v13356_v56 }
 0x216   : > { %13377 = vst [vmem:[#allocation206_spill] sm:$0xff] %v9231_v48  ;;  %v1481_v30 = vadd.s32 %v1480_v8, %v1471_v0  ;;  %v9253_v5 = vshll.u32 %v13092_v37, %v4791_v43  ;;  %v4934_v35 = vand.u32 2139095040, %v9228_v6  ;;  %v1360_v2 = vsel %vm1237_vm4, %v1359_v3, %v9103_v60 }
 0x217   : > { %v9259_v42 = vadd.s32 %v1458_v41, %v1449_v7  ;;  %v1364_v11 = vmul.f32 -0.001358992, %v1363_v26  ;;  %v1371_v52 = vmul.f32 -0.00019511016, %v1363_v26  ;;  %v1425_v24 = vsel %vm1421_vm14, %v1405_v34, %v9105_v39 }
 0x218   : > { %v1427_v56 = vsel %vm1423_vm6, %v9107_v13, %v1426_v54  ;;  %v4795_v8 = vshrl.u32 %v13184_v19, %v9231_v48  ;;  %v9271_v0 = vshrl.u32 %v13185_v14, %v9231_v48  ;;  %v9274_v60 = vshll.u32 %v13089_v51, %v4791_v43  ;;  %v13378_v43 = vld [vmem:[#allocation49_spill] sm:$0xff] }
 0x219   : > { %v9276_v3 = vadd.s32 %v1474_v53, %v1470_v28  ;;  %v1362_v41 = vsel %vm9213_vm8, 0, %v1360_v2  ;;  %v1365_v39 = vadd.f32 0.041655596, %v1364_v11  ;;  %v1372_v7 = vadd.f32 0.008332121, %v1371_v52  ;;  %v13379_v52 = vld [vmem:[#allocation92_spill] sm:$0xff] }
 0x21a   : > { %v1485_v34 = vadd.s32 1, %v1481_v30  ;;  %v9282_v13 = vshrl.u32 %v13092_v37, %v9231_v48  ;;  %v1428_v54 = vsel %vm1422_vm13, %v1425_v24, %v1427_v56  ;;  %v9291_v28 = vshrl.u32 %v13089_v51, %v9231_v48 }
 0x21b   : > { %vm1484_vm12 = vc.u32 %v9259_v42, %v9276_v3  ;;  %v4935_v53 = vshrl.u32 %v4934_v35, 23  ;;  %v1366_v25 = vmul.f32 %v1365_v39, %v1363_v26  ;;  %v1373_v2 = vmul.f32 %v1372_v7, %v1363_v26  ;;  %v13381_v39 = vld [vmem:[#allocation86_spill] sm:$0xff] }
 0x21c   : > { %v1379_v11 = vand.u32 3, %v1362_v41  ;;  %v1561_v16 = vshrl.u32 %v13184_v19, %v13379_v52  ;;  %v1564_v47 = vshrl.u32 %v13185_v14, %v13379_v52  ;;  %v1567_v24 = vshrl.u32 %v13092_v37, %v13379_v52 }
 0x21d   : > { %v1367_v56 = vadd.f32 -0.4999988, %v1366_v25  ;;  %v1374_v36 = vadd.f32 -0.16666654, %v1373_v2  ;;  %v1482_v58 = vmul.u32 %v9138_v44, %v1428_v54  ;;  %v1486_v57 = vsel %vm1484_vm12, %v1485_v34, %v1481_v30 }
 0x21e   : > { %v13380_v46 = vand.u32 2147483647, %v13378_v43  ;;  %v1560_v41 = vshll.u32 %v13182_v9, %v13381_v39  ;;  %v1563_v7 = vshll.u32 %v13184_v19, %v13381_v39  ;;  %v1566_v32 = vshll.u32 %v13185_v14, %v13381_v39 }
 0x21f   : > { %v9308_v55 = vor.u32 %v4795_v8, %v4794_v45  ;;  %v9312_v25 = vshrl.u32 %v13098_v31, %v9231_v48  ;;  %v1368_v44 = vmul.f32 %v1367_v56, %v1363_v26  ;;  %v1375_v30 = vmul.f32 %v1374_v36, %v1363_v26  ;;  %v13383_v56 = vld [vmem:[#allocation98_spill] sm:$0xff]  ;;  %v13385_v26 = vld [vmem:[#allocation111_spill] sm:$0xff] }
 0x220   : > { %v1550_v35 = vand.u32 8388607, %v13380_v46  ;;  %v1487_v34 = vadd.s32 %v1486_v57, %v1482_v58  ;;  %v9314_v54 = vor.u32 %v1561_v16, %v1560_v41  ;;  %v9316_v46 = vor.u32 %v1564_v47, %v1563_v7 }
 0x221   : > { %13382 = vst [vmem:[#allocation49_spill] sm:$0xff] %v9308_v55  ;;  %v9318_v2 = vor.u32 %v1567_v24, %v1566_v32  ;;  %v13005_v29 = vand.u32 2147483647, %v9228_v6  ;;  %v6688_v50 = vadd.s32 4294967169, %v4935_v53  ;;  %v1369_v59 = vadd.f32 1.0, %v1368_v44  ;;  %v13384_v32 = vld [vmem:[#allocation109_spill] sm:$0xff] }
 0x222   : > { %v1376_v39 = vadd.f32 1.0, %v1375_v30  ;;  %vm1380_vm13 = vcmp.lt.s32.totalorder %v1379_v11, 2  ;;  %vm1381_vm14 = vcmp.eq.s32.totalorder %v1379_v11, 0  ;;  %v1488_v45 = vadd.s32 536870912, %v1487_v34  ;;  %v13386_v53 = vld [vmem:[#allocation103_spill] sm:$0xff] }
 0x223   : > { %v1551_v8 = vor.u32 8388608, %v1550_v35  ;;  %v1385_v21 = vxor.u32 2147483648, %v1369_v59  ;;  %vm1575_vm6 = vcmp.lt.s32.totalorder %v13383_v56, 1  ;;  %vm1577_vm3 = vcmp.lt.s32.totalorder %v13383_v56, 3 }
 0x224   : > { %v1377_v48 = vmul.f32 %v1376_v39, %v1361_v23  ;;  %v9323_v36 = vshrl.u32 %v1488_v45, 30  ;;  %v1583_v57 = vsel %vm1575_vm6, %v9314_v54, %v9316_v46  ;;  %v1585_v16 = vsel %vm1577_vm3, %v9318_v2, %v13384_v32 }
 0x225   : > { %v1587_v58 = vsel %vm1575_vm6, %v9316_v46, %v9318_v2  ;;  %vm1384_vm0 = vcmp.eq.s32.totalorder %v1379_v11, 2  ;;  %vm1576_vm8 = vcmp.lt.s32.totalorder %v13383_v56, 2  ;;  %v1589_v47 = vsel %vm1577_vm3, %v13386_v53, %v13385_v26 }
 0x226   : > { %v1382_v23 = vxor.u32 2147483648, %v1377_v48  ;;  %v1386_v24 = vsel %vm1384_vm0, %v1385_v21, %v1377_v48  ;;  %v1490_v35 = vshll.u32 %v9323_v36, 30  ;;  %v1590_v41 = vsel %vm1576_vm8, %v1587_v58, %v1589_v47 }
 0x227   : > { %v9345_v7 = vshll.u32 %v1551_v8, 8  ;;  %v1586_v30 = vsel %vm1576_vm8, %v1583_v57, %v1585_v16  ;;  %v1594_v39 = vand.u32 65535, %v1590_v41  ;;  %v1595_v45 = vshrl.u32 %v1590_v41, 16 }
 0x228   : > { %v1383_v44 = vsel %vm1381_vm14, %v1369_v59, %v1382_v23  ;;  %v9352_v32 = vand.u32 8388607, %v13005_v29  ;;  %vm1378_vm4 = vweird.f32 %v13334_v62  ;;  %v9356_v48 = vsub.s32 %v1487_v34, %v1490_v35 }
 0x229   : > { %v1387_v21 = vsel %vm1380_vm13, %v1383_v44, %v1386_v24  ;;  %v4941_v58 = vadd.s32 1, %v6688_v50  ;;  %v1592_v26 = vand.u32 65535, %v9345_v7  ;;  %v1593_v59 = vshrl.u32 %v9345_v7, 16 }
 0x22a   : > { %v1388_v8 = vsel %vm1378_vm4, nan, %v1387_v21  ;;  %vm1492_vm12 = vcmp.lt.s32.totalorder %v9356_v48, 0  ;;  %v1493_v57 = vsub.s32 0, %v9356_v48  ;;  %v1616_v16 = vand.u32 65535, %v1586_v30 }
 0x22b   : > { %6737 = vmatmul.msk.f32.gmra.mxu2 %vm5797_vm11, %v1388_v8  ;;  %v1617_v23 = vshrl.u32 %v1586_v30, 16  ;;  %v9365_v62 = vor.u32 %v9271_v0, %v9238_v27  ;;  %v9369_v50 = vor.u32 %v9282_v13, %v9248_v12  ;;  %vm13015_vm13 = vcmp.lt.s32.totalorder %v9225_v15, 1 }
 0x22c   : > { %v1597_v11 = vmul.u32 %v1595_v45, %v1592_v26  ;;  %v1598_v34 = vmul.u32 %v1594_v39, %v1593_v59  ;;  %v9374_v53 = vor.u32 %v9291_v28, %v9253_v5  ;;  %v4808_v47 = vor.u32 %v9312_v25, %v9274_v60 }
 0x22d   : > { %13387 = vst [vmem:[#allocation92_spill] sm:$0xff] %v9365_v62  ;;  %v4939_v24 = vor.u32 8388608, %v9352_v32  ;;  %v1494_v27 = vsel %vm1492_vm12, %v1493_v57, %v9356_v48  ;;  %vm13016_vm14 = vcmp.lt.s32.totalorder %v9225_v15, 4  ;;  %vm4942_vm0 = vcmp.gt.s32.totalorder %v4941_v58, 0 }
 0x22e   : > { %13388 = vst [vmem:[#allocation86_spill] sm:$0xff] %v9369_v50  ;;  %v1495_v12 = vclz %v1494_v27  ;;  %v1596_v0 = vmul.u32 %v1594_v39, %v1592_v26  ;;  %v1600_v13 = vshll.u32 %v1597_v11, 16  ;;  %v1483_v35 = vadd.s32 %v9276_v3, %v9259_v42 }
 0x22f   : > { %v1599_v41 = vmul.u32 %v1595_v45, %v1593_v59  ;;  %v1619_v44 = vmul.u32 %v1617_v23, %v1592_v26  ;;  %v1620_v5 = vmul.u32 %v1616_v16, %v1593_v59  ;;  %v1602_v30 = vshll.u32 %v1598_v34, 16 }
 0x230   : > { %v6620_v28 = vadd.s32 4294967294, %v1495_v12  ;;  %vm1604_vm4 = vc.u32 %v1596_v0, %v1600_v13  ;;  %v1606_v60 = vadd.s32 %v1600_v13, %v1596_v0  ;;  %v1601_v25 = vshrl.u32 %v1597_v11, 16 }
 0x231   : > { %v1605_v32 = vsel %vm1604_vm4, 1, %v13267_v40  ;;  %v1618_v21 = vmul.u32 %v1616_v16, %v1592_v26  ;;  %v1622_v8 = vshll.u32 %v1619_v44, 16  ;;  %vm13013_vm12 = vcmp.lt.s32.totalorder %v9225_v15, 3 }
 0x232   : > { %vm6621_vm10 = vcmp.lt.s32.totalorder %v6620_v28, 0  ;;  %v1607_v39 = vadd.s32 %v1605_v32, %v1599_v41  ;;  %vm1608_vm7 = vc.u32 %v1606_v60, %v1602_v30  ;;  %v1624_v57 = vshll.u32 %v1620_v5, 16 }
 0x233   : > { %v1498_v27 = vsel %vm6621_vm10, 0, %v6620_v28  ;;  %v1609_v42 = vsel %vm1608_vm7, 1, %v13267_v40  ;;  %vm1626_vm2 = vc.u32 %v1618_v21, %v1622_v8  ;;  %v1628_v3 = vadd.s32 %v1622_v8, %v1618_v21 }
 0x234   : > { %v1499_v45 = vsub.s32 32, %v1498_v27  ;;  %v1503_v12 = vsub.s32 4294967266, %v1498_v27  ;;  %v1611_v29 = vadd.s32 %v1609_v42, %v1607_v39  ;;  %v1621_v0 = vmul.u32 %v1617_v23, %v1593_v59  ;;  %v574_v23 = vpop.f32.mrf.mxu3 }
 0x235   : > { %v4943_v11 = vsel %vm4942_vm0, %v4941_v58, 0  ;;  %v1500_v26 = vshll.u32 %v9356_v48, %v1498_v27  ;;  %v1627_v16 = vsel %vm1626_vm2, 1, %v13267_v40  ;;  %vm1630_vm4 = vc.u32 %v1628_v3, %v1624_v57 }
 0x236   : > { %v1501_v13 = vshrl.u32 %v1483_v35, %v1499_v45  ;;  %v1504_v41 = vadd.s32 127, %v1503_v12  ;;  %v1612_v30 = vadd.s32 %v1611_v29, %v1601_v25  ;;  %v1629_v60 = vadd.s32 %v1627_v16, %v1621_v0 }
 0x237   : > { %v9393_v28 = vsel %vm13015_vm13, %v9308_v55, %v9365_v62  ;;  %v1580_v59 = vsel %vm1578_vm5, %v9318_v2, 2102212464  ;;  %v1603_v58 = vshrl.u32 %v1598_v34, 16  ;;  %v1631_v48 = vsel %vm1630_vm4, 1, %v13267_v40 }
 0x238   : > { %13389 = vst [vmem:[#allocation98_spill] sm:$0xff] %v9393_v28  ;;  %v1502_v32 = vor.u32 %v1501_v13, %v1500_v26  ;;  %v1505_v21 = vshll.u32 %v1504_v41, 23  ;;  %v1623_v35 = vshrl.u32 %v1619_v44, 16  ;;  %v1633_v8 = vadd.s32 %v1631_v48, %v1629_v60 }
 0x239   : > { %v4818_v29 = vsel %vm13016_vm14, %v9374_v53, 920167782  ;;  %v4822_v25 = vsel %vm13016_vm14, %v4808_v47, 1326507024  ;;  %v4945_v39 = vand.u32 31, %v4943_v11  ;;  %v1559_v27 = vshrl.u32 %v13182_v9, %v13379_v52 }
 0x23a   : > { %v9406_v2 = vshll.u32 %v4939_v24, 8  ;;  %v1506_v34 = vor.u32 4788187, %v1505_v21  ;;  %v9408_v42 = vadd.s32 %v1612_v30, %v1603_v58  ;;  %v1634_v45 = vadd.s32 %v1633_v8, %v1623_v35 }
 0x23b   : > { %v9411_v44 = vsub.f32 %v574_v23, %v8872_v4  ;;  %v1579_v12 = vsel %vm1575_vm6, %v1559_v27, %v9314_v54  ;;  %v1581_v47 = vsel %vm1577_vm3, %v9316_v46, %v1580_v59  ;;  %v1625_v0 = vshrl.u32 %v1620_v5, 16 }
 0x23c   : > { %13390 = vst [vmem:[#allocation109_spill] sm:$0xff] %v9406_v2  ;;  %v9423_v52 = vsel %vm13015_vm13, %v9365_v62, %v9369_v50  ;;  %v1507_v24 = vand.u32 2147483647, %v1506_v34  ;;  %v1509_v26 = vcvt.s32.f32 %v1502_v32  ;;  %v9425_v16 = vadd.s32 %v1628_v3, %v1624_v57 }
 0x23d   : > { %13391 = vst [vmem:[#allocation111_spill] sm:$0xff] %v9411_v44  ;;  %v9430_v4 = vsel %vm13013_vm12, %v9369_v50, %v4818_v29  ;;  %v9435_v54 = vsel %vm13013_vm12, %v9374_v53, %v4822_v25  ;;  %v9437_v46 = vsub.s32 32, %v4945_v39  ;;  %v1635_v5 = vadd.s32 %v1634_v45, %v1625_v0 }
 0x23e   : > { %13392 = vst [vmem:[#allocation103_spill] sm:$0xff] %v9423_v52  ;;  %v13395_v13 = vand.u32 2147483647, %v13355_v17  ;;  %v1510_v57 = vmul.f32 %v1509_v26, %v1507_v24  ;;  %v1582_v3 = vsel %vm1576_vm8, %v1579_v12, %v1581_v47  ;;  %vm1638_vm7 = vc.u32 %v9408_v42, %v9425_v16  ;;  %v13401_v12 = vld [vmem:[#allocation78_spill] sm:$0xff] }
 0x23f   : > { %13393 = vst [vmem:[#allocation207_spill] sm:$0xff] %v9435_v54  ;;  %v9450_v30 = vand.u32 65535, %v9406_v2  ;;  %v5088_v53 = vand.u32 2139095040, %v9411_v44  ;;  %vm1391_vm2 = vcmp.lt.s32.totalorder %v13355_v17, 0  ;;  %v1639_v60 = vadd.s32 1, %v1635_v5 }
 0x240   : > { %13394 = vst [vmem:[#allocation208_spill] sm:$0xff] %v9437_v46  ;;  %vm9441_vm5 = vcmp.le.f32.partialorder %v13395_v13, 0.7853982  ;;  %v9454_v59 = vshrl.u32 %v4943_v11, 5  ;;  %v4948_v58 = vshll.u32 %v13182_v9, %v4945_v39  ;;  %v9458_v48 = vshrl.u32 %v9406_v2, 16 }
 0x241   : > { %13398 = vst [vmem:[#allocation209_spill] sm:$0xff] %v9450_v30  ;;  %v1511_v56 = vxor.u32 2147483648, %v1510_v57  ;;  %v4949_v23 = vshrl.u32 %v13184_v19, %v9437_v46  ;;  %v4951_v32 = vshll.u32 %v13184_v19, %v4945_v39  ;;  %v1636_v21 = vmul.u32 %v9345_v7, %v1582_v3 }
 0x242   : > { %13399 = vst [vmem:[#allocation210_spill] sm:$0xff] %v9454_v59  ;;  %v1640_v35 = vsel %vm1638_vm7, %v1639_v60, %v1635_v5  ;;  %v4952_v8 = vshrl.u32 %v13185_v14, %v9437_v46  ;;  %v4954_v11 = vshll.u32 %v13185_v14, %v4945_v39  ;;  %v4957_v29 = vshll.u32 %v13092_v37, %v4945_v39 }
 0x243   : > { %13400 = vst [vmem:[#allocation211_spill] sm:$0xff] %v9458_v48  ;;  %v1512_v25 = vsel %vm1391_vm2, %v1511_v56, %v1510_v57  ;;  %v5089_v27 = vshrl.u32 %v5088_v53, 23  ;;  %v1641_v45 = vadd.s32 %v1640_v35, %v1636_v21  ;;  %v13011_v47 = vand.u32 2147483647, %v13401_v12 }
 0x244   : > { %v1515_v34 = vsel %vm9441_vm5, %v13355_v17, %v1512_v25  ;;  %v4955_v7 = vshrl.u32 %v13092_v37, %v9437_v46  ;;  %v4958_v0 = vshrl.u32 %v13089_v51, %v9437_v46  ;;  %v9479_v24 = vshll.u32 %v13089_v51, %v4945_v39 }
 0x245   : > { %v1517_v26 = vmul.f32 %v1515_v34, %v1515_v34  ;;  %v9481_v5 = vor.u32 %v4949_v23, %v4948_v58  ;;  %v9485_v13 = vshrl.u32 %v13098_v31, %v9437_v46  ;;  %vm13029_vm10 = vcmp.lt.s32.totalorder %v9454_v59, 1 }
 0x246   : > { %v1513_v57 = vsub.s32 4, %v9323_v36  ;;  %v1718_v60 = vshrl.u32 %v13185_v14, %v7810_v61  ;;  %v1721_v39 = vshrl.u32 %v13092_v37, %v7810_v61  ;;  %v9493_v56 = vor.u32 %v4952_v8, %v4951_v32 }
 0x247   : > { %13402 = vst [vmem:[#allocation78_spill] sm:$0xff] %v9481_v5  ;;  %v1518_v3 = vmul.f32 -0.001358992, %v1517_v26  ;;  %v1525_v53 = vmul.f32 -0.00019511016, %v1517_v26  ;;  %v6691_v58 = vadd.s32 4294967169, %v5089_v27  ;;  %v1717_v6 = vshll.u32 %v13184_v19, %v7786_v10 }
 0x248   : > { %13403 = vst [vmem:[#allocation212_spill] sm:$0xff] %v9493_v56  ;;  %v1642_v23 = vadd.s32 536870912, %v1641_v45  ;;  %v1704_v21 = vand.u32 8388607, %v13011_v47  ;;  %v1720_v2 = vshll.u32 %v13185_v14, %v7786_v10  ;;  %v9501_v46 = vor.u32 %v4955_v7, %v4954_v11 }
 0x249   : > { %v1519_v35 = vadd.f32 0.041655596, %v1518_v3  ;;  %v1526_v25 = vadd.f32 0.008332121, %v1525_v53  ;;  %v9503_v48 = vor.u32 %v4958_v0, %v4957_v29  ;;  %v1514_v32 = vsel %vm1391_vm2, %v1513_v57, %v9323_v36 }
 0x24a   : > { %13404 = vst [vmem:[#allocation213_spill] sm:$0xff] %v9501_v46  ;;  %v1715_v8 = vshrl.u32 %v13184_v19, %v7810_v61  ;;  %v9510_v53 = vor.u32 %v1718_v60, %v1717_v6  ;;  %v9512_v47 = vor.u32 %v1721_v39, %v1720_v2  ;;  %v9516_v11 = vshrl.u32 %v1642_v23, 30 }
 0x24b   : > { %v1520_v27 = vmul.f32 %v1519_v35, %v1517_v26  ;;  %v1527_v3 = vmul.f32 %v1526_v25, %v1517_v26  ;;  %v1705_v29 = vor.u32 8388608, %v1704_v21  ;;  %v1714_v7 = vshll.u32 %v13182_v9, %v7786_v10 }
 0x24c   : > { %vm4966_vm6 = vcmp.lt.s32.totalorder %v9454_v59, 4  ;;  %v5095_v36 = vadd.s32 1, %v6691_v58  ;;  %v1516_v6 = vsel %vm9441_vm5, 0, %v1514_v32  ;;  %vm1729_vm3 = vcmp.lt.s32.totalorder %v7850_v38, 1 }
 0x24d   : > { %v1521_v0 = vadd.f32 -0.4999988, %v1520_v27  ;;  %v1528_v57 = vadd.f32 -0.16666654, %v1527_v3  ;;  %v9523_v60 = vor.u32 %v1715_v8, %v1714_v7  ;;  %vm1731_vm8 = vcmp.lt.s32.totalorder %v7850_v38, 3  ;;  %v13406_v8 = vld [vmem:[#allocation130_spill] sm:$0xff] }
 0x24e   : > { %v1741_v10 = vsel %vm1729_vm3, %v9510_v53, %v9512_v47  ;;  %v1743_v58 = vsel %vm1731_vm8, %v7854_v33, %v7892_v22  ;;  %v9539_v41 = vsel %vm13029_vm10, %v9481_v5, %v9493_v56  ;;  %v1644_v23 = vshll.u32 %v9516_v11, 30 }
 0x24f   : > { %v1522_v2 = vmul.f32 %v1521_v0, %v1517_v26  ;;  %v1529_v39 = vmul.f32 %v1528_v57, %v1517_v26  ;;  %13405 = vst [vmem:[#allocation214_spill] sm:$0xff] %v9539_v41  ;;  %v9544_v26 = vsel %vm4966_vm6, %v9503_v48, 920167782  ;;  %v9547_v21 = vshll.u32 %v1705_v29, 8 }
 0x250   : > { %v1533_v32 = vand.u32 3, %v1516_v6  ;;  %vm1730_vm0 = vcmp.lt.s32.totalorder %v7850_v38, 2  ;;  %v9550_v33 = vsub.s32 %v1641_v45, %v1644_v23  ;;  %v1737_v22 = vsel %vm1729_vm3, %v9523_v60, %v9510_v53 }
 0x251   : > { %v1523_v35 = vadd.f32 1.0, %v1522_v2  ;;  %v1530_v25 = vadd.f32 1.0, %v1529_v39  ;;  %v1739_v27 = vsel %vm1731_vm8, %v9512_v47, %v13406_v8  ;;  %v1744_v3 = vsel %vm1730_vm0, %v1741_v10, %v1743_v58 }
 0x252   : > { %vm5096_vm4 = vcmp.gt.s32.totalorder %v5095_v36, 0  ;;  %v1748_v0 = vand.u32 65535, %v1744_v3  ;;  %vm1646_vm5 = vcmp.lt.s32.totalorder %v9550_v33, 0  ;;  %v1647_v45 = vsub.s32 0, %v9550_v33 }
 0x253   : > { %v1531_v29 = vmul.f32 %v1530_v25, %v1515_v34  ;;  %v1539_v7 = vxor.u32 2147483648, %v1523_v35  ;;  %v1746_v57 = vand.u32 65535, %v9547_v21  ;;  %v1749_v6 = vshrl.u32 %v1744_v3, 16 }
 0x254   : > { %vm1534_vm7 = vcmp.lt.s32.totalorder %v1533_v32, 2  ;;  %v1740_v39 = vsel %vm1730_vm0, %v1737_v22, %v1739_v27  ;;  %v1747_v23 = vshrl.u32 %v9547_v21, 16  ;;  %vm1535_vm2 = vcmp.eq.s32.totalorder %v1533_v32, 0 }
 0x255   : > { %v1536_v2 = vxor.u32 2147483648, %v1531_v29  ;;  %vm1538_vm12 = vcmp.eq.s32.totalorder %v1533_v32, 2  ;;  %v1648_v34 = vsel %vm1646_vm5, %v1647_v45, %v9550_v33  ;;  %v1751_v10 = vmul.u32 %v1749_v6, %v1746_v57 }
 0x256   : > { %v1540_v25 = vsel %vm1538_vm12, %v1539_v7, %v1531_v29  ;;  %v1649_v8 = vclz %v1648_v34  ;;  %v1752_v30 = vmul.u32 %v1748_v0, %v1747_v23  ;;  %vm1532_vm13 = vweird.f32 %v13355_v17 }
 0x257   : > { %v1537_v58 = vsel %vm1535_vm2, %v1523_v35, %v1536_v2  ;;  %v1770_v41 = vand.u32 65535, %v1740_v39  ;;  %vm13022_vm14 = vcmp.lt.s32.totalorder %v9454_v59, 3  ;;  %v1750_v62 = vmul.u32 %v1748_v0, %v1746_v57 }
 0x258   : > { %v1541_v3 = vsel %vm1534_vm7, %v1537_v58, %v1540_v25  ;;  %v6623_v27 = vadd.s32 4294967294, %v1649_v8  ;;  %v1754_v55 = vshll.u32 %v1751_v10, 16  ;;  %v5097_v32 = vsel %vm5096_vm4, %v5095_v36, 0 }
 0x259   : > { %v1542_v22 = vsel %vm1532_vm13, nan, %v1541_v3  ;;  %v1637_v35 = vadd.s32 %v9425_v16, %v9408_v42  ;;  %v1753_v29 = vmul.u32 %v1749_v6, %v1747_v23  ;;  %v1771_v7 = vshrl.u32 %v1740_v39, 16 }
 0x25a   : > { %6738 = vmatmul.msk.f32.gmra.mxu2 %vm5797_vm11, %v1542_v22  ;;  %vm6624_vm12 = vcmp.lt.s32.totalorder %v6623_v27, 0  ;;  %v1756_v45 = vshll.u32 %v1752_v30, 16  ;;  %vm1758_vm5 = vc.u32 %v1750_v62, %v1754_v55  ;;  %v1760_v17 = vadd.s32 %v1754_v55, %v1750_v62 }
 0x25b   : > { %v1652_v2 = vsel %vm6624_vm12, 0, %v6623_v27  ;;  %v1759_v34 = vsel %vm1758_vm5, 1, %v13267_v40  ;;  %v1773_v58 = vmul.u32 %v1771_v7, %v1746_v57  ;;  %v1774_v25 = vmul.u32 %v1770_v41, %v1747_v23 }
 0x25c   : > { %v1653_v0 = vsub.s32 32, %v1652_v2  ;;  %v1657_v8 = vsub.s32 4294967266, %v1652_v2  ;;  %v1755_v3 = vshrl.u32 %v1751_v10, 16  ;;  %v1761_v36 = vadd.s32 %v1759_v34, %v1753_v29 }
 0x25d   : > { %vm1762_vm13 = vc.u32 %v1760_v17, %v1756_v45  ;;  %v1772_v22 = vmul.u32 %v1770_v41, %v1746_v57  ;;  %v1775_v5 = vmul.u32 %v1771_v7, %v1747_v23  ;;  %v1776_v50 = vshll.u32 %v1773_v58, 16 }
 0x25e   : > { %v1654_v42 = vshll.u32 %v9550_v33, %v1652_v2  ;;  %v1655_v16 = vshrl.u32 %v1637_v35, %v1653_v0  ;;  %v1658_v6 = vadd.s32 127, %v1657_v8  ;;  %v1763_v39 = vsel %vm1762_vm13, 1, %v13267_v40 }
 0x25f   : > { %v1765_v55 = vadd.s32 %v1763_v39, %v1761_v36  ;;  %v1778_v62 = vshll.u32 %v1774_v25, 16  ;;  %vm1780_vm4 = vc.u32 %v1772_v22, %v1776_v50  ;;  %v1782_v27 = vadd.s32 %v1776_v50, %v1772_v22 }
 0x260   : > { %v13407_v52 = vand.u32 2147483647, %v9411_v44  ;;  %v1656_v28 = vor.u32 %v1655_v16, %v1654_v42  ;;  %v1659_v10 = vshll.u32 %v1658_v6, 23  ;;  %v1781_v29 = vsel %vm1780_vm4, 1, %v13267_v40  ;;  %v577_v44 = vpop.f32.mrf.mxu3 }
 0x261   : > { %v9586_v41 = vsel %vm13029_vm10, %v9493_v56, %v9501_v46  ;;  %v1766_v33 = vadd.s32 %v1765_v55, %v1755_v3  ;;  %v1783_v57 = vadd.s32 %v1781_v29, %v1775_v5  ;;  %vm1784_vm7 = vc.u32 %v1782_v27, %v1778_v62 }
 0x262   : > { %v5092_v54 = vand.u32 8388607, %v13407_v52  ;;  %13408 = vst [vmem:[#allocation130_spill] sm:$0xff] %v9586_v41  ;;  %v13409_v23 = vor.u32 %v9485_v13, %v9479_v24  ;;  %v5099_v52 = vand.u32 31, %v5097_v32  ;;  %v1660_v35 = vor.u32 4788187, %v1659_v10 }
 0x263   : > { %v1785_v7 = vsel %vm1784_vm7, 1, %v13267_v40  ;;  %v9598_v45 = vsel %vm13022_vm14, %v9501_v46, %v9544_v26  ;;  %v1757_v17 = vshrl.u32 %v1752_v30, 16  ;;  %v1777_v2 = vshrl.u32 %v1773_v58, 16 }
 0x264   : > { %v4976_v50 = vsel %vm4966_vm6, %v13409_v23, 1326507024  ;;  %13410 = vst [vmem:[#allocation215_spill] sm:$0xff] %v9598_v45  ;;  %v1787_v5 = vadd.s32 %v1785_v7, %v1783_v57  ;;  %v5093_v34 = vor.u32 8388608, %v5092_v54  ;;  %v1661_v0 = vand.u32 2147483647, %v1660_v35 }
 0x265   : > { %v1663_v8 = vcvt.s32.f32 %v1656_v28  ;;  %vm13411_vm2 = vcmp.lt.s32.totalorder %v7850_v38, 4  ;;  %v1713_v13 = vshrl.u32 %v13182_v9, %v7810_v61  ;;  %v9605_v3 = vadd.s32 %v1766_v33, %v1757_v17 }
 0x266   : > { %v1734_v24 = vsel %vm13411_vm2, %v9512_v47, 2102212464  ;;  %v1779_v36 = vshrl.u32 %v1774_v25, 16  ;;  %v1788_v22 = vadd.s32 %v1787_v5, %v1777_v2  ;;  %v9610_v30 = vsel %vm13022_vm14, %v9503_v48, %v4976_v50 }
 0x267   : > { %13412 = vst [vmem:[#allocation216_spill] sm:$0xff] %v9610_v30  ;;  %v9612_v26 = vsub.s32 32, %v5099_v52  ;;  %v13414_v28 = vand.u32 2147483647, %v13378_v43  ;;  %v1664_v47 = vmul.f32 %v1663_v8, %v1661_v0  ;;  %v1733_v61 = vsel %vm1729_vm3, %v1713_v13, %v9523_v60 }
 0x268   : > { %v1735_v58 = vsel %vm1731_vm8, %v9510_v53, %v1734_v24  ;;  %v9626_v25 = vadd.s32 %v1782_v27, %v1778_v62  ;;  %v1789_v48 = vadd.s32 %v1788_v22, %v1779_v36  ;;  %v9628_v42 = vshrl.u32 %v5097_v32, 5 }
 0x269   : > { %13413 = vst [vmem:[#allocation217_spill] sm:$0xff] %v9612_v26  ;;  %vm9616_vm12 = vcmp.le.f32.partialorder %v13414_v28, 0.7853982  ;;  %v9630_v16 = vshll.u32 %v5093_v34, 8  ;;  %vm1545_vm5 = vcmp.lt.s32.totalorder %v13378_v43, 0  ;;  %v1665_v6 = vxor.u32 2147483648, %v1664_v47 }
 0x26a   : > { %13417 = vst [vmem:[#allocation218_spill] sm:$0xff] %v9628_v42  ;;  %v5102_v39 = vshll.u32 %v13182_v9, %v5099_v52  ;;  %v5105_v55 = vshll.u32 %v13184_v19, %v5099_v52  ;;  %vm1792_vm3 = vc.u32 %v9605_v3, %v9626_v25  ;;  %v1793_v60 = vadd.s32 1, %v1789_v48 }
 0x26b   : > { %13418 = vst [vmem:[#allocation219_spill] sm:$0xff] %v9630_v16  ;;  %v5108_v53 = vshll.u32 %v13185_v14, %v5099_v52  ;;  %v5111_v62 = vshll.u32 %v13092_v37, %v5099_v52  ;;  %v1666_v32 = vsel %vm1545_vm5, %v1665_v6, %v1664_v47  ;;  %v1736_v27 = vsel %vm1730_vm0, %v1733_v61, %v1735_v58  ;;  %v13424_v58 = vld [vmem:[#allocation99_spill] sm:$0xff]  ;;  %v13425_v6 = vld [vmem:[#allocation136_spill] sm:$0xff] }
 0x26c   : > { %v5103_v10 = vshrl.u32 %v13184_v19, %v9612_v26  ;;  %v5106_v29 = vshrl.u32 %v13185_v14, %v9612_v26  ;;  %v5109_v33 = vshrl.u32 %v13092_v37, %v9612_v26  ;;  %v1669_v57 = vsel %vm9616_vm12, %v13378_v43, %v1666_v32 }
 0x26d   : > { %v5112_v23 = vshrl.u32 %v13089_v51, %v9612_v26  ;;  %v1667_v50 = vsub.s32 4, %v9516_v11  ;;  %v1671_v38 = vmul.f32 %v1669_v57, %v1669_v57  ;;  %v1794_v35 = vsel %vm1792_vm3, %v1793_v60, %v1789_v48 }
 0x26e   : > { %v5114_v7 = vshll.u32 %v13089_v51, %v5099_v52  ;;  %v5115_v17 = vshrl.u32 %v13098_v31, %v9612_v26  ;;  %v9659_v2 = vand.u32 65535, %v9630_v16  ;;  %v1790_v5 = vmul.u32 %v9547_v21, %v1736_v27  ;;  %v13426_v27 = vld [vmem:[#allocation128_spill] sm:$0xff] }
 0x26f   : > { %vm13020_vm8 = vcmp.lt.s32.totalorder %v9628_v42, 1  ;;  %v9664_v34 = vshrl.u32 %v9630_v16, 16  ;;  %v1672_v0 = vmul.f32 -0.001358992, %v1671_v38  ;;  %v1679_v8 = vmul.f32 -0.00019511016, %v1671_v38 }
 0x270   : > { %13419 = vst [vmem:[#allocation220_spill] sm:$0xff] %v9659_v2  ;;  %v9666_v24 = vor.u32 %v5103_v10, %v5102_v39  ;;  %v9668_v13 = vor.u32 %v5106_v29, %v5105_v55  ;;  %v9670_v52 = vor.u32 %v5109_v33, %v5108_v53  ;;  %v1795_v36 = vadd.s32 %v1794_v35, %v1790_v5 }
 0x271   : > { %13420 = vst [vmem:[#allocation221_spill] sm:$0xff] %v9664_v34  ;;  %v9672_v22 = vor.u32 %v5112_v23, %v5111_v62  ;;  %v1668_v21 = vsel %vm1545_vm5, %v1667_v50, %v9516_v11  ;;  %v1673_v28 = vadd.f32 0.041655596, %v1672_v0  ;;  %v1680_v47 = vadd.f32 0.008332121, %v1679_v8 }
 0x272   : > { %13421 = vst [vmem:[#allocation222_spill] sm:$0xff] %v9666_v24  ;;  %v5116_v61 = vor.u32 %v5115_v17, %v5114_v7  ;;  %vm13021_vm0 = vcmp.lt.s32.totalorder %v9628_v42, 4  ;;  %v13023_v48 = vand.u32 2147483647, %v13424_v58  ;;  %v1869_v39 = vshrl.u32 %v13184_v19, %v13425_v6 }
 0x273   : > { %13422 = vst [vmem:[#allocation223_spill] sm:$0xff] %v9668_v13  ;;  %v1674_v55 = vmul.f32 %v1673_v28, %v1671_v38  ;;  %v1681_v60 = vmul.f32 %v1680_v47, %v1671_v38  ;;  %v1872_v53 = vshrl.u32 %v13185_v14, %v13425_v6  ;;  %v1875_v62 = vshrl.u32 %v13092_v37, %v13425_v6 }
 0x274   : > { %13423 = vst [vmem:[#allocation224_spill] sm:$0xff] %v9670_v52  ;;  %vm13038_vm13 = vcmp.lt.s32.totalorder %v9628_v42, 3  ;;  %v1670_v11 = vsel %vm9616_vm12, 0, %v1668_v21  ;;  %v1796_v32 = vadd.s32 536870912, %v1795_v36  ;;  %v1868_v10 = vshll.u32 %v13182_v9, %v13426_v27 }
 0x275   : > { %v1675_v29 = vadd.f32 -0.4999988, %v1674_v55  ;;  %v1682_v33 = vadd.f32 -0.16666654, %v1681_v60  ;;  %v1871_v23 = vshll.u32 %v13184_v19, %v13426_v27  ;;  %v1874_v50 = vshll.u32 %v13185_v14, %v13426_v27 }
 0x276   : > { %v9698_v35 = vsel %vm13020_vm8, %v9666_v24, %v9668_v13  ;;  %v5126_v54 = vsel %vm13021_vm0, %v9672_v22, 920167782  ;;  %v1858_v7 = vand.u32 8388607, %v13023_v48  ;;  %v1870_v17 = vor.u32 %v1869_v39, %v1868_v10  ;;  %v13430_v10 = vld [vmem:[#allocation142_spill] sm:$0xff] }
 0x277   : > { %13427 = vst [vmem:[#allocation99_spill] sm:$0xff] %v9698_v35  ;;  %v1676_v5 = vmul.f32 %v1675_v29, %v1671_v38  ;;  %v1683_v0 = vmul.f32 %v1682_v33, %v1671_v38  ;;  %v1873_v8 = vor.u32 %v1872_v53, %v1871_v23  ;;  %v1876_v21 = vor.u32 %v1875_v62, %v1874_v50 }
 0x278   : > { %v9709_v28 = vsel %vm13020_vm8, %v9668_v13, %v9670_v52  ;;  %v9713_v47 = vsel %vm13021_vm0, %v5116_v61, 1326507024  ;;  %v1687_v55 = vand.u32 3, %v1670_v11  ;;  %v1797_v60 = vshrl.u32 %v1796_v32, 30  ;;  %v13431_v32 = vld [vmem:[#allocation151_spill] sm:$0xff] }
 0x279   : > { %13428 = vst [vmem:[#allocation136_spill] sm:$0xff] %v9709_v28  ;;  %v9718_v39 = vsel %vm13038_vm13, %v9670_v52, %v5126_v54  ;;  %v1677_v38 = vadd.f32 1.0, %v1676_v5  ;;  %v1684_v53 = vadd.f32 1.0, %v1683_v0  ;;  %vm1686_vm4 = vweird.f32 %v13378_v43  ;;  %v13432_v0 = vld [vmem:[#allocation153_spill] sm:$0xff] }
 0x27a   : > { %13429 = vst [vmem:[#allocation128_spill] sm:$0xff] %v9718_v39  ;;  %v1798_v62 = vshll.u32 %v1797_v60, 30  ;;  %v1859_v27 = vor.u32 8388608, %v1858_v7  ;;  %vm1883_vm7 = vcmp.lt.s32.totalorder %v13430_v10, 1  ;;  %vm1885_vm2 = vcmp.lt.s32.totalorder %v13430_v10, 3 }
 0x27b   : > { %v1685_v29 = vmul.f32 %v1684_v53, %v1669_v57  ;;  %v1693_v61 = vxor.u32 2147483648, %v1677_v38  ;;  %vm1699_vm12 = vcmp.lt.s32.totalorder %v13401_v12, 0  ;;  %v1891_v11 = vsel %vm1883_vm7, %v1870_v17, %v1873_v8  ;;  %v13433_v53 = vld [vmem:[#allocation145_spill] sm:$0xff] }
 0x27c   : > { %v1893_v33 = vsel %vm1885_vm2, %v1876_v21, %v13431_v32  ;;  %vm1688_vm5 = vcmp.lt.s32.totalorder %v1687_v55, 2  ;;  %vm1689_vm3 = vcmp.eq.s32.totalorder %v1687_v55, 0  ;;  %vm1692_vm8 = vcmp.eq.s32.totalorder %v1687_v55, 2 }
 0x27d   : > { %v1799_v23 = vsub.s32 %v1795_v36, %v1798_v62  ;;  %v1690_v50 = vxor.u32 2147483648, %v1685_v29  ;;  %v1867_v54 = vshrl.u32 %v13182_v9, %v13425_v6  ;;  %vm1884_vm0 = vcmp.lt.s32.totalorder %v13430_v10, 2 }
 0x27e   : > { %v1895_v57 = vsel %vm1883_vm7, %v1873_v8, %v1876_v21  ;;  %v1894_v5 = vsel %vm1884_vm0, %v1891_v11, %v1893_v33  ;;  %v1897_v32 = vsel %vm1885_vm2, %v13433_v53, %v13432_v0  ;;  %v1694_v62 = vsel %vm1692_vm8, %v1693_v61, %v1685_v29 }
 0x27f   : > { %vm1800_vm14 = vcmp.lt.s32.totalorder %v1799_v23, 0  ;;  %v1801_v7 = vsub.s32 0, %v1799_v23  ;;  %v1691_v36 = vsel %vm1689_vm3, %v1677_v38, %v1690_v50  ;;  %v1898_v6 = vsel %vm1884_vm0, %v1895_v57, %v1897_v32  ;;  %v6858_v57 = vld [vmem:[%s12695_s2] ss:$0 sm:$0xff] }
 0x280   : > { %v9742_v48 = vshll.u32 %v1859_v27, 8  ;;  %v1695_v16 = vsel %vm1688_vm5, %v1691_v36, %v1694_v62  ;;  %v1821_v24 = vsub.s32 4, %v1797_v60  ;;  %vm13434_vm10 = vcmp.lt.s32.totalorder %v13430_v10, 4 }
 0x281   : > { %v1802_v13 = vsel %vm1800_vm14, %v1801_v7, %v1799_v23  ;;  %v1888_v11 = vsel %vm13434_vm10, %v1876_v21, 2102212464  ;;  %v1696_v33 = vsel %vm1686_vm4, nan, %v1695_v16  ;;  %v1924_v29 = vand.u32 65535, %v1894_v5 }
 0x282   : > { %v1803_v52 = vclz %v1802_v13  ;;  %v1900_v38 = vand.u32 65535, %v9742_v48  ;;  %6739 = vmatmul.msk.f32.gmra.mxu2 %vm5797_vm11, %v1696_v33  ;;  %v1901_v27 = vshrl.u32 %v9742_v48, 16  ;;  %v1902_v61 = vand.u32 65535, %v1898_v6 }
 0x283   : > { %v1903_v50 = vshrl.u32 %v1898_v6, 16  ;;  %v1925_v55 = vshrl.u32 %v1894_v5, 16  ;;  %v9755_v7 = vsub.f32 %v577_v44, %v6858_v57  ;;  %v1791_v43 = vadd.s32 %v9626_v25, %v9605_v3 }
 0x284   : > { %v6626_v16 = vadd.s32 4294967294, %v1803_v52  ;;  %v1887_v13 = vsel %vm1883_vm7, %v1867_v54, %v1870_v17  ;;  %v9763_v21 = vsel %vm1699_vm12, %v1821_v24, %v1797_v60  ;;  %v1889_v5 = vsel %vm1885_vm2, %v1873_v8, %v1888_v11 }
 0x285   : > { %13435 = vst [vmem:[#allocation142_spill] sm:$0xff] %v9755_v7  ;;  %v1905_v0 = vmul.u32 %v1903_v50, %v1900_v38  ;;  %v1906_v53 = vmul.u32 %v1902_v61, %v1901_v27  ;;  %v1904_v32 = vmul.u32 %v1902_v61, %v1900_v38  ;;  %v1926_v44 = vmul.u32 %v1924_v29, %v1900_v38 }
 0x286   : > { %vm6627_vm14 = vcmp.lt.s32.totalorder %v6626_v16, 0  ;;  %v1927_v36 = vmul.u32 %v1925_v55, %v1900_v38  ;;  %v1907_v6 = vmul.u32 %v1903_v50, %v1901_v27  ;;  %v1928_v25 = vmul.u32 %v1924_v29, %v1901_v27 }
 0x287   : > { %v1806_v62 = vsel %vm6627_vm14, 0, %v6626_v16  ;;  %v1908_v3 = vshll.u32 %v1905_v0, 16  ;;  %v1909_v17 = vshrl.u32 %v1905_v0, 16  ;;  %v1929_v54 = vmul.u32 %v1925_v55, %v1901_v27 }
 0x288   : > { %v1807_v52 = vsub.s32 32, %v1806_v62  ;;  %v1811_v33 = vsub.s32 4294967266, %v1806_v62  ;;  %v1910_v57 = vshll.u32 %v1906_v53, 16  ;;  %v1930_v60 = vshll.u32 %v1927_v36, 16 }
 0x289   : > { %vm1912_vm10 = vc.u32 %v1904_v32, %v1908_v3  ;;  %v1914_v24 = vadd.s32 %v1908_v3, %v1904_v32  ;;  %v1808_v26 = vshll.u32 %v1799_v23, %v1806_v62  ;;  %v1932_v38 = vshll.u32 %v1928_v25, 16  ;;  %v13436_v32 = vld [vmem:[#allocation3_spill] sm:$0xff] }
 0x28a   : > { %v1809_v8 = vshrl.u32 %v1791_v43, %v1807_v52  ;;  %v1812_v11 = vadd.s32 127, %v1811_v33  ;;  %v1913_v34 = vsel %vm1912_vm10, 1, %v13267_v40  ;;  %vm1934_vm4 = vc.u32 %v1926_v44, %v1930_v60 }
 0x28b   : > { %v1915_v61 = vadd.s32 %v1913_v34, %v1907_v6  ;;  %vm1916_vm8 = vc.u32 %v1914_v24, %v1910_v57  ;;  %v1935_v0 = vsel %vm1934_vm4, 1, %v13267_v40  ;;  %v1936_v55 = vadd.s32 %v1930_v60, %v1926_v44  ;;  %v13440_v6 = vld [vmem:[#allocation21_spill] sm:$0xff] }
 0x28c   : > { %v1810_v50 = vor.u32 %v1809_v8, %v1808_v26  ;;  %v1813_v16 = vshll.u32 %v1812_v11, 23  ;;  %v1917_v29 = vsel %vm1916_vm8, 1, %v13267_v40  ;;  %v1937_v2 = vadd.s32 %v1935_v0, %v1929_v54  ;;  %v13441_v60 = vld [vmem:[#allocation25_spill] sm:$0xff] }
 0x28d   : > { %v1919_v27 = vadd.s32 %v1917_v29, %v1915_v61  ;;  %v13034_v3 = vand.u32 2147483647, %v13436_v32  ;;  %v13437_v23 = vand.u32 2147483647, %v13401_v12  ;;  %v1890_v26 = vsel %vm1884_vm0, %v1887_v13, %v1889_v5 }
 0x28e   : > { %v1814_v34 = vor.u32 4788187, %v1813_v16  ;;  %v1911_v62 = vshrl.u32 %v1906_v53, 16  ;;  %v2022_v52 = vshll.u32 %v13182_v9, %v13440_v6  ;;  %v1817_v33 = vcvt.s32.f32 %v1810_v50 }
 0x28f   : > { %vm9773_vm7 = vcmp.le.f32.partialorder %v13437_v23, 0.7853982  ;;  %v1920_v57 = vadd.s32 %v1919_v27, %v1909_v17  ;;  %vm1938_vm2 = vc.u32 %v1936_v55, %v1932_v38  ;;  %v2012_v44 = vand.u32 8388607, %v13034_v3 }
 0x290   : > { %v1815_v54 = vand.u32 2147483647, %v1814_v34  ;;  %v1939_v24 = vsel %vm1938_vm2, 1, %v13267_v40  ;;  %v2023_v8 = vshrl.u32 %v13184_v19, %v13441_v60  ;;  %v2025_v10 = vshll.u32 %v13184_v19, %v13440_v6 }
 0x291   : > { %v9788_v13 = vadd.s32 %v1920_v57, %v1911_v62  ;;  %v1931_v5 = vshrl.u32 %v1927_v36, 16  ;;  %v1941_v53 = vadd.s32 %v1939_v24, %v1937_v2  ;;  %v2026_v17 = vshrl.u32 %v13185_v14, %v13441_v60  ;;  %v13442_v62 = vld [vmem:[#allocation20_spill] sm:$0xff] }
 0x292   : > { %v1818_v11 = vmul.f32 %v1817_v33, %v1815_v54  ;;  %v9792_v61 = vor.u32 %v2023_v8, %v2022_v52  ;;  %v2028_v50 = vshll.u32 %v13185_v14, %v13440_v6  ;;  %v2029_v16 = vshrl.u32 %v13092_v37, %v13441_v60 }
 0x293   : > { %v1933_v29 = vshrl.u32 %v1928_v25, 16  ;;  %v9798_v0 = vadd.s32 %v1936_v55, %v1932_v38  ;;  %v1942_v27 = vadd.s32 %v1941_v53, %v1931_v5  ;;  %v9800_v23 = vor.u32 %v2026_v17, %v2025_v10  ;;  %v13443_v55 = vld [vmem:[#allocation35_spill] sm:$0xff]  ;;  %v13445_v5 = vld [vmem:[#allocation40_spill] sm:$0xff]  ;;  %v13446_v53 = vld [vmem:[#allocation30_spill] sm:$0xff] }
 0x294   : > { %v1819_v36 = vxor.u32 2147483648, %v1818_v11  ;;  %v2013_v2 = vor.u32 8388608, %v2012_v44  ;;  %v2030_v34 = vor.u32 %v2029_v16, %v2028_v50  ;;  %vm2037_vm0 = vcmp.lt.s32.totalorder %v13442_v62, 1 }
 0x295   : > { %v1943_v33 = vadd.s32 %v1942_v27, %v1933_v29  ;;  %vm1946_vm5 = vc.u32 %v9788_v13, %v9798_v0  ;;  %vm2038_vm3 = vcmp.lt.s32.totalorder %v13442_v62, 2  ;;  %vm2039_vm14 = vcmp.lt.s32.totalorder %v13442_v62, 3 }
 0x296   : > { %v1820_v25 = vsel %vm1699_vm12, %v1819_v36, %v1818_v11  ;;  %v2045_v38 = vsel %vm2037_vm0, %v9792_v61, %v9800_v23  ;;  %v2047_v6 = vsel %vm2039_vm14, %v2030_v34, %v13443_v55  ;;  %v2049_v52 = vsel %vm2037_vm0, %v9800_v23, %v2030_v34 }
 0x297   : > { %v9823_v57 = vsel %vm13038_vm13, %v9672_v22, %v9713_v47  ;;  %v5242_v44 = vand.u32 2139095040, %v9755_v7  ;;  %v1823_v54 = vsel %vm9773_vm7, %v13401_v12, %v1820_v25  ;;  %v1947_v24 = vadd.s32 1, %v1943_v33 }
 0x298   : > { %13444 = vst [vmem:[#allocation151_spill] sm:$0xff] %v9823_v57  ;;  %v1825_v8 = vmul.f32 %v1823_v54, %v1823_v54  ;;  %v1944_v10 = vmul.u32 %v9742_v48, %v1890_v26  ;;  %v2051_v17 = vsel %vm2039_vm14, %v13446_v53, %v13445_v5  ;;  %v9834_v11 = vshll.u32 %v2013_v2, 8 }
 0x299   : > { %v1824_v22 = vsel %vm9773_vm7, 0, %v9763_v21  ;;  %v1948_v47 = vsel %vm1946_vm5, %v1947_v24, %v1943_v33  ;;  %v2048_v50 = vsel %vm2038_vm3, %v2045_v38, %v2047_v6  ;;  %v2052_v48 = vsel %vm2038_vm3, %v2049_v52, %v2051_v17 }
 0x29a   : > { %v1826_v26 = vmul.f32 -0.001358992, %v1825_v8  ;;  %v1833_v16 = vmul.f32 -0.00019511016, %v1825_v8  ;;  %v1949_v29 = vadd.s32 %v1948_v47, %v1944_v10  ;;  %v2054_v27 = vand.u32 65535, %v9834_v11 }
 0x29b   : > { %v13035_v36 = vand.u32 2147483647, %v9755_v7  ;;  %v2055_v43 = vshrl.u32 %v9834_v11, 16  ;;  %v2056_v21 = vand.u32 65535, %v2052_v48  ;;  %v2057_v2 = vshrl.u32 %v2052_v48, 16 }
 0x29c   : > { %v1827_v25 = vadd.f32 0.041655596, %v1826_v26  ;;  %v1834_v55 = vadd.f32 0.008332121, %v1833_v16  ;;  %v9849_v33 = vand.u32 3, %v1824_v22  ;;  %v1950_v24 = vadd.s32 536870912, %v1949_v29 }
 0x29d   : > { %v2058_v38 = vmul.u32 %v2056_v21, %v2054_v27  ;;  %v2059_v6 = vmul.u32 %v2057_v2, %v2054_v27  ;;  %v9851_v5 = vmul.u32 %v2056_v21, %v2055_v43  ;;  %v2079_v52 = vshrl.u32 %v2048_v50, 16 }
 0x29e   : > { %v9853_v53 = vshrl.u32 %v5242_v44, 23  ;;  %v1828_v10 = vmul.f32 %v1827_v25, %v1825_v8  ;;  %v1835_v17 = vmul.f32 %v1834_v55, %v1825_v8  ;;  %v9855_v47 = vshrl.u32 %v1950_v24, 30 }
 0x29f   : > { %v9859_v3 = vand.u32 8388607, %v13035_v36  ;;  %v2062_v48 = vshll.u32 %v2059_v6, 16  ;;  %v2064_v22 = vshll.u32 %v9851_v5, 16  ;;  %v2078_v26 = vand.u32 65535, %v2048_v50 }
 0x2a0   : > { %v1829_v16 = vadd.f32 -0.4999988, %v1828_v10  ;;  %v1836_v35 = vadd.f32 -0.16666654, %v1835_v17  ;;  %vm1846_vm12 = vcmp.eq.s32.totalorder %v9849_v33, 2  ;;  %v1952_v21 = vshll.u32 %v9855_v47, 30 }
 0x2a1   : > { %v2021_v44 = vshrl.u32 %v13182_v9, %v13441_v60  ;;  %vm1843_vm10 = vcmp.eq.s32.totalorder %v9849_v33, 0  ;;  %v2061_v25 = vmul.u32 %v2057_v2, %v2055_v43  ;;  %vm2066_vm8 = vc.u32 %v2058_v38, %v2062_v48 }
 0x2a2   : > { %v2068_v55 = vadd.s32 %v2062_v48, %v2058_v38  ;;  %v9867_v24 = vmul.u32 %v2079_v52, %v2054_v27  ;;  %v1830_v36 = vmul.f32 %v1829_v16, %v1825_v8  ;;  %v1837_v7 = vmul.f32 %v1836_v35, %v1825_v8 }
 0x2a3   : > { %vm1842_vm4 = vcmp.lt.s32.totalorder %v9849_v33, 2  ;;  %v1945_v50 = vadd.s32 %v9798_v0, %v9788_v13  ;;  %v1953_v10 = vsub.s32 %v1949_v29, %v1952_v21  ;;  %vm1840_vm7 = vweird.f32 %v13401_v12 }
 0x2a4   : > { %vm13447_vm2 = vcmp.lt.s32.totalorder %v13442_v62, 4  ;;  %v2067_v17 = vsel %vm2066_vm8, 1, %v13267_v40  ;;  %vm2070_vm5 = vc.u32 %v2068_v55, %v2064_v22  ;;  %v2082_v2 = vmul.u32 %v2078_v26, %v2055_v43 }
 0x2a5   : > { %v2042_v60 = vsel %vm13447_vm2, %v2030_v34, 2102212464  ;;  %v1831_v38 = vadd.f32 1.0, %v1830_v36  ;;  %v1838_v48 = vadd.f32 1.0, %v1837_v7  ;;  %vm1954_vm13 = vcmp.lt.s32.totalorder %v1953_v10, 0 }
 0x2a6   : > { %v1955_v16 = vsub.s32 0, %v1953_v10  ;;  %v2069_v35 = vadd.s32 %v2067_v17, %v2061_v25  ;;  %v2071_v8 = vsel %vm2070_vm5, 1, %v13267_v40  ;;  %v2080_v39 = vmul.u32 %v2078_v26, %v2054_v27 }
 0x2a7   : > { %v2084_v13 = vshll.u32 %v9867_v24, 16  ;;  %v1839_v0 = vmul.f32 %v1838_v48, %v1823_v54  ;;  %v1847_v29 = vxor.u32 2147483648, %v1831_v38  ;;  %v2063_v28 = vshrl.u32 %v2059_v6, 16 }
 0x2a8   : > { %v1956_v21 = vsel %vm1954_vm13, %v1955_v16, %v1953_v10  ;;  %v2041_v34 = vsel %vm2037_vm0, %v2021_v44, %v9792_v61  ;;  %v2043_v7 = vsel %vm2039_vm14, %v9800_v23, %v2042_v60  ;;  %v2083_v36 = vmul.u32 %v2079_v52, %v2055_v43  ;;  %v13448_v52 = vld [vmem:[#allocation4_spill] sm:$0xff] }
 0x2a9   : > { %v1957_v57 = vclz %v1956_v21  ;;  %v1844_v22 = vxor.u32 2147483648, %v1839_v0  ;;  %v2065_v25 = vshrl.u32 %v9851_v5, 16  ;;  %v2073_v27 = vadd.s32 %v2071_v8, %v2069_v35  ;;  %v13450_v21 = vld [vmem:[#allocation28_spill] sm:$0xff] }
 0x2aa   : > { %v2086_v26 = vshll.u32 %v2082_v2, 16  ;;  %v1848_v54 = vsel %vm1846_vm12, %v1847_v29, %v1839_v0  ;;  %v2085_v6 = vshrl.u32 %v9867_v24, 16  ;;  %vm2088_vm13 = vc.u32 %v2080_v39, %v2084_v13  ;;  %v13449_v29 = vld [vmem:[#allocation26_spill] sm:$0xff] }
 0x2ab   : > { %v6629_v55 = vadd.s32 4294967294, %v1957_v57  ;;  %v1845_v61 = vsel %vm1843_vm10, %v1831_v38, %v1844_v22  ;;  %v2074_v44 = vadd.s32 %v2073_v27, %v2063_v28  ;;  %v2089_v17 = vsel %vm2088_vm13, 1, %v13267_v40 }
 0x2ac   : > { %v2090_v23 = vadd.s32 %v2084_v13, %v2080_v39  ;;  %v1849_v43 = vsel %vm1842_vm4, %v1845_v61, %v1848_v54  ;;  %v2091_v5 = vadd.s32 %v2089_v17, %v2083_v36  ;;  %v2159_v60 = vand.u32 2147483647, %v13448_v52  ;;  %v6010_v61 = vld [vmem:[%s12698_s5 + $0x18] sm:$0xff] }
 0x2ad   : > { %vm6630_vm0 = vcmp.lt.s32.totalorder %v6629_v55, 0  ;;  %v1850_v57 = vsel %vm1840_vm7, nan, %v1849_v43  ;;  %v2087_v24 = vshrl.u32 %v2082_v2, 16  ;;  %v9897_v16 = vadd.s32 %v2074_v44, %v2065_v25  ;;  %6124 = vmatpush.msrb.mxu3 %v6010_v61 }
 0x2ae   : > { %v1960_v48 = vsel %vm6630_vm0, 0, %v6629_v55  ;;  %vm2092_vm14 = vc.u32 %v2090_v23, %v2086_v26  ;;  %6740 = vmatmul.msk.f32.gmra.mxu2 %vm5797_vm11, %v1850_v57  ;;  %v9900_v35 = vadd.s32 %v2090_v23, %v2086_v26  ;;  %v2166_v13 = vand.u32 8388607, %v2159_v60  ;;  %v13451_v57 = vld [vmem:[#allocation34_spill] sm:$0xff] }
 0x2af   : > { %v1961_v38 = vsub.s32 32, %v1960_v48  ;;  %v1965_v28 = vsub.s32 4294967266, %v1960_v48  ;;  %v2093_v39 = vsel %vm2092_vm14, 1, %v13267_v40  ;;  %v1962_v33 = vshll.u32 %v1953_v10, %v1960_v48 }
 0x2b0   : > { %v2095_v8 = vadd.s32 %v2093_v39, %v2091_v5  ;;  %v2176_v2 = vshll.u32 %v13182_v9, %v13449_v29  ;;  %v2177_v36 = vshrl.u32 %v13184_v19, %v13450_v21  ;;  %v9909_v22 = vadd.s32 4294967169, %v9853_v53 }
 0x2b1   : > { %v1963_v12 = vshrl.u32 %v1945_v50, %v1961_v38  ;;  %v1966_v0 = vadd.s32 127, %v1965_v28  ;;  %v5247_v25 = vor.u32 8388608, %v9859_v3  ;;  %v2044_v10 = vsel %vm2038_vm3, %v2041_v34, %v2043_v7 }
 0x2b2   : > { %v2096_v27 = vadd.s32 %v2095_v8, %v2085_v6  ;;  %v2167_v55 = vor.u32 8388608, %v2166_v13  ;;  %v2179_v50 = vshll.u32 %v13184_v19, %v13449_v29  ;;  %v2180_v53 = vshrl.u32 %v13185_v14, %v13450_v21 }
 0x2b3   : > { %v1964_v26 = vor.u32 %v1963_v12, %v1962_v33  ;;  %v1967_v54 = vshll.u32 %v1966_v0, 23  ;;  %v2182_v17 = vshll.u32 %v13185_v14, %v13449_v29  ;;  %v2183_v62 = vshrl.u32 %v13092_v37, %v13450_v21  ;;  %v13453_v33 = vld [vmem:[#allocation38_spill] sm:$0xff] }
 0x2b4   : > { %v2097_v44 = vadd.s32 %v2096_v27, %v2087_v24  ;;  %v2098_v7 = vmul.u32 %v9834_v11, %v2044_v10  ;;  %vm2100_vm3 = vc.u32 %v9897_v16, %v9900_v35  ;;  %v2178_v6 = vor.u32 %v2177_v36, %v2176_v2  ;;  %v13452_v11 = vld [vmem:[#allocation52_spill] sm:$0xff]  ;;  %v13454_v2 = vld [vmem:[#allocation45_spill] sm:$0xff] }
 0x2b5   : > { %v1968_v34 = vor.u32 4788187, %v1967_v54  ;;  %v2181_v43 = vor.u32 %v2180_v53, %v2179_v50  ;;  %v2184_v5 = vor.u32 %v2183_v62, %v2182_v17  ;;  %vm2193_vm12 = vcmp.lt.s32.totalorder %v13451_v57, 3 }
 0x2b6   : > { %v2101_v23 = vadd.s32 1, %v2097_v44  ;;  %v1971_v24 = vcvt.s32.f32 %v1964_v26  ;;  %vm2191_vm10 = vcmp.lt.s32.totalorder %v13451_v57, 1  ;;  %v9930_v38 = vshll.u32 %v2167_v55, 8 }
 0x2b7   : > { %v1969_v48 = vand.u32 2147483647, %v1968_v34  ;;  %v1975_v28 = vsub.s32 4, %v9855_v47  ;;  %vm2192_vm8 = vcmp.lt.s32.totalorder %v13451_v57, 2  ;;  %v2205_v8 = vsel %vm2193_vm12, %v13453_v33, %v13452_v11 }
 0x2b8   : > { %v2102_v39 = vsel %vm2100_vm3, %v2101_v23, %v2097_v44  ;;  %vm1853_vm4 = vcmp.lt.s32.totalorder %v13424_v58, 0  ;;  %v2175_v0 = vshrl.u32 %v13182_v9, %v13450_v21  ;;  %v2199_v29 = vsel %vm2191_vm10, %v2178_v6, %v2181_v43 }
 0x2b9   : > { %v1972_v13 = vmul.f32 %v1971_v24, %v1969_v48  ;;  %v2103_v12 = vadd.s32 %v2102_v39, %v2098_v7  ;;  %v2201_v36 = vsel %vm2193_vm12, %v2184_v5, %v13454_v2  ;;  %v2203_v10 = vsel %vm2191_vm10, %v2181_v43, %v2184_v5 }
 0x2ba   : > { %v2208_v27 = vand.u32 65535, %v9930_v38  ;;  %v2206_v55 = vsel %vm2192_vm8, %v2203_v10, %v2205_v8  ;;  %v9952_v50 = vshrl.u32 %v9930_v38, 16  ;;  %v13455_v21 = vand.u32 2147483647, %v13424_v58 }
 0x2bb   : > { %v1973_v26 = vxor.u32 2147483648, %v1972_v13  ;;  %v2104_v54 = vadd.s32 536870912, %v2103_v12  ;;  %v1976_v44 = vsel %vm1853_vm4, %v1975_v28, %v9855_v47  ;;  %v2210_v53 = vand.u32 65535, %v2206_v55 }
 0x2bc   : > { %vm9956_vm7 = vcmp.le.f32.partialorder %v13455_v21, 0.7853982  ;;  %v2211_v17 = vshrl.u32 %v2206_v55, 16  ;;  %vm13458_vm2 = vcmp.lt.s32.totalorder %v13451_v57, 4  ;;  %v2202_v23 = vsel %vm2192_vm8, %v2199_v29, %v2201_v36 }
 0x2bd   : > { %v1974_v62 = vsel %vm1853_vm4, %v1973_v26, %v1972_v13  ;;  %v9965_v34 = vshrl.u32 %v2104_v54, 30  ;;  %v2196_v7 = vsel %vm13458_vm2, %v2184_v5, 2102212464  ;;  %v2212_v24 = vmul.u32 %v2210_v53, %v2208_v27 }
 0x2be   : > { %v9974_v48 = vsel %vm9956_vm7, %v13424_v58, %v1974_v62  ;;  %v9976_v47 = vmul.u32 %v2211_v17, %v2208_v27  ;;  %v9979_v28 = vmul.u32 %v2210_v53, %v9952_v50  ;;  %v1978_v39 = vsel %vm9956_vm7, 0, %v1976_v44 }
 0x2bf   : > { %v1979_v5 = vmul.f32 %v9974_v48, %v9974_v48  ;;  %v2106_v11 = vshll.u32 %v9965_v34, 30  ;;  %v2195_v33 = vsel %vm2191_vm10, %v2175_v0, %v2178_v6  ;;  %v2197_v8 = vsel %vm2193_vm12, %v2181_v43, %v2196_v7 }
 0x2c0   : > { %v2216_v13 = vshll.u32 %v9976_v47, 16  ;;  %v2218_v29 = vshll.u32 %v9979_v28, 16  ;;  %v2233_v2 = vshrl.u32 %v2202_v23, 16  ;;  %v2215_v54 = vmul.u32 %v2211_v17, %v9952_v50 }
 0x2c1   : > { %v1980_v36 = vmul.f32 -0.001358992, %v1979_v5  ;;  %v1987_v10 = vmul.f32 -0.00019511016, %v1979_v5  ;;  %v9992_v26 = vsub.s32 %v2103_v12, %v2106_v11  ;;  %v9995_v55 = vand.u32 3, %v1978_v39 }
 0x2c2   : > { %vm2220_vm5 = vc.u32 %v2212_v24, %v2216_v13  ;;  %v2222_v21 = vadd.s32 %v2216_v13, %v2212_v24  ;;  %v2232_v61 = vand.u32 65535, %v2202_v23  ;;  %v10001_v44 = vsel %vm2192_vm8, %v2195_v33, %v2197_v8 }
 0x2c3   : > { %v1981_v6 = vadd.f32 0.041655596, %v1980_v36  ;;  %v1988_v0 = vadd.f32 0.008332121, %v1987_v10  ;;  %vm2108_vm13 = vcmp.lt.s32.totalorder %v9992_v26, 0  ;;  %v2109_v43 = vsub.s32 0, %v9992_v26 }
 0x2c4   : > { %v2221_v12 = vsel %vm2220_vm5, 1, %v13267_v40  ;;  %vm2224_vm0 = vc.u32 %v2222_v21, %v2218_v29  ;;  %v10004_v53 = vmul.u32 %v2233_v2, %v2208_v27  ;;  %v10008_v24 = vadd.s32 1, %v9909_v22 }
 0x2c5   : > { %v1982_v17 = vmul.f32 %v1981_v6, %v1979_v5  ;;  %v1989_v62 = vmul.f32 %v1988_v0, %v1979_v5  ;;  %v2110_v7 = vsel %vm2108_vm13, %v2109_v43, %v9992_v26  ;;  %v2223_v23 = vadd.s32 %v2221_v12, %v2215_v54  ;;  %v13460_v0 = vld [vmem:[#allocation14_spill] sm:$0xff] }
 0x2c6   : > { %v10012_v39 = vshll.u32 %v5247_v25, 8  ;;  %v2099_v57 = vadd.s32 %v9900_v35, %v9897_v16  ;;  %v2111_v11 = vclz %v2110_v7  ;;  %v2225_v13 = vsel %vm2224_vm0, 1, %v13267_v40 }
 0x2c7   : > { %v1983_v33 = vadd.f32 -0.4999988, %v1982_v17  ;;  %v1990_v8 = vadd.f32 -0.16666654, %v1989_v62  ;;  %v2236_v29 = vmul.u32 %v2232_v61, %v9952_v50  ;;  %vm1997_vm14 = vcmp.eq.s32.totalorder %v9995_v55, 0 }
 0x2c8   : > { %13459 = vst [vmem:[#allocation153_spill] sm:$0xff] %v10012_v39  ;;  %vm2000_vm3 = vcmp.eq.s32.totalorder %v9995_v55, 2  ;;  %v6632_v22 = vadd.s32 4294967294, %v2111_v11  ;;  %v2217_v36 = vshrl.u32 %v9976_v47, 16  ;;  %v2227_v3 = vadd.s32 %v2225_v13, %v2223_v23 }
 0x2c9   : > { %v2252_v25 = vmul.u32 %v9930_v38, %v10001_v44  ;;  %v1984_v10 = vmul.f32 %v1983_v33, %v1979_v5  ;;  %v1991_v16 = vmul.f32 %v1990_v8, %v1979_v5  ;;  %vm1996_vm12 = vcmp.lt.s32.totalorder %v9995_v55, 2 }
 0x2ca   : > { %v2234_v35 = vmul.u32 %v2232_v61, %v2208_v27  ;;  %v2238_v54 = vshll.u32 %v10004_v53, 16  ;;  %vm1994_vm10 = vweird.f32 %v13424_v58  ;;  %vm6633_vm8 = vcmp.lt.s32.totalorder %v6632_v22, 0 }
 0x2cb   : > { %v2219_v21 = vshrl.u32 %v9979_v28, 16  ;;  %v2237_v6 = vmul.u32 %v2233_v2, %v9952_v50  ;;  %v13039_v47 = vand.u32 2147483647, %v13460_v0  ;;  %v1985_v43 = vadd.f32 1.0, %v1984_v10 }
 0x2cc   : > { %v1992_v12 = vadd.f32 1.0, %v1991_v16  ;;  %v2114_v17 = vsel %vm6633_vm8, 0, %v6632_v22  ;;  %v2240_v62 = vshll.u32 %v2236_v29, 16  ;;  %vm2007_vm4 = vcmp.lt.s32.totalorder %v13436_v32, 0 }
 0x2cd   : > { %v2115_v5 = vsub.s32 32, %v2114_v17  ;;  %v2116_v27 = vshll.u32 %v9992_v26, %v2114_v17  ;;  %v2119_v61 = vsub.s32 4294967266, %v2114_v17  ;;  %v2228_v7 = vadd.s32 %v2227_v3, %v2217_v36 }
 0x2ce   : > { %v1993_v23 = vmul.f32 %v1992_v12, %v9974_v48  ;;  %v2001_v11 = vxor.u32 2147483648, %v1985_v43  ;;  %vm2242_vm7 = vc.u32 %v2234_v35, %v2238_v54  ;;  %v2244_v28 = vadd.s32 %v2238_v54, %v2234_v35  ;;  %v13471_v48 = vld [vmem:[#allocation62_spill] sm:$0xff] }
 0x2cf   : > { %v2117_v33 = vshrl.u32 %v2099_v57, %v2115_v5  ;;  %v2120_v50 = vadd.s32 127, %v2119_v61  ;;  %v2239_v2 = vshrl.u32 %v10004_v53, 16  ;;  %v2243_v8 = vsel %vm2242_vm7, 1, %v13267_v40 }
 0x2d0   : > { %vm5250_vm2 = vcmp.gt.s32.totalorder %v10008_v24, 0  ;;  %v1998_v13 = vxor.u32 2147483648, %v1993_v23  ;;  %v2245_v22 = vadd.s32 %v2243_v8, %v2237_v6  ;;  %vm2246_vm5 = vc.u32 %v2244_v28, %v2240_v62 }
 0x2d1   : > { %v2320_v26 = vand.u32 8388607, %v13039_v47  ;;  %v13461_v36 = vand.u32 2147483647, %v13436_v32  ;;  %v2118_v57 = vor.u32 %v2117_v33, %v2116_v27  ;;  %v2121_v3 = vshll.u32 %v2120_v50, 23 }
 0x2d2   : > { %v2241_v10 = vshrl.u32 %v2236_v29, 16  ;;  %v2247_v53 = vsel %vm2246_vm5, 1, %v13267_v40  ;;  %v1999_v16 = vsel %vm1997_vm14, %v1985_v43, %v1998_v13  ;;  %v2002_v35 = vsel %vm2000_vm3, %v2001_v11, %v1993_v23  ;;  %v13465_v11 = vld [vmem:[#allocation44_spill] sm:$0xff] }
 0x2d3   : > { %vm10039_vm13 = vcmp.le.f32.partialorder %v13461_v36, 0.7853982  ;;  %v10048_v54 = vadd.s32 %v2228_v7, %v2219_v21  ;;  %v2249_v6 = vadd.s32 %v2247_v53, %v2245_v22  ;;  %v2003_v12 = vsel %vm1996_vm12, %v1999_v16, %v2002_v35  ;;  %v13464_v21 = vld [vmem:[#allocation37_spill] sm:$0xff]  ;;  %v13466_v22 = vld [vmem:[#allocation46_spill] sm:$0xff]  ;;  %v13468_v53 = vld [vmem:[#allocation55_spill] sm:$0xff] }
 0x2d4   : > { %v2122_v17 = vor.u32 4788187, %v2121_v3  ;;  %v2125_v5 = vcvt.s32.f32 %v2118_v57  ;;  %v10052_v61 = vadd.s32 %v2244_v28, %v2240_v62  ;;  %v2004_v29 = vsel %vm1994_vm10, nan, %v2003_v12 }
 0x2d5   : > { %v2129_v27 = vsub.s32 4, %v9965_v34  ;;  %v2250_v33 = vadd.s32 %v2249_v6, %v2239_v2  ;;  %v2321_v43 = vor.u32 8388608, %v2320_v26  ;;  %6741 = vmatmul.msk.f32.gmra.mxu2 %vm5797_vm11, %v2004_v29  ;;  %v2330_v7 = vshll.u32 %v13182_v9, %v13464_v21 }
 0x2d6   : > { %v2123_v23 = vand.u32 2147483647, %v2122_v17  ;;  %v2333_v55 = vshll.u32 %v13184_v19, %v13464_v21  ;;  %v2334_v62 = vshrl.u32 %v13185_v14, %v13465_v11  ;;  %v2331_v58 = vshrl.u32 %v13184_v19, %v13465_v11 }
 0x2d7   : > { %v2251_v28 = vadd.s32 %v2250_v33, %v2241_v10  ;;  %v2336_v50 = vshll.u32 %v13185_v14, %v13464_v21  ;;  %v2337_v2 = vshrl.u32 %v13092_v37, %v13465_v11  ;;  %vm2254_vm0 = vc.u32 %v10048_v54, %v10052_v61  ;;  %v13467_v10 = vld [vmem:[#allocation66_spill] sm:$0xff] }
 0x2d8   : > { %v2126_v8 = vmul.f32 %v2125_v5, %v2123_v23  ;;  %v2335_v13 = vor.u32 %v2334_v62, %v2333_v55  ;;  %vm2345_vm14 = vcmp.lt.s32.totalorder %v13466_v22, 1  ;;  %v2130_v26 = vsel %vm2007_vm4, %v2129_v27, %v9965_v34 }
 0x2d9   : > { %v2255_v36 = vadd.s32 1, %v2251_v28  ;;  %v2338_v57 = vor.u32 %v2337_v2, %v2336_v50  ;;  %vm2347_vm3 = vcmp.lt.s32.totalorder %v13466_v22, 3  ;;  %vm2346_vm12 = vcmp.lt.s32.totalorder %v13466_v22, 2 }
 0x2da   : > { %v2127_v3 = vxor.u32 2147483648, %v2126_v8  ;;  %v2359_v16 = vsel %vm2347_vm3, %v13468_v53, %v13467_v10  ;;  %v10082_v35 = vshll.u32 %v2321_v43, 8  ;;  %v10085_v6 = vand.u32 65535, %v10012_v39 }
 0x2db   : > { %v2256_v12 = vsel %vm2254_vm0, %v2255_v36, %v2251_v28  ;;  %v2332_v17 = vor.u32 %v2331_v58, %v2330_v7  ;;  %v2357_v34 = vsel %vm2345_vm14, %v2335_v13, %v2338_v57  ;;  %v10092_v5 = vsel %vm5250_vm2, %v10008_v24, 0 }
 0x2dc   : > { %13469 = vst [vmem:[#allocation145_spill] sm:$0xff] %v10085_v6  ;;  %v2128_v29 = vsel %vm2007_vm4, %v2127_v3, %v2126_v8  ;;  %v2257_v27 = vadd.s32 %v2256_v12, %v2252_v25  ;;  %v2329_v33 = vshrl.u32 %v13182_v9, %v13465_v11  ;;  %v2132_v23 = vsel %vm10039_vm13, 0, %v2130_v26 }
 0x2dd   : > { %v10104_v43 = vsel %vm10039_vm13, %v13436_v32, %v2128_v29  ;;  %vm13470_vm10 = vcmp.lt.s32.totalorder %v13466_v22, 4  ;;  %v2360_v21 = vsel %vm2346_vm12, %v2357_v34, %v2359_v16  ;;  %v2362_v25 = vand.u32 65535, %v10082_v35 }
 0x2de   : > { %v2350_v24 = vsel %vm13470_vm10, %v2338_v57, 2102212464  ;;  %v2133_v38 = vmul.f32 %v10104_v43, %v10104_v43  ;;  %v2258_v44 = vadd.s32 536870912, %v2257_v27  ;;  %v10116_v7 = vshrl.u32 %v10082_v35, 16 }
 0x2df   : > { %v2353_v55 = vsel %vm2345_vm14, %v2332_v17, %v2335_v13  ;;  %v2355_v11 = vsel %vm2347_vm3, %v2338_v57, %v13471_v48  ;;  %v2364_v62 = vand.u32 65535, %v2360_v21  ;;  %v2365_v28 = vshrl.u32 %v2360_v21, 16 }
 0x2e0   : > { %v2134_v58 = vmul.f32 -0.001358992, %v2133_v38  ;;  %v2141_v50 = vmul.f32 -0.00019511016, %v2133_v38  ;;  %v10123_v2 = vshrl.u32 %v2258_v44, 30  ;;  %v2349_v8 = vsel %vm2345_vm14, %v2329_v33, %v2332_v17 }
 0x2e1   : > { %v2351_v26 = vsel %vm2347_vm3, %v2335_v13, %v2350_v24  ;;  %v2366_v36 = vmul.u32 %v2364_v62, %v2362_v25  ;;  %v10129_v3 = vmul.u32 %v2365_v28, %v2362_v25  ;;  %v10132_v10 = vmul.u32 %v2364_v62, %v10116_v7 }
 0x2e2   : > { %v2135_v53 = vadd.f32 0.041655596, %v2134_v58  ;;  %v2142_v57 = vadd.f32 0.008332121, %v2141_v50  ;;  %v2260_v16 = vshll.u32 %v10123_v2, 30  ;;  %v2356_v12 = vsel %vm2346_vm12, %v2353_v55, %v2355_v11 }
 0x2e3   : > { %v10138_v34 = vand.u32 31, %v10092_v5  ;;  %v10141_v17 = vshrl.u32 %v10012_v39, 16  ;;  %v2149_v13 = vand.u32 3, %v2132_v23  ;;  %v2370_v29 = vshll.u32 %v10129_v3, 16 }
 0x2e4   : > { %v2136_v33 = vmul.f32 %v2135_v53, %v2133_v38  ;;  %v2143_v24 = vmul.f32 %v2142_v57, %v2133_v38  ;;  %v10144_v21 = vsub.s32 %v2257_v27, %v2260_v16  ;;  %v2369_v44 = vmul.u32 %v2365_v28, %v10116_v7 }
 0x2e5   : > { %13472 = vst [vmem:[#allocation3_spill] sm:$0xff] %v10141_v17  ;;  %v10149_v48 = vsel %vm2346_vm12, %v2349_v8, %v2351_v26  ;;  %v2372_v55 = vshll.u32 %v10132_v10, 16  ;;  %vm2374_vm8 = vc.u32 %v2366_v36, %v2370_v29  ;;  %v2387_v11 = vshrl.u32 %v2356_v12, 16 }
 0x2e6   : > { %v2137_v62 = vadd.f32 -0.4999988, %v2136_v33  ;;  %v2144_v58 = vadd.f32 -0.16666654, %v2143_v24  ;;  %vm2262_vm4 = vcmp.lt.s32.totalorder %v10144_v21, 0  ;;  %v2263_v23 = vsub.s32 0, %v10144_v21 }
 0x2e7   : > { %vm2151_vm7 = vcmp.eq.s32.totalorder %v2149_v13, 0  ;;  %vm2154_vm2 = vcmp.eq.s32.totalorder %v2149_v13, 2  ;;  %v2375_v27 = vsel %vm2374_vm8, 1, %v13267_v40  ;;  %v2376_v50 = vadd.s32 %v2370_v29, %v2366_v36 }
 0x2e8   : > { %v2386_v28 = vand.u32 65535, %v2356_v12  ;;  %v2138_v53 = vmul.f32 %v2137_v62, %v2133_v38  ;;  %v2145_v22 = vmul.f32 %v2144_v58, %v2133_v38  ;;  %vm2150_vm5 = vcmp.lt.s32.totalorder %v2149_v13, 2 }
 0x2e9   : > { %v2264_v8 = vsel %vm2262_vm4, %v2263_v23, %v10144_v21  ;;  %v2377_v26 = vadd.s32 %v2375_v27, %v2369_v44  ;;  %vm2148_vm13 = vweird.f32 %v13436_v32  ;;  %v2253_v57 = vadd.s32 %v10052_v61, %v10048_v54 }
 0x2ea   : > { %v2265_v16 = vclz %v2264_v8  ;;  %v2371_v33 = vshrl.u32 %v10129_v3, 16  ;;  %v2406_v24 = vmul.u32 %v10082_v35, %v10149_v48  ;;  %v2139_v47 = vadd.f32 1.0, %v2138_v53 }
 0x2eb   : > { %v2146_v36 = vadd.f32 1.0, %v2145_v22  ;;  %vm2378_vm0 = vc.u32 %v2376_v50, %v2372_v55  ;;  %v2389_v12 = vmul.u32 %v2387_v11, %v2362_v25  ;;  %v2388_v62 = vmul.u32 %v2386_v28, %v2362_v25 }
 0x2ec   : > { %v6635_v38 = vadd.s32 4294967294, %v2265_v16  ;;  %v2379_v29 = vsel %vm2378_vm0, 1, %v13267_v40  ;;  %v2390_v44 = vmul.u32 %v2386_v28, %v10116_v7  ;;  %v2155_v23 = vxor.u32 2147483648, %v2139_v47 }
 0x2ed   : > { %v2147_v58 = vmul.f32 %v2146_v36, %v10104_v43  ;;  %v2381_v54 = vadd.s32 %v2379_v29, %v2377_v26  ;;  %v2392_v61 = vshll.u32 %v2389_v12, 16  ;;  %v2283_v3 = vsub.s32 4, %v10123_v2 }
 0x2ee   : > { %vm6636_vm14 = vcmp.lt.s32.totalorder %v6635_v38, 0  ;;  %v2373_v27 = vshrl.u32 %v10132_v10, 16  ;;  %v2391_v53 = vmul.u32 %v2387_v11, %v10116_v7  ;;  %v2394_v8 = vshll.u32 %v2390_v44, 16 }
 0x2ef   : > { %v2152_v55 = vxor.u32 2147483648, %v2147_v58  ;;  %v2156_v50 = vsel %vm2154_vm2, %v2155_v23, %v2147_v58  ;;  %v2268_v22 = vsel %vm6636_vm14, 0, %v6635_v38  ;;  %vm2396_vm3 = vc.u32 %v2388_v62, %v2392_v61 }
 0x2f0   : > { %v2269_v25 = vsub.s32 32, %v2268_v22  ;;  %v2270_v28 = vshll.u32 %v10144_v21, %v2268_v22  ;;  %v2273_v16 = vsub.s32 4294967266, %v2268_v22  ;;  %v2382_v26 = vadd.s32 %v2381_v54, %v2371_v33  ;;  %v13473_v21 = vld [vmem:[#allocation24_spill] sm:$0xff] }
 0x2f1   : > { %v2153_v43 = vsel %vm2151_vm7, %v2139_v47, %v2152_v55  ;;  %v2397_v36 = vsel %vm2396_vm3, 1, %v13267_v40  ;;  %v2398_v29 = vadd.s32 %v2392_v61, %v2388_v62  ;;  %vm2161_vm12 = vcmp.lt.s32.totalorder %v13448_v52, 0 }
 0x2f2   : > { %v2157_v10 = vsel %vm2150_vm5, %v2153_v43, %v2156_v50  ;;  %v2271_v7 = vshrl.u32 %v2253_v57, %v2269_v25  ;;  %v2274_v11 = vadd.s32 127, %v2273_v16  ;;  %v2399_v58 = vadd.s32 %v2397_v36, %v2391_v53  ;;  %v6009_v57 = vld [vmem:[%s12698_s5 + $0x10] sm:$0xff]  ;;  %v13475_v25 = vld [vmem:[#allocation54_spill] sm:$0xff] }
 0x2f3   : > { %v2158_v38 = vsel %vm2148_vm13, nan, %v2157_v10  ;;  %v2393_v23 = vshrl.u32 %v2389_v12, 16  ;;  %vm2400_vm10 = vc.u32 %v2398_v29, %v2394_v8  ;;  %v13040_v22 = vand.u32 2147483647, %v13473_v21  ;;  %6125 = vmatpush.msrb.mxu3 %v6009_v57  ;;  %v13474_v50 = vld [vmem:[#allocation48_spill] sm:$0xff]  ;;  %v13478_v57 = vld [vmem:[#allocation63_spill] sm:$0xff] }
 0x2f4   : > { %6742 = vmatmul.msk.f32.gmra.mxu2 %vm5797_vm11, %v2158_v38  ;;  %v2272_v47 = vor.u32 %v2271_v7, %v2270_v28  ;;  %v2275_v33 = vshll.u32 %v2274_v11, 23  ;;  %v2395_v54 = vshrl.u32 %v2390_v44, 16  ;;  %v2401_v13 = vsel %vm2400_vm10, 1, %v13267_v40 }
 0x2f5   : > { %v10182_v62 = vadd.s32 %v2382_v26, %v2373_v27  ;;  %v10184_v61 = vadd.s32 %v2398_v29, %v2394_v8  ;;  %v2403_v32 = vadd.s32 %v2401_v13, %v2399_v58  ;;  %v2474_v12 = vand.u32 8388607, %v13040_v22  ;;  %v13476_v58 = vld [vmem:[#allocation58_spill] sm:$0xff]  ;;  %v13477_v13 = vld [vmem:[#allocation73_spill] sm:$0xff] }
 0x2f6   : > { %v2276_v53 = vor.u32 4788187, %v2275_v33  ;;  %v2279_v55 = vcvt.s32.f32 %v2272_v47  ;;  %v2484_v44 = vshll.u32 %v13182_v9, %v13474_v50  ;;  %v2485_v28 = vshrl.u32 %v13184_v19, %v13475_v25 }
 0x2f7   : > { %v2404_v16 = vadd.s32 %v2403_v32, %v2393_v23  ;;  %v2475_v43 = vor.u32 8388608, %v2474_v12  ;;  %v2487_v27 = vshll.u32 %v13184_v19, %v13474_v50  ;;  %v2488_v8 = vshrl.u32 %v13185_v14, %v13475_v25 }
 0x2f8   : > { %v2277_v26 = vand.u32 2147483647, %v2276_v53  ;;  %v2486_v36 = vor.u32 %v2485_v28, %v2484_v44  ;;  %v2490_v29 = vshll.u32 %v13185_v14, %v13474_v50  ;;  %v2491_v10 = vshrl.u32 %v13092_v37, %v13475_v25 }
 0x2f9   : > { %v2405_v7 = vadd.s32 %v2404_v16, %v2395_v54  ;;  %vm2408_vm8 = vc.u32 %v10182_v62, %v10184_v61  ;;  %v2489_v11 = vor.u32 %v2488_v8, %v2487_v27  ;;  %vm2499_vm4 = vcmp.lt.s32.totalorder %v13476_v58, 1 }
 0x2fa   : > { %v2280_v38 = vmul.f32 %v2279_v55, %v2277_v26  ;;  %v2492_v23 = vor.u32 %v2491_v10, %v2490_v29  ;;  %vm2500_vm7 = vcmp.lt.s32.totalorder %v13476_v58, 2  ;;  %vm2501_vm2 = vcmp.lt.s32.totalorder %v13476_v58, 3  ;;  %v13481_v55 = vld [vmem:[#allocation72_spill] sm:$0xff] }
 0x2fb   : > { %v2409_v47 = vadd.s32 1, %v2405_v7  ;;  %v2507_v33 = vsel %vm2499_vm4, %v2486_v36, %v2489_v11  ;;  %v2513_v54 = vsel %vm2501_vm2, %v13478_v57, %v13477_v13  ;;  %v10211_v32 = vshll.u32 %v2475_v43, 8 }
 0x2fc   : > { %vm10215_vm5 = vcmp.le.f32.partialorder %v2159_v60, 0.7853982  ;;  %v2281_v53 = vxor.u32 2147483648, %v2280_v38  ;;  %v2509_v50 = vsel %vm2501_vm2, %v2492_v23, %v13481_v55  ;;  %v2511_v44 = vsel %vm2499_vm4, %v2489_v11, %v2492_v23 }
 0x2fd   : > { %v10225_v28 = vshrl.u32 %v10092_v5, 5  ;;  %v2284_v60 = vsel %vm2161_vm12, %v2283_v3, %v10123_v2  ;;  %v2410_v16 = vsel %vm2408_vm8, %v2409_v47, %v2405_v7  ;;  %v2514_v43 = vsel %vm2500_vm7, %v2511_v44, %v2513_v54 }
 0x2fe   : > { %v2282_v27 = vsel %vm2161_vm12, %v2281_v53, %v2280_v38  ;;  %v2411_v5 = vadd.s32 %v2410_v16, %v2406_v24  ;;  %v2483_v8 = vshrl.u32 %v13182_v9, %v13475_v25  ;;  %v2510_v2 = vsel %vm2500_vm7, %v2507_v33, %v2509_v50 }
 0x2ff   : > { %v2285_v3 = vsel %vm10215_vm5, %v13448_v52, %v2282_v27  ;;  %v2516_v26 = vand.u32 65535, %v10211_v32  ;;  %v2517_v29 = vshrl.u32 %v10211_v32, 16  ;;  %v2518_v10 = vand.u32 65535, %v2514_v43 }
 0x300   : > { %v10252_v7 = vsub.s32 32, %v10138_v34  ;;  %v2287_v35 = vmul.f32 %v2285_v3, %v2285_v3  ;;  %v2412_v48 = vadd.s32 536870912, %v2411_v5  ;;  %v2519_v24 = vshrl.u32 %v2514_v43, 16 }
 0x301   : > { %v2286_v25 = vsel %vm10215_vm5, 0, %v2284_v60  ;;  %vm13483_vm13 = vcmp.lt.s32.totalorder %v13476_v58, 4  ;;  %v10258_v47 = vmul.u32 %v2518_v10, %v2517_v29  ;;  %v2541_v33 = vshrl.u32 %v2510_v2, 16 }
 0x302   : > { %13482 = vst [vmem:[#allocation21_spill] sm:$0xff] %v10252_v7  ;;  %v2504_v38 = vsel %vm13483_vm13, %v2492_v23, 2102212464  ;;  %v2288_v13 = vmul.f32 -0.001358992, %v2287_v35  ;;  %v10260_v54 = vshrl.u32 %v2412_v48, 30  ;;  %v2521_v53 = vmul.u32 %v2519_v24, %v2516_v26 }
 0x303   : > { %v2295_v57 = vmul.f32 -0.00019511016, %v2287_v35  ;;  %v10264_v55 = vshll.u32 %v13182_v9, %v10138_v34  ;;  %v2503_v50 = vsel %vm2499_vm4, %v2483_v8, %v2486_v36  ;;  %v2520_v12 = vmul.u32 %v2518_v10, %v2516_v26 }
 0x304   : > { %v2540_v44 = vand.u32 65535, %v2510_v2  ;;  %v2289_v60 = vadd.f32 0.041655596, %v2288_v13  ;;  %v2414_v23 = vshll.u32 %v10260_v54, 30  ;;  %v2505_v43 = vsel %vm2501_vm2, %v2489_v11, %v2504_v38 }
 0x305   : > { %v2296_v16 = vadd.f32 0.008332121, %v2295_v57  ;;  %v2303_v27 = vand.u32 3, %v2286_v25  ;;  %v2524_v48 = vshll.u32 %v2521_v53, 16  ;;  %v2526_v22 = vshll.u32 %v10258_v47, 16 }
 0x306   : > { %v10272_v39 = vmul.u32 %v2541_v33, %v2516_v26  ;;  %v2290_v17 = vmul.f32 %v2289_v60, %v2287_v35  ;;  %v10274_v42 = vsub.s32 %v2411_v5, %v2414_v23  ;;  %v2523_v36 = vmul.u32 %v2519_v24, %v2517_v29 }
 0x307   : > { %v2297_v6 = vmul.f32 %v2296_v16, %v2287_v35  ;;  %v10278_v8 = vsel %vm2500_vm7, %v2503_v50, %v2505_v43  ;;  %vm2528_vm0 = vc.u32 %v2520_v12, %v2524_v48  ;;  %v2530_v2 = vadd.s32 %v2524_v48, %v2520_v12 }
 0x308   : > { %v2542_v10 = vmul.u32 %v2540_v44, %v2516_v26  ;;  %v2291_v13 = vadd.f32 -0.4999988, %v2290_v17  ;;  %vm2416_vm14 = vcmp.lt.s32.totalorder %v10274_v42, 0  ;;  %v2417_v25 = vsub.s32 0, %v10274_v42 }
 0x309   : > { %v2298_v11 = vadd.f32 -0.16666654, %v2297_v6  ;;  %v2529_v38 = vsel %vm2528_vm0, 1, %v13267_v40  ;;  %vm10283_vm3 = vc.u32 %v2530_v2, %v2526_v22  ;;  %v10287_v5 = vmul.u32 %v2540_v44, %v2517_v29 }
 0x30a   : > { %v2546_v58 = vshll.u32 %v10272_v39, 16  ;;  %v2292_v24 = vmul.f32 %v2291_v13, %v2287_v35  ;;  %vm2304_vm12 = vcmp.lt.s32.totalorder %v2303_v27, 2  ;;  %v2418_v17 = vsel %vm2416_vm14, %v2417_v25, %v10274_v42 }
 0x30b   : > { %v2299_v50 = vmul.f32 %v2298_v11, %v2287_v35  ;;  %v2531_v6 = vadd.s32 %v2529_v38, %v2523_v36  ;;  %vm2302_vm10 = vweird.f32 %v13448_v52  ;;  %vm2305_vm8 = vcmp.eq.s32.totalorder %v2303_v27, 0 }
 0x30c   : > { %vm2308_vm4 = vcmp.eq.s32.totalorder %v2303_v27, 2  ;;  %v2407_v22 = vadd.s32 %v10184_v61, %v10182_v62  ;;  %v2419_v26 = vclz %v2418_v17  ;;  %v2293_v12 = vadd.f32 1.0, %v2292_v24  ;;  %v13486_v27 = vld [vmem:[#allocation31_spill] sm:$0xff] }
 0x30d   : > { %v2300_v60 = vadd.f32 1.0, %v2299_v50  ;;  %v2525_v44 = vshrl.u32 %v2521_v53, 16  ;;  %v2533_v16 = vsel %vm10283_vm3, 1, %v13267_v40  ;;  %v2545_v43 = vmul.u32 %v2541_v33, %v2517_v29 }
 0x30e   : > { %v6638_v35 = vadd.s32 4294967294, %v2419_v26  ;;  %v2535_v23 = vadd.s32 %v2533_v16, %v2531_v6  ;;  %v2560_v48 = vmul.u32 %v10211_v32, %v10278_v8  ;;  %v2309_v2 = vxor.u32 2147483648, %v2293_v12 }
 0x30f   : > { %v2301_v36 = vmul.f32 %v2300_v60, %v2285_v3  ;;  %v2548_v13 = vshll.u32 %v10287_v5, 16  ;;  %vm2550_vm7 = vc.u32 %v2542_v10, %v2546_v58  ;;  %v2527_v62 = vshrl.u32 %v10258_v47, 16 }
 0x310   : > { %vm6639_vm2 = vcmp.lt.s32.totalorder %v6638_v35, 0  ;;  %v2547_v61 = vshrl.u32 %v10272_v39, 16  ;;  %v2551_v53 = vsel %vm2550_vm7, 1, %v13267_v40  ;;  %v2536_v38 = vadd.s32 %v2535_v23, %v2525_v44  ;;  %v13487_v23 = vld [vmem:[#allocation65_spill] sm:$0xff] }
 0x311   : > { %v2306_v11 = vxor.u32 2147483648, %v2301_v36  ;;  %v2422_v25 = vsel %vm6639_vm2, 0, %v6638_v35  ;;  %v2552_v57 = vadd.s32 %v2546_v58, %v2542_v10  ;;  %v2549_v3 = vshrl.u32 %v10287_v5, 16 }
 0x312   : > { %v2423_v29 = vsub.s32 32, %v2422_v25  ;;  %v2424_v33 = vshll.u32 %v10274_v42, %v2422_v25  ;;  %v2427_v24 = vsub.s32 4294967266, %v2422_v25  ;;  %v2310_v17 = vsel %vm2308_vm4, %v2309_v2, %v2301_v36  ;;  %v13488_v36 = vld [vmem:[#allocation75_spill] sm:$0xff] }
 0x313   : > { %v2307_v50 = vsel %vm2305_vm8, %v2293_v12, %v2306_v11  ;;  %vm2315_vm5 = vcmp.lt.s32.totalorder %v13460_v0, 0  ;;  %v2553_v47 = vadd.s32 %v2551_v53, %v2545_v43  ;;  %vm2554_vm13 = vc.u32 %v2552_v57, %v2548_v13 }
 0x314   : > { %v2311_v39 = vsel %vm2304_vm12, %v2307_v50, %v2310_v17  ;;  %v2425_v6 = vshrl.u32 %v2407_v22, %v2423_v29  ;;  %v2428_v26 = vadd.s32 127, %v2427_v24  ;;  %v2555_v10 = vsel %vm2554_vm13, 1, %v13267_v40  ;;  %v13489_v24 = vld [vmem:[#allocation74_spill] sm:$0xff] }
 0x315   : > { %v2312_v42 = vsel %vm2302_vm10, nan, %v2311_v39  ;;  %v10312_v58 = vadd.s32 %v2536_v38, %v2527_v62  ;;  %v10314_v5 = vadd.s32 %v2552_v57, %v2548_v13  ;;  %v2557_v12 = vadd.s32 %v2555_v10, %v2553_v47 }
 0x316   : > { %6743 = vmatmul.msk.f32.gmra.mxu2 %vm5797_vm11, %v2312_v42  ;;  %v2426_v60 = vor.u32 %v2425_v6, %v2424_v33  ;;  %v2429_v44 = vshll.u32 %v2428_v26, 23  ;;  %v2437_v16 = vsub.s32 4, %v10260_v54  ;;  %v13046_v35 = vand.u32 2147483647, %v13486_v27  ;;  %v13490_v6 = vld [vmem:[#allocation93_spill] sm:$0xff]  ;;  %v13491_v26 = vld [vmem:[#allocation83_spill] sm:$0xff] }
 0x317   : > { %v2558_v22 = vadd.s32 %v2557_v12, %v2547_v61  ;;  %v2638_v43 = vshll.u32 %v13182_v9, %v13487_v23  ;;  %v2639_v52 = vshrl.u32 %v13184_v19, %v13488_v36  ;;  %v2641_v2 = vshll.u32 %v13184_v19, %v13487_v23 }
 0x318   : > { %v2430_v13 = vor.u32 4788187, %v2429_v44  ;;  %v2433_v62 = vcvt.s32.f32 %v2426_v60  ;;  %v2628_v53 = vand.u32 8388607, %v13046_v35  ;;  %v2642_v11 = vshrl.u32 %v13185_v14, %v13488_v36 }
 0x319   : > { %v2559_v25 = vadd.s32 %v2558_v22, %v2549_v3  ;;  %vm2562_vm0 = vc.u32 %v10312_v58, %v10314_v5  ;;  %v2644_v61 = vshll.u32 %v13185_v14, %v13487_v23  ;;  %v2645_v38 = vshrl.u32 %v13092_v37, %v13488_v36 }
 0x31a   : > { %v2431_v57 = vand.u32 2147483647, %v2430_v13  ;;  %v10335_v29 = vor.u32 %v2639_v52, %v2638_v43  ;;  %v10337_v33 = vor.u32 %v2642_v11, %v2641_v2  ;;  %vm2653_vm14 = vcmp.lt.s32.totalorder %v13489_v24, 1 }
 0x31b   : > { %v2563_v50 = vadd.s32 1, %v2559_v25  ;;  %v2629_v17 = vor.u32 8388608, %v2628_v53  ;;  %v2646_v47 = vor.u32 %v2645_v38, %v2644_v61  ;;  %vm2655_vm3 = vcmp.lt.s32.totalorder %v13489_v24, 3 }
 0x31c   : > { %v10343_v3 = vshll.u32 %v13184_v19, %v10138_v34  ;;  %v2434_v39 = vmul.f32 %v2433_v62, %v2431_v57  ;;  %vm2654_vm12 = vcmp.lt.s32.totalorder %v13489_v24, 2  ;;  %v2667_v10 = vsel %vm2655_vm3, %v13491_v26, %v13490_v6  ;;  %v13495_v62 = vld [vmem:[#allocation91_spill] sm:$0xff] }
 0x31d   : > { %v10352_v42 = vshll.u32 %v13185_v14, %v10138_v34  ;;  %v10356_v12 = vshll.u32 %v13092_v37, %v10138_v34  ;;  %v2564_v60 = vsel %vm2562_vm0, %v2563_v50, %v2559_v25  ;;  %v2665_v44 = vsel %vm2653_vm14, %v10337_v33, %v2646_v47 }
 0x31e   : > { %v13492_v22 = vand.u32 2147483647, %v13460_v0  ;;  %v2435_v43 = vxor.u32 2147483648, %v2434_v39  ;;  %v2438_v52 = vsel %vm2315_vm5, %v2437_v16, %v10260_v54  ;;  %v2565_v2 = vadd.s32 %v2564_v60, %v2560_v48 }
 0x31f   : > { %v2661_v13 = vsel %vm2653_vm14, %v10335_v29, %v10337_v33  ;;  %v2663_v53 = vsel %vm2655_vm3, %v2646_v47, %v13495_v62  ;;  %v2668_v11 = vsel %vm2654_vm12, %v2665_v44, %v2667_v10  ;;  %v10385_v25 = vshll.u32 %v2629_v17, 8 }
 0x320   : > { %vm10366_vm10 = vcmp.le.f32.partialorder %v13492_v22, 0.7853982  ;;  %v2436_v54 = vsel %vm2315_vm5, %v2435_v43, %v2434_v39  ;;  %v2566_v16 = vadd.s32 536870912, %v2565_v2  ;;  %v2672_v32 = vand.u32 65535, %v2668_v11 }
 0x321   : > { %v2673_v8 = vshrl.u32 %v2668_v11, 16  ;;  %v10391_v48 = vshll.u32 %v13089_v51, %v10138_v34  ;;  %v2439_v61 = vsel %vm10366_vm10, %v13460_v0, %v2436_v54  ;;  %v2670_v38 = vand.u32 65535, %v10385_v25 }
 0x322   : > { %v2671_v57 = vshrl.u32 %v10385_v25, 16  ;;  %v2440_v50 = vsel %vm10366_vm10, 0, %v2438_v52  ;;  %v2441_v17 = vmul.f32 %v2439_v61, %v2439_v61  ;;  %v10400_v39 = vshrl.u32 %v2566_v16, 30 }
 0x323   : > { %v2664_v6 = vsel %vm2654_vm12, %v2661_v13, %v2663_v53  ;;  %v10406_v34 = vshrl.u32 %v13184_v19, %v10252_v7  ;;  %v2674_v26 = vmul.u32 %v2672_v32, %v2670_v38  ;;  %v10408_v10 = vmul.u32 %v2673_v8, %v2670_v38 }
 0x324   : > { %v10410_v60 = vmul.u32 %v2672_v32, %v2671_v57  ;;  %v10414_v44 = vshrl.u32 %v13185_v14, %v10252_v7  ;;  %v2442_v22 = vmul.f32 -0.001358992, %v2441_v17  ;;  %v2449_v23 = vmul.f32 -0.00019511016, %v2441_v17 }
 0x325   : > { %v2568_v43 = vshll.u32 %v10400_v39, 30  ;;  %v10417_v52 = vand.u32 3, %v2440_v50  ;;  %v2678_v13 = vshll.u32 %v10408_v10, 16  ;;  %v2695_v53 = vshrl.u32 %v2664_v6, 16 }
 0x326   : > { %v2680_v62 = vshll.u32 %v10410_v60, 16  ;;  %v2443_v11 = vadd.f32 0.041655596, %v2442_v22  ;;  %v2450_v54 = vadd.f32 0.008332121, %v2449_v23  ;;  %v2677_v32 = vmul.u32 %v2673_v8, %v2671_v57 }
 0x327   : > { %v10421_v16 = vsub.s32 %v2565_v2, %v2568_v43  ;;  %v2637_v35 = vshrl.u32 %v13182_v9, %v13488_v36  ;;  %vm2682_vm8 = vc.u32 %v2674_v26, %v2678_v13  ;;  %v2684_v56 = vadd.s32 %v2678_v13, %v2674_v26 }
 0x328   : > { %v2694_v46 = vand.u32 65535, %v2664_v6  ;;  %v2444_v41 = vmul.f32 %v2443_v11, %v2441_v17  ;;  %v2451_v30 = vmul.f32 %v2450_v54, %v2441_v17  ;;  %vm13496_vm7 = vcmp.lt.s32.totalorder %v13489_v24, 4 }
 0x329   : > { %vm2570_vm4 = vcmp.lt.s32.totalorder %v10421_v16, 0  ;;  %v2571_v50 = vsub.s32 0, %v10421_v16  ;;  %v2658_v45 = vsel %vm13496_vm7, %v2646_v47, 2102212464  ;;  %v2683_v22 = vsel %vm2682_vm8, 1, %v13267_v40 }
 0x32a   : > { %vm2686_vm2 = vc.u32 %v2684_v56, %v2680_v62  ;;  %v10430_v2 = vmul.u32 %v2695_v53, %v2670_v38  ;;  %v2445_v8 = vadd.f32 -0.4999988, %v2444_v41  ;;  %v2452_v23 = vadd.f32 -0.16666654, %v2451_v30 }
 0x32b   : > { %v2572_v36 = vsel %vm2570_vm4, %v2571_v50, %v10421_v16  ;;  %v2685_v26 = vadd.s32 %v2683_v22, %v2677_v32  ;;  %vm2459_vm5 = vcmp.eq.s32.totalorder %v10417_v52, 0  ;;  %vm2462_vm13 = vcmp.eq.s32.totalorder %v10417_v52, 2 }
 0x32c   : > { %v2573_v6 = vclz %v2572_v36  ;;  %v2657_v43 = vsel %vm2653_vm14, %v2637_v35, %v10335_v29  ;;  %v2696_v47 = vmul.u32 %v2694_v46, %v2670_v38  ;;  %v2446_v13 = vmul.f32 %v2445_v8, %v2441_v17 }
 0x32d   : > { %v2453_v11 = vmul.f32 %v2452_v23, %v2441_v17  ;;  %vm2458_vm0 = vcmp.lt.s32.totalorder %v10417_v52, 2  ;;  %v2659_v56 = vsel %vm2655_vm3, %v10337_v33, %v2658_v45  ;;  %v2687_v41 = vsel %vm2686_vm2, 1, %v13267_v40 }
 0x32e   : > { %vm2456_vm10 = vweird.f32 %v13460_v0  ;;  %v2561_v30 = vadd.s32 %v10314_v5, %v10312_v58  ;;  %v6641_v62 = vadd.s32 4294967294, %v2573_v6  ;;  %v2698_v54 = vmul.u32 %v2694_v46, %v2671_v57  ;;  %v13499_v0 = vld [vmem:[#allocation85_spill] sm:$0xff] }
 0x32f   : > { %v2700_v35 = vshll.u32 %v10430_v2, 16  ;;  %v2447_v29 = vadd.f32 1.0, %v2446_v13  ;;  %v2454_v38 = vadd.f32 1.0, %v2453_v11  ;;  %v2679_v17 = vshrl.u32 %v10408_v10, 16 }
 0x330   : > { %v2689_v32 = vadd.s32 %v2687_v41, %v2685_v26  ;;  %vm6642_vm14 = vcmp.lt.s32.totalorder %v6641_v62, 0  ;;  %v10450_v45 = vsel %vm2654_vm12, %v2657_v43, %v2659_v56  ;;  %v2699_v33 = vmul.u32 %v2695_v53, %v2671_v57  ;;  %v13497_v56 = vld [vmem:[#allocation42_spill] sm:$0xff] }
 0x331   : > { %vm2704_vm3 = vc.u32 %v2696_v47, %v2700_v35  ;;  %v2455_v50 = vmul.f32 %v2454_v38, %v2439_v61  ;;  %v2463_v22 = vxor.u32 2147483648, %v2447_v29  ;;  %v2576_v8 = vsel %vm6642_vm14, 0, %v6641_v62 }
 0x332   : > { %v2705_v58 = vsel %vm2704_vm3, 1, %v13267_v40  ;;  %v2577_v46 = vsub.s32 32, %v2576_v8  ;;  %v2578_v5 = vshll.u32 %v10421_v16, %v2576_v8  ;;  %v2581_v23 = vsub.s32 4294967266, %v2576_v8 }
 0x333   : > { %v2702_v36 = vshll.u32 %v2698_v54, 16  ;;  %v2460_v6 = vxor.u32 2147483648, %v2455_v50  ;;  %v2681_v10 = vshrl.u32 %v10410_v60, 16  ;;  %v2690_v26 = vadd.s32 %v2689_v32, %v2679_v17 }
 0x334   : > { %v2701_v24 = vshrl.u32 %v10430_v2, 16  ;;  %v2579_v43 = vshrl.u32 %v2561_v30, %v2577_v46  ;;  %v2582_v13 = vadd.s32 127, %v2581_v23  ;;  %v2706_v57 = vadd.s32 %v2700_v35, %v2696_v47  ;;  %v6008_v30 = vld [vmem:[%s12698_s5 + $0x8] sm:$0xff] }
 0x335   : > { %v2707_v53 = vadd.s32 %v2705_v58, %v2699_v33  ;;  %v2461_v61 = vsel %vm2459_vm5, %v2447_v29, %v2460_v6  ;;  %v2464_v11 = vsel %vm2462_vm13, %v2463_v22, %v2455_v50  ;;  %vm2469_vm12 = vcmp.lt.s32.totalorder %v13473_v21, 0  ;;  %v13498_v29 = vld [vmem:[#allocation80_spill] sm:$0xff]  ;;  %6126 = vmatpush.msrb.mxu3 %v6008_v30  ;;  %v13504_v30 = vld [vmem:[#allocation106_spill] sm:$0xff] }
 0x336   : > { %v2703_v16 = vshrl.u32 %v2698_v54, 16  ;;  %v13049_v41 = vand.u32 2147483647, %v13497_v56  ;;  %v2465_v60 = vsel %vm2458_vm0, %v2461_v61, %v2464_v11  ;;  %v2580_v62 = vor.u32 %v2579_v43, %v2578_v5 }
 0x337   : > { %v2583_v2 = vshll.u32 %v2582_v13, 23  ;;  %vm2708_vm8 = vc.u32 %v2706_v57, %v2702_v36  ;;  %v2466_v47 = vsel %vm2456_vm10, nan, %v2465_v60  ;;  %v2792_v38 = vshll.u32 %v13182_v9, %v13498_v29 }
 0x338   : > { %v2709_v35 = vsel %vm2708_vm8, 1, %v13267_v40  ;;  %v2782_v54 = vand.u32 8388607, %v13049_v41  ;;  %6744 = vmatmul.msk.f32.gmra.mxu2 %vm5797_vm11, %v2466_v47  ;;  %v2587_v17 = vcvt.s32.f32 %v2580_v62  ;;  %v2793_v33 = vshrl.u32 %v13184_v19, %v13499_v0 }
 0x339   : > { %v2584_v52 = vor.u32 4788187, %v2583_v2  ;;  %v2711_v32 = vadd.s32 %v2709_v35, %v2707_v53  ;;  %v10477_v50 = vadd.s32 %v2690_v26, %v2681_v10  ;;  %v10479_v22 = vadd.s32 %v2706_v57, %v2702_v36  ;;  %v13500_v10 = vld [vmem:[#allocation84_spill] sm:$0xff]  ;;  %v13505_v35 = vld [vmem:[#allocation97_spill] sm:$0xff] }
 0x33a   : > { %v2783_v8 = vor.u32 8388608, %v2782_v54  ;;  %v2795_v58 = vshll.u32 %v13184_v19, %v13498_v29  ;;  %v2591_v5 = vsub.s32 4, %v10400_v39  ;;  %v2796_v6 = vshrl.u32 %v13185_v14, %v13499_v0 }
 0x33b   : > { %v2585_v46 = vand.u32 2147483647, %v2584_v52  ;;  %v2712_v23 = vadd.s32 %v2711_v32, %v2701_v24  ;;  %v10486_v43 = vor.u32 %v2793_v33, %v2792_v38  ;;  %v2798_v13 = vshll.u32 %v13185_v14, %v13498_v29 }
 0x33c   : > { %v2799_v36 = vshrl.u32 %v13092_v37, %v13499_v0  ;;  %vm2807_vm4 = vcmp.lt.s32.totalorder %v13500_v10, 1  ;;  %v10493_v53 = vor.u32 %v2796_v6, %v2795_v58  ;;  %vm2809_vm7 = vcmp.lt.s32.totalorder %v13500_v10, 3 }
 0x33d   : > { %v2588_v26 = vmul.f32 %v2587_v17, %v2585_v46  ;;  %v2713_v57 = vadd.s32 %v2712_v23, %v2703_v16  ;;  %v2714_v24 = vmul.u32 %v10385_v25, %v10450_v45  ;;  %vm2716_vm2 = vc.u32 %v10477_v50, %v10479_v22 }
 0x33e   : > { %v2800_v61 = vor.u32 %v2799_v36, %v2798_v13  ;;  %v10500_v11 = vshll.u32 %v2783_v8, 8  ;;  %v10504_v60 = vshrl.u32 %v13092_v37, %v10252_v7  ;;  %v13501_v62 = vand.u32 2147483647, %v13473_v21  ;;  %v13506_v8 = vld [vmem:[#allocation102_spill] sm:$0xff] }
 0x33f   : > { %v2589_v2 = vxor.u32 2147483648, %v2588_v26  ;;  %v2717_v47 = vadd.s32 1, %v2713_v57  ;;  %v10514_v25 = vshrl.u32 %v13089_v51, %v10252_v7  ;;  %vm2808_vm13 = vcmp.lt.s32.totalorder %v13500_v10, 2 }
 0x340   : > { %vm10508_vm5 = vcmp.le.f32.partialorder %v13501_v62, 0.7853982  ;;  %v2819_v45 = vsel %vm2807_vm4, %v10493_v53, %v2800_v61  ;;  %v2821_v54 = vsel %vm2809_vm7, %v13505_v35, %v13504_v30  ;;  %v2592_v38 = vsel %vm2469_vm12, %v2591_v5, %v10400_v39 }
 0x341   : > { %v2590_v29 = vsel %vm2469_vm12, %v2589_v2, %v2588_v26  ;;  %v2718_v52 = vsel %vm2716_vm2, %v2717_v47, %v2713_v57  ;;  %v2815_v17 = vsel %vm2807_vm4, %v10486_v43, %v10493_v53  ;;  %v2817_v58 = vsel %vm2809_vm7, %v2800_v61, %v13506_v8 }
 0x342   : > { %v10536_v32 = vsel %vm10508_vm5, %v13473_v21, %v2590_v29  ;;  %v2719_v33 = vadd.s32 %v2718_v52, %v2714_v24  ;;  %v2824_v46 = vand.u32 65535, %v10500_v11  ;;  %v10544_v39 = vshrl.u32 %v13098_v31, %v10252_v7 }
 0x343   : > { %v2595_v5 = vmul.f32 %v10536_v32, %v10536_v32  ;;  %v2822_v23 = vsel %vm2808_vm13, %v2819_v45, %v2821_v54  ;;  %v2825_v6 = vshrl.u32 %v10500_v11, 16  ;;  %v2594_v13 = vsel %vm10508_vm5, 0, %v2592_v38 }
 0x344   : > { %v2720_v36 = vadd.s32 536870912, %v2719_v33  ;;  %v2826_v26 = vand.u32 65535, %v2822_v23  ;;  %v2827_v57 = vshrl.u32 %v2822_v23, 16  ;;  %v10555_v24 = vor.u32 %v10406_v34, %v10264_v55 }
 0x345   : > { %v2596_v62 = vmul.f32 -0.001358992, %v2595_v5  ;;  %v2603_v2 = vmul.f32 -0.00019511016, %v2595_v5  ;;  %v2818_v47 = vsel %vm2808_vm13, %v2815_v17, %v2817_v58  ;;  %v10563_v38 = vand.u32 3, %v2594_v13 }
 0x346   : > { %13507 = vst [vmem:[#allocation25_spill] sm:$0xff] %v10555_v24  ;;  %v10559_v30 = vshrl.u32 %v2720_v36, 30  ;;  %v2828_v45 = vmul.u32 %v2826_v26, %v2824_v46  ;;  %v2829_v35 = vmul.u32 %v2827_v57, %v2824_v46  ;;  %v10561_v54 = vmul.u32 %v2826_v26, %v2825_v6 }
 0x347   : > { %v2597_v16 = vadd.f32 0.041655596, %v2596_v62  ;;  %v2604_v29 = vadd.f32 0.008332121, %v2603_v2  ;;  %v2791_v52 = vshrl.u32 %v13182_v9, %v13499_v0  ;;  %v2831_v34 = vmul.u32 %v2827_v57, %v2825_v6 }
 0x348   : > { %v2722_v55 = vshll.u32 %v10559_v30, 30  ;;  %v2832_v8 = vshll.u32 %v2829_v35, 16  ;;  %v2849_v23 = vshrl.u32 %v2818_v47, 16  ;;  %vm13508_vm0 = vcmp.lt.s32.totalorder %v13500_v10, 4 }
 0x349   : > { %v2598_v41 = vmul.f32 %v2597_v16, %v2595_v5  ;;  %v2605_v17 = vmul.f32 %v2604_v29, %v2595_v5  ;;  %v2812_v58 = vsel %vm13508_vm0, %v2800_v61, 2102212464  ;;  %v2834_v36 = vshll.u32 %v10561_v54, 16 }
 0x34a   : > { %v10571_v26 = vsub.s32 %v2719_v33, %v2722_v55  ;;  %vm2836_vm10 = vc.u32 %v2828_v45, %v2832_v8  ;;  %v2838_v13 = vadd.s32 %v2832_v8, %v2828_v45  ;;  %v2848_v62 = vand.u32 65535, %v2818_v47 }
 0x34b   : > { %v2599_v2 = vadd.f32 -0.4999988, %v2598_v41  ;;  %v2606_v7 = vadd.f32 -0.16666654, %v2605_v17  ;;  %vm2616_vm14 = vcmp.eq.s32.totalorder %v10563_v38, 2  ;;  %v2811_v0 = vsel %vm2807_vm4, %v2791_v52, %v10486_v43 }
 0x34c   : > { %v2837_v57 = vsel %vm2836_vm10, 1, %v13267_v40  ;;  %vm2613_vm3 = vcmp.eq.s32.totalorder %v10563_v38, 0  ;;  %vm2724_vm12 = vcmp.lt.s32.totalorder %v10571_v26, 0  ;;  %v2725_v61 = vsub.s32 0, %v10571_v26 }
 0x34d   : > { %v2839_v33 = vadd.s32 %v2837_v57, %v2831_v34  ;;  %v2851_v16 = vmul.u32 %v2849_v23, %v2824_v46  ;;  %v2600_v45 = vmul.f32 %v2599_v2, %v2595_v5  ;;  %v2607_v47 = vmul.f32 %v2606_v7, %v2595_v5 }
 0x34e   : > { %vm2612_vm8 = vcmp.lt.s32.totalorder %v10563_v38, 2  ;;  %v2813_v41 = vsel %vm2809_vm7, %v10493_v53, %v2812_v58  ;;  %vm2840_vm2 = vc.u32 %v2838_v13, %v2834_v36  ;;  %vm2610_vm4 = vweird.f32 %v13473_v21  ;;  %v13509_v13 = vld [vmem:[#allocation51_spill] sm:$0xff] }
 0x34f   : > { %v2726_v43 = vsel %vm2724_vm12, %v2725_v61, %v10571_v26  ;;  %v2833_v29 = vshrl.u32 %v2829_v35, 16  ;;  %v2850_v52 = vmul.u32 %v2848_v62, %v2824_v46  ;;  %v2852_v55 = vmul.u32 %v2848_v62, %v2825_v6 }
 0x350   : > { %v2601_v8 = vadd.f32 1.0, %v2600_v45  ;;  %v2608_v17 = vadd.f32 1.0, %v2607_v47  ;;  %v2727_v34 = vclz %v2726_v43  ;;  %v2841_v2 = vsel %vm2840_vm2, 1, %v13267_v40 }
 0x351   : > { %v2715_v7 = vadd.s32 %v10479_v22, %v10477_v50  ;;  %v2843_v5 = vadd.s32 %v2841_v2, %v2839_v33  ;;  %v2853_v57 = vmul.u32 %v2849_v23, %v2825_v6  ;;  %v2854_v59 = vshll.u32 %v2851_v16, 16 }
 0x352   : > { %v2609_v53 = vmul.f32 %v2608_v17, %v10536_v32  ;;  %v2617_v58 = vxor.u32 2147483648, %v2601_v8  ;;  %v6644_v36 = vadd.s32 4294967294, %v2727_v34  ;;  %v13054_v61 = vand.u32 2147483647, %v13509_v13 }
 0x353   : > { %v10594_v46 = vsel %vm2808_vm13, %v2811_v0, %v2813_v41  ;;  %v2835_v35 = vshrl.u32 %v10561_v54, 16  ;;  %v2856_v62 = vshll.u32 %v2852_v55, 16  ;;  %vm2858_vm7 = vc.u32 %v2850_v52, %v2854_v59 }
 0x354   : > { %v2614_v45 = vxor.u32 2147483648, %v2609_v53  ;;  %vm2623_vm5 = vcmp.lt.s32.totalorder %v13486_v27, 0  ;;  %vm6645_vm0 = vcmp.lt.s32.totalorder %v6644_v36, 0  ;;  %v2844_v50 = vadd.s32 %v2843_v5, %v2833_v29 }
 0x355   : > { %v2859_v22 = vsel %vm2858_vm7, 1, %v13267_v40  ;;  %v2618_v32 = vsel %vm2616_vm14, %v2617_v58, %v2609_v53  ;;  %v2730_v6 = vsel %vm6645_vm0, 0, %v6644_v36  ;;  %v2860_v23 = vadd.s32 %v2854_v59, %v2850_v52 }
 0x356   : > { %v2861_v33 = vadd.s32 %v2859_v22, %v2853_v57  ;;  %v2615_v10 = vsel %vm2613_vm3, %v2601_v8, %v2614_v45  ;;  %v2731_v0 = vsub.s32 32, %v2730_v6  ;;  %v2732_v54 = vshll.u32 %v10571_v26, %v2730_v6  ;;  %v13514_v45 = vld [vmem:[#allocation94_spill] sm:$0xff] }
 0x357   : > { %v2735_v47 = vsub.s32 4294967266, %v2730_v6  ;;  %v2619_v41 = vsel %vm2612_vm8, %v2615_v10, %v2618_v32  ;;  %v13510_v43 = vand.u32 2147483647, %v13486_v27  ;;  %v2855_v17 = vshrl.u32 %v2851_v16, 16 }
 0x358   : > { %v2857_v34 = vshrl.u32 %v2852_v55, 16  ;;  %vm2862_vm10 = vc.u32 %v2860_v23, %v2856_v62  ;;  %v2620_v59 = vsel %vm2610_vm4, nan, %v2619_v41  ;;  %v2733_v52 = vshrl.u32 %v2715_v7, %v2731_v0  ;;  %v13513_v55 = vld [vmem:[#allocation88_spill] sm:$0xff] }
 0x359   : > { %vm10608_vm13 = vcmp.le.f32.partialorder %v13510_v43, 0.7853982  ;;  %v2736_v8 = vadd.s32 127, %v2735_v47  ;;  %v2863_v26 = vsel %vm2862_vm10, 1, %v13267_v40  ;;  %6745 = vmatmul.msk.f32.gmra.mxu2 %vm5797_vm11, %v2620_v59  ;;  %v2845_v38 = vadd.s32 %v2844_v50, %v2835_v35  ;;  %v13515_v47 = vld [vmem:[#allocation100_spill] sm:$0xff] }
 0x35a   : > { %v2864_v2 = vadd.s32 %v2860_v23, %v2856_v62  ;;  %v2865_v5 = vadd.s32 %v2863_v26, %v2861_v33  ;;  %v2936_v57 = vand.u32 8388607, %v13054_v61  ;;  %v2734_v53 = vor.u32 %v2733_v52, %v2732_v54 }
 0x35b   : > { %v2737_v58 = vshll.u32 %v2736_v8, 23  ;;  %v2745_v16 = vsub.s32 4, %v10559_v30  ;;  %v2946_v21 = vshll.u32 %v13182_v9, %v13513_v55  ;;  %v2947_v22 = vshrl.u32 %v13184_v19, %v13514_v45 }
 0x35c   : > { %v2866_v36 = vadd.s32 %v2865_v5, %v2855_v17  ;;  %v2937_v7 = vor.u32 8388608, %v2936_v57  ;;  %v2949_v35 = vshll.u32 %v13184_v19, %v13513_v55  ;;  %v2741_v50 = vcvt.s32.f32 %v2734_v53 }
 0x35d   : > { %v2738_v62 = vor.u32 4788187, %v2737_v58  ;;  %v2950_v32 = vshrl.u32 %v13185_v14, %v13514_v45  ;;  %v2952_v6 = vshll.u32 %v13185_v14, %v13513_v55  ;;  %v2868_v33 = vmul.u32 %v10500_v11, %v10594_v46  ;;  %v13516_v11 = vld [vmem:[#allocation116_spill] sm:$0xff] }
 0x35e   : > { %v2867_v23 = vadd.s32 %v2866_v36, %v2857_v34  ;;  %vm2870_vm14 = vc.u32 %v2845_v38, %v2864_v2  ;;  %v2953_v10 = vshrl.u32 %v13092_v37, %v13514_v45  ;;  %vm2961_vm3 = vcmp.lt.s32.totalorder %v13515_v47, 1  ;;  %v13517_v46 = vld [vmem:[#allocation104_spill] sm:$0xff] }
 0x35f   : > { %v2739_v0 = vand.u32 2147483647, %v2738_v62  ;;  %v2951_v54 = vor.u32 %v2950_v32, %v2949_v35  ;;  %vm2963_vm12 = vcmp.lt.s32.totalorder %v13515_v47, 3  ;;  %v2746_v41 = vsel %vm2623_vm5, %v2745_v16, %v10559_v30 }
 0x360   : > { %v2871_v43 = vadd.s32 1, %v2867_v23  ;;  %v2948_v17 = vor.u32 %v2947_v22, %v2946_v21  ;;  %v2954_v34 = vor.u32 %v2953_v10, %v2952_v6  ;;  %vm2962_vm8 = vcmp.lt.s32.totalorder %v13515_v47, 2 }
 0x361   : > { %v2742_v59 = vmul.f32 %v2741_v50, %v2739_v0  ;;  %v2975_v52 = vsel %vm2963_vm12, %v13517_v46, %v13516_v11  ;;  %v10643_v8 = vshll.u32 %v2937_v7, 8  ;;  %v10647_v26 = vor.u32 %v10414_v44, %v10343_v3  ;;  %v13519_v44 = vld [vmem:[#allocation112_spill] sm:$0xff] }
 0x362   : > { %v10651_v30 = vor.u32 %v10504_v60, %v10352_v42  ;;  %v2872_v5 = vsel %vm2870_vm14, %v2871_v43, %v2867_v23  ;;  %v2973_v57 = vsel %vm2961_vm3, %v2951_v54, %v2954_v34  ;;  %v10658_v53 = vor.u32 %v10514_v25, %v10356_v12 }
 0x363   : > { %13518 = vst [vmem:[#allocation20_spill] sm:$0xff] %v10647_v26  ;;  %v2743_v58 = vxor.u32 2147483648, %v2742_v59  ;;  %v2748_v16 = vsel %vm10608_vm13, 0, %v2746_v41  ;;  %v2873_v55 = vadd.s32 %v2872_v5, %v2868_v33  ;;  %v2969_v3 = vsel %vm2961_vm3, %v2948_v17, %v2951_v54 }
 0x364   : > { %v2971_v42 = vsel %vm2963_vm12, %v2954_v34, %v13519_v44  ;;  %v2976_v60 = vsel %vm2962_vm8, %v2973_v57, %v2975_v52  ;;  %v2978_v21 = vand.u32 65535, %v10643_v8  ;;  %v2979_v36 = vshrl.u32 %v10643_v8, 16  ;;  %v13521_v44 = vld [vmem:[#allocation79_spill] sm:$0xff] }
 0x365   : > { %v2744_v12 = vsel %vm2623_vm5, %v2743_v58, %v2742_v59  ;;  %v2874_v25 = vadd.s32 536870912, %v2873_v55  ;;  %v2980_v7 = vand.u32 65535, %v2976_v60  ;;  %v2945_v62 = vshrl.u32 %v13182_v9, %v13514_v45 }
 0x366   : > { %v10678_v35 = vsel %vm10608_vm13, %v13486_v27, %v2744_v12  ;;  %v2981_v50 = vshrl.u32 %v2976_v60, 16  ;;  %vm13520_vm2 = vcmp.lt.s32.totalorder %v13515_v47, 4  ;;  %v2972_v33 = vsel %vm2962_vm8, %v2969_v3, %v2971_v42 }
 0x367   : > { %v2749_v32 = vmul.f32 %v10678_v35, %v10678_v35  ;;  %v10684_v6 = vshrl.u32 %v2874_v25, 30  ;;  %v2966_v23 = vsel %vm13520_vm2, %v2954_v34, 2102212464  ;;  %v10690_v10 = vand.u32 3, %v2748_v16 }
 0x368   : > { %v2982_v29 = vmul.u32 %v2980_v7, %v2978_v21  ;;  %v10692_v0 = vmul.u32 %v2981_v50, %v2978_v21  ;;  %v10694_v41 = vmul.u32 %v2980_v7, %v2979_v36  ;;  %v10696_v59 = vadd.s32 %v2864_v2, %v2845_v38 }
 0x369   : > { %v2750_v45 = vmul.f32 -0.001358992, %v2749_v32  ;;  %v2757_v43 = vmul.f32 -0.00019511016, %v2749_v32  ;;  %v2876_v11 = vshll.u32 %v10684_v6, 30  ;;  %vm2777_vm4 = vcmp.lt.s32.totalorder %v13497_v56, 0 }
 0x36a   : > { %v2965_v34 = vsel %vm2961_vm3, %v2945_v62, %v2948_v17  ;;  %v2967_v46 = vsel %vm2963_vm12, %v2951_v54, %v2966_v23  ;;  %v2986_v52 = vshll.u32 %v10692_v0, 16  ;;  %v3003_v5 = vshrl.u32 %v2972_v33, 16 }
 0x36b   : > { %v2751_v57 = vadd.f32 0.041655596, %v2750_v45  ;;  %v2758_v58 = vadd.f32 0.008332121, %v2757_v43  ;;  %v10705_v16 = vsub.s32 %v2873_v55, %v2876_v11  ;;  %v2985_v3 = vmul.u32 %v2981_v50, %v2979_v36 }
 0x36c   : > { %v2988_v38 = vshll.u32 %v10694_v41, 16  ;;  %vm2990_vm7 = vc.u32 %v2982_v29, %v2986_v52  ;;  %v3002_v2 = vand.u32 65535, %v2972_v33  ;;  %v13053_v42 = vand.u32 2147483647, %v13521_v44 }
 0x36d   : > { %v2752_v60 = vmul.f32 %v2751_v57, %v2749_v32  ;;  %v2759_v12 = vmul.f32 %v2758_v58, %v2749_v32  ;;  %vm2878_vm5 = vcmp.lt.s32.totalorder %v10705_v16, 0  ;;  %v2879_v54 = vsub.s32 0, %v10705_v16 }
 0x36e   : > { %v10713_v17 = vsel %vm2962_vm8, %v2965_v34, %v2967_v46  ;;  %v2991_v55 = vsel %vm2990_vm7, 1, %v13267_v40  ;;  %v2992_v25 = vadd.s32 %v2986_v52, %v2982_v29  ;;  %v10716_v7 = vmul.u32 %v3003_v5, %v2978_v21 }
 0x36f   : > { %v2753_v62 = vadd.f32 -0.4999988, %v2752_v60  ;;  %v2760_v50 = vadd.f32 -0.16666654, %v2759_v12  ;;  %v2880_v23 = vsel %vm2878_vm5, %v2879_v54, %v10705_v16  ;;  %v2993_v33 = vadd.s32 %v2991_v55, %v2985_v3 }
 0x370   : > { %vm2767_vm0 = vcmp.eq.s32.totalorder %v10690_v10, 0  ;;  %vm2770_vm13 = vcmp.eq.s32.totalorder %v10690_v10, 2  ;;  %v2881_v45 = vclz %v2880_v23  ;;  %v2899_v43 = vsub.s32 4, %v10684_v6 }
 0x371   : > { %v3004_v47 = vmul.u32 %v3002_v2, %v2978_v21  ;;  %v3006_v11 = vmul.u32 %v3002_v2, %v2979_v36  ;;  %v2754_v34 = vmul.f32 %v2753_v62, %v2749_v32  ;;  %v2761_v46 = vmul.f32 %v2760_v50, %v2749_v32 }
 0x372   : > { %vm2766_vm10 = vcmp.lt.s32.totalorder %v10690_v10, 2  ;;  %v2987_v29 = vshrl.u32 %v10692_v0, 16  ;;  %vm2994_vm14 = vc.u32 %v2992_v25, %v2988_v38  ;;  %vm2764_vm3 = vweird.f32 %v13486_v27  ;;  %v13525_v27 = vld [vmem:[#allocation115_spill] sm:$0xff] }
 0x373   : > { %v6647_v52 = vadd.s32 4294967294, %v2881_v45  ;;  %v2989_v57 = vshrl.u32 %v10694_v41, 16  ;;  %v2995_v58 = vsel %vm2994_vm14, 1, %v13267_v40  ;;  %v3008_v3 = vshll.u32 %v10716_v7, 16 }
 0x374   : > { %v2755_v60 = vadd.f32 1.0, %v2754_v34  ;;  %v2762_v12 = vadd.f32 1.0, %v2761_v46  ;;  %v2997_v21 = vadd.s32 %v2995_v58, %v2993_v33  ;;  %v3007_v2 = vmul.u32 %v3003_v5, %v2979_v36 }
 0x375   : > { %vm6648_vm12 = vcmp.lt.s32.totalorder %v6647_v52, 0  ;;  %v3010_v32 = vshll.u32 %v3006_v11, 16  ;;  %vm3012_vm8 = vc.u32 %v3004_v47, %v3008_v3  ;;  %v3014_v54 = vadd.s32 %v3008_v3, %v3004_v47 }
 0x376   : > { %v2763_v0 = vmul.f32 %v2762_v12, %v10678_v35  ;;  %v2771_v38 = vxor.u32 2147483648, %v2755_v60  ;;  %v2884_v55 = vsel %vm6648_vm12, 0, %v6647_v52  ;;  %v10732_v41 = vsel %vm2777_vm4, %v2899_v43, %v10684_v6 }
 0x377   : > { %v2885_v25 = vsub.s32 32, %v2884_v55  ;;  %v2886_v62 = vshll.u32 %v10705_v16, %v2884_v55  ;;  %v2889_v50 = vsub.s32 4294967266, %v2884_v55  ;;  %v3013_v23 = vsel %vm3012_vm8, 1, %v13267_v40 }
 0x378   : > { %vm13059_vm2 = vcmp.lt.s32.totalorder %v10225_v28, 1  ;;  %v2768_v36 = vxor.u32 2147483648, %v2763_v0  ;;  %v2998_v5 = vadd.s32 %v2997_v21, %v2987_v29  ;;  %v3009_v33 = vshrl.u32 %v10716_v7, 16 }
 0x379   : > { %v3015_v35 = vadd.s32 %v3013_v23, %v3007_v2  ;;  %v13522_v45 = vand.u32 2147483647, %v13497_v56  ;;  %v2887_v6 = vshrl.u32 %v10696_v59, %v2885_v25  ;;  %v2890_v43 = vadd.s32 127, %v2889_v50 }
 0x37a   : > { %v3011_v16 = vshrl.u32 %v3006_v11, 16  ;;  %vm3016_vm5 = vc.u32 %v3014_v54, %v3010_v32  ;;  %v2769_v34 = vsel %vm2767_vm0, %v2755_v60, %v2768_v36  ;;  %v2772_v46 = vsel %vm2770_vm13, %v2771_v38, %v2763_v0  ;;  %v6007_v60 = vld [vmem:[%s12698_s5] sm:$0xff]  ;;  %v580_v36 = vpop.f32.mrf.mxu3 }
 0x37b   : > { %vm10740_vm7 = vcmp.le.f32.partialorder %v13522_v45, 0.7853982  ;;  %v3017_v7 = vsel %vm3016_vm5, 1, %v13267_v40  ;;  %v3090_v29 = vand.u32 8388607, %v13053_v42  ;;  %v2773_v52 = vsel %vm2766_vm10, %v2769_v34, %v2772_v46  ;;  %6127 = vmatpush.msrb.mxu3 %v6007_v60  ;;  %v13529_v34 = vld [vmem:[#allocation123_spill] sm:$0xff] }
 0x37c   : > { %v2888_v58 = vor.u32 %v2887_v6, %v2886_v62  ;;  %v2891_v3 = vshll.u32 %v2890_v43, 23  ;;  %v3019_v59 = vadd.s32 %v3017_v7, %v3015_v35  ;;  %v2774_v11 = vsel %vm2764_vm3, nan, %v2773_v52  ;;  %v13526_v62 = vld [vmem:[#allocation118_spill] sm:$0xff]  ;;  %v13527_v35 = vld [vmem:[#allocation121_spill] sm:$0xff] }
 0x37d   : > { %v10759_v12 = vadd.s32 %v2998_v5, %v2989_v57  ;;  %v10761_v21 = vadd.s32 %v3014_v54, %v3010_v32  ;;  %v3022_v2 = vmul.u32 %v10643_v8, %v10713_v17  ;;  %6746 = vmatmul.msk.f32.gmra.mxu2 %vm5797_vm11, %v2774_v11  ;;  %v3091_v55 = vor.u32 8388608, %v3090_v29  ;;  %v6859_v52 = vld [vmem:[%s12695_s2] ss:$0 sm:$0xff] }
 0x37e   : > { %v2892_v10 = vor.u32 4788187, %v2891_v3  ;;  %v2895_v0 = vcvt.s32.f32 %v2888_v58  ;;  %v3020_v38 = vadd.s32 %v3019_v59, %v3009_v33  ;;  %v3100_v25 = vshll.u32 %v13182_v9, %v13525_v27 }
 0x37f   : > { %v3101_v50 = vshrl.u32 %v13184_v19, %v13526_v62  ;;  %v3103_v57 = vshll.u32 %v13184_v19, %v13525_v27  ;;  %v3104_v32 = vshrl.u32 %v13185_v14, %v13526_v62  ;;  %v3106_v54 = vshll.u32 %v13185_v14, %v13525_v27 }
 0x380   : > { %v2893_v8 = vand.u32 2147483647, %v2892_v10  ;;  %v3021_v17 = vadd.s32 %v3020_v38, %v3011_v16  ;;  %v3107_v23 = vshrl.u32 %v13092_v37, %v13526_v62  ;;  %vm3024_vm0 = vc.u32 %v10759_v12, %v10761_v21  ;;  %v13528_v16 = vld [vmem:[#allocation133_spill] sm:$0xff] }
 0x381   : > { %v3102_v5 = vor.u32 %v3101_v50, %v3100_v25  ;;  %v3105_v33 = vor.u32 %v3104_v32, %v3103_v57  ;;  %vm3115_vm13 = vcmp.lt.s32.totalorder %v13527_v35, 1  ;;  %vm3117_vm10 = vcmp.lt.s32.totalorder %v13527_v35, 3  ;;  %v13532_v32 = vld [vmem:[#allocation132_spill] sm:$0xff] }
 0x382   : > { %v2896_v45 = vmul.f32 %v2895_v0, %v2893_v8  ;;  %v3025_v6 = vadd.s32 1, %v3021_v17  ;;  %v3108_v43 = vor.u32 %v3107_v23, %v3106_v54  ;;  %vm13060_vm14 = vcmp.lt.s32.totalorder %v10225_v28, 4 }
 0x383   : > { %vm3116_vm3 = vcmp.lt.s32.totalorder %v13527_v35, 2  ;;  %v3129_v46 = vsel %vm3117_vm10, %v13529_v34, %v13528_v16  ;;  %v10788_v7 = vshll.u32 %v3091_v55, 8  ;;  %v10794_v29 = vsel %vm13059_vm2, %v10555_v24, %v10647_v26 }
 0x384   : > { %v10799_v58 = vsub.f32 %v580_v36, %v6859_v52  ;;  %v2897_v3 = vxor.u32 2147483648, %v2896_v45  ;;  %v3026_v59 = vsel %vm3024_vm0, %v3025_v6, %v3021_v17  ;;  %v2902_v11 = vsel %vm10740_vm7, 0, %v10732_v41 }
 0x385   : > { %v3027_v60 = vadd.s32 %v3026_v59, %v3022_v2  ;;  %v3099_v10 = vshrl.u32 %v13182_v9, %v13526_v62  ;;  %v3127_v0 = vsel %vm3115_vm13, %v3105_v33, %v3108_v43  ;;  %vm13531_vm12 = vcmp.lt.s32.totalorder %v13527_v35, 4 }
 0x386   : > { %13530 = vst [vmem:[#allocation35_spill] sm:$0xff] %v10799_v58  ;;  %v2898_v38 = vsel %vm2777_vm4, %v2897_v3, %v2896_v45  ;;  %v3120_v55 = vsel %vm13531_vm12, %v3108_v43, 2102212464  ;;  %v3123_v27 = vsel %vm3115_vm13, %v3102_v5, %v3105_v33  ;;  %v3130_v25 = vsel %vm3116_vm3, %v3127_v0, %v3129_v46 }
 0x387   : > { %v10822_v41 = vsel %vm10740_vm7, %v13497_v56, %v2898_v38  ;;  %v3028_v2 = vadd.s32 536870912, %v3027_v60  ;;  %v3132_v62 = vand.u32 65535, %v10788_v7  ;;  %v10826_v50 = vshrl.u32 %v10788_v7, 16 }
 0x388   : > { %v2903_v57 = vmul.f32 %v10822_v41, %v10822_v41  ;;  %v3125_v8 = vsel %vm3117_vm10, %v3108_v43, %v13532_v32  ;;  %v3134_v17 = vand.u32 65535, %v3130_v25  ;;  %v3135_v54 = vshrl.u32 %v3130_v25, 16 }
 0x389   : > { %v10836_v47 = vsel %vm13060_vm14, %v10658_v53, 920167782  ;;  %v5396_v23 = vand.u32 2139095040, %v10799_v58  ;;  %v10839_v36 = vand.u32 3, %v2902_v11  ;;  %v10841_v45 = vshrl.u32 %v3028_v2, 30 }
 0x38a   : > { %v2904_v6 = vmul.f32 -0.001358992, %v2903_v57  ;;  %v2911_v16 = vmul.f32 -0.00019511016, %v2903_v57  ;;  %v3119_v34 = vsel %vm3115_vm13, %v3099_v10, %v3102_v5  ;;  %v3137_v46 = vmul.u32 %v3135_v54, %v3132_v62 }
 0x38b   : > { %v3030_v43 = vshll.u32 %v10841_v45, 30  ;;  %v3121_v52 = vsel %vm3117_vm10, %v3105_v33, %v3120_v55  ;;  %v3126_v3 = vsel %vm3116_vm3, %v3123_v27, %v3125_v8  ;;  %v3138_v59 = vmul.u32 %v3134_v17, %v10826_v50 }
 0x38c   : > { %v2905_v11 = vadd.f32 0.041655596, %v2904_v6  ;;  %v2912_v0 = vadd.f32 0.008332121, %v2911_v16  ;;  %v3136_v38 = vmul.u32 %v3134_v17, %v3132_v62  ;;  %v3140_v25 = vshll.u32 %v3137_v46, 16 }
 0x38d   : > { %v10852_v32 = vshrl.u32 %v5396_v23, 23  ;;  %v3023_v5 = vadd.s32 %v10761_v21, %v10759_v12  ;;  %v10856_v10 = vsub.s32 %v3027_v60, %v3030_v43  ;;  %v10860_v55 = vsel %vm3116_vm3, %v3119_v34, %v3121_v52  ;;  %v13533_v34 = vld [vmem:[#allocation105_spill] sm:$0xff] }
 0x38e   : > { %v2906_v42 = vmul.f32 %v2905_v11, %v2903_v57  ;;  %v2913_v33 = vmul.f32 %v2912_v0, %v2903_v57  ;;  %v3157_v27 = vshrl.u32 %v3126_v3, 16  ;;  %vm2924_vm4 = vcmp.eq.s32.totalorder %v10839_v36, 2 }
 0x38f   : > { %vm3032_vm8 = vcmp.lt.s32.totalorder %v10856_v10, 0  ;;  %v3033_v8 = vsub.s32 0, %v10856_v10  ;;  %v3139_v17 = vmul.u32 %v3135_v54, %v10826_v50  ;;  %v3142_v23 = vshll.u32 %v3138_v59, 16 }
 0x390   : > { %v2907_v6 = vadd.f32 -0.4999988, %v2906_v42  ;;  %v2914_v12 = vadd.f32 -0.16666654, %v2913_v33  ;;  %vm3144_vm7 = vc.u32 %v3136_v38, %v3140_v25  ;;  %v3146_v21 = vadd.s32 %v3140_v25, %v3136_v38 }
 0x391   : > { %vm2921_vm5 = vcmp.eq.s32.totalorder %v10839_v36, 0  ;;  %v3034_v35 = vsel %vm3032_vm8, %v3033_v8, %v10856_v10  ;;  %v3141_v60 = vshrl.u32 %v3137_v46, 16  ;;  %v3156_v16 = vand.u32 65535, %v3126_v3 }
 0x392   : > { %v13055_v43 = vand.u32 2147483647, %v13533_v34  ;;  %v2908_v52 = vmul.f32 %v2907_v6, %v2903_v57  ;;  %v2915_v11 = vmul.f32 %v2914_v12, %v2903_v57  ;;  %vm2920_vm0 = vcmp.lt.s32.totalorder %v10839_v36, 2 }
 0x393   : > { %v3035_v0 = vclz %v3034_v35  ;;  %v3145_v54 = vsel %vm3144_vm7, 1, %v13267_v40  ;;  %vm2918_vm13 = vweird.f32 %v13497_v56  ;;  %v3143_v42 = vshrl.u32 %v3138_v59, 16 }
 0x394   : > { %v3147_v33 = vadd.s32 %v3145_v54, %v3139_v17  ;;  %vm3148_vm10 = vc.u32 %v3146_v21, %v3142_v23  ;;  %v3159_v38 = vmul.u32 %v3157_v27, %v3132_v62  ;;  %v2909_v25 = vadd.f32 1.0, %v2908_v52 }
 0x395   : > { %v2916_v22 = vadd.f32 1.0, %v2915_v11  ;;  %v6650_v8 = vadd.s32 4294967294, %v3035_v0  ;;  %v3149_v46 = vsel %vm3148_vm10, 1, %v13267_v40  ;;  %v3158_v61 = vmul.u32 %v3156_v16, %v3132_v62 }
 0x396   : > { %v3151_v3 = vadd.s32 %v3149_v46, %v3147_v33  ;;  %v3160_v57 = vmul.u32 %v3156_v16, %v10826_v50  ;;  %v3162_v6 = vshll.u32 %v3159_v38, 16  ;;  %v2925_v35 = vxor.u32 2147483648, %v2909_v25 }
 0x397   : > { %v2917_v12 = vmul.f32 %v2916_v22, %v10822_v41  ;;  %vm6651_vm3 = vcmp.lt.s32.totalorder %v6650_v8, 0  ;;  %v3161_v2 = vmul.u32 %v3157_v27, %v10826_v50  ;;  %v3163_v23 = vshrl.u32 %v3159_v38, 16 }
 0x398   : > { %v3038_v59 = vsel %vm6651_vm3, 0, %v6650_v8  ;;  %v3152_v17 = vadd.s32 %v3151_v3, %v3141_v60  ;;  %v3164_v21 = vshll.u32 %v3160_v57, 16  ;;  %vm3166_vm12 = vc.u32 %v3158_v61, %v3162_v6 }
 0x399   : > { %v2922_v52 = vxor.u32 2147483648, %v2917_v12  ;;  %v2926_v11 = vsel %vm2924_vm4, %v2925_v35, %v2917_v12  ;;  %v3039_v0 = vsub.s32 32, %v3038_v59  ;;  %v3040_v62 = vshll.u32 %v10856_v10, %v3038_v59  ;;  %v13534_v35 = vld [vmem:[#allocation137_spill] sm:$0xff] }
 0x39a   : > { %v3043_v54 = vsub.s32 4294967266, %v3038_v59  ;;  %v10879_v16 = vadd.s32 %v3152_v17, %v3143_v42  ;;  %v3168_v22 = vadd.s32 %v3162_v6, %v3158_v61  ;;  %vm2931_vm8 = vcmp.lt.s32.totalorder %v13509_v13, 0 }
 0x39b   : > { %v2923_v41 = vsel %vm2921_vm5, %v2909_v25, %v2922_v52  ;;  %v3041_v50 = vshrl.u32 %v3023_v5, %v3039_v0  ;;  %v3167_v27 = vsel %vm3166_vm12, 1, %v13267_v40  ;;  %v3244_v60 = vand.u32 8388607, %v13055_v43 }
 0x39c   : > { %v2927_v33 = vsel %vm2920_vm0, %v2923_v41, %v2926_v11  ;;  %v3044_v10 = vadd.s32 127, %v3043_v54  ;;  %v3169_v38 = vadd.s32 %v3167_v27, %v3161_v2  ;;  %vm3170_vm4 = vc.u32 %v3168_v22, %v3164_v21  ;;  %v13536_v54 = vld [vmem:[#allocation143_spill] sm:$0xff] }
 0x39d   : > { %v2928_v61 = vsel %vm2918_vm13, nan, %v2927_v33  ;;  %v3042_v42 = vor.u32 %v3041_v50, %v3040_v62  ;;  %v3171_v25 = vsel %vm3170_vm4, 1, %v13267_v40  ;;  %v10892_v8 = vadd.s32 %v3168_v22, %v3164_v21  ;;  %v13535_v21 = vld [vmem:[#allocation139_spill] sm:$0xff]  ;;  %v13537_v33 = vld [vmem:[#allocation164_spill] sm:$0xff] }
 0x39e   : > { %6747 = vmatmul.msk.f32.gmra.mxu2 %vm5797_vm11, %v2928_v61  ;;  %v3045_v5 = vshll.u32 %v3044_v10, 23  ;;  %v3165_v46 = vshrl.u32 %v3160_v57, 16  ;;  %v3173_v3 = vadd.s32 %v3171_v25, %v3169_v38  ;;  %v3176_v36 = vmul.u32 %v10788_v7, %v10860_v55  ;;  %v13538_v10 = vld [vmem:[#allocation154_spill] sm:$0xff] }
 0x39f   : > { %v3049_v6 = vcvt.s32.f32 %v3042_v42  ;;  %v3053_v2 = vsub.s32 4, %v10841_v45  ;;  %v3245_v12 = vor.u32 8388608, %v3244_v60  ;;  %v3254_v56 = vshll.u32 %v13182_v9, %v13534_v35 }
 0x3a0   : > { %vm13065_vm7 = vcmp.lt.s32.totalorder %v10225_v28, 3  ;;  %v3046_v59 = vor.u32 4788187, %v3045_v5  ;;  %v3174_v17 = vadd.s32 %v3173_v3, %v3163_v23  ;;  %v3255_v52 = vshrl.u32 %v13184_v19, %v13535_v21 }
 0x3a1   : > { %v3257_v57 = vshll.u32 %v13184_v19, %v13534_v35  ;;  %vm3178_vm5 = vc.u32 %v10879_v16, %v10892_v8  ;;  %v3258_v7 = vshrl.u32 %v13185_v14, %v13535_v21  ;;  %v3260_v55 = vshll.u32 %v13185_v14, %v13534_v35 }
 0x3a2   : > { %v3261_v11 = vshrl.u32 %v13092_v37, %v13535_v21  ;;  %v3047_v0 = vand.u32 2147483647, %v3046_v59  ;;  %v3175_v23 = vadd.s32 %v3174_v17, %v3165_v46  ;;  %v10913_v62 = vor.u32 %v3255_v52, %v3254_v56  ;;  %v13543_v17 = vld [vmem:[#allocation159_spill] sm:$0xff] }
 0x3a3   : > { %vm3269_vm0 = vcmp.lt.s32.totalorder %v13536_v54, 1  ;;  %v10916_v22 = vor.u32 %v3258_v7, %v3257_v57  ;;  %vm3271_vm13 = vcmp.lt.s32.totalorder %v13536_v54, 3  ;;  %v10921_v50 = vshll.u32 %v3245_v12, 8 }
 0x3a4   : > { %v10918_v41 = vor.u32 %v3261_v11, %v3260_v55  ;;  %v3050_v27 = vmul.f32 %v3049_v6, %v3047_v0  ;;  %v3179_v60 = vadd.s32 1, %v3175_v23  ;;  %vm3270_vm10 = vcmp.lt.s32.totalorder %v13536_v54, 2 }
 0x3a5   : > { %v3283_v38 = vsel %vm3271_vm13, %v13538_v10, %v13537_v33  ;;  %v10932_v61 = vsel %vm13059_vm2, %v10647_v26, %v10651_v30  ;;  %v13539_v42 = vand.u32 2147483647, %v10799_v58  ;;  %v13540_v5 = vand.u32 2147483647, %v13509_v13 }
 0x3a6   : > { %v3281_v3 = vsel %vm3269_vm0, %v10916_v22, %v10918_v41  ;;  %v3051_v6 = vxor.u32 2147483648, %v3050_v27  ;;  %v3054_v12 = vsel %vm2931_vm8, %v3053_v2, %v10841_v45  ;;  %v3180_v35 = vsel %vm3178_vm5, %v3179_v60, %v3175_v23 }
 0x3a7   : > { %v5400_v25 = vand.u32 8388607, %v13539_v42  ;;  %vm10938_vm3 = vcmp.le.f32.partialorder %v13540_v5, 0.7853982  ;;  %v3277_v56 = vsel %vm3269_vm0, %v10913_v62, %v10916_v22  ;;  %v3181_v59 = vadd.s32 %v3180_v35, %v3176_v36 }
 0x3a8   : > { %v3279_v52 = vsel %vm3271_vm13, %v10918_v41, %v13543_v17  ;;  %v3284_v57 = vsel %vm3270_vm10, %v3281_v3, %v3283_v38  ;;  %v3286_v45 = vand.u32 65535, %v10921_v50  ;;  %v6697_v2 = vadd.s32 4294967169, %v10852_v32 }
 0x3a9   : > { %v3052_v7 = vsel %vm2931_vm8, %v3051_v6, %v3050_v27  ;;  %v10967_v55 = vshrl.u32 %v10921_v50, 16  ;;  %v3288_v11 = vand.u32 65535, %v3284_v57  ;;  %v13544_v36 = vor.u32 %v10544_v39, %v10391_v48 }
 0x3aa   : > { %v10979_v23 = vsel %vm10938_vm3, %v13509_v13, %v3052_v7  ;;  %v3182_v32 = vadd.s32 536870912, %v3181_v59  ;;  %v3289_v60 = vshrl.u32 %v3284_v57, 16  ;;  %v3056_v27 = vsel %vm10938_vm3, 0, %v3054_v12 }
 0x3ab   : > { %v10974_v0 = vsel %vm13060_vm14, %v13544_v36, 1326507024  ;;  %v3057_v33 = vmul.f32 %v10979_v23, %v10979_v23  ;;  %v3280_v48 = vsel %vm3270_vm10, %v3277_v56, %v3279_v52  ;;  %v10988_v39 = vmul.u32 %v3288_v11, %v10967_v55 }
 0x3ac   : > { %v10994_v10 = vsel %vm13065_vm7, %v10651_v30, %v10836_v47  ;;  %v10996_v38 = vshrl.u32 %v3182_v32, 30  ;;  %v3290_v42 = vmul.u32 %v3288_v11, %v3286_v45  ;;  %v10998_v5 = vmul.u32 %v3289_v60, %v3286_v45 }
 0x3ad   : > { %v5401_v46 = vor.u32 8388608, %v5400_v25  ;;  %v11000_v3 = vadd.s32 1, %v6697_v2  ;;  %v3058_v6 = vmul.f32 -0.001358992, %v3057_v33  ;;  %v3065_v12 = vmul.f32 -0.00019511016, %v3057_v33 }
 0x3ae   : > { %v11002_v35 = vand.u32 3, %v3056_v27  ;;  %v3184_v56 = vshll.u32 %v10996_v38, 30  ;;  %v3294_v17 = vshll.u32 %v10998_v5, 16  ;;  %v3311_v52 = vshrl.u32 %v3280_v48, 16 }
 0x3af   : > { %v3059_v57 = vadd.f32 0.041655596, %v3058_v6  ;;  %v3066_v47 = vadd.f32 0.008332121, %v3065_v12  ;;  %v3253_v7 = vshrl.u32 %v13182_v9, %v13535_v21  ;;  %v3296_v11 = vshll.u32 %v10988_v39, 16 }
 0x3b0   : > { %v11009_v36 = vsub.s32 %v3181_v59, %v3184_v56  ;;  %vm3298_vm12 = vc.u32 %v3290_v42, %v3294_v17  ;;  %v3300_v25 = vadd.s32 %v3294_v17, %v3290_v42  ;;  %v3310_v2 = vand.u32 65535, %v3280_v48 }
 0x3b1   : > { %v11011_v32 = vshll.u32 %v5401_v46, 8  ;;  %v3060_v27 = vmul.f32 %v3059_v57, %v3057_v33  ;;  %v3067_v43 = vmul.f32 %v3066_v47, %v3057_v33  ;;  %v3293_v58 = vmul.u32 %v3289_v60, %v10967_v55 }
 0x3b2   : > { %v3177_v6 = vadd.s32 %v10892_v8, %v10879_v16  ;;  %vm3186_vm8 = vcmp.lt.s32.totalorder %v11009_v36, 0  ;;  %v3187_v21 = vsub.s32 0, %v11009_v36  ;;  %v3313_v12 = vmul.u32 %v3311_v52, %v3286_v45 }
 0x3b3   : > { %13545 = vst [vmem:[#allocation40_spill] sm:$0xff] %v11011_v32  ;;  %v3061_v26 = vadd.f32 -0.4999988, %v3060_v27  ;;  %v3068_v59 = vadd.f32 -0.16666654, %v3067_v43  ;;  %v3299_v56 = vsel %vm3298_vm12, 1, %v13267_v40  ;;  %vm11019_vm4 = vc.u32 %v3300_v25, %v3296_v11 }
 0x3b4   : > { %vm3075_vm5 = vcmp.eq.s32.totalorder %v11002_v35, 0  ;;  %vm3078_vm3 = vcmp.eq.s32.totalorder %v11002_v35, 2  ;;  %v3188_v60 = vsel %vm3186_vm8, %v3187_v21, %v11009_v36  ;;  %v3273_v16 = vsel %vm3269_vm0, %v3253_v7, %v10913_v62 }
 0x3b5   : > { %v3312_v8 = vmul.u32 %v3310_v2, %v3286_v45  ;;  %v11030_v42 = vmul.u32 %v3310_v2, %v10967_v55  ;;  %v3062_v43 = vmul.f32 %v3061_v26, %v3057_v33  ;;  %v3069_v46 = vmul.f32 %v3068_v59, %v3057_v33 }
 0x3b6   : > { %vm3074_vm12 = vcmp.lt.s32.totalorder %v11002_v35, 2  ;;  %v3189_v17 = vclz %v3188_v60  ;;  %v3301_v57 = vadd.s32 %v3299_v56, %v3293_v58  ;;  %vm3072_vm2 = vweird.f32 %v13509_v13 }
 0x3b7   : > { %vm3085_vm14 = vcmp.lt.s32.totalorder %v13521_v44, 0  ;;  %vm13548_vm8 = vcmp.lt.s32.totalorder %v13536_v54, 4  ;;  %v3295_v62 = vshrl.u32 %v10998_v5, 16  ;;  %v3303_v45 = vsel %vm11019_vm4, 1, %v13267_v40  ;;  %v13553_v54 = vld [vmem:[#allocation11_spill] sm:$0xff] }
 0x3b8   : > { %v3274_v47 = vsel %vm13548_vm8, %v10918_v41, 2102212464  ;;  %v3316_v26 = vshll.u32 %v3313_v12, 16  ;;  %v3063_v33 = vadd.f32 1.0, %v3062_v43  ;;  %v3070_v7 = vadd.f32 1.0, %v3069_v46 }
 0x3b9   : > { %v6653_v11 = vadd.s32 4294967294, %v3189_v17  ;;  %v3305_v25 = vadd.s32 %v3303_v45, %v3301_v57  ;;  %v3315_v58 = vmul.u32 %v3311_v52, %v10967_v55  ;;  %v3318_v2 = vshll.u32 %v11030_v42, 16 }
 0x3ba   : > { %vm3320_vm0 = vc.u32 %v3312_v8, %v3316_v26  ;;  %v3322_v27 = vadd.s32 %v3316_v26, %v3312_v8  ;;  %v3071_v21 = vmul.f32 %v3070_v7, %v10979_v23  ;;  %v3079_v41 = vxor.u32 2147483648, %v3063_v33 }
 0x3bb   : > { %vm6654_vm8 = vcmp.lt.s32.totalorder %v6653_v11, 0  ;;  %v3275_v5 = vsel %vm3271_vm13, %v10916_v22, %v3274_v47  ;;  %v3297_v56 = vshrl.u32 %v10988_v39, 16  ;;  %v3321_v48 = vsel %vm3320_vm0, 1, %v13267_v40 }
 0x3bc   : > { %v3192_v59 = vsel %vm6654_vm8, 0, %v6653_v11  ;;  %vm3324_vm4 = vc.u32 %v3322_v27, %v3318_v2  ;;  %v3076_v60 = vxor.u32 2147483648, %v3071_v21  ;;  %v3306_v43 = vadd.s32 %v3305_v25, %v3295_v62 }
 0x3bd   : > { %v3193_v55 = vsub.s32 32, %v3192_v59  ;;  %v3194_v52 = vshll.u32 %v11009_v36, %v3192_v59  ;;  %v3197_v8 = vsub.s32 4294967266, %v3192_v59  ;;  %v3317_v46 = vshrl.u32 %v3313_v12, 16 }
 0x3be   : > { %v3323_v23 = vadd.s32 %v3321_v48, %v3315_v58  ;;  %v3325_v17 = vsel %vm3324_vm4, 1, %v13267_v40  ;;  %v3077_v57 = vsel %vm3075_vm5, %v3063_v33, %v3076_v60  ;;  %v3080_v22 = vsel %vm3078_vm3, %v3079_v41, %v3071_v21  ;;  %v13549_v58 = vld [vmem:[#allocation113_spill] sm:$0xff]  ;;  %v5911_v21 = vpop.f32.mrf.mxu2  ;;  %v13555_v48 = vld [vmem:[#allocation127_spill] sm:$0xff]  ;;  %v13556_v60 = vld [vmem:[#allocation122_spill] sm:$0xff] }
 0x3bf   : > { %v3195_v39 = vshrl.u32 %v3177_v6, %v3193_v55  ;;  %v3207_v47 = vsub.s32 4, %v10996_v38  ;;  %v3081_v45 = vsel %vm3074_vm12, %v3077_v57, %v3080_v22  ;;  %v3198_v26 = vadd.s32 127, %v3197_v8  ;;  %v13557_v55 = vld [vmem:[#allocation129_spill] sm:$0xff] }
 0x3c0   : > { %v3319_v36 = vshrl.u32 %v11030_v42, 16  ;;  %v3327_v62 = vadd.s32 %v3325_v17, %v3323_v23  ;;  %v3082_v12 = vsel %vm3072_vm2, nan, %v3081_v45  ;;  %v11062_v11 = vadd.s32 %v3306_v43, %v3297_v56 }
 0x3c1   : > { %v3196_v7 = vor.u32 %v3195_v39, %v3194_v52  ;;  %v11064_v33 = vadd.s32 %v3322_v27, %v3318_v2  ;;  %6748 = vmatmul.msk.f32.gmra.mxu2 %vm5797_vm11, %v3082_v12  ;;  %v3199_v6 = vshll.u32 %v3198_v26, 23  ;;  %v3276_v25 = vsel %vm3270_vm10, %v3273_v16, %v3275_v5  ;;  %v5701_v27 = vpop.f32.mrf.mxu1  ;;  %v13558_v52 = vld [vmem:[#allocation125_spill] sm:$0xff]  ;;  %v13560_v26 = vld [vmem:[#allocation107_spill] sm:$0xff] }
 0x3c2   : > { %v3328_v35 = vadd.s32 %v3327_v62, %v3317_v46  ;;  %vm3424_vm13 = vcmp.lt.s32.totalorder %v13549_v58, 2  ;;  %vm5404_vm5 = vcmp.gt.s32.totalorder %v11000_v3, 0  ;;  %v13550_v42 = vand.u32 2147483647, %v13521_v44 }
 0x3c3   : > { %v3208_v2 = vsel %vm3085_vm14, %v3207_v47, %v10996_v38  ;;  %vm6015_vm2 = vcmask 261120   ;;  %vm13554_vm10 = vcmask 31744   ;;  %v3200_v16 = vor.u32 4788187, %v3199_v6 }
 0x3c4   : > { %vm11073_vm3 = vcmp.le.f32.partialorder %v13550_v42, 0.7853982  ;;  %6725 = vmatmul.msk.f32.gmra.mxu1 %vm13554_vm10, %v13553_v54  ;;  %v3203_v41 = vcvt.s32.f32 %v3196_v7  ;;  %v5912_v5 = vadd.f32 %v5911_v21, %v5701_v27  ;;  %v3329_v59 = vadd.s32 %v3328_v35, %v3319_v36  ;;  %v13561_v7 = vld [vmem:[#allocation108_spill] sm:$0xff]  ;;  %v13562_v35 = vld [vmem:[#allocation110_spill] sm:$0xff] }
 0x3c5   : > { %v3330_v56 = vmul.u32 %v10921_v50, %v3276_v25  ;;  %vm3332_vm12 = vc.u32 %v11062_v11, %v11064_v33  ;;  %v3434_v38 = vsel %vm3424_vm13, %v13556_v60, %v13555_v48  ;;  %v3438_v43 = vsel %vm3424_vm13, %v13558_v52, %v13557_v55 }
 0x3c6   : > { %v3201_v8 = vand.u32 2147483647, %v3200_v16  ;;  %6765 = vmatmul.msk.f32.vlgmr.msrb.gmra.mxu3 %vm6015_vm2, %v5912_v5  ;;  %v3333_v46 = vadd.s32 1, %v3329_v59  ;;  %v3442_v23 = vand.u32 65535, %v3438_v43  ;;  %v3443_v17 = vshrl.u32 %v3438_v43, 16  ;;  %v13563_v16 = vld [vmem:[#allocation120_spill] sm:$0xff] }
 0x3c7   : > { %v11098_v50 = vsel %vm13065_vm7, %v10658_v53, %v10974_v0  ;;  %v11101_v57 = vand.u32 65535, %v11011_v32  ;;  %v3464_v22 = vand.u32 65535, %v3434_v38  ;;  %v3465_v39 = vshrl.u32 %v3434_v38, 16 }
 0x3c8   : > { %v3204_v47 = vmul.f32 %v3203_v41, %v3201_v8  ;;  %v3334_v45 = vsel %vm3332_vm12, %v3333_v46, %v3329_v59  ;;  %v3444_v36 = vmul.u32 %v3442_v23, %v13560_v26  ;;  %v3445_v62 = vmul.u32 %v3443_v17, %v13560_v26 }
 0x3c9   : > { %13559 = vst [vmem:[#allocation30_spill] sm:$0xff] %v11101_v57  ;;  %v11108_v12 = vsel %vm5404_vm5, %v11000_v3, 0  ;;  %v3210_v53 = vsel %vm11073_vm3, 0, %v3208_v2  ;;  %v3335_v0 = vadd.s32 %v3334_v45, %v3330_v56  ;;  %v3446_v6 = vmul.u32 %v3442_v23, %v13561_v7 }
 0x3ca   : > { %v3205_v25 = vxor.u32 2147483648, %v3204_v47  ;;  %v3407_v42 = vshrl.u32 %v13182_v9, %v13562_v35  ;;  %v3447_v27 = vmul.u32 %v3443_v17, %v13561_v7  ;;  %v3448_v21 = vshll.u32 %v3445_v62, 16  ;;  %v13567_v35 = vld [vmem:[#allocation119_spill] sm:$0xff] }
 0x3cb   : > { %v3336_v54 = vadd.s32 536870912, %v3335_v0  ;;  %vm13564_vm0 = vcmp.lt.s32.totalorder %v13549_v58, 4  ;;  %v3450_v3 = vshll.u32 %v3446_v6, 16  ;;  %v11120_v5 = vmul.u32 %v3465_v39, %v13560_v26 }
 0x3cc   : > { %v3428_v41 = vsel %vm13564_vm0, %v13563_v16, 2102212464  ;;  %v3206_v2 = vsel %vm3085_vm14, %v3205_v25, %v3204_v47  ;;  %vm3452_vm8 = vc.u32 %v3444_v36, %v3448_v21  ;;  %v3454_v59 = vadd.s32 %v3448_v21, %v3444_v36 }
 0x3cd   : > { %v3466_v56 = vmul.u32 %v3464_v22, %v13560_v26  ;;  %v11128_v48 = vsel %vm11073_vm3, %v13521_v44, %v3206_v2  ;;  %v11130_v60 = vshrl.u32 %v3336_v54, 30  ;;  %v3453_v38 = vsel %vm3452_vm8, 1, %v13267_v40  ;;  %v13565_v26 = vld [vmem:[#allocation117_spill] sm:$0xff] }
 0x3ce   : > { %v11134_v55 = vmul.u32 %v3464_v22, %v13561_v7  ;;  %v3211_v52 = vmul.f32 %v11128_v48, %v11128_v48  ;;  %v3455_v43 = vadd.s32 %v3453_v38, %v3447_v27  ;;  %vm3456_vm14 = vc.u32 %v3454_v59, %v3450_v3 }
 0x3cf   : > { %v3470_v8 = vshll.u32 %v11120_v5, 16  ;;  %v11139_v46 = vand.u32 3, %v3210_v53  ;;  %v3338_v13 = vshll.u32 %v11130_v60, 30  ;;  %v3449_v23 = vshrl.u32 %v3445_v62, 16 }
 0x3d0   : > { %v3457_v17 = vsel %vm3456_vm14, 1, %v13267_v40  ;;  %v3212_v47 = vmul.f32 -0.001358992, %v3211_v52  ;;  %v3219_v45 = vmul.f32 -0.00019511016, %v3211_v52  ;;  %vm13566_vm4 = vcmp.lt.s32.totalorder %v13549_v58, 1 }
 0x3d1   : > { %v3427_v22 = vsel %vm13566_vm4, %v3407_v42, %v13565_v26  ;;  %v3459_v36 = vadd.s32 %v3457_v17, %v3455_v43  ;;  %v11146_v25 = vsub.s32 %v3335_v0, %v3338_v13  ;;  %vm13568_vm5 = vcmp.lt.s32.totalorder %v13549_v58, 3  ;;  %v13569_v43 = vld [vmem:[#allocation135_spill] sm:$0xff] }
 0x3d2   : > { %v3429_v27 = vsel %vm13568_vm5, %v13567_v35, %v3428_v41  ;;  %v3451_v53 = vshrl.u32 %v3446_v6, 16  ;;  %vm3474_vm3 = vc.u32 %v3466_v56, %v3470_v8  ;;  %v3213_v21 = vadd.f32 0.041655596, %v3212_v47  ;;  %v13570_v35 = vld [vmem:[#allocation101_spill] sm:$0xff] }
 0x3d3   : > { %v3220_v54 = vadd.f32 0.008332121, %v3219_v45  ;;  %v3469_v62 = vmul.u32 %v3465_v39, %v13561_v7  ;;  %v3472_v16 = vshll.u32 %v11134_v55, 16  ;;  %vm3340_vm10 = vcmp.lt.s32.totalorder %v11146_v25, 0 }
 0x3d4   : > { %v3341_v3 = vsub.s32 0, %v11146_v25  ;;  %v3460_v42 = vadd.s32 %v3459_v36, %v3449_v23  ;;  %v3475_v0 = vsel %vm3474_vm3, 1, %v13267_v40  ;;  %v11157_v2 = vand.u32 31, %v11108_v12 }
 0x3d5   : > { %v3214_v59 = vmul.f32 %v3213_v21, %v3211_v52  ;;  %v3221_v41 = vmul.f32 %v3220_v54, %v3211_v52  ;;  %v3476_v6 = vadd.s32 %v3470_v8, %v3466_v56  ;;  %vm3232_vm12 = vcmp.eq.s32.totalorder %v11139_v46, 2 }
 0x3d6   : > { %v3331_v39 = vadd.s32 %v11064_v33, %v11062_v11  ;;  %v3342_v7 = vsel %vm3340_vm10, %v3341_v3, %v11146_v25  ;;  %v3430_v38 = vsel %vm3424_vm13, %v3427_v22, %v3429_v27  ;;  %vm3578_vm0 = vcmp.lt.s32.totalorder %v13569_v43, 2 }
 0x3d7   : > { %v3215_v13 = vadd.f32 -0.4999988, %v3214_v59  ;;  %v3222_v23 = vadd.f32 -0.16666654, %v3221_v41  ;;  %v3343_v17 = vclz %v3342_v7  ;;  %v3477_v47 = vadd.s32 %v3475_v0, %v3469_v62  ;;  %v13573_v62 = vld [vmem:[#allocation146_spill] sm:$0xff]  ;;  %v13575_v0 = vld [vmem:[#allocation148_spill] sm:$0xff] }
 0x3d8   : > { %vm3229_vm8 = vcmp.eq.s32.totalorder %v11139_v46, 0  ;;  %v11167_v45 = vadd.s32 %v3460_v42, %v3451_v53  ;;  %v3471_v56 = vshrl.u32 %v11120_v5, 16  ;;  %vm3478_vm14 = vc.u32 %v3476_v6, %v3472_v16  ;;  %v13571_v53 = vld [vmem:[#allocation126_spill] sm:$0xff] }
 0x3d9   : > { %v11170_v8 = vadd.s32 %v3476_v6, %v3472_v16  ;;  %v3216_v11 = vmul.f32 %v3215_v13, %v3211_v52  ;;  %v3223_v33 = vmul.f32 %v3222_v23, %v3211_v52  ;;  %vm3228_vm4 = vcmp.lt.s32.totalorder %v11139_v46, 2  ;;  %v13572_v52 = vld [vmem:[#allocation147_spill] sm:$0xff]  ;;  %v5914_v46 = vpop.f32.mrf.mxu2 }
 0x3da   : > { %v6656_v58 = vadd.s32 4294967294, %v3343_v17  ;;  %v3479_v26 = vsel %vm3478_vm14, 1, %v13267_v40  ;;  %vm3226_vm13 = vweird.f32 %v13521_v44  ;;  %v3473_v22 = vshrl.u32 %v11134_v55, 16  ;;  %v13574_v55 = vld [vmem:[#allocation150_spill] sm:$0xff] }
 0x3db   : > { %v3481_v36 = vadd.s32 %v3479_v26, %v3477_v47  ;;  %v3484_v27 = vmul.u32 %v13570_v35, %v3430_v38  ;;  %v11179_v5 = vshrl.u32 %v13182_v9, %v13571_v53  ;;  %v3217_v21 = vadd.f32 1.0, %v3216_v11  ;;  %v13576_v35 = vld [vmem:[#allocation134_spill] sm:$0xff] }
 0x3dc   : > { %v3224_v54 = vadd.f32 1.0, %v3223_v33  ;;  %vm6657_vm5 = vcmp.lt.s32.totalorder %v6656_v58, 0  ;;  %v3588_v16 = vsel %vm3578_vm0, %v13573_v62, %v13572_v52  ;;  %vm3486_vm3 = vc.u32 %v11167_v45, %v11170_v8 }
 0x3dd   : > { %v3346_v3 = vsel %vm6657_vm5, 0, %v6656_v58  ;;  %v3482_v42 = vadd.s32 %v3481_v36, %v3471_v56  ;;  %v3592_v59 = vsel %vm3578_vm0, %v13575_v0, %v13574_v55  ;;  %v3233_v6 = vxor.u32 2147483648, %v3217_v21 }
 0x3de   : > { %v3225_v41 = vmul.f32 %v3224_v54, %v11128_v48  ;;  %v3347_v7 = vsub.s32 32, %v3346_v3  ;;  %v3348_v38 = vshll.u32 %v11146_v25, %v3346_v3  ;;  %v3351_v13 = vsub.s32 4294967266, %v3346_v3  ;;  %v13577_v54 = vld [vmem:[#allocation144_spill] sm:$0xff] }
 0x3df   : > { %v3483_v23 = vadd.s32 %v3482_v42, %v3473_v22  ;;  %v3596_v17 = vand.u32 65535, %v3592_v59  ;;  %v3597_v47 = vshrl.u32 %v3592_v59, 16  ;;  %v3618_v58 = vand.u32 65535, %v3588_v16 }
 0x3e0   : > { %v3230_v11 = vxor.u32 2147483648, %v3225_v41  ;;  %v3234_v56 = vsel %vm3232_vm12, %v3233_v6, %v3225_v41  ;;  %v3349_v33 = vshrl.u32 %v3331_v39, %v3347_v7  ;;  %v3352_v26 = vadd.s32 127, %v3351_v13  ;;  %v5704_v41 = vpop.f32.mrf.mxu1 }
 0x3e1   : > { %v3487_v36 = vadd.s32 1, %v3483_v23  ;;  %v3599_v53 = vmul.u32 %v3597_v47, %v13576_v35  ;;  %v3619_v52 = vshrl.u32 %v3588_v16, 16  ;;  %vm3239_vm10 = vcmp.lt.s32.totalorder %v13533_v34, 0 }
 0x3e2   : > { %v3231_v48 = vsel %vm3229_vm8, %v3217_v21, %v3230_v11  ;;  %v3350_v25 = vor.u32 %v3349_v33, %v3348_v38  ;;  %v3598_v22 = vmul.u32 %v3596_v17, %v13576_v35  ;;  %v3600_v62 = vmul.u32 %v3596_v17, %v13577_v54  ;;  %v13581_v38 = vld [vmem:[#allocation12_spill] sm:$0xff] }
 0x3e3   : > { %v3235_v3 = vsel %vm3228_vm4, %v3231_v48, %v3234_v56  ;;  %v13578_v39 = vand.u32 2147483647, %v13533_v34  ;;  %v3353_v16 = vshll.u32 %v3352_v26, 23  ;;  %v3488_v21 = vsel %vm3486_vm3, %v3487_v36, %v3483_v23 }
 0x3e4   : > { %v3602_v55 = vshll.u32 %v3599_v53, 16  ;;  %v3236_v0 = vsel %vm3226_vm13, nan, %v3235_v3  ;;  %v3361_v59 = vsub.s32 4, %v11130_v60  ;;  %v3489_v6 = vadd.s32 %v3488_v21, %v3484_v27 }
 0x3e5   : > { %vm11205_vm12 = vcmp.le.f32.partialorder %v13578_v39, 0.7853982  ;;  %v3601_v7 = vmul.u32 %v3597_v47, %v13577_v54  ;;  %vm13582_vm8 = vcmask 31744   ;;  %6749 = vmatmul.msk.f32.gmra.mxu2 %vm5797_vm11, %v3236_v0  ;;  %v3354_v13 = vor.u32 4788187, %v3353_v16  ;;  %v13583_v0 = vld [vmem:[#allocation138_spill] sm:$0xff] }
 0x3e6   : > { %6726 = vmatmul.msk.f32.gmra.mxu1 %vm13582_vm8, %v13581_v38  ;;  %v3357_v17 = vcvt.s32.f32 %v3350_v25  ;;  %v5915_v11 = vadd.f32 %v5914_v46, %v5704_v41  ;;  %v3604_v23 = vshll.u32 %v3600_v62, 16  ;;  %v3490_v56 = vadd.s32 536870912, %v3489_v6  ;;  %v13585_v38 = vld [vmem:[#allocation141_spill] sm:$0xff] }
 0x3e7   : > { %vm3606_vm14 = vc.u32 %v3598_v22, %v3602_v55  ;;  %v3608_v44 = vadd.s32 %v3602_v55, %v3598_v22  ;;  %v3620_v33 = vmul.u32 %v3618_v58, %v13576_v35  ;;  %v3355_v26 = vand.u32 2147483647, %v3354_v13 }
 0x3e8   : > { %6766 = vmatmul.msk.f32.gmra.mxu3 %vm6015_vm2, %v5915_v11  ;;  %v3607_v27 = vsel %vm3606_vm14, 1, %v13267_v40  ;;  %v3621_v47 = vmul.u32 %v3619_v52, %v13576_v35  ;;  %v3622_v36 = vmul.u32 %v3618_v58, %v13577_v54  ;;  %v11224_v48 = vshrl.u32 %v3490_v56, 30 }
 0x3e9   : > { %v3603_v3 = vshrl.u32 %v3599_v53, 16  ;;  %v3609_v25 = vadd.s32 %v3607_v27, %v3601_v7  ;;  %vm3610_vm4 = vc.u32 %v3608_v44, %v3604_v23  ;;  %v3358_v39 = vmul.f32 %v3357_v17, %v3355_v26 }
 0x3ea   : > { %v3611_v16 = vsel %vm3610_vm4, 1, %v13267_v40  ;;  %v3623_v22 = vmul.u32 %v3619_v52, %v13577_v54  ;;  %v3624_v21 = vshll.u32 %v3621_v47, 16  ;;  %v3492_v55 = vshll.u32 %v11224_v48, 30 }
 0x3eb   : > { %vm13584_vm13 = vcmp.lt.s32.totalorder %v13569_v43, 1  ;;  %v3613_v41 = vadd.s32 %v3611_v16, %v3609_v25  ;;  %v3626_v58 = vshll.u32 %v3622_v36, 16  ;;  %v3359_v46 = vxor.u32 2147483648, %v3358_v39 }
 0x3ec   : > { %v3581_v35 = vsel %vm13584_vm13, %v11179_v5, %v13583_v0  ;;  %vm13586_vm5 = vcmp.lt.s32.totalorder %v13569_v43, 4  ;;  %vm3628_vm3 = vc.u32 %v3620_v33, %v3624_v21  ;;  %v3630_v7 = vadd.s32 %v3624_v21, %v3620_v33  ;;  %v13587_v33 = vld [vmem:[#allocation140_spill] sm:$0xff] }
 0x3ed   : > { %v3582_v53 = vsel %vm13586_vm5, %v13585_v38, 2102212464  ;;  %v11236_v13 = vsub.s32 %v3489_v6, %v3492_v55  ;;  %v3605_v52 = vshrl.u32 %v3600_v62, 16  ;;  %v3614_v54 = vadd.s32 %v3613_v41, %v3603_v3 }
 0x3ee   : > { %v3629_v17 = vsel %vm3628_vm3, 1, %v13267_v40  ;;  %v3360_v11 = vsel %vm3239_vm10, %v3359_v46, %v3358_v39  ;;  %v3362_v5 = vsel %vm3239_vm10, %v3361_v59, %v11130_v60  ;;  %vm3632_vm8 = vc.u32 %v3630_v7, %v3626_v58 }
 0x3ef   : > { %v3631_v23 = vadd.s32 %v3629_v17, %v3623_v22  ;;  %v11247_v56 = vsel %vm11205_vm12, %v13533_v34, %v3360_v11  ;;  %vm3494_vm14 = vcmp.lt.s32.totalorder %v11236_v13, 0  ;;  %v3495_v62 = vsub.s32 0, %v11236_v13  ;;  %v13590_v17 = vld [vmem:[#allocation155_spill] sm:$0xff] }
 0x3f0   : > { %v3625_v6 = vshrl.u32 %v3621_v47, 16  ;;  %v3365_v44 = vmul.f32 %v11247_v56, %v11247_v56  ;;  %vm13588_vm4 = vcmp.lt.s32.totalorder %v13569_v43, 3  ;;  %v3627_v60 = vshrl.u32 %v3622_v36, 16  ;;  %v13591_v43 = vld [vmem:[#allocation124_spill] sm:$0xff] }
 0x3f1   : > { %v3583_v26 = vsel %vm13588_vm4, %v13587_v33, %v3582_v53  ;;  %v3633_v59 = vsel %vm3632_vm8, 1, %v13267_v40  ;;  %v3496_v27 = vsel %vm3494_vm14, %v3495_v62, %v11236_v13  ;;  %v11258_v3 = vadd.s32 %v3614_v54, %v3605_v52  ;;  %v13592_v62 = vld [vmem:[#allocation64_spill] sm:$0xff] }
 0x3f2   : > { %v11260_v25 = vadd.s32 %v3630_v7, %v3626_v58  ;;  %v3635_v39 = vadd.s32 %v3633_v59, %v3631_v23  ;;  %v11263_v16 = vshrl.u32 %v11011_v32, 16  ;;  %v3366_v47 = vmul.f32 -0.001358992, %v3365_v44 }
 0x3f3   : > { %v3373_v22 = vmul.f32 -0.00019511016, %v3365_v44  ;;  %v3497_v21 = vclz %v3496_v27  ;;  %v11266_v55 = vshrl.u32 %v11108_v12, 5  ;;  %v11269_v36 = vsub.s32 32, %v11157_v2  ;;  %v13593_v27 = vld [vmem:[#allocation169_spill] sm:$0xff] }
 0x3f4   : > { %13589 = vst [vmem:[#allocation4_spill] sm:$0xff] %v11263_v16  ;;  %v3364_v0 = vsel %vm11205_vm12, 0, %v3362_v5  ;;  %v3636_v41 = vadd.s32 %v3635_v39, %v3625_v6  ;;  %v3367_v46 = vadd.f32 0.041655596, %v3366_v47  ;;  %v3584_v53 = vsel %vm3578_vm0, %v3581_v35, %v3583_v26  ;;  %v13594_v39 = vld [vmem:[#allocation167_spill] sm:$0xff] }
 0x3f5   : > { %v3374_v58 = vadd.f32 0.008332121, %v3373_v22  ;;  %v6659_v38 = vadd.s32 4294967294, %v3497_v21  ;;  %v11277_v7 = vshll.u32 %v13182_v9, %v11157_v2  ;;  %v3485_v12 = vadd.s32 %v11170_v8, %v11167_v45 }
 0x3f6   : > { %v3637_v52 = vadd.s32 %v3636_v41, %v3627_v60  ;;  %vm3640_vm10 = vc.u32 %v11258_v3, %v11260_v25  ;;  %v3368_v42 = vmul.f32 %v3367_v46, %v3365_v44  ;;  %vm3732_vm13 = vcmp.lt.s32.totalorder %v13590_v17, 2 }
 0x3f7   : > { %v3375_v54 = vmul.f32 %v3374_v58, %v3365_v44  ;;  %vm6660_vm12 = vcmp.lt.s32.totalorder %v6659_v38, 0  ;;  %v3381_v11 = vand.u32 3, %v3364_v0  ;;  %v3638_v35 = vmul.u32 %v13591_v43, %v3584_v53 }
 0x3f8   : > { %v3500_v5 = vsel %vm6660_vm12, 0, %v6659_v38  ;;  %v3641_v23 = vadd.s32 1, %v3637_v52  ;;  %vm3393_vm0 = vcmp.lt.s32.totalorder %v13592_v62, 0  ;;  %v3369_v6 = vadd.f32 -0.4999988, %v3368_v42 }
 0x3f9   : > { %v3376_v33 = vadd.f32 -0.16666654, %v3375_v54  ;;  %v3501_v26 = vsub.s32 32, %v3500_v5  ;;  %v3502_v45 = vshll.u32 %v11236_v13, %v3500_v5  ;;  %v11289_v8 = vshll.u32 %v13184_v19, %v11157_v2 }
 0x3fa   : > { %v3505_v60 = vsub.s32 4294967266, %v3500_v5  ;;  %v3642_v59 = vsel %vm3640_vm10, %v3641_v23, %v3637_v52  ;;  %v3746_v47 = vsel %vm3732_vm13, %v13594_v39, %v13593_v27  ;;  %v11300_v22 = vshll.u32 %v13185_v14, %v11157_v2  ;;  %v13598_v23 = vld [vmem:[#allocation157_spill] sm:$0xff] }
 0x3fb   : > { %v3370_v21 = vmul.f32 %v3369_v6, %v3365_v44  ;;  %v3377_v13 = vmul.f32 %v3376_v33, %v3365_v44  ;;  %v3503_v0 = vshrl.u32 %v3485_v12, %v3501_v26  ;;  %vm3380_vm5 = vweird.f32 %v13533_v34  ;;  %v5707_v26 = vpop.f32.mrf.mxu1  ;;  %v13600_v39 = vld [vmem:[#allocation13_spill] sm:$0xff] }
 0x3fc   : > { %vm3382_vm3 = vcmp.lt.s32.totalorder %v3381_v11, 2  ;;  %v3506_v41 = vadd.s32 127, %v3505_v60  ;;  %v3643_v46 = vadd.s32 %v3642_v59, %v3638_v35  ;;  %v3750_v58 = vand.u32 65535, %v3746_v47  ;;  %v5917_v60 = vpop.f32.mrf.mxu2  ;;  %v13599_v59 = vld [vmem:[#allocation158_spill] sm:$0xff] }
 0x3fd   : > { %v3371_v38 = vadd.f32 1.0, %v3370_v21  ;;  %v3378_v53 = vadd.f32 1.0, %v3377_v13  ;;  %v3504_v52 = vor.u32 %v3503_v0, %v3502_v45  ;;  %v3751_v42 = vshrl.u32 %v3746_v47, 16 }
 0x3fe   : > { %v13595_v54 = vand.u32 2147483647, %v13592_v62  ;;  %v3507_v43 = vshll.u32 %v3506_v41, 23  ;;  %v3515_v44 = vsub.s32 4, %v11224_v48  ;;  %v3644_v12 = vadd.s32 536870912, %v3643_v46 }
 0x3ff   : > { %v3752_v6 = vmul.u32 %v3750_v58, %v13598_v23  ;;  %v3379_v33 = vmul.f32 %v3378_v53, %v11247_v56  ;;  %v3387_v35 = vxor.u32 2147483648, %v3371_v38  ;;  %v11313_v45 = vmul.u32 %v3751_v42, %v13598_v23 }
 0x400   : > { %vm11305_vm8 = vcmp.le.f32.partialorder %v13595_v54, 0.7853982  ;;  %v11316_v27 = vmul.u32 %v3750_v58, %v13599_v59  ;;  %vm13601_vm14 = vcmask 31744   ;;  %v3508_v47 = vor.u32 4788187, %v3507_v43 }
 0x401   : > { %6727 = vmatmul.msk.f32.gmra.mxu1 %vm13601_vm14, %v13600_v39  ;;  %v3511_v21 = vcvt.s32.f32 %v3504_v52  ;;  %v5918_v13 = vadd.f32 %v5917_v60, %v5707_v26  ;;  %v11320_v0 = vshrl.u32 %v3644_v12, 30  ;;  %vm3383_vm4 = vcmp.eq.s32.totalorder %v3381_v11, 0 }
 0x402   : > { %v3384_v41 = vxor.u32 2147483648, %v3379_v33  ;;  %vm3386_vm10 = vcmp.eq.s32.totalorder %v3381_v11, 2  ;;  %v3756_v56 = vshll.u32 %v11313_v45, 16  ;;  %v3509_v54 = vand.u32 2147483647, %v3508_v47 }
 0x403   : > { %v3388_v53 = vsel %vm3386_vm10, %v3387_v35, %v3379_v33  ;;  %v3516_v58 = vsel %vm3393_vm0, %v3515_v44, %v11224_v48  ;;  %6767 = vmatmul.msk.f32.gmra.mxu3 %vm6015_vm2, %v5918_v13  ;;  %v3646_v39 = vshll.u32 %v11320_v0, 30  ;;  %v3758_v52 = vshll.u32 %v11316_v27, 16  ;;  %v13602_v33 = vld [vmem:[#allocation168_spill] sm:$0xff]  ;;  %v13603_v35 = vld [vmem:[#allocation166_spill] sm:$0xff]  ;;  %v13604_v44 = vld [vmem:[#allocation149_spill] sm:$0xff] }
 0x404   : > { %v3385_v43 = vsel %vm3383_vm4, %v3371_v38, %v3384_v41  ;;  %vm3760_vm12 = vc.u32 %v3752_v6, %v3756_v56  ;;  %v3762_v12 = vadd.s32 %v3756_v56, %v3752_v6  ;;  %v3512_v60 = vmul.f32 %v3511_v21, %v3509_v54 }
 0x405   : > { %v3389_v26 = vsel %vm3382_vm3, %v3385_v43, %v3388_v53  ;;  %v11330_v32 = vsub.s32 %v3643_v46, %v3646_v39  ;;  %v3742_v47 = vsel %vm3732_vm13, %v13603_v35, %v13602_v33  ;;  %v3715_v38 = vshrl.u32 %v13182_v9, %v13604_v44  ;;  %v13605_v39 = vld [vmem:[#allocation163_spill] sm:$0xff] }
 0x406   : > { %v3390_v48 = vsel %vm3380_vm5, nan, %v3389_v26  ;;  %v3755_v13 = vmul.u32 %v3751_v42, %v13599_v59  ;;  %v3772_v41 = vand.u32 65535, %v3742_v47  ;;  %v3513_v11 = vxor.u32 2147483648, %v3512_v60 }
 0x407   : > { %6750 = vmatmul.msk.f32.gmra.mxu2 %vm5797_vm11, %v3390_v48  ;;  %vm3648_vm3 = vcmp.lt.s32.totalorder %v11330_v32, 0  ;;  %v3649_v46 = vsub.s32 0, %v11330_v32  ;;  %v3761_v6 = vsel %vm3760_vm12, 1, %v13267_v40  ;;  %v11347_v21 = vshll.u32 %v13092_v37, %v11157_v2 }
 0x408   : > { %v3518_v34 = vsel %vm11305_vm8, 0, %v3516_v58  ;;  %vm3764_vm5 = vc.u32 %v3762_v12, %v3758_v52  ;;  %v3773_v56 = vshrl.u32 %v3742_v47, 16  ;;  %v3514_v42 = vsel %vm3393_vm0, %v3513_v11, %v3512_v60 }
 0x409   : > { %v3639_v53 = vadd.s32 %v11260_v25, %v11258_v3  ;;  %v3650_v54 = vsel %vm3648_vm3, %v3649_v46, %v11330_v32  ;;  %vm13606_vm14 = vcmp.lt.s32.totalorder %v13590_v17, 4  ;;  %v11362_v26 = vsel %vm11305_vm8, %v13592_v62, %v3514_v42  ;;  %v13607_v3 = vld [vmem:[#allocation161_spill] sm:$0xff]  ;;  %v13609_v46 = vld [vmem:[#allocation162_spill] sm:$0xff] }
 0x40a   : > { %v3736_v43 = vsel %vm13606_vm14, %v13605_v39, 2102212464  ;;  %v3651_v58 = vclz %v3650_v54  ;;  %v3763_v52 = vadd.s32 %v3761_v6, %v3755_v13  ;;  %v11365_v12 = vmul.u32 %v3773_v56, %v13598_v23  ;;  %v13611_v54 = vld [vmem:[#allocation76_spill] sm:$0xff] }
 0x40b   : > { %v3519_v60 = vmul.f32 %v11362_v26, %v11362_v26  ;;  %vm13608_vm0 = vcmp.lt.s32.totalorder %v13590_v17, 1  ;;  %v3765_v33 = vsel %vm3764_vm5, 1, %v13267_v40  ;;  %v3774_v35 = vmul.u32 %v3772_v41, %v13598_v23 }
 0x40c   : > { %v11372_v25 = vsel %vm13608_vm0, %v3715_v38, %v13607_v3  ;;  %v11376_v5 = vand.u32 3, %v3518_v34  ;;  %v6662_v47 = vadd.s32 4294967294, %v3651_v58  ;;  %v11379_v48 = vmul.u32 %v3772_v41, %v13599_v59 }
 0x40d   : > { %v3778_v44 = vshll.u32 %v11365_v12, 16  ;;  %v3520_v13 = vmul.f32 -0.001358992, %v3519_v60  ;;  %v3527_v11 = vmul.f32 -0.00019511016, %v3519_v60  ;;  %vm13610_vm8 = vcmp.lt.s32.totalorder %v13590_v17, 3 }
 0x40e   : > { %v3737_v6 = vsel %vm13610_vm8, %v13609_v46, %v3736_v43  ;;  %v3757_v38 = vshrl.u32 %v11313_v45, 16  ;;  %vm6663_vm4 = vcmp.lt.s32.totalorder %v6662_v47, 0  ;;  %v3669_v42 = vsub.s32 4, %v11320_v0 }
 0x40f   : > { %v3767_v23 = vadd.s32 %v3765_v33, %v3763_v52  ;;  %v3777_v34 = vmul.u32 %v3773_v56, %v13599_v59  ;;  %vm3547_vm10 = vcmp.lt.s32.totalorder %v13611_v54, 0  ;;  %v3521_v41 = vadd.f32 0.041655596, %v3520_v13 }
 0x410   : > { %v3528_v39 = vadd.f32 0.008332121, %v3527_v11  ;;  %v3654_v58 = vsel %vm6663_vm4, 0, %v6662_v47  ;;  %vm3782_vm12 = vc.u32 %v3774_v35, %v3778_v44  ;;  %vm3540_vm3 = vcmp.eq.s32.totalorder %v11376_v5, 2 }
 0x411   : > { %v3655_v3 = vsub.s32 32, %v3654_v58  ;;  %v3656_v16 = vshll.u32 %v11330_v32, %v3654_v58  ;;  %v3659_v43 = vsub.s32 4294967266, %v3654_v58  ;;  %v3780_v45 = vshll.u32 %v11379_v48, 16 }
 0x412   : > { %v3522_v46 = vmul.f32 %v3521_v41, %v3519_v60  ;;  %v3529_v57 = vmul.f32 %v3528_v39, %v3519_v60  ;;  %v3759_v52 = vshrl.u32 %v11316_v27, 16  ;;  %v3781_v59 = vshrl.u32 %v11379_v48, 16 }
 0x413   : > { %vm3537_vm5 = vcmp.eq.s32.totalorder %v11376_v5, 0  ;;  %v3657_v56 = vshrl.u32 %v3639_v53, %v3655_v3  ;;  %v3660_v33 = vadd.s32 127, %v3659_v43  ;;  %v3783_v47 = vsel %vm3782_vm12, 1, %v13267_v40  ;;  %v5920_v3 = vpop.f32.mrf.mxu2 }
 0x414   : > { %v3784_v13 = vadd.s32 %v3778_v44, %v3774_v35  ;;  %v3523_v11 = vadd.f32 -0.4999988, %v3522_v46  ;;  %v3530_v24 = vadd.f32 -0.16666654, %v3529_v57  ;;  %vm3536_vm14 = vcmp.lt.s32.totalorder %v11376_v5, 2  ;;  %v5710_v57 = vpop.f32.mrf.mxu1 }
 0x415   : > { %v3768_v32 = vadd.s32 %v3767_v23, %v3757_v38  ;;  %v3785_v58 = vadd.s32 %v3783_v47, %v3777_v34  ;;  %vm3534_vm0 = vweird.f32 %v13592_v62  ;;  %v13612_v41 = vand.u32 2147483647, %v13611_v54  ;;  %v13615_v23 = vld [vmem:[#allocation174_spill] sm:$0xff]  ;;  %v13616_v34 = vld [vmem:[#allocation15_spill] sm:$0xff] }
 0x416   : > { %v3658_v48 = vor.u32 %v3657_v56, %v3656_v16  ;;  %v3661_v53 = vshll.u32 %v3660_v33, 23  ;;  %v3779_v39 = vshrl.u32 %v11365_v12, 16  ;;  %vm3786_vm4 = vc.u32 %v3784_v13, %v3780_v45 }
 0x417   : > { %vm11400_vm8 = vcmp.le.f32.partialorder %v13612_v41, 0.7853982  ;;  %v3524_v35 = vmul.f32 %v3523_v11, %v3519_v60  ;;  %v3531_v44 = vmul.f32 %v3530_v24, %v3519_v60  ;;  %v3787_v38 = vsel %vm3786_vm4, 1, %v13267_v40 }
 0x418   : > { %vm3886_vm12 = vcmp.lt.s32.totalorder %v13615_v23, 2  ;;  %vm13617_vm7 = vcmask 31744   ;;  %v3662_v43 = vor.u32 4788187, %v3661_v53  ;;  %v3665_v46 = vcvt.s32.f32 %v3658_v48 }
 0x419   : > { %6728 = vmatmul.msk.f32.gmra.mxu1 %vm13617_vm7, %v13616_v34  ;;  %v5921_v47 = vadd.f32 %v5920_v3, %v5710_v57  ;;  %v3789_v41 = vadd.s32 %v3787_v38, %v3785_v58  ;;  %v3525_v16 = vadd.f32 1.0, %v3524_v35  ;;  %v3532_v56 = vadd.f32 1.0, %v3531_v44  ;;  %v13618_v35 = vld [vmem:[#allocation41_spill] sm:$0xff]  ;;  %v13623_v34 = vld [vmem:[#allocation171_spill] sm:$0xff] }
 0x41a   : > { %v11409_v33 = vadd.s32 %v3768_v32, %v3759_v52  ;;  %v11411_v12 = vadd.s32 %v3784_v13, %v3780_v45  ;;  %v3663_v24 = vand.u32 2147483647, %v3662_v43  ;;  %v3670_v60 = vsel %vm3547_vm10, %v3669_v42, %v11320_v0  ;;  %v13619_v52 = vld [vmem:[#allocation27_spill] sm:$0xff]  ;;  %v13620_v13 = vld [vmem:[#allocation16_spill] sm:$0xff] }
 0x41b   : > { %6768 = vmatmul.msk.f32.gmra.mxu3 %vm6015_vm2, %v5921_v47  ;;  %v3738_v11 = vsel %vm3732_vm13, %v11372_v25, %v3737_v6  ;;  %v3790_v48 = vadd.s32 %v3789_v41, %v3779_v39  ;;  %v3533_v58 = vmul.f32 %v3532_v56, %v11362_v26  ;;  %v3541_v53 = vxor.u32 2147483648, %v3525_v16  ;;  %v13621_v32 = vld [vmem:[#allocation43_spill] sm:$0xff]  ;;  %v13622_v26 = vld [vmem:[#allocation152_spill] sm:$0xff] }
 0x41c   : > { %v3896_v45 = vsel %vm3886_vm12, %v13619_v52, %v13618_v35  ;;  %v3900_v0 = vsel %vm3886_vm12, %v13621_v32, %v13620_v13  ;;  %v3666_v42 = vmul.f32 %v3665_v46, %v3663_v24  ;;  %v3792_v6 = vmul.u32 %v13622_v26, %v3738_v11  ;;  %v13624_v46 = vld [vmem:[#allocation172_spill] sm:$0xff] }
 0x41d   : > { %v3791_v44 = vadd.s32 %v3790_v48, %v3781_v59  ;;  %v3904_v57 = vand.u32 65535, %v3900_v0  ;;  %v3905_v3 = vshrl.u32 %v3900_v0, 16  ;;  %v3538_v17 = vxor.u32 2147483648, %v3533_v58 }
 0x41e   : > { %v3542_v25 = vsel %vm3540_vm3, %v3541_v53, %v3533_v58  ;;  %vm3794_vm7 = vc.u32 %v11409_v33, %v11411_v12  ;;  %v3667_v39 = vxor.u32 2147483648, %v3666_v42  ;;  %v3926_v56 = vand.u32 65535, %v3896_v45 }
 0x41f   : > { %v3795_v38 = vadd.s32 1, %v3791_v44  ;;  %v3906_v43 = vmul.u32 %v3904_v57, %v13623_v34  ;;  %v3907_v47 = vmul.u32 %v3905_v3, %v13623_v34  ;;  %v3539_v59 = vsel %vm3537_vm5, %v3525_v16, %v3538_v17 }
 0x420   : > { %v11439_v41 = vmul.u32 %v3904_v57, %v13624_v46  ;;  %v3927_v24 = vshrl.u32 %v3896_v45, 16  ;;  %v3543_v11 = vsel %vm3536_vm14, %v3539_v59, %v3542_v25  ;;  %v3668_v48 = vsel %vm3547_vm10, %v3667_v39, %v3666_v42 }
 0x421   : > { %v3796_v58 = vsel %vm3794_vm7, %v3795_v38, %v3791_v44  ;;  %v3910_v53 = vshll.u32 %v3907_v47, 16  ;;  %v3544_v35 = vsel %vm3534_vm0, nan, %v3543_v11  ;;  %v3671_v16 = vsel %vm11400_vm8, %v13611_v54, %v3668_v48  ;;  %v13625_v48 = vld [vmem:[#allocation170_spill] sm:$0xff] }
 0x422   : > { %v3797_v52 = vadd.s32 %v3796_v58, %v3792_v6  ;;  %v3909_v13 = vmul.u32 %v3905_v3, %v13624_v46  ;;  %6751 = vmatmul.msk.f32.gmra.mxu2 %vm5797_vm11, %v3544_v35  ;;  %v3672_v5 = vsel %vm11400_vm8, 0, %v3670_v60  ;;  %v3673_v45 = vmul.f32 %v3671_v16, %v3671_v16 }
 0x423   : > { %v3912_v32 = vshll.u32 %v11439_v41, 16  ;;  %vm3914_vm13 = vc.u32 %v3906_v43, %v3910_v53  ;;  %v3916_v42 = vadd.s32 %v3910_v53, %v3906_v43  ;;  %v3929_v44 = vmul.u32 %v3927_v24, %v13623_v34 }
 0x424   : > { %v3798_v0 = vadd.s32 536870912, %v3797_v52  ;;  %v3915_v62 = vsel %vm3914_vm13, 1, %v13267_v40  ;;  %v3674_v57 = vmul.f32 -0.001358992, %v3673_v45  ;;  %v3681_v17 = vmul.f32 -0.00019511016, %v3673_v45 }
 0x425   : > { %v3928_v25 = vmul.u32 %v3926_v56, %v13623_v34  ;;  %v3930_v3 = vmul.u32 %v3926_v56, %v13624_v46  ;;  %v3917_v27 = vadd.s32 %v3915_v62, %v3909_v13  ;;  %vm3918_vm10 = vc.u32 %v3916_v42, %v3912_v32 }
 0x426   : > { %v11459_v26 = vshrl.u32 %v3798_v0, 30  ;;  %v3932_v60 = vshll.u32 %v3929_v44, 16  ;;  %v3675_v6 = vadd.f32 0.041655596, %v3674_v57  ;;  %v3682_v39 = vadd.f32 0.008332121, %v3681_v17 }
 0x427   : > { %v3689_v38 = vand.u32 3, %v3672_v5  ;;  %v3919_v59 = vsel %vm3918_vm10, 1, %v13267_v40  ;;  %v11464_v43 = vshll.u32 %v13089_v51, %v11157_v2  ;;  %v3869_v34 = vshrl.u32 %v13182_v9, %v13625_v48 }
 0x428   : > { %v3800_v11 = vshll.u32 %v11459_v26, 30  ;;  %v3931_v56 = vmul.u32 %v3927_v24, %v13624_v46  ;;  %v3676_v58 = vmul.f32 %v3675_v6, %v3673_v45  ;;  %v3683_v53 = vmul.f32 %v3682_v39, %v3673_v45  ;;  %v13626_v46 = vld [vmem:[#allocation179_spill] sm:$0xff] }
 0x429   : > { %v3934_v35 = vshll.u32 %v3930_v3, 16  ;;  %vm3936_vm3 = vc.u32 %v3928_v25, %v3932_v60  ;;  %v3911_v5 = vshrl.u32 %v3907_v47, 16  ;;  %v3921_v32 = vadd.s32 %v3919_v59, %v3917_v27 }
 0x42a   : > { %v11470_v13 = vsub.s32 %v3797_v52, %v3800_v11  ;;  %v3937_v0 = vsel %vm3936_vm3, 1, %v13267_v40  ;;  %v3677_v62 = vadd.f32 -0.4999988, %v3676_v58  ;;  %v3684_v2 = vadd.f32 -0.16666654, %v3683_v53  ;;  %v13628_v53 = vld [vmem:[#allocation177_spill] sm:$0xff] }
 0x42b   : > { %vm3690_vm5 = vcmp.lt.s32.totalorder %v3689_v38, 2  ;;  %vm3694_vm14 = vcmp.eq.s32.totalorder %v3689_v38, 2  ;;  %v3938_v42 = vadd.s32 %v3932_v60, %v3928_v25  ;;  %vm13627_vm8 = vcmp.lt.s32.totalorder %v13615_v23, 4 }
 0x42c   : > { %vm3802_vm0 = vcmp.lt.s32.totalorder %v11470_v13, 0  ;;  %v3803_v57 = vsub.s32 0, %v11470_v13  ;;  %v3890_v24 = vsel %vm13627_vm8, %v13626_v46, 2102212464  ;;  %v3933_v17 = vshrl.u32 %v3929_v44, 16  ;;  %v13630_v44 = vld [vmem:[#allocation178_spill] sm:$0xff] }
 0x42d   : > { %v3678_v52 = vmul.f32 %v3677_v62, %v3673_v45  ;;  %v3685_v6 = vmul.f32 %v3684_v2, %v3673_v45  ;;  %v3939_v47 = vadd.s32 %v3937_v0, %v3931_v56  ;;  %vm3940_vm4 = vc.u32 %v3938_v42, %v3934_v35  ;;  %v13632_v0 = vld [vmem:[#allocation5_spill] sm:$0xff] }
 0x42e   : > { %v3804_v27 = vsel %vm3802_vm0, %v3803_v57, %v11470_v13  ;;  %v3913_v39 = vshrl.u32 %v11439_v41, 16  ;;  %v3922_v59 = vadd.s32 %v3921_v32, %v3911_v5  ;;  %v3941_v25 = vsel %vm3940_vm4, 1, %v13267_v40 }
 0x42f   : > { %v3679_v60 = vadd.f32 1.0, %v3678_v52  ;;  %v3686_v11 = vadd.f32 1.0, %v3685_v6  ;;  %v3805_v48 = vclz %v3804_v27  ;;  %v3943_v58 = vadd.s32 %v3941_v25, %v3939_v47  ;;  %v13634_v47 = vld [vmem:[#allocation50_spill] sm:$0xff] }
 0x430   : > { %vm13629_vm7 = vcmp.lt.s32.totalorder %v13615_v23, 1  ;;  %vm13631_vm13 = vcmp.lt.s32.totalorder %v13615_v23, 3  ;;  %v3935_v56 = vshrl.u32 %v3930_v3, 16  ;;  %vm4040_vm10 = vcmp.lt.s32.totalorder %v13632_v0, 2  ;;  %v13635_v27 = vld [vmem:[#allocation10_spill] sm:$0xff]  ;;  %v13636_v23 = vld [vmem:[#allocation165_spill] sm:$0xff] }
 0x431   : > { %v3889_v46 = vsel %vm13629_vm7, %v3869_v34, %v13628_v53  ;;  %v3891_v45 = vsel %vm13631_vm13, %v13630_v44, %v3890_v24  ;;  %v3687_v62 = vmul.f32 %v3686_v11, %v3671_v16  ;;  %v3695_v41 = vxor.u32 2147483648, %v3679_v60  ;;  %v13633_v24 = vld [vmem:[#allocation114_spill] sm:$0xff]  ;;  %v13638_v11 = vld [vmem:[#allocation181_spill] sm:$0xff] }
 0x432   : > { %v6665_v5 = vadd.s32 4294967294, %v3805_v48  ;;  %v3944_v32 = vadd.s32 %v3943_v58, %v3933_v17  ;;  %vm3691_vm3 = vcmp.eq.s32.totalorder %v3689_v38, 0  ;;  %v3793_v2 = vadd.s32 %v11411_v12, %v11409_v33 }
 0x433   : > { %v11490_v57 = vadd.s32 %v3922_v59, %v3913_v39  ;;  %v11492_v52 = vadd.s32 %v3938_v42, %v3934_v35  ;;  %v3692_v34 = vxor.u32 2147483648, %v3687_v62  ;;  %v3696_v6 = vsel %vm3694_vm14, %v3695_v41, %v3687_v62 }
 0x434   : > { %vm6666_vm0 = vcmp.lt.s32.totalorder %v6665_v5, 0  ;;  %v3892_v3 = vsel %vm3886_vm12, %v3889_v46, %v3891_v45  ;;  %vm3701_vm8 = vcmp.lt.s32.totalorder %v13633_v24, 0  ;;  %vm3688_vm4 = vweird.f32 %v13611_v54  ;;  %v13637_v54 = vld [vmem:[#allocation59_spill] sm:$0xff] }
 0x435   : > { %v3808_v16 = vsel %vm6666_vm0, 0, %v6665_v5  ;;  %v3945_v17 = vadd.s32 %v3944_v32, %v3935_v56  ;;  %v4054_v33 = vsel %vm4040_vm10, %v13635_v27, %v13634_v47  ;;  %v3693_v12 = vsel %vm3691_vm3, %v3679_v60, %v3692_v34  ;;  %v5713_v32 = vpop.f32.mrf.mxu1  ;;  %v5923_v34 = vpop.f32.mrf.mxu2  ;;  %v13640_v47 = vld [vmem:[#allocation36_spill] sm:$0xff] }
 0x436   : > { %v3809_v35 = vsub.s32 32, %v3808_v16  ;;  %v3810_v42 = vshll.u32 %v11470_v13, %v3808_v16  ;;  %v3813_v39 = vsub.s32 4294967266, %v3808_v16  ;;  %v3697_v59 = vsel %vm3690_vm5, %v3693_v12, %v3696_v6  ;;  %v13641_v12 = vld [vmem:[#allocation17_spill] sm:$0xff] }
 0x437   : > { %v3946_v25 = vmul.u32 %v13636_v23, %v3892_v3  ;;  %vm3948_vm12 = vc.u32 %v11490_v57, %v11492_v52  ;;  %v4050_v48 = vsel %vm4040_vm10, %v13638_v11, %v13637_v54  ;;  %v3698_v58 = vsel %vm3688_vm4, nan, %v3697_v59  ;;  %v13639_v3 = vld [vmem:[#allocation176_spill] sm:$0xff] }
 0x438   : > { %v3811_v53 = vshrl.u32 %v3793_v2, %v3809_v35  ;;  %v3814_v46 = vadd.s32 127, %v3813_v39  ;;  %v3949_v60 = vadd.s32 1, %v3945_v17  ;;  %6752 = vmatmul.msk.f32.gmra.mxu2 %vm5797_vm11, %v3698_v58  ;;  %v3823_v13 = vsub.s32 4, %v11459_v26  ;;  %v13646_v58 = vld [vmem:[#allocation6_spill] sm:$0xff] }
 0x439   : > { %v4058_v38 = vand.u32 65535, %v4054_v33  ;;  %v4059_v44 = vshrl.u32 %v4054_v33, 16  ;;  %v4080_v45 = vand.u32 65535, %v4050_v48  ;;  %v4081_v5 = vshrl.u32 %v4050_v48, 16 }
 0x43a   : > { %v3812_v56 = vor.u32 %v3811_v53, %v3810_v42  ;;  %v3815_v62 = vshll.u32 %v3814_v46, 23  ;;  %v3950_v41 = vsel %vm3948_vm12, %v3949_v60, %v3945_v17  ;;  %vm13642_vm5 = vcmask 31744  }
 0x43b   : > { %v3951_v6 = vadd.s32 %v3950_v41, %v3946_v25  ;;  %v4060_v16 = vmul.u32 %v4058_v38, %v13639_v3  ;;  %v4061_v2 = vmul.u32 %v4059_v44, %v13639_v3  ;;  %v4062_v27 = vmul.u32 %v4058_v38, %v13640_v47  ;;  %6729 = vmatmul.msk.f32.gmra.mxu1 %vm13642_vm5, %v13641_v12 }
 0x43c   : > { %v13643_v35 = vand.u32 2147483647, %v13633_v24  ;;  %v3816_v17 = vor.u32 4788187, %v3815_v62  ;;  %v3819_v42 = vcvt.s32.f32 %v3812_v56  ;;  %v5924_v39 = vadd.f32 %v5923_v34, %v5713_v32 }
 0x43d   : > { %v3952_v59 = vadd.s32 536870912, %v3951_v6  ;;  %v4063_v23 = vmul.u32 %v4059_v44, %v13640_v47  ;;  %v4064_v25 = vshll.u32 %v4061_v2, 16  ;;  %v4066_v54 = vshll.u32 %v4062_v27, 16 }
 0x43e   : > { %vm11521_vm14 = vcmp.le.f32.partialorder %v13643_v35, 0.7853982  ;;  %v3817_v11 = vand.u32 2147483647, %v3816_v17  ;;  %v3824_v48 = vsel %vm3701_vm8, %v3823_v13, %v11459_v26  ;;  %6769 = vmatmul.msk.f32.gmra.mxu3 %vm6015_vm2, %v5924_v39  ;;  %v4023_v53 = vshrl.u32 %v13182_v9, %v13646_v58  ;;  %v13647_v13 = vld [vmem:[#allocation39_spill] sm:$0xff] }
 0x43f   : > { %v4083_v46 = vmul.u32 %v4081_v5, %v13639_v3  ;;  %v11533_v60 = vshrl.u32 %v3952_v59, 30  ;;  %vm4068_vm7 = vc.u32 %v4060_v16, %v4064_v25  ;;  %v4070_v38 = vadd.s32 %v4064_v25, %v4060_v16  ;;  %v13651_v58 = vld [vmem:[#allocation7_spill] sm:$0xff] }
 0x440   : > { %v4084_v44 = vmul.u32 %v4080_v45, %v13640_v47  ;;  %v3820_v56 = vmul.f32 %v3819_v42, %v3817_v11  ;;  %v4069_v62 = vsel %vm4068_vm7, 1, %v13267_v40  ;;  %v4082_v41 = vmul.u32 %v4080_v45, %v13639_v3  ;;  %v13649_v42 = vld [vmem:[#allocation9_spill] sm:$0xff] }
 0x441   : > { %v4086_v32 = vshll.u32 %v4083_v46, 16  ;;  %v3954_v26 = vshll.u32 %v11533_v60, 30  ;;  %vm13648_vm13 = vcmp.lt.s32.totalorder %v13632_v0, 4  ;;  %v4071_v12 = vadd.s32 %v4069_v62, %v4063_v23 }
 0x442   : > { %v4044_v34 = vsel %vm13648_vm13, %v13647_v13, 2102212464  ;;  %vm4072_vm3 = vc.u32 %v4070_v38, %v4066_v54  ;;  %v3821_v35 = vxor.u32 2147483648, %v3820_v56  ;;  %v4065_v17 = vshrl.u32 %v4061_v2, 16 }
 0x443   : > { %v4073_v16 = vsel %vm4072_vm3, 1, %v13267_v40  ;;  %v4088_v39 = vshll.u32 %v4084_v44, 16  ;;  %v11543_v59 = vsub.s32 %v3951_v6, %v3954_v26  ;;  %vm13650_vm0 = vcmp.lt.s32.totalorder %v13632_v0, 1 }
 0x444   : > { %v4043_v45 = vsel %vm13650_vm0, %v4023_v53, %v13649_v42  ;;  %v4075_v3 = vadd.s32 %v4073_v16, %v4071_v12  ;;  %v4085_v25 = vmul.u32 %v4081_v5, %v13640_v47  ;;  %v3822_v11 = vsel %vm3701_vm8, %v3821_v35, %v3820_v56 }
 0x445   : > { %vm13652_vm4 = vcmp.lt.s32.totalorder %v13632_v0, 3  ;;  %vm4090_vm12 = vc.u32 %v4082_v41, %v4086_v32  ;;  %v4092_v2 = vadd.s32 %v4086_v32, %v4082_v41  ;;  %v3825_v6 = vsel %vm11521_vm14, %v13633_v24, %v3822_v11  ;;  %v13653_v0 = vld [vmem:[#allocation175_spill] sm:$0xff] }
 0x446   : > { %v4045_v23 = vsel %vm13652_vm4, %v13651_v58, %v4044_v34  ;;  %vm3956_vm5 = vcmp.lt.s32.totalorder %v11543_v59, 0  ;;  %v3957_v54 = vsub.s32 0, %v11543_v59  ;;  %v4067_v53 = vshrl.u32 %v4062_v27, 16 }
 0x447   : > { %v3827_v38 = vmul.f32 %v3825_v6, %v3825_v6  ;;  %v4076_v5 = vadd.s32 %v4075_v3, %v4065_v17  ;;  %v4091_v47 = vsel %vm4090_vm12, 1, %v13267_v40  ;;  %vm4094_vm8 = vc.u32 %v4092_v2, %v4088_v39 }
 0x448   : > { %v3958_v56 = vsel %vm3956_vm5, %v3957_v54, %v11543_v59  ;;  %v4087_v62 = vshrl.u32 %v4083_v46, 16  ;;  %v4093_v26 = vadd.s32 %v4091_v47, %v4085_v25  ;;  %v4095_v41 = vsel %vm4094_vm8, 1, %v13267_v40  ;;  %v13654_v47 = vld [vmem:[#allocation131_spill] sm:$0xff] }
 0x449   : > { %v3826_v32 = vsel %vm11521_vm14, 0, %v3824_v48  ;;  %v3828_v13 = vmul.f32 -0.001358992, %v3827_v38  ;;  %v3835_v34 = vmul.f32 -0.00019511016, %v3827_v38  ;;  %v3959_v12 = vclz %v3958_v56 }
 0x44a   : > { %v11564_v35 = vadd.s32 %v4076_v5, %v4067_v53  ;;  %v4089_v27 = vshrl.u32 %v4084_v44, 16  ;;  %v11566_v16 = vadd.s32 %v4092_v2, %v4088_v39  ;;  %v4097_v17 = vadd.s32 %v4095_v41, %v4093_v26 }
 0x44b   : > { %v3829_v42 = vadd.f32 0.041655596, %v3828_v13  ;;  %v3836_v3 = vadd.f32 0.008332121, %v3835_v34  ;;  %v6668_v11 = vadd.s32 4294967294, %v3959_v12  ;;  %v4046_v46 = vsel %vm4040_vm10, %v4043_v45, %v4045_v23 }
 0x44c   : > { %v11572_v25 = vshrl.u32 %v13184_v19, %v11269_v36  ;;  %v11576_v33 = vshrl.u32 %v13185_v14, %v11269_v36  ;;  %v3947_v48 = vadd.s32 %v11492_v52, %v11490_v57  ;;  %v4098_v44 = vadd.s32 %v4097_v17, %v4087_v62 }
 0x44d   : > { %v3830_v39 = vmul.f32 %v3829_v42, %v3827_v38  ;;  %v3837_v58 = vmul.f32 %v3836_v3, %v3827_v38  ;;  %v3843_v2 = vand.u32 3, %v3826_v32  ;;  %vm6669_vm14 = vcmp.lt.s32.totalorder %v6668_v11, 0  ;;  %v13655_v32 = vld [vmem:[#allocation180_spill] sm:$0xff] }
 0x44e   : > { %v3962_v54 = vsel %vm6669_vm14, 0, %v6668_v11  ;;  %v4099_v53 = vadd.s32 %v4098_v44, %v4089_v27  ;;  %v4100_v45 = vmul.u32 %v13653_v0, %v4046_v46  ;;  %vm4102_vm10 = vc.u32 %v11564_v35, %v11566_v16  ;;  %v13656_v3 = vld [vmem:[#allocation188_spill] sm:$0xff] }
 0x44f   : > { %v3831_v19 = vadd.f32 -0.4999988, %v3830_v39  ;;  %v3838_v23 = vadd.f32 -0.16666654, %v3837_v58  ;;  %v3963_v5 = vsub.s32 32, %v3962_v54  ;;  %v3964_v14 = vshll.u32 %v11543_v59, %v3962_v54  ;;  %v5716_v39 = vpop.f32.mrf.mxu1  ;;  %v5926_v58 = vpop.f32.mrf.mxu2 }
 0x450   : > { %vm3855_vm7 = vcmp.lt.s32.totalorder %v13654_v47, 0  ;;  %v11587_v57 = vshrl.u32 %v13092_v37, %v11269_v36  ;;  %vm3842_vm13 = vweird.f32 %v13633_v24  ;;  %v3967_v52 = vsub.s32 4294967266, %v3962_v54  ;;  %v13667_v24 = vld [vmem:[#allocation32_spill] sm:$0xff] }
 0x451   : > { %v4103_v56 = vadd.s32 1, %v4099_v53  ;;  %v3832_v62 = vmul.f32 %v3831_v19, %v3827_v38  ;;  %v3839_v26 = vmul.f32 %v3838_v23, %v3827_v38  ;;  %v3965_v41 = vshrl.u32 %v3947_v48, %v3963_v5  ;;  %v13657_v38 = vld [vmem:[#allocation186_spill] sm:$0xff] }
 0x452   : > { %vm4194_vm3 = vcmp.lt.s32.totalorder %v13655_v32, 2  ;;  %vm3844_vm0 = vcmp.lt.s32.totalorder %v3843_v2, 2  ;;  %vm3845_vm4 = vcmp.eq.s32.totalorder %v3843_v2, 0  ;;  %v3968_v13 = vadd.s32 127, %v3967_v52 }
 0x453   : > { %v4104_v59 = vsel %vm4102_vm10, %v4103_v56, %v4099_v53  ;;  %v3833_v34 = vadd.f32 1.0, %v3832_v62  ;;  %v3840_v12 = vadd.f32 1.0, %v3839_v26  ;;  %v3966_v37 = vor.u32 %v3965_v41, %v3964_v14  ;;  %v13658_v53 = vld [vmem:[#allocation18_spill] sm:$0xff]  ;;  %v13660_v56 = vld [vmem:[#allocation187_spill] sm:$0xff]  ;;  %v13661_v62 = vld [vmem:[#allocation184_spill] sm:$0xff] }
 0x454   : > { %v4105_v27 = vadd.s32 %v4104_v59, %v4100_v45  ;;  %vm3848_vm12 = vcmp.eq.s32.totalorder %v3843_v2, 2  ;;  %v3969_v17 = vshll.u32 %v3968_v13, 23  ;;  %v3977_v42 = vsub.s32 4, %v11533_v60  ;;  %v13662_v41 = vld [vmem:[#allocation2_spill] sm:$0xff] }
 0x455   : > { %v4208_v11 = vsel %vm4194_vm3, %v13657_v38, %v13656_v3  ;;  %v3841_v46 = vmul.f32 %v3840_v12, %v3825_v6  ;;  %v3849_v48 = vxor.u32 2147483648, %v3833_v34  ;;  %v3973_v44 = vcvt.s32.f32 %v3966_v37  ;;  %v13663_v12 = vld [vmem:[#allocation185_spill] sm:$0xff] }
 0x456   : > { %v4106_v54 = vadd.s32 536870912, %v4105_v27  ;;  %vm13659_vm5 = vcmask 31744   ;;  %v3970_v0 = vor.u32 4788187, %v3969_v17  ;;  %v5927_v45 = vadd.f32 %v5926_v58, %v5716_v39 }
 0x457   : > { %6730 = vmatmul.msk.f32.gmra.mxu1 %vm13659_vm5, %v13658_v53  ;;  %v4212_v19 = vand.u32 65535, %v4208_v11  ;;  %v4213_v23 = vshrl.u32 %v4208_v11, 16  ;;  %v3846_v5 = vxor.u32 2147483648, %v3841_v46  ;;  %v3850_v14 = vsel %vm3848_vm12, %v3849_v48, %v3841_v46 }
 0x458   : > { %v11602_v52 = vshrl.u32 %v4106_v54, 30  ;;  %v4204_v6 = vsel %vm4194_vm3, %v13661_v62, %v13660_v56  ;;  %v3971_v26 = vand.u32 2147483647, %v3970_v0  ;;  %6770 = vmatmul.msk.f32.gmra.mxu3 %vm6015_vm2, %v5927_v45  ;;  %v13664_v3 = vand.u32 2147483647, %v13654_v47 }
 0x459   : > { %v4214_v13 = vmul.u32 %v4212_v19, %v13662_v41  ;;  %v11611_v59 = vmul.u32 %v4213_v23, %v13662_v41  ;;  %v11614_v37 = vmul.u32 %v4212_v19, %v13663_v12  ;;  %v3847_v17 = vsel %vm3845_vm4, %v3833_v34, %v3846_v5  ;;  %v13668_v5 = vld [vmem:[#allocation183_spill] sm:$0xff] }
 0x45a   : > { %vm11619_vm8 = vcmp.le.f32.partialorder %v13664_v3, 0.7853982  ;;  %v3978_v11 = vsel %vm3855_vm7, %v3977_v42, %v11533_v60  ;;  %v4108_v46 = vshll.u32 %v11602_v52, 30  ;;  %v3851_v48 = vsel %vm3844_vm0, %v3847_v17, %v3850_v14 }
 0x45b   : > { %v3974_v39 = vmul.f32 %v3973_v44, %v3971_v26  ;;  %v4218_v58 = vshll.u32 %v11611_v59, 16  ;;  %v4235_v54 = vshrl.u32 %v4204_v6, 16  ;;  %v3852_v34 = vsel %vm3842_vm13, nan, %v3851_v48 }
 0x45c   : > { %v11631_v53 = vsub.s32 %v4105_v27, %v4108_v46  ;;  %v4217_v0 = vmul.u32 %v4213_v23, %v13663_v12  ;;  %v4234_v45 = vand.u32 65535, %v4204_v6  ;;  %6753 = vmatmul.msk.f32.gmra.mxu2 %vm5797_vm11, %v3852_v34  ;;  %v3980_v60 = vsel %vm11619_vm8, 0, %v3978_v11 }
 0x45d   : > { %v3975_v19 = vxor.u32 2147483648, %v3974_v39  ;;  %v4220_v2 = vshll.u32 %v11614_v37, 16  ;;  %vm4222_vm14 = vc.u32 %v4214_v13, %v4218_v58  ;;  %v4177_v27 = vshrl.u32 %v13182_v9, %v13667_v24 }
 0x45e   : > { %vm4110_vm10 = vcmp.lt.s32.totalorder %v11631_v53, 0  ;;  %v4111_v42 = vsub.s32 0, %v11631_v53  ;;  %v4223_v44 = vsel %vm4222_vm14, 1, %v13267_v40  ;;  %v4198_v14 = vsel %vm4196_vm1, %v13668_v5, 2102212464 }
 0x45f   : > { %v3976_v23 = vsel %vm3855_vm7, %v3975_v19, %v3974_v39  ;;  %v4224_v56 = vadd.s32 %v4218_v58, %v4214_v13  ;;  %v11649_v62 = vmul.u32 %v4235_v54, %v13662_v41  ;;  %v4225_v17 = vadd.s32 %v4223_v44, %v4217_v0  ;;  %v13669_v19 = vld [vmem:[#allocation182_spill] sm:$0xff] }
 0x460   : > { %v11654_v6 = vsel %vm11619_vm8, %v13654_v47, %v3976_v23  ;;  %v4112_v26 = vsel %vm4110_vm10, %v4111_v42, %v11631_v53  ;;  %v4236_v3 = vmul.u32 %v4234_v45, %v13662_v41  ;;  %v11661_v48 = vand.u32 3, %v3980_v60  ;;  %v13673_v23 = vld [vmem:[#allocation156_spill] sm:$0xff] }
 0x461   : > { %v3981_v11 = vmul.f32 %v11654_v6, %v11654_v6  ;;  %v4113_v46 = vclz %v4112_v26  ;;  %vm4226_vm7 = vc.u32 %v4224_v56, %v4220_v2  ;;  %v4240_v13 = vshll.u32 %v11649_v62, 16  ;;  %v13671_v2 = vld [vmem:[#allocation56_spill] sm:$0xff] }
 0x462   : > { %v4101_v39 = vadd.s32 %v11566_v16, %v11564_v35  ;;  %v4227_v38 = vsel %vm4226_vm7, 1, %v13267_v40  ;;  %v11667_v58 = vmul.u32 %v4234_v45, %v13663_v12  ;;  %vm13670_vm1 = vcmp.lt.s32.totalorder %v13655_v32, 1 }
 0x463   : > { %v3982_v34 = vmul.f32 -0.001358992, %v3981_v11  ;;  %v3989_v0 = vmul.f32 -0.00019511016, %v3981_v11  ;;  %v6671_v41 = vadd.s32 4294967294, %v4113_v46  ;;  %v4197_v42 = vsel %vm13670_vm1, %v4177_v27, %v13669_v19 }
 0x464   : > { %vm13672_vm13 = vcmp.lt.s32.totalorder %v13655_v32, 3  ;;  %v4219_v24 = vshrl.u32 %v11611_v59, 16  ;;  %v4229_v44 = vadd.s32 %v4227_v38, %v4225_v17  ;;  %vm4244_vm0 = vc.u32 %v4236_v3, %v4240_v13 }
 0x465   : > { %v4199_v60 = vsel %vm13672_vm13, %v13671_v2, %v4198_v14  ;;  %v3983_v35 = vadd.f32 0.041655596, %v3982_v34  ;;  %v3990_v16 = vadd.f32 0.008332121, %v3989_v0  ;;  %vm6672_vm4 = vcmp.lt.s32.totalorder %v6671_v41, 0 }
 0x466   : > { %v4239_v45 = vmul.u32 %v4235_v54, %v13663_v12  ;;  %vm4009_vm12 = vcmp.lt.s32.totalorder %v13673_v23, 0  ;;  %vm4002_vm5 = vcmp.eq.s32.totalorder %v11661_v48, 2  ;;  %v4116_v5 = vsel %vm6672_vm4, 0, %v6671_v41 }
 0x467   : > { %v4242_v27 = vshll.u32 %v11667_v58, 16  ;;  %v4245_v56 = vsel %vm4244_vm0, 1, %v13267_v40  ;;  %v4246_v26 = vadd.s32 %v4240_v13, %v4236_v3  ;;  %v3984_v14 = vmul.f32 %v3983_v35, %v3981_v11 }
 0x468   : > { %v3991_v46 = vmul.f32 %v3990_v16, %v3981_v11  ;;  %v4117_v59 = vsub.s32 32, %v4116_v5  ;;  %v4118_v17 = vshll.u32 %v11631_v53, %v4116_v5  ;;  %vm3999_vm8 = vcmp.eq.s32.totalorder %v11661_v48, 0 }
 0x469   : > { %v4121_v38 = vsub.s32 4294967266, %v4116_v5  ;;  %v4200_v12 = vsel %vm4194_vm3, %v4197_v42, %v4199_v60  ;;  %v4221_v54 = vshrl.u32 %v11614_v37, 16  ;;  %v4230_v34 = vadd.s32 %v4229_v44, %v4219_v24 }
 0x46a   : > { %v3985_v0 = vadd.f32 -0.4999988, %v3984_v14  ;;  %v3992_v41 = vadd.f32 -0.16666654, %v3991_v46  ;;  %vm3998_vm14 = vcmp.lt.s32.totalorder %v11661_v48, 2  ;;  %v4119_v19 = vshrl.u32 %v4101_v39, %v4117_v59  ;;  %v5929_v14 = vpop.f32.mrf.mxu2  ;;  %v13677_v46 = vld [vmem:[#allocation190_spill] sm:$0xff] }
 0x46b   : > { %v4131_v3 = vsub.s32 4, %v11602_v52  ;;  %vm3996_vm10 = vweird.f32 %v13654_v47  ;;  %v4122_v13 = vadd.s32 127, %v4121_v38  ;;  %v4241_v53 = vshrl.u32 %v11649_v62, 16  ;;  %v13678_v59 = vld [vmem:[#allocation19_spill] sm:$0xff] }
 0x46c   : > { %v4247_v2 = vadd.s32 %v4245_v56, %v4239_v45  ;;  %vm4248_vm7 = vc.u32 %v4246_v26, %v4242_v27  ;;  %v3986_v35 = vmul.f32 %v3985_v0, %v3981_v11  ;;  %v3993_v32 = vmul.f32 %v3992_v41, %v3981_v11  ;;  %v5719_v56 = vpop.f32.mrf.mxu1 }
 0x46d   : > { %v4120_v42 = vor.u32 %v4119_v19, %v4118_v17  ;;  %v4249_v37 = vsel %vm4248_vm7, 1, %v13267_v40  ;;  %v13674_v60 = vand.u32 2147483647, %v13673_v23  ;;  %v4123_v39 = vshll.u32 %v4122_v13, 23  ;;  %v13680_v19 = vld [vmem:[#allocation8_spill] sm:$0xff] }
 0x46e   : > { %v11697_v44 = vadd.s32 %v4230_v34, %v4221_v54  ;;  %v4243_v16 = vshrl.u32 %v11667_v58, 16  ;;  %v4251_v5 = vadd.s32 %v4249_v37, %v4247_v2  ;;  %v3987_v62 = vadd.f32 1.0, %v3986_v35  ;;  %v13681_v2 = vld [vmem:[#allocation194_spill] sm:$0xff]  ;;  %v13682_v35 = vld [vmem:[#allocation69_spill] sm:$0xff] }
 0x46f   : > { %vm11693_vm3 = vcmp.le.f32.partialorder %v13674_v60, 0.7853982  ;;  %v3994_v45 = vadd.f32 1.0, %v3993_v32  ;;  %v11700_v11 = vadd.s32 %v4246_v26, %v4242_v27  ;;  %vm4348_vm1 = vcmp.lt.s32.totalorder %v13677_v46, 2 }
 0x470   : > { %vm13679_vm13 = vcmask 31744   ;;  %v4124_v17 = vor.u32 4788187, %v4123_v39  ;;  %v4127_v38 = vcvt.s32.f32 %v4120_v42  ;;  %v5930_v0 = vadd.f32 %v5929_v14, %v5719_v56  ;;  %v13683_v42 = vld [vmem:[#allocation195_spill] sm:$0xff]  ;;  %v13686_v14 = vld [vmem:[#allocation193_spill] sm:$0xff] }
 0x471   : > { %6731 = vmatmul.msk.f32.gmra.mxu1 %vm13679_vm13, %v13678_v59  ;;  %v4252_v41 = vadd.s32 %v4251_v5, %v4241_v53  ;;  %v3995_v54 = vmul.f32 %v3994_v45, %v11654_v6  ;;  %v4003_v34 = vxor.u32 2147483648, %v3987_v62  ;;  %v4132_v58 = vsel %vm4009_vm12, %v4131_v3, %v11602_v52  ;;  %v13684_v53 = vld [vmem:[#allocation60_spill] sm:$0xff]  ;;  %v13685_v45 = vld [vmem:[#allocation57_spill] sm:$0xff] }
 0x472   : > { %v4254_v13 = vmul.u32 %v13680_v19, %v4200_v12  ;;  %v4125_v27 = vand.u32 2147483647, %v4124_v17  ;;  %6771 = vmatmul.msk.f32.gmra.mxu3 %vm6015_vm2, %v5930_v0  ;;  %v4358_v32 = vsel %vm4348_vm1, %v13682_v35, %v13681_v2  ;;  %v4362_v6 = vsel %vm4348_vm1, %v13684_v53, %v13683_v42 }
 0x473   : > { %v4253_v26 = vadd.s32 %v4252_v41, %v4243_v16  ;;  %v4000_v37 = vxor.u32 2147483648, %v3995_v54  ;;  %v4004_v52 = vsel %vm4002_vm5, %v4003_v34, %v3995_v54  ;;  %vm4256_vm0 = vc.u32 %v11697_v44, %v11700_v11 }
 0x474   : > { %v4366_v12 = vand.u32 65535, %v4362_v6  ;;  %v4128_v3 = vmul.f32 %v4127_v38, %v4125_v27  ;;  %v4367_v39 = vshrl.u32 %v4362_v6, 16  ;;  %v4388_v16 = vand.u32 65535, %v4358_v32 }
 0x475   : > { %v4257_v60 = vadd.s32 1, %v4253_v26  ;;  %v4001_v5 = vsel %vm3999_vm8, %v3987_v62, %v4000_v37  ;;  %v4389_v17 = vshrl.u32 %v4358_v32, 16  ;;  %v11734_v38 = vshrl.u32 %v13089_v51, %v11269_v36  ;;  %v13687_v32 = vld [vmem:[#allocation191_spill] sm:$0xff] }
 0x476   : > { %v4368_v56 = vmul.u32 %v4366_v12, %v13685_v45  ;;  %v11727_v59 = vmul.u32 %v4366_v12, %v13686_v14  ;;  %v4005_v0 = vsel %vm3998_vm14, %v4001_v5, %v4004_v52  ;;  %v4129_v41 = vxor.u32 2147483648, %v4128_v3 }
 0x477   : > { %v4258_v54 = vsel %vm4256_vm0, %v4257_v60, %v4253_v26  ;;  %v4369_v34 = vmul.u32 %v4367_v39, %v13685_v45  ;;  %v4006_v62 = vsel %vm3996_vm10, nan, %v4005_v0  ;;  %v4134_v19 = vsel %vm11693_vm3, 0, %v4132_v58  ;;  %v13688_v0 = vld [vmem:[#allocation47_spill] sm:$0xff] }
 0x478   : > { %v4259_v27 = vadd.s32 %v4258_v54, %v4254_v13  ;;  %6754 = vmatmul.msk.f32.gmra.mxu2 %vm5797_vm11, %v4006_v62  ;;  %v4130_v48 = vsel %vm4009_vm12, %v4129_v41, %v4128_v3  ;;  %v4371_v26 = vmul.u32 %v4367_v39, %v13686_v14  ;;  %v4374_v35 = vshll.u32 %v11727_v59, 16 }
 0x479   : > { %v4372_v2 = vshll.u32 %v4369_v34, 16  ;;  %v4133_v51 = vsel %vm11693_vm3, %v13673_v23, %v4130_v48  ;;  %v4331_v42 = vshrl.u32 %v13182_v9, %v13687_v32  ;;  %v4391_v58 = vmul.u32 %v4389_v17, %v13685_v45  ;;  %v13689_v32 = vld [vmem:[#allocation22_spill] sm:$0xff] }
 0x47a   : > { %v4260_v47 = vadd.s32 536870912, %v4259_v27  ;;  %v4135_v13 = vmul.f32 %v4133_v51, %v4133_v51  ;;  %v4390_v6 = vmul.u32 %v4388_v16, %v13685_v45  ;;  %v11756_v12 = vmul.u32 %v4388_v16, %v13686_v14 }
 0x47b   : > { %vm4376_vm4 = vc.u32 %v4368_v56, %v4372_v2  ;;  %v4378_v53 = vadd.s32 %v4372_v2, %v4368_v56  ;;  %v4394_v24 = vshll.u32 %v4391_v58, 16  ;;  %v11760_v5 = vshrl.u32 %v13098_v31, %v11269_v36 }
 0x47c   : > { %v11752_v37 = vshrl.u32 %v4260_v47, 30  ;;  %v4377_v52 = vsel %vm4376_vm4, 1, %v13267_v40  ;;  %v4136_v3 = vmul.f32 -0.001358992, %v4135_v13  ;;  %v4143_v60 = vmul.f32 -0.00019511016, %v4135_v13 }
 0x47d   : > { %v4379_v39 = vadd.s32 %v4377_v52, %v4371_v26  ;;  %vm4380_vm12 = vc.u32 %v4378_v53, %v4374_v35  ;;  %v4352_v45 = vsel %vm4350_vm15, %v13688_v0, 2102212464  ;;  %v4151_v62 = vand.u32 3, %v4134_v19  ;;  %v13690_v19 = vld [vmem:[#allocation53_spill] sm:$0xff] }
 0x47e   : > { %v4262_v56 = vshll.u32 %v11752_v37, 30  ;;  %v4381_v41 = vsel %vm4380_vm12, 1, %v13267_v40  ;;  %v4137_v54 = vadd.f32 0.041655596, %v4136_v3  ;;  %v4144_v16 = vadd.f32 0.008332121, %v4143_v60 }
 0x47f   : > { %v4373_v48 = vshrl.u32 %v4369_v34, 16  ;;  %v4383_v26 = vadd.s32 %v4381_v41, %v4379_v39  ;;  %v4393_v35 = vmul.u32 %v4389_v17, %v13686_v14  ;;  %vm4398_vm5 = vc.u32 %v4390_v6, %v4394_v24 }
 0x480   : > { %v11767_v2 = vsub.s32 %v4259_v27, %v4262_v56  ;;  %v4138_v31 = vmul.f32 %v4137_v54, %v4135_v13  ;;  %v4145_v47 = vmul.f32 %v4144_v16, %v4135_v13  ;;  %v4351_v53 = vsel %vm4347_vm9, %v4331_v42, %v13689_v32 }
 0x481   : > { %v4396_v52 = vshll.u32 %v11756_v12, 16  ;;  %vm13691_vm8 = vcmp.lt.s32.totalorder %v13677_v46, 3  ;;  %v4399_v27 = vsel %vm4398_vm5, 1, %v13267_v40  ;;  %v4375_v60 = vshrl.u32 %v11727_v59, 16 }
 0x482   : > { %vm4264_vm15 = vcmp.lt.s32.totalorder %v11767_v2, 0  ;;  %v4265_v3 = vsub.s32 0, %v11767_v2  ;;  %v4353_v34 = vsel %vm13691_vm8, %v13690_v19, %v4352_v45  ;;  %v4139_v14 = vadd.f32 -0.4999988, %v4138_v31 }
 0x483   : > { %v4146_v17 = vadd.f32 -0.16666654, %v4145_v47  ;;  %v4400_v39 = vadd.s32 %v4394_v24, %v4390_v6  ;;  %v4384_v42 = vadd.s32 %v4383_v26, %v4373_v48  ;;  %v4395_v0 = vshrl.u32 %v4391_v58, 16 }
 0x484   : > { %v4266_v56 = vsel %vm4264_vm15, %v4265_v3, %v11767_v2  ;;  %v4401_v41 = vadd.s32 %v4399_v27, %v4393_v35  ;;  %v4140_v54 = vmul.f32 %v4139_v14, %v4135_v13  ;;  %vm4150_vm14 = vweird.f32 %v13673_v23  ;;  %v13693_v14 = vld [vmem:[#allocation189_spill] sm:$0xff] }
 0x485   : > { %v4147_v16 = vmul.f32 %v4146_v17, %v4135_v13  ;;  %v4267_v32 = vclz %v4266_v56  ;;  %vm4402_vm9 = vc.u32 %v4400_v39, %v4396_v52  ;;  %vm4156_vm10 = vcmp.eq.s32.totalorder %v4151_v62, 2 }
 0x486   : > { %v4255_v45 = vadd.s32 %v11700_v11, %v11697_v44  ;;  %v4403_v31 = vsel %vm4402_vm9, 1, %v13267_v40  ;;  %v4141_v47 = vadd.f32 1.0, %v4140_v54  ;;  %v4354_v58 = vsel %vm4348_vm1, %v4351_v53, %v4353_v34  ;;  %v13692_v44 = vld [vmem:[#allocation160_spill] sm:$0xff] }
 0x487   : > { %v4148_v59 = vadd.f32 1.0, %v4147_v16  ;;  %v6674_v6 = vadd.s32 4294967294, %v4267_v32  ;;  %v4405_v24 = vadd.s32 %v4403_v31, %v4401_v41  ;;  %v11788_v48 = vadd.s32 %v4384_v42, %v4375_v60  ;;  %v13694_v41 = vld [vmem:[#allocation81_spill] sm:$0xff] }
 0x488   : > { %v4397_v13 = vshrl.u32 %v11756_v12, 16  ;;  %v11791_v26 = vadd.s32 %v4400_v39, %v4396_v52  ;;  %v4157_v3 = vxor.u32 2147483648, %v4141_v47  ;;  %vm4163_vm3 = vcmp.lt.s32.totalorder %v13692_v44, 0 }
 0x489   : > { %v4149_v35 = vmul.f32 %v4148_v59, %v4133_v51  ;;  %vm6675_vm7 = vcmp.lt.s32.totalorder %v6674_v6, 0  ;;  %v4406_v19 = vadd.s32 %v4405_v24, %v4395_v0  ;;  %vm4152_vm13 = vcmp.lt.s32.totalorder %v4151_v62, 2  ;;  %v5932_v24 = vpop.f32.mrf.mxu2 }
 0x48a   : > { %vm4153_vm0 = vcmp.eq.s32.totalorder %v4151_v62, 0  ;;  %v4270_v11 = vsel %vm6675_vm7, 0, %v6674_v6  ;;  %vm4502_vm4 = vcmp.lt.s32.totalorder %v8846_v49, 2  ;;  %v4285_v52 = vsub.s32 4, %v11752_v37  ;;  %v5722_v6 = vpop.f32.mrf.mxu1 }
 0x48b   : > { %v4154_v27 = vxor.u32 2147483648, %v4149_v35  ;;  %v4158_v46 = vsel %vm4156_vm10, %v4157_v3, %v4149_v35  ;;  %v4271_v53 = vsub.s32 32, %v4270_v11  ;;  %v4272_v34 = vshll.u32 %v11767_v2, %v4270_v11  ;;  %v13699_v3 = vld [vmem:[#allocation23_spill] sm:$0xff] }
 0x48c   : > { %v4275_v12 = vsub.s32 4294967266, %v4270_v11  ;;  %v4407_v51 = vadd.s32 %v4406_v19, %v4397_v13  ;;  %v4408_v17 = vmul.u32 %v13693_v14, %v4354_v58  ;;  %vm4410_vm1 = vc.u32 %v11788_v48, %v11791_v26  ;;  %v13698_v58 = vld [vmem:[#allocation197_spill] sm:$0xff] }
 0x48d   : > { %v4155_v60 = vsel %vm4153_vm0, %v4141_v47, %v4154_v27  ;;  %v4273_v39 = vshrl.u32 %v4255_v45, %v4271_v53  ;;  %v4512_v56 = vsel %vm4502_vm4, %v9021_v20, %v9033_v63  ;;  %v4516_v54 = vsel %vm4502_vm4, %v13694_v41, %v9044_v1 }
 0x48e   : > { %v4159_v42 = vsel %vm4152_vm13, %v4155_v60, %v4158_v46  ;;  %v4276_v0 = vadd.s32 127, %v4275_v12  ;;  %v4411_v2 = vadd.s32 1, %v4407_v51  ;;  %v4520_v45 = vand.u32 65535, %v4516_v54  ;;  %v13701_v46 = vld [vmem:[#allocation90_spill] sm:$0xff]  ;;  %v13702_v60 = vld [vmem:[#allocation196_spill] sm:$0xff] }
 0x48f   : > { %v4160_v16 = vsel %vm4150_vm14, nan, %v4159_v42  ;;  %v4274_v32 = vor.u32 %v4273_v39, %v4272_v34  ;;  %v4521_v31 = vshrl.u32 %v4516_v54, 16  ;;  %v13695_v47 = vand.u32 2147483647, %v13692_v44 }
 0x490   : > { %6755 = vmatmul.msk.f32.gmra.mxu2 %vm5797_vm11, %v4160_v16  ;;  %v4277_v63 = vshll.u32 %v4276_v0, 23  ;;  %v4412_v62 = vsel %vm4410_vm1, %v4411_v2, %v4407_v51  ;;  %v4543_v59 = vshrl.u32 %v4512_v56, 16  ;;  %v4522_v23 = vmul.u32 %v4520_v45, %v13698_v58 }
 0x491   : > { %vm11815_vm12 = vcmp.le.f32.partialorder %v13695_v47, 0.7853982  ;;  %v4413_v1 = vadd.s32 %v4412_v62, %v4408_v17  ;;  %v4523_v13 = vmul.u32 %v4521_v31, %v13698_v58  ;;  %v4542_v35 = vand.u32 65535, %v4512_v56 }
 0x492   : > { %vm13700_vm5 = vcmask 31744   ;;  %v4278_v19 = vor.u32 4788187, %v4277_v63  ;;  %v4281_v11 = vcvt.s32.f32 %v4274_v32  ;;  %v5933_v27 = vadd.f32 %v5932_v24, %v5722_v6 }
 0x493   : > { %6732 = vmatmul.msk.f32.gmra.mxu1 %vm13700_vm5, %v13699_v3  ;;  %v4524_v53 = vmul.u32 %v4520_v45, %v13701_v46  ;;  %v11827_v34 = vsel %vm4163_vm3, %v4285_v52, %v11752_v37  ;;  %v4414_v12 = vadd.s32 536870912, %v4413_v1  ;;  %v4525_v51 = vmul.u32 %v4521_v31, %v13701_v46  ;;  %v13703_v45 = vld [vmem:[#allocation70_spill] sm:$0xff]  ;;  %v13705_v3 = vld [vmem:[#allocation68_spill] sm:$0xff] }
 0x494   : > { %v4526_v14 = vshll.u32 %v4523_v13, 16  ;;  %v4279_v17 = vand.u32 2147483647, %v4278_v19  ;;  %6772 = vmatmul.msk.f32.gmra.mxu3 %vm6015_vm2, %v5933_v27  ;;  %v4485_v39 = vshrl.u32 %v13182_v9, %v13702_v60  ;;  %v4545_v42 = vmul.u32 %v4543_v59, %v13698_v58  ;;  %v13707_v27 = vld [vmem:[#allocation61_spill] sm:$0xff] }
 0x495   : > { %v4528_v56 = vshll.u32 %v4524_v53, 16  ;;  %v11834_v0 = vshrl.u32 %v4414_v12, 30  ;;  %v4546_v37 = vmul.u32 %v4542_v35, %v13701_v46  ;;  %v4544_v54 = vmul.u32 %v4542_v35, %v13698_v58 }
 0x496   : > { %vm4530_vm15 = vc.u32 %v4522_v23, %v4526_v14  ;;  %v4532_v2 = vadd.s32 %v4526_v14, %v4522_v23  ;;  %v4282_v52 = vmul.f32 %v4281_v11, %v4279_v17  ;;  %v4548_v16 = vshll.u32 %v4545_v42, 16 }
 0x497   : > { %v4531_v41 = vsel %vm4530_vm15, 1, %v13267_v40  ;;  %v4416_v32 = vshll.u32 %v11834_v0, 30  ;;  %vm13704_vm8 = vcmp.lt.s32.totalorder %v8846_v49, 4  ;;  %v4527_v62 = vshrl.u32 %v4523_v13, 16 }
 0x498   : > { %v4506_v31 = vsel %vm13704_vm8, %v13703_v45, 2102212464  ;;  %v4533_v47 = vadd.s32 %v4531_v41, %v4525_v51  ;;  %vm4534_vm9 = vc.u32 %v4532_v2, %v4528_v56  ;;  %v4283_v63 = vxor.u32 2147483648, %v4282_v52 }
 0x499   : > { %v4535_v6 = vsel %vm4534_vm9, 1, %v13267_v40  ;;  %v4550_v24 = vshll.u32 %v4546_v37, 16  ;;  %v11844_v23 = vsub.s32 %v4413_v1, %v4416_v32  ;;  %vm13706_vm14 = vcmp.lt.s32.totalorder %v8846_v49, 1 }
 0x49a   : > { %v4505_v58 = vsel %vm13706_vm14, %v4485_v39, %v13705_v3  ;;  %v4537_v35 = vadd.s32 %v4535_v6, %v4533_v47  ;;  %v4547_v19 = vmul.u32 %v4543_v59, %v13701_v46  ;;  %v4284_v11 = vsel %vm4163_vm3, %v4283_v63, %v4282_v52 }
 0x49b   : > { %vm13708_vm10 = vcmp.lt.s32.totalorder %v8846_v49, 3  ;;  %vm4552_vm7 = vc.u32 %v4544_v54, %v4548_v16  ;;  %v4554_v13 = vadd.s32 %v4548_v16, %v4544_v54  ;;  %v4287_v1 = vsel %vm11815_vm12, %v13692_v44, %v4284_v11  ;;  %v13709_v49 = vld [vmem:[#allocation67_spill] sm:$0xff] }
 0x49c   : > { %v4507_v12 = vsel %vm13708_vm10, %v13707_v27, %v4506_v31  ;;  %vm4418_vm13 = vcmp.lt.s32.totalorder %v11844_v23, 0  ;;  %v4419_v51 = vsub.s32 0, %v11844_v23  ;;  %v4529_v14 = vshrl.u32 %v4524_v53, 16 }
 0x49d   : > { %v4289_v17 = vmul.f32 %v4287_v1, %v4287_v1  ;;  %v4538_v59 = vadd.s32 %v4537_v35, %v4527_v62  ;;  %v4553_v46 = vsel %vm4552_vm7, 1, %v13267_v40  ;;  %vm4556_vm3 = vc.u32 %v4554_v13, %v4550_v24 }
 0x49e   : > { %v4420_v60 = vsel %vm4418_vm13, %v4419_v51, %v11844_v23  ;;  %v4549_v39 = vshrl.u32 %v4545_v42, 16  ;;  %v4555_v56 = vadd.s32 %v4553_v46, %v4547_v19  ;;  %v4557_v2 = vsel %vm4556_vm3, 1, %v13267_v40 }
 0x49f   : > { %v4288_v52 = vsel %vm11815_vm12, 0, %v11827_v34  ;;  %v4290_v41 = vmul.f32 -0.001358992, %v4289_v17  ;;  %v4297_v54 = vmul.f32 -0.00019511016, %v4289_v17  ;;  %v4421_v16 = vclz %v4420_v60 }
 0x4a0   : > { %v11866_v32 = vadd.s32 %v4538_v59, %v4529_v14  ;;  %v4551_v53 = vshrl.u32 %v4546_v37, 16  ;;  %v11868_v45 = vadd.s32 %v4554_v13, %v4550_v24  ;;  %v4559_v31 = vadd.s32 %v4557_v2, %v4555_v56  ;;  %v13711_v2 = vld [vmem:[#allocation202_spill] sm:$0xff] }
 0x4a1   : > { %v4291_v47 = vadd.f32 0.041655596, %v4290_v41  ;;  %v4298_v63 = vadd.f32 0.008332121, %v4297_v54  ;;  %v6677_v62 = vadd.s32 4294967294, %v4421_v16  ;;  %v4508_v42 = vsel %vm4502_vm4, %v4505_v58, %v4507_v12 }
 0x4a2   : > { %v11874_v6 = vor.u32 %v11572_v25, %v11277_v7  ;;  %v11878_v20 = vor.u32 %v11576_v33, %v11289_v8  ;;  %v4409_v34 = vadd.s32 %v11791_v26, %v11788_v48  ;;  %v4560_v37 = vadd.s32 %v4559_v31, %v4549_v39  ;;  %v13710_v33 = vld [vmem:[#allocation173_spill] sm:$0xff]  ;;  %v5935_v31 = vpop.f32.mrf.mxu2 }
 0x4a3   : > { %v4292_v24 = vmul.f32 %v4291_v47, %v4289_v17  ;;  %v4299_v3 = vmul.f32 %v4298_v63, %v4289_v17  ;;  %v4305_v35 = vand.u32 3, %v4288_v52  ;;  %vm6678_vm0 = vcmp.lt.s32.totalorder %v6677_v62, 0 }
 0x4a4   : > { %v4424_v19 = vsel %vm6678_vm0, 0, %v6677_v62  ;;  %v4561_v11 = vadd.s32 %v4560_v37, %v4551_v53  ;;  %v4562_v58 = vmul.u32 %v13709_v49, %v4508_v42  ;;  %vm4564_vm4 = vc.u32 %v11866_v32, %v11868_v45  ;;  %v5725_v53 = vpop.f32.mrf.mxu1 }
 0x4a5   : > { %v4293_v7 = vadd.f32 -0.4999988, %v4292_v24  ;;  %v4300_v25 = vadd.f32 -0.16666654, %v4299_v3  ;;  %v4425_v27 = vsub.s32 32, %v4424_v19  ;;  %v4426_v8 = vshll.u32 %v11844_v23, %v4424_v19 }
 0x4a6   : > { %vm4317_vm1 = vcmp.lt.s32.totalorder %v13710_v33, 0  ;;  %v11889_v48 = vor.u32 %v11587_v57, %v11300_v22  ;;  %vm4304_vm12 = vweird.f32 %v13692_v44  ;;  %v4429_v26 = vsub.s32 4294967266, %v4424_v19  ;;  %v13713_v19 = vld [vmem:[#allocation89_spill] sm:$0xff]  ;;  %v13720_v44 = vld [vmem:[#allocation198_spill] sm:$0xff] }
 0x4a7   : > { %v4565_v12 = vadd.s32 1, %v4561_v11  ;;  %v4294_v13 = vmul.f32 %v4293_v7, %v4289_v17  ;;  %v4301_v51 = vmul.f32 %v4300_v25, %v4289_v17  ;;  %v4427_v14 = vshrl.u32 %v4409_v34, %v4425_v27  ;;  %v13712_v17 = vld [vmem:[#allocation201_spill] sm:$0xff]  ;;  %v13716_v27 = vld [vmem:[#allocation95_spill] sm:$0xff] }
 0x4a8   : > { %vm4656_vm5 = vcmp.lt.s32.totalorder %v9052_v18, 2  ;;  %vm4306_vm15 = vcmp.lt.s32.totalorder %v4305_v35, 2  ;;  %vm4307_vm8 = vcmp.eq.s32.totalorder %v4305_v35, 0  ;;  %v4430_v59 = vadd.s32 127, %v4429_v26 }
 0x4a9   : > { %v4566_v23 = vsel %vm4564_vm4, %v4565_v12, %v4561_v11  ;;  %v4295_v46 = vadd.f32 1.0, %v4294_v13  ;;  %v4302_v60 = vadd.f32 1.0, %v4301_v51  ;;  %v4428_v22 = vor.u32 %v4427_v14, %v4426_v8  ;;  %v13714_v11 = vld [vmem:[#allocation82_spill] sm:$0xff]  ;;  %v13723_v13 = vld [vmem:[#allocation33_spill] sm:$0xff] }
 0x4aa   : > { %v4567_v57 = vadd.s32 %v4566_v23, %v4562_v58  ;;  %vm4310_vm9 = vcmp.eq.s32.totalorder %v4305_v35, 2  ;;  %v4431_v39 = vshll.u32 %v4430_v59, 23  ;;  %v4439_v56 = vsub.s32 4, %v11834_v0 }
 0x4ab   : > { %v4670_v52 = vsel %vm4656_vm5, %v13712_v17, %v13711_v2  ;;  %v4303_v41 = vmul.f32 %v4302_v60, %v4287_v1  ;;  %v4311_v54 = vxor.u32 2147483648, %v4295_v46  ;;  %v4435_v16 = vcvt.s32.f32 %v4428_v22  ;;  %v13715_v1 = vld [vmem:[#allocation199_spill] sm:$0xff] }
 0x4ac   : > { %v4568_v47 = vadd.s32 536870912, %v4567_v57  ;;  %v4432_v63 = vor.u32 4788187, %v4431_v39  ;;  %v5936_v62 = vadd.f32 %v5935_v31, %v5725_v53  ;;  %v4674_v42 = vand.u32 65535, %v4670_v52 }
 0x4ad   : > { %v4675_v34 = vshrl.u32 %v4670_v52, 16  ;;  %v4308_v37 = vxor.u32 2147483648, %v4303_v41  ;;  %v4312_v24 = vsel %vm4310_vm9, %v4311_v54, %v4303_v41  ;;  %v4666_v49 = vsel %vm4656_vm5, %v13714_v11, %v13713_v19 }
 0x4ae   : > { %v11901_v3 = vshrl.u32 %v4568_v47, 30  ;;  %v4433_v58 = vand.u32 2147483647, %v4432_v63  ;;  %6773 = vmatmul.msk.f32.gmra.mxu3 %vm6015_vm2, %v5936_v62  ;;  %v4676_v7 = vmul.u32 %v4674_v42, %v13715_v1  ;;  %v11913_v8 = vmul.u32 %v4674_v42, %v13716_v27 }
 0x4af   : > { %v11910_v25 = vmul.u32 %v4675_v34, %v13715_v1  ;;  %v4309_v26 = vsel %vm4307_vm8, %v4295_v46, %v4308_v37  ;;  %v13717_v12 = vand.u32 2147483647, %v13710_v33  ;;  %v4440_v51 = vsel %vm4317_vm1, %v4439_v56, %v11834_v0 }
 0x4b0   : > { %v4570_v14 = vshll.u32 %v11901_v3, 30  ;;  %v4313_v59 = vsel %vm4306_vm15, %v4309_v26, %v4312_v24  ;;  %v4436_v23 = vmul.f32 %v4435_v16, %v4433_v58  ;;  %v4697_v22 = vshrl.u32 %v4666_v49, 16  ;;  %v13721_v16 = vld [vmem:[#allocation71_spill] sm:$0xff] }
 0x4b1   : > { %vm11918_vm14 = vcmp.le.f32.partialorder %v13717_v12, 0.7853982  ;;  %v4680_v60 = vshll.u32 %v11910_v25, 16  ;;  %v4314_v46 = vsel %vm4304_vm12, nan, %v4313_v59  ;;  %v4679_v2 = vmul.u32 %v4675_v34, %v13716_v27 }
 0x4b2   : > { %v11930_v39 = vsub.s32 %v4567_v57, %v4570_v14  ;;  %v4696_v17 = vand.u32 65535, %v4666_v49  ;;  %6756 = vmatmul.msk.f32.gmra.mxu2 %vm5797_vm11, %v4314_v46  ;;  %v4437_v52 = vxor.u32 2147483648, %v4436_v23  ;;  %v4442_v0 = vsel %vm11918_vm14, 0, %v4440_v51  ;;  %v13725_v14 = vld [vmem:[#allocation77_spill] sm:$0xff] }
 0x4b3   : > { %v4682_v35 = vshll.u32 %v11913_v8, 16  ;;  %vm4684_vm10 = vc.u32 %v4676_v7, %v4680_v60  ;;  %v4639_v57 = vshrl.u32 %v13182_v9, %v13720_v44  ;;  %vm13722_vm13 = vcmp.lt.s32.totalorder %v9052_v18, 4 }
 0x4b4   : > { %vm4572_vm7 = vcmp.lt.s32.totalorder %v11930_v39, 0  ;;  %v4573_v56 = vsub.s32 0, %v11930_v39  ;;  %v4685_v41 = vsel %vm4684_vm10, 1, %v13267_v40  ;;  %v4438_v54 = vsel %vm4317_vm1, %v4437_v52, %v4436_v23 }
 0x4b5   : > { %v4660_v53 = vsel %vm13722_vm13, %v13721_v16, 2102212464  ;;  %v4686_v31 = vadd.s32 %v4680_v60, %v4676_v7  ;;  %v11948_v47 = vmul.u32 %v4697_v22, %v13715_v1  ;;  %v11953_v63 = vsel %vm11918_vm14, %v13710_v33, %v4438_v54 }
 0x4b6   : > { %v4574_v62 = vsel %vm4572_vm7, %v4573_v56, %v11930_v39  ;;  %v4687_v42 = vadd.s32 %v4685_v41, %v4679_v2  ;;  %v4698_v34 = vmul.u32 %v4696_v17, %v13715_v1  ;;  %v4443_v37 = vmul.f32 %v11953_v63, %v11953_v63  ;;  %v13727_v2 = vld [vmem:[#allocation192_spill] sm:$0xff] }
 0x4b7   : > { %v4575_v24 = vclz %v4574_v62  ;;  %vm4688_vm3 = vc.u32 %v4686_v31, %v4682_v35  ;;  %v4702_v19 = vshll.u32 %v11948_v47, 16  ;;  %v11960_v11 = vand.u32 3, %v4442_v0 }
 0x4b8   : > { %v4563_v49 = vadd.s32 %v11868_v45, %v11866_v32  ;;  %v4689_v58 = vsel %vm4688_vm3, 1, %v13267_v40  ;;  %v11966_v7 = vmul.u32 %v4696_v17, %v13716_v27  ;;  %v4444_v26 = vmul.f32 -0.001358992, %v4443_v37 }
 0x4b9   : > { %v4451_v12 = vmul.f32 -0.00019511016, %v4443_v37  ;;  %v6680_v1 = vadd.s32 4294967294, %v4575_v24  ;;  %vm13724_vm0 = vcmp.lt.s32.totalorder %v9052_v18, 1  ;;  %vm13726_vm4 = vcmp.lt.s32.totalorder %v9052_v18, 3 }
 0x4ba   : > { %v4659_v51 = vsel %vm13724_vm0, %v4639_v57, %v13723_v13  ;;  %v4661_v59 = vsel %vm13726_vm4, %v13725_v14, %v4660_v53  ;;  %v4681_v23 = vshrl.u32 %v11910_v25, 16  ;;  %v4691_v60 = vadd.s32 %v4689_v58, %v4687_v42  ;;  %v5728_v14 = vpop.f32.mrf.mxu1 }
 0x4bb   : > { %vm4706_vm1 = vc.u32 %v4698_v34, %v4702_v19  ;;  %v4445_v32 = vadd.f32 0.041655596, %v4444_v26  ;;  %v4452_v45 = vadd.f32 0.008332121, %v4451_v12  ;;  %vm6681_vm12 = vcmp.lt.s32.totalorder %v6680_v1, 0 }
 0x4bc   : > { %v4701_v46 = vmul.u32 %v4697_v22, %v13716_v27  ;;  %vm4471_vm15 = vcmp.lt.s32.totalorder %v13727_v2, 0  ;;  %vm4464_vm8 = vcmp.eq.s32.totalorder %v11960_v11, 2  ;;  %v4578_v17 = vsel %vm6681_vm12, 0, %v6680_v1 }
 0x4bd   : > { %v4704_v52 = vshll.u32 %v11966_v7, 16  ;;  %v4707_v0 = vsel %vm4706_vm1, 1, %v13267_v40  ;;  %v4708_v35 = vadd.s32 %v4702_v19, %v4698_v34  ;;  %v4446_v56 = vmul.f32 %v4445_v32, %v4443_v37 }
 0x4be   : > { %v4453_v44 = vmul.f32 %v4452_v45, %v4443_v37  ;;  %v4579_v25 = vsub.s32 32, %v4578_v17  ;;  %v4580_v57 = vshll.u32 %v11930_v39, %v4578_v17  ;;  %vm4461_vm9 = vcmp.eq.s32.totalorder %v11960_v11, 0 }
 0x4bf   : > { %v4583_v41 = vsub.s32 4294967266, %v4578_v17  ;;  %v4662_v27 = vsel %vm4656_vm5, %v4659_v51, %v4661_v59  ;;  %v4683_v22 = vshrl.u32 %v11913_v8, 16  ;;  %v4692_v54 = vadd.s32 %v4691_v60, %v4681_v23  ;;  %v5938_v59 = vpop.f32.mrf.mxu2 }
 0x4c0   : > { %v4447_v16 = vadd.f32 -0.4999988, %v4446_v56  ;;  %v4454_v53 = vadd.f32 -0.16666654, %v4453_v44  ;;  %vm4460_vm14 = vcmp.lt.s32.totalorder %v11960_v11, 2  ;;  %v4581_v31 = vshrl.u32 %v4563_v49, %v4579_v25 }
 0x4c1   : > { %v4593_v62 = vsub.s32 4, %v11901_v3  ;;  %vm4458_vm10 = vweird.f32 %v13710_v33  ;;  %v4584_v42 = vadd.s32 127, %v4583_v41  ;;  %v4703_v39 = vshrl.u32 %v11948_v47, 16  ;;  %v13734_v41 = vld [vmem:[#allocation103_spill] sm:$0xff]  ;;  %v13737_v33 = vld [vmem:[#allocation206_spill] sm:$0xff] }
 0x4c2   : > { %v4709_v34 = vadd.s32 %v4707_v0, %v4701_v46  ;;  %vm4710_vm7 = vc.u32 %v4708_v35, %v4704_v52  ;;  %v4448_v24 = vmul.f32 %v4447_v16, %v4443_v37  ;;  %v4455_v18 = vmul.f32 %v4454_v53, %v4443_v37  ;;  %v13731_v0 = vld [vmem:[#allocation87_spill] sm:$0xff] }
 0x4c3   : > { %v4582_v19 = vor.u32 %v4581_v31, %v4580_v57  ;;  %v4711_v8 = vsel %vm4710_vm7, 1, %v13267_v40  ;;  %v13728_v58 = vand.u32 2147483647, %v13727_v2  ;;  %v4585_v49 = vshll.u32 %v4584_v42, 23  ;;  %v13733_v57 = vld [vmem:[#allocation207_spill] sm:$0xff] }
 0x4c4   : > { %v11996_v12 = vadd.s32 %v4692_v54, %v4683_v22  ;;  %v4705_v1 = vshrl.u32 %v11966_v7, 16  ;;  %v4713_v13 = vadd.s32 %v4711_v8, %v4709_v34  ;;  %v4449_v47 = vadd.f32 1.0, %v4448_v24 }
 0x4c5   : > { %vm11992_vm5 = vcmp.le.f32.partialorder %v13728_v58, 0.7853982  ;;  %v4456_v51 = vadd.f32 1.0, %v4455_v18  ;;  %v11999_v37 = vadd.s32 %v4708_v35, %v4704_v52  ;;  %vm4810_vm13 = vcmp.lt.s32.totalorder %v9225_v15, 2  ;;  %v13732_v35 = vld [vmem:[#allocation98_spill] sm:$0xff] }
 0x4c6   : > { %v4586_v23 = vor.u32 4788187, %v4585_v49  ;;  %v4589_v60 = vcvt.s32.f32 %v4582_v19  ;;  %v5939_v32 = vadd.f32 %v5938_v59, %v5728_v14  ;;  %v4714_v45 = vadd.s32 %v4713_v13, %v4703_v39  ;;  %v13736_v39 = vld [vmem:[#allocation204_spill] sm:$0xff] }
 0x4c7   : > { %v4457_v46 = vmul.f32 %v4456_v51, %v11953_v63  ;;  %v4465_v17 = vxor.u32 2147483648, %v4449_v47  ;;  %v4594_v7 = vsel %vm4471_vm15, %v4593_v62, %v11901_v3  ;;  %v4716_v56 = vmul.u32 %v13731_v0, %v4662_v27  ;;  %v13735_v62 = vld [vmem:[#allocation203_spill] sm:$0xff] }
 0x4c8   : > { %v4587_v44 = vand.u32 2147483647, %v4586_v23  ;;  %6774 = vmatmul.msk.f32.gmra.mxu3 %vm6015_vm2, %v5939_v32  ;;  %v4715_v52 = vadd.s32 %v4714_v45, %v4705_v1  ;;  %v4820_v25 = vsel %vm4810_vm13, %v13732_v35, %v9430_v4  ;;  %v4824_v63 = vsel %vm4810_vm13, %v13734_v41, %v13733_v57  ;;  %v13738_v57 = vld [vmem:[#allocation86_spill] sm:$0xff] }
 0x4c9   : > { %v4462_v22 = vxor.u32 2147483648, %v4457_v46  ;;  %v4466_v3 = vsel %vm4464_vm8, %v4465_v17, %v4457_v46  ;;  %vm4718_vm3 = vc.u32 %v11996_v12, %v11999_v37  ;;  %v4828_v27 = vand.u32 65535, %v4824_v63 }
 0x4ca   : > { %v4590_v54 = vmul.f32 %v4589_v60, %v4587_v44  ;;  %v4719_v16 = vadd.s32 1, %v4715_v52  ;;  %v4829_v53 = vshrl.u32 %v4824_v63, 16  ;;  %v4850_v31 = vand.u32 65535, %v4820_v25 }
 0x4cb   : > { %v4463_v4 = vsel %vm4461_vm9, %v4449_v47, %v4462_v22  ;;  %v4830_v42 = vmul.u32 %v4828_v27, %v13735_v62  ;;  %v12024_v34 = vmul.u32 %v4828_v27, %v13736_v39  ;;  %v4851_v24 = vshrl.u32 %v4820_v25, 16 }
 0x4cc   : > { %v4467_v18 = vsel %vm4460_vm14, %v4463_v4, %v4466_v3  ;;  %v4591_v19 = vxor.u32 2147483648, %v4590_v54  ;;  %v4720_v8 = vsel %vm4718_vm3, %v4719_v16, %v4715_v52  ;;  %v4831_v58 = vmul.u32 %v4829_v53, %v13735_v62 }
 0x4cd   : > { %v12031_v49 = vor.u32 %v11734_v38, %v11347_v21  ;;  %v4468_v1 = vsel %vm4458_vm10, nan, %v4467_v18  ;;  %v4596_v13 = vsel %vm11992_vm5, 0, %v4594_v7  ;;  %v4721_v47 = vadd.s32 %v4720_v8, %v4716_v56 }
 0x4ce   : > { %6757 = vmatmul.msk.f32.gmra.mxu2 %vm5797_vm11, %v4468_v1  ;;  %v4592_v11 = vsel %vm4471_vm15, %v4591_v19, %v4590_v54  ;;  %v4833_v51 = vmul.u32 %v4829_v53, %v13736_v39  ;;  %v4834_v14 = vshll.u32 %v4831_v58, 16  ;;  %v4836_v59 = vshll.u32 %v12024_v34, 16  ;;  %v13742_v1 = vld [vmem:[#allocation92_spill] sm:$0xff] }
 0x4cf   : > { %v4595_v21 = vsel %vm11992_vm5, %v13727_v2, %v4592_v11  ;;  %v4722_v38 = vadd.s32 536870912, %v4721_v47  ;;  %v4793_v23 = vshrl.u32 %v13182_v9, %v13737_v33  ;;  %v4853_v60 = vmul.u32 %v4851_v24, %v13735_v62 }
 0x4d0   : > { %v4597_v32 = vmul.f32 %v4595_v21, %v4595_v21  ;;  %vm4838_vm0 = vc.u32 %v4830_v42, %v4834_v14  ;;  %v4840_v45 = vadd.s32 %v4834_v14, %v4830_v42  ;;  %v4852_v46 = vmul.u32 %v4850_v31, %v13735_v62  ;;  %v13740_v42 = vld [vmem:[#allocation49_spill] sm:$0xff] }
 0x4d1   : > { %v12049_v17 = vshrl.u32 %v4722_v38, 30  ;;  %v4839_v7 = vsel %vm4838_vm0, 1, %v13267_v40  ;;  %v12053_v0 = vmul.u32 %v4850_v31, %v13736_v39  ;;  %v4856_v26 = vshll.u32 %v4853_v60, 16 }
 0x4d2   : > { %v4598_v56 = vmul.f32 -0.001358992, %v4597_v32  ;;  %v4605_v44 = vmul.f32 -0.00019511016, %v4597_v32  ;;  %v4841_v52 = vadd.s32 %v4839_v7, %v4833_v51  ;;  %vm4842_vm4 = vc.u32 %v4840_v45, %v4836_v59 }
 0x4d3   : > { %v5424_v35 = vor.u32 %v11760_v5, %v11464_v43  ;;  %v4724_v25 = vshll.u32 %v12049_v17, 30  ;;  %vm13739_vm1 = vcmp.lt.s32.totalorder %v9225_v15, 4  ;;  %v4843_v63 = vsel %vm4842_vm4, 1, %v13267_v40 }
 0x4d4   : > { %v4814_v41 = vsel %vm13739_vm1, %v13738_v57, 2102212464  ;;  %v4599_v22 = vadd.f32 0.041655596, %v4598_v56  ;;  %v4606_v3 = vadd.f32 0.008332121, %v4605_v44  ;;  %v4845_v53 = vadd.s32 %v4843_v63, %v4841_v52 }
 0x4d5   : > { %v4613_v27 = vand.u32 3, %v4596_v13  ;;  %v4835_v54 = vshrl.u32 %v4831_v58, 16  ;;  %v12062_v16 = vsub.s32 %v4721_v47, %v4724_v25  ;;  %v4855_v31 = vmul.u32 %v4851_v24, %v13736_v39 }
 0x4d6   : > { %vm4860_vm12 = vc.u32 %v4852_v46, %v4856_v26  ;;  %v4600_v4 = vmul.f32 %v4599_v22, %v4597_v32  ;;  %v4607_v62 = vmul.f32 %v4606_v3, %v4597_v32  ;;  %vm13741_vm15 = vcmp.lt.s32.totalorder %v9225_v15, 1  ;;  %v13745_v22 = vld [vmem:[#allocation210_spill] sm:$0xff] }
 0x4d7   : > { %v4813_v18 = vsel %vm13741_vm15, %v4793_v23, %v13740_v42  ;;  %v4858_v19 = vshll.u32 %v12053_v0, 16  ;;  %vm4726_vm8 = vcmp.lt.s32.totalorder %v12062_v16, 0  ;;  %v4727_v8 = vsub.s32 0, %v12062_v16 }
 0x4d8   : > { %vm13743_vm9 = vcmp.lt.s32.totalorder %v9225_v15, 3  ;;  %v4861_v13 = vsel %vm4860_vm12, 1, %v13267_v40  ;;  %v4601_v39 = vadd.f32 -0.4999988, %v4600_v4  ;;  %v4608_v24 = vadd.f32 -0.16666654, %v4607_v62 }
 0x4d9   : > { %v4815_v58 = vsel %vm13743_vm9, %v13742_v1, %v4814_v41  ;;  %v4837_v47 = vshrl.u32 %v12024_v34, 16  ;;  %v4862_v11 = vadd.s32 %v4856_v26, %v4852_v46  ;;  %v4728_v51 = vsel %vm4726_vm8, %v4727_v8, %v12062_v16  ;;  %v13746_v4 = vld [vmem:[#allocation96_spill] sm:$0xff]  ;;  %v13748_v8 = vld [vmem:[#allocation214_spill] sm:$0xff] }
 0x4da   : > { %v4846_v14 = vadd.s32 %v4845_v53, %v4835_v54  ;;  %v4857_v59 = vshrl.u32 %v4853_v60, 16  ;;  %v4863_v38 = vadd.s32 %v4861_v13, %v4855_v31  ;;  %v4602_v33 = vmul.f32 %v4601_v39, %v4597_v32  ;;  %v13749_v39 = vld [vmem:[#allocation216_spill] sm:$0xff] }
 0x4db   : > { %v4609_v23 = vmul.f32 %v4608_v24, %v4597_v32  ;;  %v4729_v45 = vclz %v4728_v51  ;;  %vm4864_vm14 = vc.u32 %v4862_v11, %v4858_v19  ;;  %vm4612_vm10 = vweird.f32 %v13727_v2  ;;  %v13750_v24 = vld [vmem:[#allocation130_spill] sm:$0xff]  ;;  %v6260_v2 = vld [vmem:[%s12700_s7 + $0x18] sm:$0xff] }
 0x4dc   : > { %vm4618_vm7 = vcmp.eq.s32.totalorder %v4613_v27, 2  ;;  %v4717_v7 = vadd.s32 %v11999_v37, %v11996_v12  ;;  %v4865_v56 = vsel %vm4864_vm14, 1, %v13267_v40  ;;  %v4603_v44 = vadd.f32 1.0, %v4602_v33  ;;  %v13744_v12 = vld [vmem:[#allocation29_spill] sm:$0xff]  ;;  %6373 = vmatpush.msrb.mxu0 %v6260_v2  ;;  %6834 = vmatpush.msra.mxu2 %v6260_v2  ;;  %v13760_v2 = vld [vmem:[#allocation212_spill] sm:$0xff] }
 0x4dd   : > { %v4610_v34 = vadd.f32 1.0, %v4609_v23  ;;  %v6683_v46 = vadd.s32 4294967294, %v4729_v45  ;;  %v4867_v26 = vadd.s32 %v4865_v56, %v4863_v38  ;;  %v4816_v60 = vsel %vm4810_vm13, %v4813_v18, %v4815_v58  ;;  %v5941_v56 = vpop.f32.mrf.mxu2 }
 0x4de   : > { %v12083_v52 = vadd.s32 %v4846_v14, %v4837_v47  ;;  %v4859_v32 = vshrl.u32 %v12053_v0, 16  ;;  %v12086_v25 = vadd.s32 %v4862_v11, %v4858_v19  ;;  %v4619_v41 = vxor.u32 2147483648, %v4603_v44  ;;  %v13747_v19 = vld [vmem:[#allocation215_spill] sm:$0xff] }
 0x4df   : > { %v4611_v57 = vmul.f32 %v4610_v34, %v4595_v21  ;;  %vm6684_vm5 = vcmp.lt.s32.totalorder %v6683_v46, 0  ;;  %v4868_v63 = vadd.s32 %v4867_v26, %v4857_v59  ;;  %vm4625_vm3 = vcmp.lt.s32.totalorder %v13744_v12, 0  ;;  %v13754_v34 = vld [vmem:[#allocation209_spill] sm:$0xff] }
 0x4e0   : > { %vm4614_vm0 = vcmp.lt.s32.totalorder %v4613_v27, 2  ;;  %vm4615_vm4 = vcmp.eq.s32.totalorder %v4613_v27, 0  ;;  %v4732_v37 = vsel %vm6684_vm5, 0, %v6683_v46  ;;  %vm4964_vm1 = vcmp.lt.s32.totalorder %v13745_v22, 2 }
 0x4e1   : > { %v4616_v3 = vxor.u32 2147483648, %v4611_v57  ;;  %v4620_v15 = vsel %vm4618_vm7, %v4619_v41, %v4611_v57  ;;  %v4733_v54 = vsub.s32 32, %v4732_v37  ;;  %v4734_v53 = vshll.u32 %v12062_v16, %v4732_v37 }
 0x4e2   : > { %v4737_v0 = vsub.s32 4294967266, %v4732_v37  ;;  %v4747_v31 = vsub.s32 4, %v12049_v17  ;;  %v4869_v21 = vadd.s32 %v4868_v63, %v4859_v32  ;;  %v4870_v62 = vmul.u32 %v13746_v4, %v4816_v60  ;;  %v13755_v63 = vld [vmem:[#allocation211_spill] sm:$0xff] }
 0x4e3   : > { %v4617_v42 = vsel %vm4615_vm4, %v4603_v44, %v4616_v3  ;;  %v4735_v18 = vshrl.u32 %v4717_v7, %v4733_v54  ;;  %vm4872_vm13 = vc.u32 %v12083_v52, %v12086_v25  ;;  %v4974_v1 = vsel %vm4964_vm1, %v13748_v8, %v13747_v19  ;;  %v5731_v7 = vpop.f32.mrf.mxu1 }
 0x4e4   : > { %v4621_v58 = vsel %vm4614_vm0, %v4617_v42, %v4620_v15  ;;  %v4738_v13 = vadd.s32 127, %v4737_v0  ;;  %v4873_v16 = vadd.s32 1, %v4869_v21  ;;  %v4978_v47 = vsel %vm4964_vm1, %v13750_v24, %v13749_v39 }
 0x4e5   : > { %v4622_v11 = vsel %vm4612_vm10, nan, %v4621_v58  ;;  %v4736_v51 = vor.u32 %v4735_v18, %v4734_v53  ;;  %v4982_v14 = vand.u32 65535, %v4978_v47  ;;  %v4983_v59 = vshrl.u32 %v4978_v47, 16 }
 0x4e6   : > { %6758 = vmatmul.msk.f32.gmra.mxu2 %vm5797_vm11, %v4622_v11  ;;  %v13751_v38 = vand.u32 2147483647, %v13744_v12  ;;  %v4739_v33 = vshll.u32 %v4738_v13, 23  ;;  %v4874_v23 = vsel %vm4872_vm13, %v4873_v16, %v4869_v21  ;;  %v5005_v45 = vshrl.u32 %v4974_v1, 16  ;;  %v13756_v21 = vld [vmem:[#allocation208_spill] sm:$0xff]  ;;  %v13757_v16 = vld [vmem:[#allocation213_spill] sm:$0xff] }
 0x4e7   : > { %v4875_v44 = vadd.s32 %v4874_v23, %v4870_v62  ;;  %v4984_v46 = vmul.u32 %v4982_v14, %v13754_v34  ;;  %v4985_v26 = vmul.u32 %v4983_v59, %v13754_v34  ;;  %v5004_v60 = vand.u32 65535, %v4974_v1 }
 0x4e8   : > { %vm12110_vm12 = vcmp.le.f32.partialorder %v13751_v38, 0.7853982  ;;  %v4740_v32 = vor.u32 4788187, %v4739_v33  ;;  %v4743_v57 = vcvt.s32.f32 %v4736_v51  ;;  %v5942_v41 = vadd.f32 %v5941_v56, %v5731_v7  ;;  %v13758_v38 = vld [vmem:[#allocation78_spill] sm:$0xff] }
 0x4e9   : > { %v4986_v37 = vmul.u32 %v4982_v14, %v13755_v63  ;;  %v12123_v3 = vsel %vm4625_vm3, %v4747_v31, %v12049_v17  ;;  %v4876_v15 = vadd.s32 536870912, %v4875_v44  ;;  %v4987_v54 = vmul.u32 %v4983_v59, %v13755_v63 }
 0x4ea   : > { %v4988_v53 = vshll.u32 %v4985_v26, 16  ;;  %v4741_v0 = vand.u32 2147483647, %v4740_v32  ;;  %6775 = vmatmul.msk.f32.gmra.mxu3 %vm6015_vm2, %v5942_v41  ;;  %v4947_v4 = vshrl.u32 %v13182_v9, %v13756_v21  ;;  %v5007_v42 = vmul.u32 %v5005_v45, %v13754_v34 }
 0x4eb   : > { %v4990_v62 = vshll.u32 %v4986_v37, 16  ;;  %v12130_v18 = vshrl.u32 %v4876_v15, 30  ;;  %v5008_v17 = vmul.u32 %v5004_v60, %v13755_v63  ;;  %vm5425_vm8 = vcmp.lt.s32.totalorder %v11266_v55, 1 }
 0x4ec   : > { %vm4992_vm15 = vc.u32 %v4984_v46, %v4988_v53  ;;  %v4994_v19 = vadd.s32 %v4988_v53, %v4984_v46  ;;  %vm5428_vm9 = vcmp.lt.s32.totalorder %v11266_v55, 4  ;;  %v4744_v31 = vmul.f32 %v4743_v57, %v4741_v0 }
 0x4ed   : > { %v4993_v8 = vsel %vm4992_vm15, 1, %v13267_v40  ;;  %v5006_v1 = vmul.u32 %v5004_v60, %v13754_v34  ;;  %v5010_v58 = vshll.u32 %v5007_v42, 16  ;;  %v4878_v13 = vshll.u32 %v12130_v18, 30 }
 0x4ee   : > { %v4968_v39 = vsel %vm4966_vm6, %v13757_v16, 2102212464  ;;  %v4995_v24 = vadd.s32 %v4993_v8, %v4987_v54  ;;  %vm4996_vm14 = vc.u32 %v4994_v19, %v4990_v62  ;;  %v4745_v47 = vxor.u32 2147483648, %v4744_v31 }
 0x4ef   : > { %v4989_v11 = vshrl.u32 %v4985_v26, 16  ;;  %v4997_v51 = vsel %vm4996_vm14, 1, %v13267_v40  ;;  %v5012_v14 = vshll.u32 %v5008_v17, 16  ;;  %v12142_v59 = vsub.s32 %v4875_v44, %v4878_v13 }
 0x4f0   : > { %vm13759_vm10 = vcmp.lt.s32.totalorder %v13745_v22, 1  ;;  %v4999_v23 = vadd.s32 %v4997_v51, %v4995_v24  ;;  %v5009_v7 = vmul.u32 %v5005_v45, %v13755_v63  ;;  %v4746_v56 = vsel %vm4625_vm3, %v4745_v47, %v4744_v31 }
 0x4f1   : > { %v4967_v33 = vsel %vm13759_vm10, %v4947_v4, %v13758_v38  ;;  %vm13761_vm6 = vcmp.lt.s32.totalorder %v13745_v22, 3  ;;  %vm5014_vm7 = vc.u32 %v5006_v1, %v5010_v58  ;;  %v5016_v46 = vadd.s32 %v5010_v58, %v5006_v1 }
 0x4f2   : > { %v4969_v34 = vsel %vm13761_vm6, %v13760_v2, %v4968_v39  ;;  %v4749_v44 = vsel %vm12110_vm12, %v13744_v12, %v4746_v56  ;;  %vm4880_vm5 = vcmp.lt.s32.totalorder %v12142_v59, 0  ;;  %v4881_v26 = vsub.s32 0, %v12142_v59 }
 0x4f3   : > { %v4991_v60 = vshrl.u32 %v4986_v37, 16  ;;  %v4751_v32 = vmul.f32 %v4749_v44, %v4749_v44  ;;  %v5000_v45 = vadd.s32 %v4999_v23, %v4989_v11  ;;  %v5015_v57 = vsel %vm5014_vm7, 1, %v13267_v40  ;;  %v13762_v11 = vld [vmem:[#allocation109_spill] sm:$0xff] }
 0x4f4   : > { %vm5018_vm3 = vc.u32 %v5016_v46, %v5012_v14  ;;  %v4882_v41 = vsel %vm4880_vm5, %v4881_v26, %v12142_v59  ;;  %v5011_v63 = vshrl.u32 %v5007_v42, 16  ;;  %v5017_v15 = vadd.s32 %v5015_v57, %v5009_v7  ;;  %v13763_v7 = vld [vmem:[#allocation200_spill] sm:$0xff]  ;;  %v13764_v26 = vld [vmem:[#allocation218_spill] sm:$0xff] }
 0x4f5   : > { %v5019_v54 = vsel %vm5018_vm3, 1, %v13267_v40  ;;  %v4750_v53 = vsel %vm12110_vm12, 0, %v12123_v3  ;;  %v4752_v0 = vmul.f32 -0.001358992, %v4751_v32  ;;  %v4759_v21 = vmul.f32 -0.00019511016, %v4751_v32 }
 0x4f6   : > { %v4883_v4 = vclz %v4882_v41  ;;  %v12164_v62 = vadd.s32 %v5000_v45, %v4991_v60  ;;  %v5013_v37 = vshrl.u32 %v5008_v17, 16  ;;  %v12166_v19 = vadd.s32 %v5016_v46, %v5012_v14 }
 0x4f7   : > { %v5021_v31 = vadd.s32 %v5019_v54, %v5017_v15  ;;  %v4753_v8 = vadd.f32 0.041655596, %v4752_v0  ;;  %v4760_v1 = vadd.f32 0.008332121, %v4759_v21  ;;  %v4970_v42 = vsel %vm4964_vm1, %v4967_v33, %v4969_v34 }
 0x4f8   : > { %v6686_v58 = vadd.s32 4294967294, %v4883_v4  ;;  %v12174_v27 = vsel %vm5425_vm8, %v11874_v6, %v11878_v20  ;;  %v12179_v3 = vsel %vm5428_vm9, %v12031_v49, 920167782  ;;  %v4871_v17 = vadd.s32 %v12086_v25, %v12083_v52 }
 0x4f9   : > { %v5022_v13 = vadd.s32 %v5021_v31, %v5011_v63  ;;  %v4754_v16 = vmul.f32 %v4753_v8, %v4751_v32  ;;  %v4761_v39 = vmul.f32 %v4760_v1, %v4751_v32  ;;  %v4767_v24 = vand.u32 3, %v4750_v53  ;;  %v13765_v53 = vld [vmem:[#allocation151_spill] sm:$0xff]  ;;  %v5734_v31 = vpop.f32.mrf.mxu1  ;;  %v5944_v8 = vpop.f32.mrf.mxu2 }
 0x4fa   : > { %vm6687_vm0 = vcmp.lt.s32.totalorder %v6686_v58, 0  ;;  %v5024_v51 = vmul.u32 %v13762_v11, %v4970_v42  ;;  %vm5026_vm4 = vc.u32 %v12164_v62, %v12166_v19  ;;  %vm4779_vm1 = vcmp.lt.s32.totalorder %v13763_v7, 0  ;;  %v13768_v11 = vld [vmem:[#allocation99_spill] sm:$0xff] }
 0x4fb   : > { %v4886_v22 = vsel %vm6687_vm0, 0, %v6686_v58  ;;  %v5023_v47 = vadd.s32 %v5022_v13, %v5013_v37  ;;  %v4755_v14 = vadd.f32 -0.4999988, %v4754_v16  ;;  %v4762_v38 = vadd.f32 -0.16666654, %v4761_v39 }
 0x4fc   : > { %v4887_v33 = vsub.s32 32, %v4886_v22  ;;  %v4888_v23 = vshll.u32 %v12142_v59, %v4886_v22  ;;  %v12192_v52 = vsel %vm5425_vm8, %v11878_v20, %v11889_v48  ;;  %vm4766_vm13 = vweird.f32 %v13744_v12  ;;  %v13774_v12 = vld [vmem:[#allocation217_spill] sm:$0xff] }
 0x4fd   : > { %v4891_v25 = vsub.s32 4294967266, %v4886_v22  ;;  %v5027_v56 = vadd.s32 1, %v5023_v47  ;;  %v4756_v2 = vmul.f32 %v4755_v14, %v4751_v32  ;;  %v4763_v34 = vmul.f32 %v4762_v38, %v4751_v32  ;;  %v13766_v32 = vld [vmem:[#allocation136_spill] sm:$0xff] }
 0x4fe   : > { %v4889_v46 = vshrl.u32 %v4871_v17, %v4887_v33  ;;  %vm5118_vm12 = vcmp.lt.s32.totalorder %v13764_v26, 2  ;;  %vm4768_vm15 = vcmp.lt.s32.totalorder %v4767_v24, 2  ;;  %vm4769_vm14 = vcmp.eq.s32.totalorder %v4767_v24, 0 }
 0x4ff   : > { %v4892_v59 = vadd.s32 127, %v4891_v25  ;;  %v5028_v60 = vsel %vm5026_vm4, %v5027_v56, %v5023_v47  ;;  %v4757_v45 = vadd.f32 1.0, %v4756_v2  ;;  %v4764_v57 = vadd.f32 1.0, %v4763_v34  ;;  %v13767_v47 = vld [vmem:[#allocation128_spill] sm:$0xff] }
 0x500   : > { %v4890_v41 = vor.u32 %v4889_v46, %v4888_v23  ;;  %v5029_v63 = vadd.s32 %v5028_v60, %v5024_v51  ;;  %vm4772_vm10 = vcmp.eq.s32.totalorder %v4767_v24, 2  ;;  %v4901_v54 = vsub.s32 4, %v12130_v18  ;;  %v13770_v23 = vld [vmem:[#allocation221_spill] sm:$0xff] }
 0x501   : > { %v4893_v15 = vshll.u32 %v4892_v59, 23  ;;  %v5132_v0 = vsel %vm5118_vm12, %v13766_v32, %v13765_v53  ;;  %v4765_v21 = vmul.f32 %v4764_v57, %v4749_v44  ;;  %v4773_v4 = vxor.u32 2147483648, %v4757_v45  ;;  %v13769_v44 = vld [vmem:[#allocation220_spill] sm:$0xff] }
 0x502   : > { %v4897_v37 = vcvt.s32.f32 %v4890_v41  ;;  %v5030_v1 = vadd.s32 536870912, %v5029_v63  ;;  %v5945_v42 = vadd.f32 %v5944_v8, %v5734_v31  ;;  %v5136_v17 = vand.u32 65535, %v5132_v0  ;;  %v13775_v31 = vld [vmem:[#allocation224_spill] sm:$0xff] }
 0x503   : > { %v4894_v58 = vor.u32 4788187, %v4893_v15  ;;  %v5137_v13 = vshrl.u32 %v5132_v0, 16  ;;  %v4770_v16 = vxor.u32 2147483648, %v4765_v21  ;;  %v4774_v39 = vsel %vm4772_vm10, %v4773_v4, %v4765_v21 }
 0x504   : > { %v12204_v22 = vshrl.u32 %v5030_v1, 30  ;;  %v5128_v51 = vsel %vm5118_vm12, %v13768_v11, %v13767_v47  ;;  %6776 = vmatmul.msk.f32.gmra.mxu3 %vm6015_vm2, %v5945_v42  ;;  %v5138_v38 = vmul.u32 %v5136_v17, %v13769_v44  ;;  %v12216_v25 = vmul.u32 %v5136_v17, %v13770_v23 }
 0x505   : > { %v4895_v14 = vand.u32 2147483647, %v4894_v58  ;;  %v12213_v33 = vmul.u32 %v5137_v13, %v13769_v44  ;;  %v4771_v56 = vsel %vm4769_vm14, %v4757_v45, %v4770_v16  ;;  %v13771_v2 = vand.u32 2147483647, %v13763_v7 }
 0x506   : > { %v4902_v46 = vsel %vm4779_vm1, %v4901_v54, %v12130_v18  ;;  %v5032_v59 = vshll.u32 %v12204_v22, 30  ;;  %v4775_v60 = vsel %vm4768_vm15, %v4771_v56, %v4774_v39  ;;  %v5159_v15 = vshrl.u32 %v5128_v51, 16 }
 0x507   : > { %vm12221_vm6 = vcmp.le.f32.partialorder %v13771_v2, 0.7853982  ;;  %v4898_v57 = vmul.f32 %v4897_v37, %v4895_v14  ;;  %v5142_v41 = vshll.u32 %v12213_v33, 16  ;;  %v4776_v45 = vsel %vm4766_vm13, nan, %v4775_v60  ;;  %v13779_v60 = vld [vmem:[#allocation223_spill] sm:$0xff] }
 0x508   : > { %v12233_v53 = vsub.s32 %v5029_v63, %v5032_v59  ;;  %v5141_v32 = vmul.u32 %v5137_v13, %v13770_v23  ;;  %v5158_v0 = vand.u32 65535, %v5128_v51  ;;  %6759 = vmatmul.msk.f32.gmra.mxu2 %vm5797_vm11, %v4776_v45  ;;  %v4904_v18 = vsel %vm12221_vm6, 0, %v4902_v46  ;;  %v13777_v46 = vld [vmem:[#allocation222_spill] sm:$0xff] }
 0x509   : > { %v4899_v21 = vxor.u32 2147483648, %v4898_v57  ;;  %v5144_v24 = vshll.u32 %v12216_v25, 16  ;;  %vm5146_vm7 = vc.u32 %v5138_v38, %v5142_v41  ;;  %v5101_v63 = vshrl.u32 %v13182_v9, %v13774_v12 }
 0x50a   : > { %vm5034_vm5 = vcmp.lt.s32.totalorder %v12233_v53, 0  ;;  %v5035_v54 = vsub.s32 0, %v12233_v53  ;;  %v5147_v4 = vsel %vm5146_vm7, 1, %v13267_v40  ;;  %vm13776_vm3 = vcmp.lt.s32.totalorder %v13764_v26, 4 }
 0x50b   : > { %v4900_v37 = vsel %vm4779_vm1, %v4899_v21, %v4898_v57  ;;  %v5122_v8 = vsel %vm13776_vm3, %v13775_v31, 2102212464  ;;  %v5148_v1 = vadd.s32 %v5142_v41, %v5138_v38  ;;  %v12251_v58 = vmul.u32 %v5159_v15, %v13769_v44 }
 0x50c   : > { %v12256_v42 = vsel %vm12221_vm6, %v13763_v7, %v4900_v37  ;;  %v5036_v17 = vsel %vm5034_vm5, %v5035_v54, %v12233_v53  ;;  %v5149_v13 = vadd.s32 %v5147_v4, %v5141_v32  ;;  %v5160_v16 = vmul.u32 %v5158_v0, %v13769_v44 }
 0x50d   : > { %v4905_v39 = vmul.f32 %v12256_v42, %v12256_v42  ;;  %v5037_v47 = vclz %v5036_v17  ;;  %vm5150_vm0 = vc.u32 %v5148_v1, %v5144_v24  ;;  %v5164_v11 = vshll.u32 %v12251_v58, 16 }
 0x50e   : > { %v12263_v51 = vand.u32 3, %v4904_v18  ;;  %v5025_v14 = vadd.s32 %v12166_v19, %v12164_v62  ;;  %v5151_v38 = vsel %vm5150_vm0, 1, %v13267_v40  ;;  %v12269_v56 = vmul.u32 %v5158_v0, %v13770_v23  ;;  %v13781_v0 = vld [vmem:[#allocation205_spill] sm:$0xff] }
 0x50f   : > { %v4906_v2 = vmul.f32 -0.001358992, %v4905_v39  ;;  %v4913_v34 = vmul.f32 -0.00019511016, %v4905_v39  ;;  %v6689_v44 = vadd.s32 4294967294, %v5037_v47  ;;  %vm13778_vm4 = vcmp.lt.s32.totalorder %v13764_v26, 1 }
 0x510   : > { %v5121_v59 = vsel %vm13778_vm4, %v5101_v63, %v13777_v46  ;;  %vm13780_vm1 = vcmp.lt.s32.totalorder %v13764_v26, 3  ;;  %v5143_v41 = vshrl.u32 %v12213_v33, 16  ;;  %v5153_v45 = vadd.s32 %v5151_v38, %v5149_v13 }
 0x511   : > { %v5123_v57 = vsel %vm13780_vm1, %v13779_v60, %v5122_v8  ;;  %vm5168_vm13 = vc.u32 %v5160_v16, %v5164_v11  ;;  %v4907_v62 = vadd.f32 0.041655596, %v4906_v2  ;;  %v4914_v19 = vadd.f32 0.008332121, %v4913_v34 }
 0x512   : > { %vm6690_vm15 = vcmp.lt.s32.totalorder %v6689_v44, 0  ;;  %v5163_v32 = vmul.u32 %v5159_v15, %v13770_v23  ;;  %vm4933_vm14 = vcmp.lt.s32.totalorder %v13781_v0, 0  ;;  %vm4926_vm10 = vcmp.eq.s32.totalorder %v12263_v51, 2 }
 0x513   : > { %v5040_v21 = vsel %vm6690_vm15, 0, %v6689_v44  ;;  %v5166_v18 = vshll.u32 %v12269_v56, 16  ;;  %v5169_v24 = vsel %vm5168_vm13, 1, %v13267_v40  ;;  %v5170_v54 = vadd.s32 %v5164_v11, %v5160_v16 }
 0x514   : > { %v4908_v12 = vmul.f32 %v4907_v62, %v4905_v39  ;;  %v4915_v63 = vmul.f32 %v4914_v19, %v4905_v39  ;;  %v5041_v33 = vsub.s32 32, %v5040_v21  ;;  %v5042_v4 = vshll.u32 %v12233_v53, %v5040_v21 }
 0x515   : > { %vm4923_vm6 = vcmp.eq.s32.totalorder %v12263_v51, 0  ;;  %v5045_v37 = vsub.s32 4294967266, %v5040_v21  ;;  %v12287_v23 = vsel %vm5118_vm12, %v5121_v59, %v5123_v57  ;;  %v5145_v15 = vshrl.u32 %v12216_v25, 16  ;;  %v5737_v57 = vpop.f32.mrf.mxu1 }
 0x516   : > { %v5154_v31 = vadd.s32 %v5153_v45, %v5143_v41  ;;  %v4909_v8 = vadd.f32 -0.4999988, %v4908_v12  ;;  %v4916_v1 = vadd.f32 -0.16666654, %v4915_v63  ;;  %vm4922_vm7 = vcmp.lt.s32.totalorder %v12263_v51, 2  ;;  %v5947_v41 = vpop.f32.mrf.mxu2  ;;  %v13785_v63 = vld [vmem:[#allocation219_spill] sm:$0xff] }
 0x517   : > { %v5043_v17 = vshrl.u32 %v5025_v14, %v5041_v33  ;;  %v5055_v13 = vsub.s32 4, %v12204_v22  ;;  %vm4920_vm5 = vweird.f32 %v13763_v7  ;;  %v5046_v53 = vadd.s32 127, %v5045_v37  ;;  %v13788_v7 = vld [vmem:[#allocation21_spill] sm:$0xff] }
 0x518   : > { %v5165_v16 = vshrl.u32 %v12251_v58, 16  ;;  %v5171_v47 = vadd.s32 %v5169_v24, %v5163_v32  ;;  %vm5172_vm3 = vc.u32 %v5170_v54, %v5166_v18  ;;  %v4910_v26 = vmul.f32 %v4909_v8, %v4905_v39 }
 0x519   : > { %v4917_v11 = vmul.f32 %v4916_v1, %v4905_v39  ;;  %v5044_v38 = vor.u32 %v5043_v17, %v5042_v4  ;;  %v5173_v25 = vsel %vm5172_vm3, 1, %v13267_v40  ;;  %v13782_v2 = vand.u32 2147483647, %v13781_v0  ;;  %v6259_v39 = vld [vmem:[%s12700_s7 + $0x10] sm:$0xff] }
 0x51a   : > { %v5047_v14 = vshll.u32 %v5046_v53, 23  ;;  %v12301_v44 = vadd.s32 %v5154_v31, %v5145_v15  ;;  %v5167_v46 = vshrl.u32 %v12269_v56, 16  ;;  %v5175_v59 = vadd.s32 %v5173_v25, %v5171_v47  ;;  %6374 = vmatpush.msrb.mxu0 %v6259_v39  ;;  %6835 = vmatpush.msra.mxu2 %v6259_v39 }
 0x51b   : > { %vm12297_vm12 = vcmp.le.f32.partialorder %v13782_v2, 0.7853982  ;;  %v4911_v58 = vadd.f32 1.0, %v4910_v26  ;;  %v4918_v60 = vadd.f32 1.0, %v4917_v11  ;;  %v12307_v45 = vadd.s32 %v5170_v54, %v5166_v18 }
 0x51c   : > { %vm5272_vm0 = vcmp.lt.s32.totalorder %v10225_v28, 2  ;;  %v5048_v62 = vor.u32 4788187, %v5047_v14  ;;  %v5051_v19 = vcvt.s32.f32 %v5044_v38  ;;  %v5948_v32 = vadd.f32 %v5947_v41, %v5737_v57 }
 0x51d   : > { %v5176_v21 = vadd.s32 %v5175_v59, %v5165_v16  ;;  %v4919_v56 = vmul.f32 %v4918_v60, %v12256_v42  ;;  %v4927_v24 = vxor.u32 2147483648, %v4911_v58  ;;  %v5056_v12 = vsel %vm4933_vm14, %v5055_v13, %v12204_v22  ;;  %v13787_v13 = vld [vmem:[#allocation3_spill] sm:$0xff] }
 0x51e   : > { %v5178_v33 = vmul.u32 %v13785_v63, %v12287_v23  ;;  %vm5427_vm4 = vcmp.lt.s32.totalorder %v11266_v55, 3  ;;  %v5049_v18 = vand.u32 2147483647, %v5048_v62  ;;  %6777 = vmatmul.msk.f32.gmra.mxu3 %vm6015_vm2, %v5948_v32  ;;  %v5282_v4 = vsel %vm5272_vm0, %v10794_v29, %v10994_v10  ;;  %v13786_v10 = vld [vmem:[#allocation145_spill] sm:$0xff] }
 0x51f   : > { %v5177_v54 = vadd.s32 %v5176_v21, %v5167_v46  ;;  %v5286_v42 = vsel %vm5272_vm0, %v10932_v61, %v11098_v50  ;;  %v4924_v22 = vxor.u32 2147483648, %v4919_v56  ;;  %v4928_v37 = vsel %vm4926_vm10, %v4927_v24, %v4919_v56 }
 0x520   : > { %vm5180_vm1 = vc.u32 %v12301_v44, %v12307_v45  ;;  %v5290_v23 = vand.u32 65535, %v5286_v42  ;;  %v5052_v15 = vmul.f32 %v5051_v19, %v5049_v18  ;;  %v5291_v8 = vshrl.u32 %v5286_v42, 16 }
 0x521   : > { %v5181_v31 = vadd.s32 1, %v5177_v54  ;;  %v5312_v1 = vand.u32 65535, %v5282_v4  ;;  %v4925_v29 = vsel %vm4923_vm6, %v4911_v58, %v4924_v22  ;;  %v5313_v61 = vshrl.u32 %v5282_v4, 16 }
 0x522   : > { %v5292_v17 = vmul.u32 %v5290_v23, %v13786_v10  ;;  %v12334_v53 = vmul.u32 %v5290_v23, %v13787_v13  ;;  %v4929_v50 = vsel %vm4922_vm7, %v4925_v29, %v4928_v37  ;;  %v5053_v16 = vxor.u32 2147483648, %v5052_v15  ;;  %v13792_v29 = vld [vmem:[#allocation20_spill] sm:$0xff] }
 0x523   : > { %v5182_v47 = vsel %vm5180_vm1, %v5181_v31, %v5177_v54  ;;  %v5293_v26 = vmul.u32 %v5291_v8, %v13786_v10  ;;  %v5438_v11 = vsel %vm5428_vm9, %v5424_v35, 1326507024  ;;  %v4930_v38 = vsel %vm4920_vm5, nan, %v4929_v50  ;;  %v13790_v31 = vld [vmem:[#allocation25_spill] sm:$0xff] }
 0x524   : > { %v5058_v25 = vsel %vm12297_vm12, 0, %v5056_v12  ;;  %v5183_v2 = vadd.s32 %v5182_v47, %v5178_v33  ;;  %6760 = vmatmul.msk.f32.gmra.mxu2 %vm5797_vm11, %v4930_v38  ;;  %v5054_v51 = vsel %vm4933_vm14, %v5053_v16, %v5052_v15  ;;  %v5295_v14 = vmul.u32 %v5291_v8, %v13787_v13 }
 0x525   : > { %v5296_v46 = vshll.u32 %v5293_v26, 16  ;;  %v5298_v43 = vshll.u32 %v12334_v53, 16  ;;  %v5057_v5 = vsel %vm12297_vm12, %v13781_v0, %v5054_v51  ;;  %v5255_v59 = vshrl.u32 %v13182_v9, %v13788_v7 }
 0x526   : > { %v5184_v35 = vadd.s32 536870912, %v5183_v2  ;;  %v5315_v58 = vmul.u32 %v5313_v61, %v13786_v10  ;;  %v5059_v60 = vmul.f32 %v5057_v5, %v5057_v5  ;;  %v5314_v41 = vmul.u32 %v5312_v1, %v13786_v10 }
 0x527   : > { %vm5300_vm13 = vc.u32 %v5292_v17, %v5296_v46  ;;  %v5302_v57 = vadd.s32 %v5296_v46, %v5292_v17  ;;  %v12364_v19 = vmul.u32 %v5312_v1, %v13787_v13  ;;  %v12370_v24 = vsel %vm5427_vm4, %v11889_v48, %v12179_v3 }
 0x528   : > { %v12360_v39 = vshrl.u32 %v5184_v35, 30  ;;  %v5301_v62 = vsel %vm5300_vm13, 1, %v13267_v40  ;;  %v5318_v34 = vshll.u32 %v5315_v58, 16  ;;  %v5060_v32 = vmul.f32 -0.001358992, %v5059_v60 }
 0x529   : > { %v5067_v21 = vmul.f32 -0.00019511016, %v5059_v60  ;;  %v5303_v56 = vadd.s32 %v5301_v62, %v5295_v14  ;;  %vm5304_vm15 = vc.u32 %v5302_v57, %v5298_v43  ;;  %vm13789_vm14 = vcmp.lt.s32.totalorder %v10225_v28, 4 }
 0x52a   : > { %v5186_v12 = vshll.u32 %v12360_v39, 30  ;;  %v5276_v63 = vsel %vm13789_vm14, %v10651_v30, 2102212464  ;;  %v5305_v33 = vsel %vm5304_vm15, 1, %v13267_v40  ;;  %v5061_v18 = vadd.f32 0.041655596, %v5060_v32 }
 0x52b   : > { %v5068_v54 = vadd.f32 0.008332121, %v5067_v21  ;;  %v5075_v4 = vand.u32 3, %v5058_v25  ;;  %v5297_v42 = vshrl.u32 %v5293_v26, 16  ;;  %v5307_v37 = vadd.s32 %v5305_v33, %v5303_v56 }
 0x52c   : > { %v12377_v22 = vsub.s32 %v5183_v2, %v5186_v12  ;;  %v5317_v23 = vmul.u32 %v5313_v61, %v13787_v13  ;;  %vm5322_vm10 = vc.u32 %v5314_v41, %v5318_v34  ;;  %v5062_v3 = vmul.f32 %v5061_v18, %v5059_v60  ;;  %v13794_v12 = vld [vmem:[#allocation153_spill] sm:$0xff] }
 0x52d   : > { %v5069_v15 = vmul.f32 %v5068_v54, %v5059_v60  ;;  %vm13791_vm6 = vcmp.lt.s32.totalorder %v10225_v28, 1  ;;  %v5320_v30 = vshll.u32 %v12364_v19, 16  ;;  %vm13793_vm5 = vcmp.lt.s32.totalorder %v10225_v28, 3 }
 0x52e   : > { %v5275_v8 = vsel %vm13791_vm6, %v5255_v59, %v13790_v31  ;;  %vm5188_vm7 = vcmp.lt.s32.totalorder %v12377_v22, 0  ;;  %v5189_v1 = vsub.s32 0, %v12377_v22  ;;  %v5277_v10 = vsel %vm13793_vm5, %v13792_v29, %v5276_v63  ;;  %v5950_v29 = vpop.f32.mrf.mxu2 }
 0x52f   : > { %v5323_v17 = vsel %vm5322_vm10, 1, %v13267_v40  ;;  %v5063_v13 = vadd.f32 -0.4999988, %v5062_v3  ;;  %v5070_v61 = vadd.f32 -0.16666654, %v5069_v15  ;;  %v5299_v50 = vshrl.u32 %v12334_v53, 16 }
 0x530   : > { %v5324_v16 = vadd.s32 %v5318_v34, %v5314_v41  ;;  %v5190_v47 = vsel %vm5188_vm7, %v5189_v1, %v12377_v22  ;;  %v5308_v26 = vadd.s32 %v5307_v37, %v5297_v42  ;;  %v5319_v38 = vshrl.u32 %v5315_v58, 16  ;;  %v13795_v37 = vld [vmem:[#allocation111_spill] sm:$0xff]  ;;  %v5740_v1 = vpop.f32.mrf.mxu1 }
 0x531   : > { %v5325_v25 = vadd.s32 %v5323_v17, %v5317_v23  ;;  %v5064_v2 = vmul.f32 %v5063_v13, %v5059_v60  ;;  %v5071_v51 = vmul.f32 %v5070_v61, %v5059_v60  ;;  %v5191_v14 = vclz %v5190_v47 }
 0x532   : > { %vm5326_vm3 = vc.u32 %v5324_v16, %v5320_v30  ;;  %v5439_v46 = vsel %vm5427_vm4, %v12031_v49, %v5438_v11  ;;  %vm5080_vm12 = vcmp.eq.s32.totalorder %v5075_v4, 2  ;;  %v5179_v43 = vadd.s32 %v12307_v45, %v12301_v44 }
 0x533   : > { %v5327_v53 = vsel %vm5326_vm3, 1, %v13267_v40  ;;  %v5065_v35 = vadd.f32 1.0, %v5064_v2  ;;  %v5072_v7 = vadd.f32 1.0, %v5071_v51  ;;  %v6692_v59 = vadd.s32 4294967294, %v5191_v14 }
 0x534   : > { %v5329_v57 = vadd.s32 %v5327_v53, %v5325_v25  ;;  %v5278_v58 = vsel %vm5272_vm0, %v5275_v8, %v5277_v10  ;;  %v12400_v60 = vadd.s32 %v5308_v26, %v5299_v50  ;;  %v5321_v41 = vshrl.u32 %v12364_v19, 16  ;;  %v13799_v10 = vld [vmem:[#allocation30_spill] sm:$0xff]  ;;  %v13800_v26 = vld [vmem:[#allocation4_spill] sm:$0xff] }
 0x535   : > { %v12403_v62 = vadd.s32 %v5324_v16, %v5320_v30  ;;  %v5073_v49 = vmul.f32 %v5072_v7, %v5057_v5  ;;  %v5081_v11 = vxor.u32 2147483648, %v5065_v35  ;;  %vm6693_vm1 = vcmp.lt.s32.totalorder %v6692_v59, 0 }
 0x536   : > { %v5330_v34 = vadd.s32 %v5329_v57, %v5319_v38  ;;  %vm5076_vm13 = vcmp.lt.s32.totalorder %v5075_v4, 2  ;;  %vm5077_vm15 = vcmp.eq.s32.totalorder %v5075_v4, 0  ;;  %v5194_v44 = vsel %vm6693_vm1, 0, %v6692_v59 }
 0x537   : > { %vm5426_vm14 = vcmp.lt.s32.totalorder %v11266_v55, 2  ;;  %v5078_v45 = vxor.u32 2147483648, %v5073_v49  ;;  %v5082_v32 = vsel %vm5080_vm12, %v5081_v11, %v5073_v49  ;;  %v5195_v28 = vsub.s32 32, %v5194_v44 }
 0x538   : > { %v5196_v21 = vshll.u32 %v12377_v22, %v5194_v44  ;;  %vm5074_vm0 = vweird.f32 %v13781_v0  ;;  %v5199_v19 = vsub.s32 4294967266, %v5194_v44  ;;  %v5331_v56 = vadd.s32 %v5330_v34, %v5321_v41 }
 0x539   : > { %v5332_v5 = vmul.u32 %v13794_v12, %v5278_v58  ;;  %v5079_v63 = vsel %vm5077_vm15, %v5065_v35, %v5078_v45  ;;  %v5197_v33 = vshrl.u32 %v5179_v43, %v5195_v28  ;;  %vm5334_vm10 = vc.u32 %v12400_v60, %v12403_v62 }
 0x53a   : > { %v5436_v18 = vsel %vm5426_vm14, %v12174_v27, %v12370_v24  ;;  %v5083_v54 = vsel %vm5076_vm13, %v5079_v63, %v5082_v32  ;;  %v5200_v42 = vadd.s32 127, %v5199_v19  ;;  %v5335_v22 = vadd.s32 1, %v5331_v56 }
 0x53b   : > { %v5440_v0 = vsel %vm5426_vm14, %v12192_v52, %v5439_v46  ;;  %vm5087_vm6 = vcmp.lt.s32.totalorder %v13795_v37, 0  ;;  %v5084_v23 = vsel %vm5074_vm0, nan, %v5083_v54  ;;  %v5198_v3 = vor.u32 %v5197_v33, %v5196_v21 }
 0x53c   : > { %v5444_v15 = vand.u32 65535, %v5440_v0  ;;  %v5445_v31 = vshrl.u32 %v5440_v0, 16  ;;  %6761 = vmatmul.msk.f32.gmra.mxu2 %vm5797_vm11, %v5084_v23  ;;  %v13796_v8 = vand.u32 2147483647, %v13795_v37  ;;  %v5201_v24 = vshll.u32 %v5200_v42, 23 }
 0x53d   : > { %v5336_v4 = vsel %vm5334_vm10, %v5335_v22, %v5331_v56  ;;  %v5467_v30 = vshrl.u32 %v5436_v18, 16  ;;  %v5466_v61 = vand.u32 65535, %v5436_v18  ;;  %v5205_v16 = vcvt.s32.f32 %v5198_v3 }
 0x53e   : > { %vm12424_vm7 = vcmp.le.f32.partialorder %v13796_v8, 0.7853982  ;;  %v5337_v52 = vadd.s32 %v5336_v4, %v5332_v5  ;;  %v5446_v17 = vmul.u32 %v5444_v15, %v13799_v10  ;;  %v5447_v13 = vmul.u32 %v5445_v31, %v13799_v10 }
 0x53f   : > { %v5202_v50 = vor.u32 4788187, %v5201_v24  ;;  %v5951_v47 = vadd.f32 %v5950_v29, %v5740_v1  ;;  %v5448_v38 = vmul.u32 %v5444_v15, %v13800_v26  ;;  %v5209_v25 = vsub.s32 4, %v12360_v39 }
 0x540   : > { %v5338_v2 = vadd.s32 536870912, %v5337_v52  ;;  %v5449_v51 = vmul.u32 %v5445_v31, %v13800_v26  ;;  %v5450_v14 = vshll.u32 %v5447_v13, 16  ;;  %v5409_v43 = vshrl.u32 %v13182_v9, %v11269_v36 }
 0x541   : > { %v5203_v46 = vand.u32 2147483647, %v5202_v50  ;;  %6778 = vmatmul.msk.f32.gmra.mxu3 %vm6015_vm2, %v5951_v47  ;;  %v5452_v53 = vshll.u32 %v5448_v38, 16  ;;  %v5469_v35 = vmul.u32 %v5467_v30, %v13799_v10  ;;  %v5470_v57 = vmul.u32 %v5466_v61, %v13800_v26 }
 0x542   : > { %v12437_v7 = vshrl.u32 %v5338_v2, 30  ;;  %vm5454_vm5 = vc.u32 %v5446_v17, %v5450_v14  ;;  %v5456_v59 = vadd.s32 %v5450_v14, %v5446_v17  ;;  %v5468_v49 = vmul.u32 %v5466_v61, %v13799_v10 }
 0x543   : > { %v5206_v58 = vmul.f32 %v5205_v16, %v5203_v46  ;;  %v5455_v41 = vsel %vm5454_vm5, 1, %v13267_v40  ;;  %v5472_v11 = vshll.u32 %v5469_v35, 16  ;;  %v5430_v9 = vsel %vm5428_vm9, %v11889_v48, 2102212464 }
 0x544   : > { %v5340_v34 = vshll.u32 %v12437_v7, 30  ;;  %v5457_v36 = vadd.s32 %v5455_v41, %v5449_v51  ;;  %vm5458_vm3 = vc.u32 %v5456_v59, %v5452_v53  ;;  %v5451_v45 = vshrl.u32 %v5447_v13, 16 }
 0x545   : > { %v5207_v44 = vxor.u32 2147483648, %v5206_v58  ;;  %v5459_v32 = vsel %vm5458_vm3, 1, %v13267_v40  ;;  %v5474_v28 = vshll.u32 %v5470_v57, 16  ;;  %v5429_v19 = vsel %vm5425_vm8, %v5409_v43, %v11874_v6 }
 0x546   : > { %v5341_v21 = vsub.s32 %v5337_v52, %v5340_v34  ;;  %v5461_v56 = vadd.s32 %v5459_v32, %v5457_v36  ;;  %v5471_v12 = vmul.u32 %v5467_v30, %v13800_v26  ;;  %v5431_v48 = vsel %vm5427_vm4, %v11878_v20, %v5430_v9  ;;  %v5743_v36 = vpop.f32.mrf.mxu1 }
 0x547   : > { %v5208_v5 = vsel %vm5087_vm6, %v5207_v44, %v5206_v58  ;;  %vm5476_vm9 = vc.u32 %v5468_v49, %v5472_v11  ;;  %v5478_v63 = vadd.s32 %v5472_v11, %v5468_v49  ;;  %v5453_v54 = vshrl.u32 %v5448_v38, 16  ;;  %v13801_v38 = vld [vmem:[#allocation40_spill] sm:$0xff]  ;;  %v5953_v44 = vpop.f32.mrf.mxu2 }
 0x548   : > { %v5211_v33 = vsel %vm12424_vm7, %v13795_v37, %v5208_v5  ;;  %vm5342_vm12 = vcmp.lt.s32.totalorder %v5341_v21, 0  ;;  %v5343_v18 = vsub.s32 0, %v5341_v21  ;;  %v5462_v42 = vadd.s32 %v5461_v56, %v5451_v45 }
 0x549   : > { %v5213_v6 = vmul.f32 %v5211_v33, %v5211_v33  ;;  %v5477_v22 = vsel %vm5476_vm9, 1, %v13267_v40  ;;  %vm5480_vm8 = vc.u32 %v5478_v63, %v5474_v28  ;;  %v5473_v23 = vshrl.u32 %v5469_v35, 16 }
 0x54a   : > { %v5344_v0 = vsel %vm5342_vm12, %v5343_v18, %v5341_v21  ;;  %v5479_v3 = vadd.s32 %v5477_v22, %v5471_v12  ;;  %v5481_v15 = vsel %vm5480_vm8, 1, %v13267_v40  ;;  %v5210_v20 = vsel %vm5087_vm6, %v5209_v25, %v12360_v39 }
 0x54b   : > { %v5214_v31 = vmul.f32 -0.001358992, %v5213_v6  ;;  %v5221_v8 = vmul.f32 -0.00019511016, %v5213_v6  ;;  %v5345_v24 = vclz %v5344_v0  ;;  %v12464_v4 = vadd.s32 %v5462_v42, %v5453_v54  ;;  %v13802_v54 = vld [vmem:[#allocation142_spill] sm:$0xff] }
 0x54c   : > { %v5475_v30 = vshrl.u32 %v5470_v57, 16  ;;  %v12466_v1 = vadd.s32 %v5478_v63, %v5474_v28  ;;  %v5483_v29 = vadd.s32 %v5481_v15, %v5479_v3  ;;  %v5432_v13 = vsel %vm5426_vm14, %v5429_v19, %v5431_v48 }
 0x54d   : > { %v5215_v52 = vadd.f32 0.041655596, %v5214_v31  ;;  %v5222_v10 = vadd.f32 0.008332121, %v5221_v8  ;;  %v6695_v17 = vadd.s32 4294967294, %v5345_v24  ;;  %v5212_v40 = vsel %vm12424_vm7, 0, %v5210_v20 }
 0x54e   : > { %v5484_v61 = vadd.s32 %v5483_v29, %v5473_v23  ;;  %v5333_v16 = vadd.s32 %v12403_v62, %v12400_v60  ;;  %v5486_v25 = vmul.u32 %v13801_v38, %v5432_v13  ;;  %vm5488_vm1 = vc.u32 %v12464_v4, %v12466_v1 }
 0x54f   : > { %v5216_v39 = vmul.f32 %v5215_v52, %v5213_v6  ;;  %v5223_v50 = vmul.f32 %v5222_v10, %v5213_v6  ;;  %vm6696_vm4 = vcmp.lt.s32.totalorder %v6695_v17, 0  ;;  %v5229_v27 = vand.u32 3, %v5212_v40 }
 0x550   : > { %v5348_v47 = vsel %vm6696_vm4, 0, %v6695_v17  ;;  %v5485_v26 = vadd.s32 %v5484_v61, %v5475_v30  ;;  %vm5228_vm0 = vweird.f32 %v13795_v37  ;;  %vm5241_vm10 = vcmp.lt.s32.totalorder %v13802_v54, 0 }
 0x551   : > { %v5217_v2 = vadd.f32 -0.4999988, %v5216_v39  ;;  %v5224_v55 = vadd.f32 -0.16666654, %v5223_v50  ;;  %v5349_v51 = vsub.s32 32, %v5348_v47  ;;  %v5350_v14 = vshll.u32 %v5341_v21, %v5348_v47 }
 0x552   : > { %v5353_v46 = vsub.s32 4294967266, %v5348_v47  ;;  %v5489_v43 = vadd.s32 1, %v5485_v26  ;;  %vm5234_vm13 = vcmp.eq.s32.totalorder %v5229_v27, 2  ;;  %vm5231_vm15 = vcmp.eq.s32.totalorder %v5229_v27, 0 }
 0x553   : > { %v5218_v53 = vmul.f32 %v5217_v2, %v5213_v6  ;;  %v5225_v35 = vmul.f32 %v5224_v55, %v5213_v6  ;;  %v5351_v59 = vshrl.u32 %v5333_v16, %v5349_v51  ;;  %v5954_v21 = vadd.f32 %v5953_v44, %v5743_v36 }
 0x554   : > { %v5354_v57 = vadd.s32 127, %v5353_v46  ;;  %v5490_v60 = vsel %vm5488_vm1, %v5489_v43, %v5485_v26  ;;  %vm5230_vm14 = vcmp.lt.s32.totalorder %v5229_v27, 2  ;;  %v13803_v22 = vand.u32 2147483647, %v13802_v54 }
 0x555   : > { %v5219_v62 = vadd.f32 1.0, %v5218_v53  ;;  %v5226_v58 = vadd.f32 1.0, %v5225_v35  ;;  %v5352_v41 = vor.u32 %v5351_v59, %v5350_v14  ;;  %v5491_v49 = vadd.s32 %v5490_v60, %v5486_v25  ;;  %6779 = vmatmul.msk.f32.gmra.mxu3 %vm6015_vm2, %v5954_v21  ;;  %v6258_v53 = vld [vmem:[%s12700_s7 + $0x8] sm:$0xff]  ;;  %v5746_v35 = vpop.f32.mrf.mxu1  ;;  %v5956_v59 = vpop.f32.mrf.mxu2  ;;  %v6257_v60 = vld [vmem:[%s12700_s7] sm:$0xff] }
 0x556   : > { %v5355_v11 = vshll.u32 %v5354_v57, 23  ;;  %vm12486_vm6 = vcmp.le.f32.partialorder %v13803_v22, 0.7853982  ;;  %v5363_v15 = vsub.s32 4, %v12437_v7  ;;  %v5487_v40 = vadd.s32 %v12466_v1, %v12464_v4  ;;  %v12505_v57 = vld [vmem:[%s12699_s6] ss:$0 sm:$0xff]  ;;  %6375 = vmatpush.msrb.mxu0 %v6258_v53  ;;  %6836 = vmatpush.msra.mxu2 %v6258_v53 }
 0x557   : > { %v5227_v34 = vmul.f32 %v5226_v58, %v5211_v33  ;;  %v5235_v9 = vxor.u32 2147483648, %v5219_v62  ;;  %v5492_v45 = vadd.s32 536870912, %v5491_v49  ;;  %v5359_v28 = vcvt.s32.f32 %v5352_v41  ;;  %v13806_v21 = vld [vmem:[#allocation35_spill] sm:$0xff] }
 0x558   : > { %v5356_v32 = vor.u32 4788187, %v5355_v11  ;;  %v5364_v30 = vsel %vm5241_vm10, %v5363_v15, %v12437_v7  ;;  %v5957_v41 = vadd.f32 %v5956_v59, %v5746_v35  ;;  %6376 = vmatpush.msrb.mxu0 %v6257_v60  ;;  %6837 = vmatpush.msra.mxu2 %v6257_v60  ;;  %vm5382_vm8 = vweird.f32 %v13802_v54 }
 0x559   : > { %v5232_v19 = vxor.u32 2147483648, %v5227_v34  ;;  %v5236_v56 = vsel %vm5234_vm13, %v5235_v9, %v5227_v34  ;;  %v12477_v12 = vshrl.u32 %v5492_v45, 30  ;;  %v5366_v61 = vsel %vm12486_vm6, 0, %v5364_v30 }
 0x55a   : > { %v5357_v5 = vand.u32 2147483647, %v5356_v32  ;;  %v5383_v55 = vand.u32 3, %v5366_v61  ;;  %vm5395_vm4 = vcmp.lt.s32.totalorder %v13806_v21, 0 }
 0x55b   : > { %v5233_v48 = vsel %vm5231_vm15, %v5219_v62, %v5232_v19  ;;  %v5494_v63 = vshll.u32 %v12477_v12, 30  ;;  %v5517_v0 = vsub.s32 4, %v12477_v12 }
 0x55c   : > { %v5237_v33 = vsel %vm5230_vm14, %v5233_v48, %v5236_v56  ;;  %v5360_v18 = vmul.f32 %v5359_v28, %v5357_v5  ;;  %vm5388_vm3 = vcmp.eq.s32.totalorder %v5383_v55, 2  ;;  %vm5385_vm9 = vcmp.eq.s32.totalorder %v5383_v55, 0 }
 0x55d   : > { %v5238_v6 = vsel %vm5228_vm0, nan, %v5237_v33  ;;  %v5495_v42 = vsub.s32 %v5491_v49, %v5494_v63  ;;  %v6129_v49 = vpop.f32.mrf.mxu3  ;;  %6780 = vmatmul.msk.f32.gmra.mxu3 %vm6015_vm2, %v5957_v41  ;;  %vm5384_vm12 = vcmp.lt.s32.totalorder %v5383_v55, 2  ;;  %v13807_v5 = vand.u32 2147483647, %v13806_v21 }
 0x55e   : > { %6762 = vmatmul.msk.f32.gmra.mxu2 %vm5797_vm11, %v5238_v6  ;;  %v5361_v37 = vxor.u32 2147483648, %v5360_v18  ;;  %v6130_v9 = vadd.f32 %v12505_v57, %v6129_v49  ;;  %v5959_v6 = vpop.f32.mrf.mxu2  ;;  %vm5536_vm0 = vweird.f32 %v13806_v21 }
 0x55f   : > { %vm5496_vm7 = vcmp.lt.s32.totalorder %v5495_v42, 0  ;;  %v5497_v23 = vsub.s32 0, %v5495_v42  ;;  %vm12518_vm1 = vcmp.le.f32.partialorder %v13807_v5, 0.7853982 }
 0x560   : > { %v5362_v3 = vsel %vm5241_vm10, %v5361_v37, %v5360_v18  ;;  %v6225_v32 = vmax.f32 %v6130_v9, 0.0  ;;  %v5749_v18 = vpop.f32.mrf.mxu1 }
 0x561   : > { %v5365_v20 = vsel %vm12486_vm6, %v13802_v54, %v5362_v3  ;;  %v5498_v31 = vsel %vm5496_vm7, %v5497_v23, %v5495_v42 }
 0x562   : > { %v5367_v8 = vmul.f32 %v5365_v20, %v5365_v20  ;;  %v5499_v24 = vclz %v5498_v31  ;;  %6797 = vmatmul.msk.f32.vlgmr.msrb.gmra.mxu0 %vm6015_vm2, %v6225_v32 }
 0x564   : > { %v5368_v29 = vmul.f32 -0.001358992, %v5367_v8  ;;  %v5375_v52 = vmul.f32 -0.00019511016, %v5367_v8  ;;  %v6698_v10 = vadd.s32 4294967294, %v5499_v24 }
 0x565   : > { %v6132_v22 = vpop.f32.mrf.mxu3 }
 0x566   : > { %v5369_v17 = vadd.f32 0.041655596, %v5368_v29  ;;  %v5376_v13 = vadd.f32 0.008332121, %v5375_v52  ;;  %vm6699_vm5 = vcmp.lt.s32.totalorder %v6698_v10, 0  ;;  %v6133_v23 = vadd.f32 %v12505_v57, %v6132_v22  ;;  %v5962_v52 = vpop.f32.mrf.mxu2 }
 0x567   : > { %v5502_v39 = vsel %vm6699_vm5, 0, %v6698_v10 }
 0x568   : > { %v5370_v50 = vmul.f32 %v5369_v17, %v5367_v8  ;;  %v5377_v16 = vmul.f32 %v5376_v13, %v5367_v8  ;;  %v5503_v47 = vsub.s32 32, %v5502_v39  ;;  %v5504_v26 = vshll.u32 %v5495_v42, %v5502_v39  ;;  %v5752_v29 = vpop.f32.mrf.mxu1 }
 0x569   : > { %v5507_v38 = vsub.s32 4294967266, %v5502_v39  ;;  %v5960_v42 = vadd.f32 %v5959_v6, %v5749_v18  ;;  %v6226_v15 = vmax.f32 %v6133_v23, 0.0 }
 0x56a   : > { %v5371_v25 = vadd.f32 -0.4999988, %v5370_v50  ;;  %v5378_v7 = vadd.f32 -0.16666654, %v5377_v16  ;;  %v5505_v2 = vshrl.u32 %v5487_v40, %v5503_v47  ;;  %v5963_v40 = vadd.f32 %v5962_v52, %v5752_v29 }
 0x56b   : > { %v5508_v51 = vadd.s32 127, %v5507_v38  ;;  %6781 = vmatmul.msk.f32.gmra.mxu3 %vm6015_vm2, %v5960_v42  ;;  %6798 = vmatmul.msk.f32.gmra.mxu0 %vm6015_vm2, %v6226_v15 }
 0x56c   : > { %v5372_v14 = vmul.f32 %v5371_v25, %v5367_v8  ;;  %v5379_v27 = vmul.f32 %v5378_v7, %v5367_v8  ;;  %v5506_v46 = vor.u32 %v5505_v2, %v5504_v26  ;;  %v5518_v8 = vsel %vm5395_vm4, %v5517_v0, %v12477_v12 }
 0x56d   : > { %v5509_v43 = vshll.u32 %v5508_v51, 23  ;;  %v5520_v10 = vsel %vm12518_vm1, 0, %v5518_v8  ;;  %v6135_v61 = vpop.f32.mrf.mxu3 }
 0x56e   : > { %v5373_v4 = vadd.f32 1.0, %v5372_v14  ;;  %v5380_v1 = vadd.f32 1.0, %v5379_v27  ;;  %v5513_v58 = vcvt.s32.f32 %v5506_v46  ;;  %v6136_v39 = vadd.f32 %v12505_v57, %v6135_v61  ;;  %v5965_v55 = vpop.f32.mrf.mxu2 }
 0x56f   : > { %v5510_v62 = vor.u32 4788187, %v5509_v43  ;;  %v5537_v12 = vand.u32 3, %v5520_v10 }
 0x570   : > { %v5381_v11 = vmul.f32 %v5380_v1, %v5365_v20  ;;  %v5389_v34 = vxor.u32 2147483648, %v5373_v4  ;;  %v6227_v47 = vmax.f32 %v6136_v39, 0.0  ;;  %v5755_v2 = vpop.f32.mrf.mxu1 }
 0x571   : > { %v5511_v36 = vand.u32 2147483647, %v5510_v62  ;;  %vm5542_vm13 = vcmp.eq.s32.totalorder %v5537_v12, 2  ;;  %v5966_v27 = vadd.f32 %v5965_v55, %v5755_v2  ;;  %vm5539_vm15 = vcmp.eq.s32.totalorder %v5537_v12, 0 }
 0x572   : > { %v5386_v44 = vxor.u32 2147483648, %v5381_v11  ;;  %v5390_v45 = vsel %vm5388_vm3, %v5389_v34, %v5381_v11  ;;  %vm5538_vm14 = vcmp.lt.s32.totalorder %v5537_v12, 2 }
 0x573   : > { %v5514_v28 = vmul.f32 %v5513_v58, %v5511_v36  ;;  %6782 = vmatmul.msk.f32.gmra.mxu3 %vm6015_vm2, %v5963_v40  ;;  %6799 = vmatmul.msk.f32.gmra.mxu0 %vm6015_vm2, %v6227_v47 }
 0x574   : > { %v5387_v19 = vsel %vm5385_vm9, %v5373_v4, %v5386_v44 }
 0x575   : > { %v5391_v56 = vsel %vm5384_vm12, %v5387_v19, %v5390_v45  ;;  %v5515_v63 = vxor.u32 2147483648, %v5514_v28  ;;  %v6138_v46 = vpop.f32.mrf.mxu3 }
 0x576   : > { %v5392_v33 = vsel %vm5382_vm8, nan, %v5391_v56  ;;  %v6139_v43 = vadd.f32 %v12505_v57, %v6138_v46  ;;  %v5968_v58 = vpop.f32.mrf.mxu2 }
 0x577   : > { %6763 = vmatmul.msk.f32.gmra.mxu2 %vm5797_vm11, %v5392_v33  ;;  %v5516_v54 = vsel %vm5395_vm4, %v5515_v63, %v5514_v28 }
 0x578   : > { %v5519_v37 = vsel %vm12518_vm1, %v13806_v21, %v5516_v54  ;;  %v6228_v53 = vmax.f32 %v6139_v43, 0.0  ;;  %v5758_v62 = vpop.f32.mrf.mxu1 }
 0x579   : > { %v5521_v3 = vmul.f32 %v5519_v37, %v5519_v37  ;;  %v5969_v41 = vadd.f32 %v5968_v58, %v5758_v62 }
 0x57b   : > { %v5522_v20 = vmul.f32 -0.001358992, %v5521_v3  ;;  %v5529_v31 = vmul.f32 -0.00019511016, %v5521_v3  ;;  %6783 = vmatmul.msk.f32.gmra.mxu3 %vm6015_vm2, %v5966_v27  ;;  %6800 = vmatmul.msk.f32.gmra.mxu0 %vm6015_vm2, %v6228_v53 }
 0x57d   : > { %v5523_v24 = vadd.f32 0.041655596, %v5522_v20  ;;  %v5530_v30 = vadd.f32 0.008332121, %v5529_v31  ;;  %v6141_v49 = vpop.f32.mrf.mxu3 }
 0x57e   : > { %v6142_v11 = vadd.f32 %v12505_v57, %v6141_v49  ;;  %v5971_v36 = vpop.f32.mrf.mxu2 }
 0x57f   : > { %v5524_v17 = vmul.f32 %v5523_v24, %v5521_v3  ;;  %v5531_v13 = vmul.f32 %v5530_v30, %v5521_v3 }
 0x580   : > { %v6229_v34 = vmax.f32 %v6142_v11, 0.0  ;;  %v5761_v9 = vpop.f32.mrf.mxu1  ;;  %v12581_v11 = vld [vmem:[%s12701_s8] ss:$0 sm:$0xff] }
 0x581   : > { %v5525_v50 = vadd.f32 -0.4999988, %v5524_v17  ;;  %v5532_v16 = vadd.f32 -0.16666654, %v5531_v13  ;;  %v5972_v44 = vadd.f32 %v5971_v36, %v5761_v9 }
 0x583   : > { %v5526_v26 = vmul.f32 %v5525_v50, %v5521_v3  ;;  %v5533_v38 = vmul.f32 %v5532_v16, %v5521_v3  ;;  %6784 = vmatmul.msk.f32.gmra.mxu3 %vm6015_vm2, %v5969_v41  ;;  %6801 = vmatmul.msk.f32.gmra.mxu0 %vm6015_vm2, %v6229_v34 }
 0x585   : > { %v5527_v25 = vadd.f32 1.0, %v5526_v26  ;;  %v5534_v7 = vadd.f32 1.0, %v5533_v38  ;;  %v6144_v45 = vpop.f32.mrf.mxu3 }
 0x586   : > { %v6145_v32 = vadd.f32 %v12505_v57, %v6144_v45  ;;  %v5974_v19 = vpop.f32.mrf.mxu2 }
 0x587   : > { %v5535_v51 = vmul.f32 %v5534_v7, %v5519_v37  ;;  %v5543_v14 = vxor.u32 2147483648, %v5527_v25 }
 0x588   : > { %v6230_v28 = vmax.f32 %v6145_v32, 0.0  ;;  %v5764_v21 = vpop.f32.mrf.mxu1 }
 0x589   : > { %v5540_v4 = vxor.u32 2147483648, %v5535_v51  ;;  %v5544_v1 = vsel %vm5542_vm13, %v5543_v14, %v5535_v51  ;;  %v5975_v56 = vadd.f32 %v5974_v19, %v5764_v21 }
 0x58b   : > { %v5541_v35 = vsel %vm5539_vm15, %v5527_v25, %v5540_v4  ;;  %6785 = vmatmul.msk.f32.gmra.mxu3 %vm6015_vm2, %v5972_v44  ;;  %6802 = vmatmul.msk.f32.gmra.mxu0 %vm6015_vm2, %v6230_v28 }
 0x58c   : > { %v5545_v59 = vsel %vm5538_vm14, %v5541_v35, %v5544_v1 }
 0x58d   : > { %v5546_v60 = vsel %vm5536_vm0, nan, %v5545_v59  ;;  %v6147_v5 = vpop.f32.mrf.mxu3 }
 0x58e   : > { %6764 = vmatmul.msk.f32.gmra.mxu2 %vm5797_vm11, %v5546_v60  ;;  %v6148_v48 = vadd.f32 %v12505_v57, %v6147_v5  ;;  %v5977_v18 = vpop.f32.mrf.mxu2 }
 0x590   : > { %v6231_v63 = vmax.f32 %v6148_v48, 0.0  ;;  %v5767_v33 = vpop.f32.mrf.mxu1 }
 0x591   : > { %v5978_v6 = vadd.f32 %v5977_v18, %v5767_v33 }
 0x593   : > { %6786 = vmatmul.msk.f32.gmra.mxu3 %vm6015_vm2, %v5975_v56  ;;  %6803 = vmatmul.msk.f32.gmra.mxu0 %vm6015_vm2, %v6231_v63 }
 0x595   : > { %v6150_v54 = vpop.f32.mrf.mxu3 }
 0x596   : > { %v6151_v42 = vadd.f32 %v12505_v57, %v6150_v54  ;;  %v5980_v37 = vpop.f32.mrf.mxu2 }
 0x598   : > { %v6232_v22 = vmax.f32 %v6151_v42, 0.0  ;;  %v5770_v0 = vpop.f32.mrf.mxu1 }
 0x599   : > { %v5981_v23 = vadd.f32 %v5980_v37, %v5770_v0 }
 0x59b   : > { %6787 = vmatmul.msk.f32.gmra.mxu3 %vm6015_vm2, %v5978_v6  ;;  %6804 = vmatmul.msk.f32.gmra.mxu0 %vm6015_vm2, %v6232_v22 }
 0x59d   : > { %v6153_v3 = vpop.f32.mrf.mxu3 }
 0x59e   : > { %v6154_v15 = vadd.f32 %v12505_v57, %v6153_v3  ;;  %v5983_v8 = vpop.f32.mrf.mxu2 }
 0x5a0   : > { %v6233_v20 = vmax.f32 %v6154_v15, 0.0  ;;  %v5773_v31 = vpop.f32.mrf.mxu1 }
 0x5a1   : > { %v5984_v24 = vadd.f32 %v5983_v8, %v5773_v31 }
 0x5a3   : > { %6788 = vmatmul.msk.f32.gmra.mxu3 %vm6015_vm2, %v5981_v23  ;;  %6805 = vmatmul.msk.f32.gmra.mxu0 %vm6015_vm2, %v6233_v20 }
 0x5a5   : > { %v6156_v30 = vpop.f32.mrf.mxu3 }
 0x5a6   : > { %v6157_v29 = vadd.f32 %v12505_v57, %v6156_v30  ;;  %v5986_v17 = vpop.f32.mrf.mxu2 }
 0x5a8   : > { %v6234_v52 = vmax.f32 %v6157_v29, 0.0  ;;  %v5776_v10 = vpop.f32.mrf.mxu1 }
 0x5a9   : > { %v5987_v13 = vadd.f32 %v5986_v17, %v5776_v10 }
 0x5ab   : > { %6789 = vmatmul.msk.f32.gmra.mxu3 %vm6015_vm2, %v5984_v24  ;;  %6806 = vmatmul.msk.f32.gmra.mxu0 %vm6015_vm2, %v6234_v52 }
 0x5ad   : > { %v6159_v40 = vpop.f32.mrf.mxu3 }
 0x5ae   : > { %v6160_v61 = vadd.f32 %v12505_v57, %v6159_v40  ;;  %v5989_v16 = vpop.f32.mrf.mxu2 }
 0x5b0   : > { %v6235_v39 = vmax.f32 %v6160_v61, 0.0  ;;  %v5779_v50 = vpop.f32.mrf.mxu1 }
 0x5b1   : > { %v5990_v12 = vadd.f32 %v5989_v16, %v5779_v50 }
 0x5b3   : > { %6790 = vmatmul.msk.f32.gmra.mxu3 %vm6015_vm2, %v5987_v13  ;;  %6807 = vmatmul.msk.f32.gmra.mxu0 %vm6015_vm2, %v6235_v39 }
 0x5b5   : > { %v6162_v47 = vpop.f32.mrf.mxu3 }
 0x5b6   : > { %v6163_v26 = vadd.f32 %v12505_v57, %v6162_v47  ;;  %v5992_v7 = vpop.f32.mrf.mxu2 }
 0x5b8   : > { %v6236_v38 = vmax.f32 %v6163_v26, 0.0  ;;  %v5782_v25 = vpop.f32.mrf.mxu1 }
 0x5b9   : > { %v5993_v2 = vadd.f32 %v5992_v7, %v5782_v25 }
 0x5bb   : > { %6791 = vmatmul.msk.f32.gmra.mxu3 %vm6015_vm2, %v5990_v12  ;;  %6808 = vmatmul.msk.f32.gmra.mxu0 %vm6015_vm2, %v6236_v38 }
 0x5bd   : > { %v6165_v55 = vpop.f32.mrf.mxu3 }
 0x5be   : > { %v6166_v51 = vadd.f32 %v12505_v57, %v6165_v55 }
 0x5bf   : > { %v5995_v46 = vpop.f32.mrf.mxu2 }
 0x5c0   : > { %v6237_v14 = vmax.f32 %v6166_v51, 0.0  ;;  %v5785_v27 = vpop.f32.mrf.mxu1 }
 0x5c1   : > { %v5996_v43 = vadd.f32 %v5995_v46, %v5785_v27 }
 0x5c3   : > { %6792 = vmatmul.msk.f32.gmra.mxu3 %vm6015_vm2, %v5993_v2  ;;  %6809 = vmatmul.msk.f32.gmra.mxu0 %vm6015_vm2, %v6237_v14 }
 0x5c5   : > { %v6168_v4 = vpop.f32.mrf.mxu3 }
 0x5c6   : > { %v6169_v1 = vadd.f32 %v12505_v57, %v6168_v4 }
 0x5c8   : > { %v6238_v53 = vmax.f32 %v6169_v1, 0.0  ;;  %v5788_v35 = vpop.f32.mrf.mxu1 }
 0x5cb   : > { %6793 = vmatmul.msk.f32.gmra.mxu3 %vm6015_vm2, %v5996_v43  ;;  %6810 = vmatmul.msk.f32.gmra.mxu0 %vm6015_vm2, %v6238_v53 }
 0x5d0   : > { %v5791_v45 = vpop.f32.mrf.mxu1 }
 0x5d8   : > { %v6171_v59 = vpop.f32.mrf.mxu3  ;;  %v5794_v23 = vpop.f32.mrf.mxu1 }
 0x5d9   : > { %v6172_v60 = vadd.f32 %v12505_v57, %v6171_v59 }
 0x5db   : > { %v6239_v41 = vmax.f32 %v6172_v60, 0.0 }
 0x5dd   : > { %6811 = vmatmul.msk.f32.gmra.mxu0 %vm6015_vm2, %v6239_v41 }
 0x5df   : > { %v6378_v34 = vpop.f32.mrf.mxu0 }
 0x5e0   : > { %v6174_v49 = vpop.f32.mrf.mxu3  ;;  %v6379_v36 = vadd.f32 %v12581_v11, %v6378_v34 }
 0x5e1   : > { %v5998_v62 = vpop.f32.mrf.mxu2  ;;  %v6175_v9 = vadd.f32 %v12505_v57, %v6174_v49 }
 0x5e2   : > { %v5999_v58 = vadd.f32 %v5998_v62, %v5788_v35  ;;  %6474 = vst [vmem:[%s12589_s26] sm:$0xff] %v6379_v36 }
 0x5e3   : > { %v6240_v44 = vmax.f32 %v6175_v9, 0.0 }
 0x5e4   : > { %6794 = vmatmul.msk.f32.gmra.mxu3 %vm6015_vm2, %v5999_v58 }
 0x5e5   : > { %6812 = vmatmul.msk.f32.gmra.mxu0 %vm6015_vm2, %v6240_v44 }
 0x5e8   : > { %v6381_v19 = vpop.f32.mrf.mxu0 }
 0x5e9   : > { %v6382_v5 = vadd.f32 %v12581_v11, %v6381_v19 }
 0x5eb   : > { %6475 = vst [vmem:[%s12589_s26 + $0x8] sm:$0xff] %v6382_v5 }
 0x5ee   : > { %v6177_v21 = vpop.f32.mrf.mxu3 }
 0x5ef   : > { %v6178_v56 = vadd.f32 %v12505_v57, %v6177_v21 }
 0x5f0   : > { %v6384_v33 = vpop.f32.mrf.mxu0 }
 0x5f1   : > { %v6241_v48 = vmax.f32 %v6178_v56, 0.0  ;;  %v6385_v6 = vadd.f32 %v12581_v11, %v6384_v33 }
 0x5f3   : > { %6813 = vmatmul.msk.f32.gmra.mxu0 %vm6015_vm2, %v6241_v48  ;;  %6476 = vst [vmem:[%s12589_s26 + $0x10] sm:$0xff] %v6385_v6 }
 0x5f6   : > { %v6180_v63 = vpop.f32.mrf.mxu3 }
 0x5f7   : > { %v6181_v18 = vadd.f32 %v12505_v57, %v6180_v63 }
 0x5f8   : > { %v6387_v22 = vpop.f32.mrf.mxu0 }
 0x5f9   : > { %v6242_v54 = vmax.f32 %v6181_v18, 0.0  ;;  %v6388_v37 = vadd.f32 %v12581_v11, %v6387_v22 }
 0x5fa   : > { %v6001_v32 = vpop.f32.mrf.mxu2 }
 0x5fb   : > { %v6002_v28 = vadd.f32 %v6001_v32, %v5791_v45  ;;  %6814 = vmatmul.msk.f32.gmra.mxu0 %vm6015_vm2, %v6242_v54  ;;  %6477 = vst [vmem:[%s12589_s26 + $0x18] sm:$0xff] %v6388_v37 }
 0x5fd   : > { %6795 = vmatmul.msk.f32.gmra.mxu3 %vm6015_vm2, %v6002_v28 }
 0x5fe   : > { %v6183_v42 = vpop.f32.mrf.mxu3 }
 0x5ff   : > { %v6184_v0 = vadd.f32 %v12505_v57, %v6183_v42 }
 0x600   : > { %v6390_v8 = vpop.f32.mrf.mxu0 }
 0x601   : > { %v6243_v3 = vmax.f32 %v6184_v0, 0.0  ;;  %v6391_v30 = vadd.f32 %v12581_v11, %v6390_v8 }
 0x603   : > { %6815 = vmatmul.msk.f32.gmra.mxu0 %vm6015_vm2, %v6243_v3  ;;  %6478 = vst [vmem:[%s12589_s26 + $0x20] sm:$0xff] %v6391_v30 }
 0x606   : > { %v6186_v31 = vpop.f32.mrf.mxu3 }
 0x607   : > { %v6187_v24 = vadd.f32 %v12505_v57, %v6186_v31 }
 0x608   : > { %v6393_v10 = vpop.f32.mrf.mxu0 }
 0x609   : > { %v6244_v29 = vmax.f32 %v6187_v24, 0.0  ;;  %v6394_v13 = vadd.f32 %v12581_v11, %v6393_v10 }
 0x60b   : > { %6816 = vmatmul.msk.f32.gmra.mxu0 %vm6015_vm2, %v6244_v29  ;;  %6479 = vst [vmem:[%s12589_s26 + $0x28] sm:$0xff] %v6394_v13 }
 0x60e   : > { %v6189_v52 = vpop.f32.mrf.mxu3 }
 0x60f   : > { %v6190_v17 = vadd.f32 %v12505_v57, %v6189_v52 }
 0x610   : > { %v6396_v39 = vpop.f32.mrf.mxu0 }
 0x611   : > { %v6004_v15 = vpop.f32.mrf.mxu2  ;;  %v6245_v40 = vmax.f32 %v6190_v17, 0.0  ;;  %v6397_v16 = vadd.f32 %v12581_v11, %v6396_v39 }
 0x612   : > { %v6005_v20 = vadd.f32 %v6004_v15, %v5794_v23 }
 0x613   : > { %6817 = vmatmul.msk.f32.gmra.mxu0 %vm6015_vm2, %v6245_v40  ;;  %6480 = vst [vmem:[%s12589_s26 + $0x30] sm:$0xff] %v6397_v16 }
 0x614   : > { %6796 = vmatmul.msk.f32.gmra.mxu3 %vm6015_vm2, %v6005_v20 }
 0x616   : > { %v6192_v61 = vpop.f32.mrf.mxu3 }
 0x617   : > { %v6193_v50 = vadd.f32 %v12505_v57, %v6192_v61 }
 0x618   : > { %v6399_v26 = vpop.f32.mrf.mxu0 }
 0x619   : > { %v6246_v12 = vmax.f32 %v6193_v50, 0.0  ;;  %v6400_v25 = vadd.f32 %v12581_v11, %v6399_v26 }
 0x61b   : > { %6818 = vmatmul.msk.f32.gmra.mxu0 %vm6015_vm2, %v6246_v12  ;;  %6481 = vst [vmem:[%s12589_s26 + $0x38] sm:$0xff] %v6400_v25 }
 0x61e   : > { %v6195_v47 = vpop.f32.mrf.mxu3 }
 0x61f   : > { %v6196_v38 = vadd.f32 %v12505_v57, %v6195_v47 }
 0x620   : > { %v6402_v55 = vpop.f32.mrf.mxu0 }
 0x621   : > { %v6247_v7 = vmax.f32 %v6196_v38, 0.0  ;;  %v6403_v14 = vadd.f32 %v12581_v11, %v6402_v55 }
 0x623   : > { %6819 = vmatmul.msk.f32.gmra.mxu0 %vm6015_vm2, %v6247_v7  ;;  %6482 = vst [vmem:[%s12589_s26 + $0x40] sm:$0xff] %v6403_v14 }
 0x626   : > { %v6198_v2 = vpop.f32.mrf.mxu3 }
 0x627   : > { %v6199_v51 = vadd.f32 %v12505_v57, %v6198_v2 }
 0x628   : > { %v6405_v43 = vpop.f32.mrf.mxu0 }
 0x629   : > { %v6248_v27 = vmax.f32 %v6199_v51, 0.0  ;;  %v6406_v1 = vadd.f32 %v12581_v11, %v6405_v43 }
 0x62b   : > { %6820 = vmatmul.msk.f32.gmra.mxu0 %vm6015_vm2, %v6248_v27  ;;  %6483 = vst [vmem:[%s12589_s26 + $0x48] sm:$0xff] %v6406_v1 }
 0x62e   : > { %v6201_v46 = vpop.f32.mrf.mxu3 }
 0x62f   : > { %v6202_v4 = vadd.f32 %v12505_v57, %v6201_v46 }
 0x630   : > { %v6408_v59 = vpop.f32.mrf.mxu0 }
 0x631   : > { %v6249_v53 = vmax.f32 %v6202_v4, 0.0  ;;  %v6409_v62 = vadd.f32 %v12581_v11, %v6408_v59 }
 0x633   : > { %6821 = vmatmul.msk.f32.gmra.mxu0 %vm6015_vm2, %v6249_v53  ;;  %6484 = vst [vmem:[%s12589_s26 + $0x50] sm:$0xff] %v6409_v62 }
 0x636   : > { %v6204_v35 = vpop.f32.mrf.mxu3 }
 0x637   : > { %v6205_v60 = vadd.f32 %v12505_v57, %v6204_v35 }
 0x638   : > { %v6411_v49 = vpop.f32.mrf.mxu0 }
 0x639   : > { %v6250_v58 = vmax.f32 %v6205_v60, 0.0  ;;  %v6412_v9 = vadd.f32 %v12581_v11, %v6411_v49 }
 0x63b   : > { %6822 = vmatmul.msk.f32.gmra.mxu0 %vm6015_vm2, %v6250_v58  ;;  %6485 = vst [vmem:[%s12589_s26 + $0x58] sm:$0xff] %v6412_v9 }
 0x63e   : > { %v6207_v41 = vpop.f32.mrf.mxu3 }
 0x63f   : > { %v6208_v34 = vadd.f32 %v12505_v57, %v6207_v41 }
 0x640   : > { %v6414_v45 = vpop.f32.mrf.mxu0 }
 0x641   : > { %v6251_v36 = vmax.f32 %v6208_v34, 0.0  ;;  %v6415_v28 = vadd.f32 %v12581_v11, %v6414_v45 }
 0x643   : > { %6823 = vmatmul.msk.f32.gmra.mxu0 %vm6015_vm2, %v6251_v36  ;;  %6486 = vst [vmem:[%s12589_s26 + $0x60] sm:$0xff] %v6415_v28 }
 0x646   : > { %v6210_v44 = vpop.f32.mrf.mxu3 }
 0x647   : > { %v6211_v32 = vadd.f32 %v12505_v57, %v6210_v44 }
 0x648   : > { %v6417_v56 = vpop.f32.mrf.mxu0 }
 0x649   : > { %v6252_v21 = vmax.f32 %v6211_v32, 0.0  ;;  %v6418_v48 = vadd.f32 %v12581_v11, %v6417_v56 }
 0x64b   : > { %6824 = vmatmul.msk.f32.gmra.mxu0 %vm6015_vm2, %v6252_v21  ;;  %6487 = vst [vmem:[%s12589_s26 + $0x68] sm:$0xff] %v6418_v48 }
 0x64e   : > { %v6213_v19 = vpop.f32.mrf.mxu3 }
 0x64f   : > { %v6214_v5 = vadd.f32 %v12505_v57, %v6213_v19 }
 0x651   : > { %v6253_v63 = vmax.f32 %v6214_v5, 0.0 }
 0x653   : > { %6825 = vmatmul.msk.f32.gmra.mxu0 %vm6015_vm2, %v6253_v63 }
 0x65a   : > { %v6420_v33 = vpop.f32.mrf.mxu0 }
 0x65b   : > { %v6421_v18 = vadd.f32 %v12581_v11, %v6420_v33 }
 0x65d   : > { %6488 = vst [vmem:[%s12589_s26 + $0x70] sm:$0xff] %v6421_v18 }
 0x662   : > { %v6423_v22 = vpop.f32.mrf.mxu0 }
 0x663   : > { %v6424_v0 = vadd.f32 %v12581_v11, %v6423_v22 }
 0x665   : > { %6489 = vst [vmem:[%s12589_s26 + $0x78] sm:$0xff] %v6424_v0 }
 0x667   : > { %v6216_v6 = vpop.f32.mrf.mxu3 }
 0x668   : > { %v6217_v54 = vadd.f32 %v12505_v57, %v6216_v6 }
 0x66a   : > { %v6254_v42 = vmax.f32 %v6217_v54, 0.0 }
 0x66c   : > { %6826 = vmatmul.msk.f32.gmra.mxu0 %vm6015_vm2, %v6254_v42 }
 0x670   : > { %v6426_v3 = vpop.f32.mrf.mxu0 }
 0x671   : > { %v6427_v20 = vadd.f32 %v12581_v11, %v6426_v3 }
 0x673   : > { %6490 = vst [vmem:[%s12589_s26 + $0x80] sm:$0xff] %v6427_v20 }
 0x678   : > { %v6429_v31 = vpop.f32.mrf.mxu0 }
 0x679   : > { %v6430_v8 = vadd.f32 %v12581_v11, %v6429_v31 }
 0x67b   : > { %6491 = vst [vmem:[%s12589_s26 + $0x88] sm:$0xff] %v6430_v8 }
 0x680   : > { %v6219_v37 = vpop.f32.mrf.mxu3  ;;  %v6432_v24 = vpop.f32.mrf.mxu0 }
 0x681   : > { %v6220_v23 = vadd.f32 %v12505_v57, %v6219_v37  ;;  %v6433_v30 = vadd.f32 %v12581_v11, %v6432_v24 }
 0x683   : > { %v6255_v15 = vmax.f32 %v6220_v23, 0.0  ;;  %6492 = vst [vmem:[%s12589_s26 + $0x90] sm:$0xff] %v6433_v30 }
 0x685   : > { %6827 = vmatmul.msk.f32.gmra.mxu0 %vm6015_vm2, %v6255_v15 }
 0x688   : > { %v6435_v17 = vpop.f32.mrf.mxu0 }
 0x689   : > { %v6436_v13 = vadd.f32 %v12581_v11, %v6435_v17 }
 0x68b   : > { %6493 = vst [vmem:[%s12589_s26 + $0x98] sm:$0xff] %v6436_v13 }
 0x690   : > { %v6438_v40 = vpop.f32.mrf.mxu0 }
 0x691   : > { %v6439_v61 = vadd.f32 %v12581_v11, %v6438_v40 }
 0x693   : > { %6494 = vst [vmem:[%s12589_s26 + $0xa0] sm:$0xff] %v6439_v61 }
 0x697   : > { %v6222_v29 = vpop.f32.mrf.mxu3 }
 0x698   : > { %v6223_v52 = vadd.f32 %v12505_v57, %v6222_v29  ;;  %v6441_v39 = vpop.f32.mrf.mxu0 }
 0x699   : > { %v6442_v50 = vadd.f32 %v12581_v11, %v6441_v39 }
 0x69a   : > { %v6256_v10 = vmax.f32 %v6223_v52, 0.0 }
 0x69b   : > { %6495 = vst [vmem:[%s12589_s26 + $0xa8] sm:$0xff] %v6442_v50 }
 0x69c   : > { %6828 = vmatmul.msk.f32.vlgmr.msra.gmra.mxu2 %vm6015_vm2, %v6256_v10 }
 0x6a0   : > { %v6444_v57 = vpop.f32.mrf.mxu0 }
 0x6a1   : > { %v6445_v16 = vadd.f32 %v12581_v11, %v6444_v57 }
 0x6a3   : > { %6496 = vst [vmem:[%s12589_s26 + $0xb0] sm:$0xff] %v6445_v16 }
 0x6a8   : > { %v6447_v12 = vpop.f32.mrf.mxu0 }
 0x6a9   : > { %v6448_v47 = vadd.f32 %v12581_v11, %v6447_v12 }
 0x6ab   : > { %6497 = vst [vmem:[%s12589_s26 + $0xb8] sm:$0xff] %v6448_v47 }
 0x6b0   : > { %v6450_v26 = vpop.f32.mrf.mxu0 }
 0x6b1   : > { %v6451_v38 = vadd.f32 %v12581_v11, %v6450_v26 }
 0x6b3   : > { %6498 = vst [vmem:[%s12589_s26 + $0xc0] sm:$0xff] %v6451_v38 }
 0x6b8   : > { %v6453_v25 = vpop.f32.mrf.mxu0 }
 0x6b9   : > { %v6454_v7 = vadd.f32 %v12581_v11, %v6453_v25 }
 0x6bb   : > { %6499 = vst [vmem:[%s12589_s26 + $0xc8] sm:$0xff] %v6454_v7 }
 0x6c0   : > { %v6456_v2 = vpop.f32.mrf.mxu0 }
 0x6c1   : > { %v6457_v55 = vadd.f32 %v12581_v11, %v6456_v2 }
 0x6c3   : > { %6500 = vst [vmem:[%s12589_s26 + $0xd0] sm:$0xff] %v6457_v55 }
 0x6c8   : > { %v6459_v51 = vpop.f32.mrf.mxu0 }
 0x6c9   : > { %v6460_v14 = vadd.f32 %v12581_v11, %v6459_v51 }
 0x6cb   : > { %6501 = vst [vmem:[%s12589_s26 + $0xd8] sm:$0xff] %v6460_v14 }
 0x6d0   : > { %v6462_v27 = vpop.f32.mrf.mxu0 }
 0x6d1   : > { %v6463_v46 = vadd.f32 %v12581_v11, %v6462_v27 }
 0x6d3   : > { %6502 = vst [vmem:[%s12589_s26 + $0xe0] sm:$0xff] %v6463_v46 }
 0x6e9   : > { %v6465_v43 = vpop.f32.mrf.mxu0 }
 0x6ea   : > { %v6466_v4 = vadd.f32 %v12581_v11, %v6465_v43 }
 0x6ec   : > { %6503 = vst [vmem:[%s12589_s26 + $0xe8] sm:$0xff] %v6466_v4 }
 0x702   : > { %v6468_v1 = vpop.f32.mrf.mxu0 }
 0x703   : > { %v6469_v53 = vadd.f32 %v12581_v11, %v6468_v1 }
 0x705   : > { %6504 = vst [vmem:[%s12589_s26 + $0xf0] sm:$0xff] %v6469_v53 }
 0x71f   : > { %v6471_v35 = vpop.f32.mrf.mxu2 }
 0x720   : > { %v6472_v59 = vadd.f32 %v12581_v11, %v6471_v35 }
 0x722   : > { %6505 = vst [vmem:[%s12589_s26 + $0xf8] sm:$0xff] %v6472_v59 }
 0x723 PF: > { %s19_s30 = sadd.s32 1, %s6866_s30  }
 0x724   : > { %p16_p4 = scmp.ge.s32.totalorder %s19_s30, 4  }
 0x726   :  { %18 = sbr.rel (!%p16_p4) target bundleno = 1 (0x1), region = 86 }

</bundles_post_ra>
